<compile_context>
chip_gen: v7x
topology: tpu7x:2x2x1
jax: 0.10.0
libtpu: 0.0.40
codegen_flags: <defaults>
</compile_context>

<pallas_src>
import functools

import jax
import jax.numpy as jnp
from jax import lax
from jax.experimental import pallas as pl
from jax.experimental.pallas import tpu as pltpu


# ------------- fused conv3x3(pad=1) + bias + ReLU + maxpool(2) kernel -------------
def _conv_pool_kernel(x_ref, w_ref, b_ref, o_ref, *, hh, wq):
    """One image per grid step.

    x_ref: (4, Cin, S)   4 polyphase components (even/odd row x even/odd col) of
                         the zero-padded input, spatial flattened in rows of width wq.
    w_ref: (3, 3, Cout, Cin)
    b_ref: (Cout, 1)
    o_ref: (Cout, L), L = hh*wq; the last column of every width-wq row is junk
           (dropped by the wrapper).
    """
    L = hh * wq
    m = None
    for dr in (0, 1):                 # 2x2 maxpool offsets
        for dc in (0, 1):
            acc = jnp.zeros(o_ref.shape, jnp.float32)
            for kh in range(3):       # 3x3 conv taps
                for kw in range(3):
                    a = dr + kh
                    b = dc + kw
                    comp = 2 * (a % 2) + (b % 2)
                    start = (a // 2) * wq + (b // 2)
                    win = x_ref[comp, :, start:start + L]          # (Cin, L)
                    acc = acc + jnp.dot(w_ref[kh, kw], win,
                                        preferred_element_type=jnp.float32)
            m = acc if m is None else jnp.maximum(m, acc)
    # relu(maxpool(conv(x) + bias)) == relu(max-over-offsets + bias)
    o_ref[...] = jnp.maximum(m + b_ref[...], 0.0)


def conv3x3_relu_pool(x, w_hwio, bias):
    """relu(max_pool2d(conv2d(x, w, b, stride=1, padding=1), 2)) for NCHW x."""
    B, Cin, H, W = x.shape
    assert H % 2 == 0 and W % 2 == 0
    Cout = w_hwio.shape[-1]
    Hh, Wh = H // 2, W // 2
    Hq, Wq = Hh + 1, Wh + 1            # polyphase component spatial dims
    S = (Hq + 1) * Wq                  # +1 zero row keeps shifted windows in bounds
    L = Hh * Wq

    # XLA glue: zero pad (top/left 1, right 1, bottom 3), split into the four
    # (row-parity, col-parity) polyphase components, flatten their spatial dims.
    xp = jnp.pad(x, ((0, 0), (0, 0), (1, 3), (1, 1)))
    poly = xp.reshape(B, Cin, Hq + 1, 2, Wq, 2).transpose(3, 5, 0, 1, 2, 4)
    poly = poly.reshape(4, B, Cin, S)

    w_t = jnp.transpose(w_hwio, (0, 1, 3, 2))      # (3,3,Cin,Cout) -> (3,3,Cout,Cin)
    b2 = bias.reshape(Cout, 1)

    y = pl.pallas_call(
        functools.partial(_conv_pool_kernel, hh=Hh, wq=Wq),
        out_shape=jax.ShapeDtypeStruct((B, Cout, L), jnp.float32),
        grid=(B,),
        in_specs=[
            pl.BlockSpec((4, None, Cin, S), lambda i: (0, i, 0, 0)),
            pl.BlockSpec((3, 3, Cout, Cin), lambda i: (0, 0, 0, 0)),
            pl.BlockSpec((Cout, 1), lambda i: (0, 0)),
        ],
        out_specs=pl.BlockSpec((None, Cout, L), lambda i: (i, 0, 0)),
        compiler_params=pltpu.CompilerParams(dimension_semantics=("parallel",)),
    )(poly, w_t, b2)

    # drop the junk last column of each width-Wq row -> NCHW (B, Cout, Hh, Wh)
    return y.reshape(B, Cout, Hh, Wq)[:, :, :, :Wh]


# ------------------- fused fc1 + ReLU + fc2 + log_softmax kernel -------------------
def _fc_head_kernel(x_ref, w1_ref, b1_ref, w2_ref, b2_ref, o_ref):
    h = jnp.dot(x_ref[...], w1_ref[...], preferred_element_type=jnp.float32) + b1_ref[...]
    h = jnp.maximum(h, 0.0)                                       # fc1 + relu
    z = jnp.dot(h, w2_ref[...], preferred_element_type=jnp.float32) + b2_ref[...]
    zm = z - jnp.max(z, axis=-1, keepdims=True)                   # stable log_softmax
    o_ref[...] = zm - jnp.log(jnp.sum(jnp.exp(zm), axis=-1, keepdims=True))


def fc_head(feat, w1, b1, w2, b2):
    # TODO(synk): if num_channels is scaled up, tile fc1's (K, N) weight over a K
    # grid axis with an f32 VMEM accumulator so it keeps fitting v7x's 64 MiB VMEM.
    B = feat.shape[0]
    return pl.pallas_call(
        _fc_head_kernel,
        out_shape=jax.ShapeDtypeStruct((B, w2.shape[1]), jnp.float32),
    )(feat, w1, b1.reshape(1, -1), w2, b2.reshape(1, -1))


# ---------------- parameters (deterministic, torch-like uniform init) ----------------
def init_params(key, nc):
    ks = jax.random.split(key, 10)

    def u(k, shape, fan_in):
        bound = 1.0 / jnp.sqrt(jnp.float32(fan_in))
        return jax.random.uniform(k, shape, jnp.float32, -bound, bound)

    p = {}
    p["w1"] = u(ks[0], (3, 3, 3, nc), 3 * 9)              # HWIO
    p["b1"] = u(ks[1], (nc,), 3 * 9)
    p["w2"] = u(ks[2], (3, 3, nc, 2 * nc), nc * 9)
    p["b2"] = u(ks[3], (2 * nc,), nc * 9)
    p["w3"] = u(ks[4], (3, 3, 2 * nc, 4 * nc), 2 * nc * 9)
    p["b3"] = u(ks[5], (4 * nc,), 2 * nc * 9)
    fin1 = 4 * nc * 8 * 8
    p["wf1"] = u(ks[6], (fin1, 4 * nc), fin1)
    p["bf1"] = u(ks[7], (4 * nc,), fin1)
    p["wf2"] = u(ks[8], (4 * nc, 6), 4 * nc)
    p["bf2"] = u(ks[9], (6,), 4 * nc)
    return p


# -------------------------------- forward pass --------------------------------
def image_regression_forward(x_nchw, p):
    x = conv3x3_relu_pool(x_nchw, p["w1"], p["b1"])      # conv1 + relu(maxpool)
    x = conv3x3_relu_pool(x, p["w2"], p["b2"])           # conv2 + relu(maxpool)
    x = conv3x3_relu_pool(x, p["w3"], p["b3"])           # conv3 + relu(maxpool)
    B = x.shape[0]
    feat = x.reshape(B, -1)                              # == torch x.view(-1, 4*nc*8*8)
    return fc_head(feat, p["wf1"], p["bf1"], p["wf2"], p["bf2"])


# ---------------- pure-JAX reference for correctness ----------------
def reference_forward(x_nchw, p):
    def conv(x, w, b):
        y = lax.conv_general_dilated(x, w, (1, 1), "SAME",
                                     dimension_numbers=("NCHW", "HWIO", "NCHW"))
        return y + b[None, :, None, None]

    def pr(x):
        B, C, H, W = x.shape
        x = x.reshape(B, C, H // 2, 2, W // 2, 2).max(axis=(3, 5))
        return jnp.maximum(x, 0.0)

    x = pr(conv(x_nchw, p["w1"], p["b1"]))
    x = pr(conv(x, p["w2"], p["b2"]))
    x = pr(conv(x, p["w3"], p["b3"]))
    x = x.reshape(x.shape[0], -1)
    x = jnp.maximum(x @ p["wf1"] + p["bf1"], 0.0)
    x = x @ p["wf2"] + p["bf2"]
    return jax.nn.log_softmax(x, axis=1)


if __name__ == "__main__":
    nc = 4          # small num_channels
    key = jax.random.PRNGKey(0)
    kx, kp = jax.random.split(key)
    # fc1 expects num_channels*4*8*8 features => input spatial must be 64x64
    # (three 2x2 maxpools: 64 -> 32 -> 16 -> 8).
    x = jax.random.normal(kx, (2, 3, 64, 64), jnp.float32)
    params = init_params(kp, nc)

    fwd = jax.jit(image_regression_forward)
    out = jax.block_until_ready(fwd(x, params))
    ref = jax.block_until_ready(reference_forward(x, params))

    assert out.shape == (2, 6), out.shape
    assert bool(jnp.all(jnp.isfinite(out)))
    assert jnp.allclose(out, ref, atol=1e-3, rtol=1e-3), (out, ref)
    print("KERNEL_OK")
</pallas_src>

<mosaic_0001>
module attributes {stable_mosaic.version = 11 : i64} {
  func.func @_conv_pool_kernel(%arg0: i32, %arg1: memref<4x1x3x1122xf32, #tpu.memory_space<vmem>>, %arg2: memref<3x3x4x3xf32, #tpu.memory_space<vmem>>, %arg3: memref<4x1xf32, #tpu.memory_space<vmem>>, %arg4: memref<1x4x1056xf32, #tpu.memory_space<vmem>>) attributes {dimension_semantics = [#tpu.dimension_semantics<parallel>], iteration_bounds = array<i64: 2>, scalar_prefetch = 0 : i64, scratch_operands = 0 : i64, tpu.core_type = #tpu.core_type<tc>, window_params = [{transform_indices = @transform_0, window_bounds = array<i64: 4, 1, 3, 1122>}, {pipeline_mode = #tpu.pipeline_mode<synchronous>, transform_indices = @transform_1, window_bounds = array<i64: 3, 3, 4, 3>}, {pipeline_mode = #tpu.pipeline_mode<synchronous>, transform_indices = @transform_2, window_bounds = array<i64: 4, 1>}, {transform_indices = @transform_3, window_bounds = array<i64: 1, 4, 1056>}]} {
    %cst = arith.constant 0.000000e+00 : f32
    %0 = vector.broadcast %cst : f32 to vector<4x1056xf32>
    %c0 = arith.constant 0 : index
    %c0_0 = arith.constant 0 : index
    %c0_1 = arith.constant 0 : index
    %c0_2 = arith.constant 0 : index
    %1 = vector.load %arg1[%c0, %c0_0, %c0_1, %c0_2] : memref<4x1x3x1122xf32, #tpu.memory_space<vmem>>, vector<1x1x3x1056xf32>
    %2 = vector.shape_cast %1 : vector<1x1x3x1056xf32> to vector<3x1056xf32>
    %c0_3 = arith.constant 0 : index
    %c0_4 = arith.constant 0 : index
    %c0_5 = arith.constant 0 : index
    %c0_6 = arith.constant 0 : index
    %3 = vector.load %arg2[%c0_3, %c0_4, %c0_5, %c0_6] : memref<3x3x4x3xf32, #tpu.memory_space<vmem>>, vector<1x1x4x3xf32>
    %4 = vector.shape_cast %3 : vector<1x1x4x3xf32> to vector<4x3xf32>
    %cst_7 = arith.constant dense<0.000000e+00> : vector<4x1056xf32>
    %5 = tpu.matmul %4, %2, %cst_7 {dimension_numbers = #tpu.dot_dimension_numbers<[1], [0], [0], [1], [0, 0, 1, 1], [], []>} : vector<4x3xf32>, vector<3x1056xf32>, vector<4x1056xf32> -> vector<4x1056xf32>
    %6 = arith.addf %0, %5 : vector<4x1056xf32>
    %c1 = arith.constant 1 : index
    %c0_8 = arith.constant 0 : index
    %c0_9 = arith.constant 0 : index
    %c0_10 = arith.constant 0 : index
    %7 = vector.load %arg1[%c1, %c0_8, %c0_9, %c0_10] : memref<4x1x3x1122xf32, #tpu.memory_space<vmem>>, vector<1x1x3x1056xf32>
    %8 = vector.shape_cast %7 : vector<1x1x3x1056xf32> to vector<3x1056xf32>
    %c0_11 = arith.constant 0 : index
    %c1_12 = arith.constant 1 : index
    %c0_13 = arith.constant 0 : index
    %c0_14 = arith.constant 0 : index
    %9 = vector.load %arg2[%c0_11, %c1_12, %c0_13, %c0_14] : memref<3x3x4x3xf32, #tpu.memory_space<vmem>>, vector<1x1x4x3xf32>
    %10 = vector.shape_cast %9 : vector<1x1x4x3xf32> to vector<4x3xf32>
    %cst_15 = arith.constant dense<0.000000e+00> : vector<4x1056xf32>
    %11 = tpu.matmul %10, %8, %cst_15 {dimension_numbers = #tpu.dot_dimension_numbers<[1], [0], [0], [1], [0, 0, 1, 1], [], []>} : vector<4x3xf32>, vector<3x1056xf32>, vector<4x1056xf32> -> vector<4x1056xf32>
    %12 = arith.addf %6, %11 : vector<4x1056xf32>
    %c0_16 = arith.constant 0 : index
    %c0_17 = arith.constant 0 : index
    %c0_18 = arith.constant 0 : index
    %c1_19 = arith.constant 1 : index
    %13 = vector.load %arg1[%c0_16, %c0_17, %c0_18, %c1_19] : memref<4x1x3x1122xf32, #tpu.memory_space<vmem>>, vector<1x1x3x1056xf32>
    %14 = vector.shape_cast %13 : vector<1x1x3x1056xf32> to vector<3x1056xf32>
    %c0_20 = arith.constant 0 : index
    %c2 = arith.constant 2 : index
    %c0_21 = arith.constant 0 : index
    %c0_22 = arith.constant 0 : index
    %15 = vector.load %arg2[%c0_20, %c2, %c0_21, %c0_22] : memref<3x3x4x3xf32, #tpu.memory_space<vmem>>, vector<1x1x4x3xf32>
    %16 = vector.shape_cast %15 : vector<1x1x4x3xf32> to vector<4x3xf32>
    %cst_23 = arith.constant dense<0.000000e+00> : vector<4x1056xf32>
    %17 = tpu.matmul %16, %14, %cst_23 {dimension_numbers = #tpu.dot_dimension_numbers<[1], [0], [0], [1], [0, 0, 1, 1], [], []>} : vector<4x3xf32>, vector<3x1056xf32>, vector<4x1056xf32> -> vector<4x1056xf32>
    %18 = arith.addf %12, %17 : vector<4x1056xf32>
    %c2_24 = arith.constant 2 : index
    %c0_25 = arith.constant 0 : index
    %c0_26 = arith.constant 0 : index
    %c0_27 = arith.constant 0 : index
    %19 = vector.load %arg1[%c2_24, %c0_25, %c0_26, %c0_27] : memref<4x1x3x1122xf32, #tpu.memory_space<vmem>>, vector<1x1x3x1056xf32>
    %20 = vector.shape_cast %19 : vector<1x1x3x1056xf32> to vector<3x1056xf32>
    %c1_28 = arith.constant 1 : index
    %c0_29 = arith.constant 0 : index
    %c0_30 = arith.constant 0 : index
    %c0_31 = arith.constant 0 : index
    %21 = vector.load %arg2[%c1_28, %c0_29, %c0_30, %c0_31] : memref<3x3x4x3xf32, #tpu.memory_space<vmem>>, vector<1x1x4x3xf32>
    %22 = vector.shape_cast %21 : vector<1x1x4x3xf32> to vector<4x3xf32>
    %cst_32 = arith.constant dense<0.000000e+00> : vector<4x1056xf32>
    %23 = tpu.matmul %22, %20, %cst_32 {dimension_numbers = #tpu.dot_dimension_numbers<[1], [0], [0], [1], [0, 0, 1, 1], [], []>} : vector<4x3xf32>, vector<3x1056xf32>, vector<4x1056xf32> -> vector<4x1056xf32>
    %24 = arith.addf %18, %23 : vector<4x1056xf32>
    %c3 = arith.constant 3 : index
    %c0_33 = arith.constant 0 : index
    %c0_34 = arith.constant 0 : index
    %c0_35 = arith.constant 0 : index
    %25 = vector.load %arg1[%c3, %c0_33, %c0_34, %c0_35] : memref<4x1x3x1122xf32, #tpu.memory_space<vmem>>, vector<1x1x3x1056xf32>
    %26 = vector.shape_cast %25 : vector<1x1x3x1056xf32> to vector<3x1056xf32>
    %c1_36 = arith.constant 1 : index
    %c1_37 = arith.constant 1 : index
    %c0_38 = arith.constant 0 : index
    %c0_39 = arith.constant 0 : index
    %27 = vector.load %arg2[%c1_36, %c1_37, %c0_38, %c0_39] : memref<3x3x4x3xf32, #tpu.memory_space<vmem>>, vector<1x1x4x3xf32>
    %28 = vector.shape_cast %27 : vector<1x1x4x3xf32> to vector<4x3xf32>
    %cst_40 = arith.constant dense<0.000000e+00> : vector<4x1056xf32>
    %29 = tpu.matmul %28, %26, %cst_40 {dimension_numbers = #tpu.dot_dimension_numbers<[1], [0], [0], [1], [0, 0, 1, 1], [], []>} : vector<4x3xf32>, vector<3x1056xf32>, vector<4x1056xf32> -> vector<4x1056xf32>
    %30 = arith.addf %24, %29 : vector<4x1056xf32>
    %c2_41 = arith.constant 2 : index
    %c0_42 = arith.constant 0 : index
    %c0_43 = arith.constant 0 : index
    %c1_44 = arith.constant 1 : index
    %31 = vector.load %arg1[%c2_41, %c0_42, %c0_43, %c1_44] : memref<4x1x3x1122xf32, #tpu.memory_space<vmem>>, vector<1x1x3x1056xf32>
    %32 = vector.shape_cast %31 : vector<1x1x3x1056xf32> to vector<3x1056xf32>
    %c1_45 = arith.constant 1 : index
    %c2_46 = arith.constant 2 : index
    %c0_47 = arith.constant 0 : index
    %c0_48 = arith.constant 0 : index
    %33 = vector.load %arg2[%c1_45, %c2_46, %c0_47, %c0_48] : memref<3x3x4x3xf32, #tpu.memory_space<vmem>>, vector<1x1x4x3xf32>
    %34 = vector.shape_cast %33 : vector<1x1x4x3xf32> to vector<4x3xf32>
    %cst_49 = arith.constant dense<0.000000e+00> : vector<4x1056xf32>
    %35 = tpu.matmul %34, %32, %cst_49 {dimension_numbers = #tpu.dot_dimension_numbers<[1], [0], [0], [1], [0, 0, 1, 1], [], []>} : vector<4x3xf32>, vector<3x1056xf32>, vector<4x1056xf32> -> vector<4x1056xf32>
    %36 = arith.addf %30, %35 : vector<4x1056xf32>
    %c0_50 = arith.constant 0 : index
    %c0_51 = arith.constant 0 : index
    %c0_52 = arith.constant 0 : index
    %c33 = arith.constant 33 : index
    %37 = vector.load %arg1[%c0_50, %c0_51, %c0_52, %c33] : memref<4x1x3x1122xf32, #tpu.memory_space<vmem>>, vector<1x1x3x1056xf32>
    %38 = vector.shape_cast %37 : vector<1x1x3x1056xf32> to vector<3x1056xf32>
    %c2_53 = arith.constant 2 : index
    %c0_54 = arith.constant 0 : index
    %c0_55 = arith.constant 0 : index
    %c0_56 = arith.constant 0 : index
    %39 = vector.load %arg2[%c2_53, %c0_54, %c0_55, %c0_56] : memref<3x3x4x3xf32, #tpu.memory_space<vmem>>, vector<1x1x4x3xf32>
    %40 = vector.shape_cast %39 : vector<1x1x4x3xf32> to vector<4x3xf32>
    %cst_57 = arith.constant dense<0.000000e+00> : vector<4x1056xf32>
    %41 = tpu.matmul %40, %38, %cst_57 {dimension_numbers = #tpu.dot_dimension_numbers<[1], [0], [0], [1], [0, 0, 1, 1], [], []>} : vector<4x3xf32>, vector<3x1056xf32>, vector<4x1056xf32> -> vector<4x1056xf32>
    %42 = arith.addf %36, %41 : vector<4x1056xf32>
    %c1_58 = arith.constant 1 : index
    %c0_59 = arith.constant 0 : index
    %c0_60 = arith.constant 0 : index
    %c33_61 = arith.constant 33 : index
    %43 = vector.load %arg1[%c1_58, %c0_59, %c0_60, %c33_61] : memref<4x1x3x1122xf32, #tpu.memory_space<vmem>>, vector<1x1x3x1056xf32>
    %44 = vector.shape_cast %43 : vector<1x1x3x1056xf32> to vector<3x1056xf32>
    %c2_62 = arith.constant 2 : index
    %c1_63 = arith.constant 1 : index
    %c0_64 = arith.constant 0 : index
    %c0_65 = arith.constant 0 : index
    %45 = vector.load %arg2[%c2_62, %c1_63, %c0_64, %c0_65] : memref<3x3x4x3xf32, #tpu.memory_space<vmem>>, vector<1x1x4x3xf32>
    %46 = vector.shape_cast %45 : vector<1x1x4x3xf32> to vector<4x3xf32>
    %cst_66 = arith.constant dense<0.000000e+00> : vector<4x1056xf32>
    %47 = tpu.matmul %46, %44, %cst_66 {dimension_numbers = #tpu.dot_dimension_numbers<[1], [0], [0], [1], [0, 0, 1, 1], [], []>} : vector<4x3xf32>, vector<3x1056xf32>, vector<4x1056xf32> -> vector<4x1056xf32>
    %48 = arith.addf %42, %47 : vector<4x1056xf32>
    %c0_67 = arith.constant 0 : index
    %c0_68 = arith.constant 0 : index
    %c0_69 = arith.constant 0 : index
    %c34 = arith.constant 34 : index
    %49 = vector.load %arg1[%c0_67, %c0_68, %c0_69, %c34] : memref<4x1x3x1122xf32, #tpu.memory_space<vmem>>, vector<1x1x3x1056xf32>
    %50 = vector.shape_cast %49 : vector<1x1x3x1056xf32> to vector<3x1056xf32>
    %c2_70 = arith.constant 2 : index
    %c2_71 = arith.constant 2 : index
    %c0_72 = arith.constant 0 : index
    %c0_73 = arith.constant 0 : index
    %51 = vector.load %arg2[%c2_70, %c2_71, %c0_72, %c0_73] : memref<3x3x4x3xf32, #tpu.memory_space<vmem>>, vector<1x1x4x3xf32>
    %52 = vector.shape_cast %51 : vector<1x1x4x3xf32> to vector<4x3xf32>
    %cst_74 = arith.constant dense<0.000000e+00> : vector<4x1056xf32>
    %53 = tpu.matmul %52, %50, %cst_74 {dimension_numbers = #tpu.dot_dimension_numbers<[1], [0], [0], [1], [0, 0, 1, 1], [], []>} : vector<4x3xf32>, vector<3x1056xf32>, vector<4x1056xf32> -> vector<4x1056xf32>
    %54 = arith.addf %48, %53 : vector<4x1056xf32>
    %cst_75 = arith.constant 0.000000e+00 : f32
    %55 = vector.broadcast %cst_75 : f32 to vector<4x1056xf32>
    %c1_76 = arith.constant 1 : index
    %c0_77 = arith.constant 0 : index
    %c0_78 = arith.constant 0 : index
    %c0_79 = arith.constant 0 : index
    %56 = vector.load %arg1[%c1_76, %c0_77, %c0_78, %c0_79] : memref<4x1x3x1122xf32, #tpu.memory_space<vmem>>, vector<1x1x3x1056xf32>
    %57 = vector.shape_cast %56 : vector<1x1x3x1056xf32> to vector<3x1056xf32>
    %c0_80 = arith.constant 0 : index
    %c0_81 = arith.constant 0 : index
    %c0_82 = arith.constant 0 : index
    %c0_83 = arith.constant 0 : index
    %58 = vector.load %arg2[%c0_80, %c0_81, %c0_82, %c0_83] : memref<3x3x4x3xf32, #tpu.memory_space<vmem>>, vector<1x1x4x3xf32>
    %59 = vector.shape_cast %58 : vector<1x1x4x3xf32> to vector<4x3xf32>
    %cst_84 = arith.constant dense<0.000000e+00> : vector<4x1056xf32>
    %60 = tpu.matmul %59, %57, %cst_84 {dimension_numbers = #tpu.dot_dimension_numbers<[1], [0], [0], [1], [0, 0, 1, 1], [], []>} : vector<4x3xf32>, vector<3x1056xf32>, vector<4x1056xf32> -> vector<4x1056xf32>
    %61 = arith.addf %55, %60 : vector<4x1056xf32>
    %c0_85 = arith.constant 0 : index
    %c0_86 = arith.constant 0 : index
    %c0_87 = arith.constant 0 : index
    %c1_88 = arith.constant 1 : index
    %62 = vector.load %arg1[%c0_85, %c0_86, %c0_87, %c1_88] : memref<4x1x3x1122xf32, #tpu.memory_space<vmem>>, vector<1x1x3x1056xf32>
    %63 = vector.shape_cast %62 : vector<1x1x3x1056xf32> to vector<3x1056xf32>
    %c0_89 = arith.constant 0 : index
    %c1_90 = arith.constant 1 : index
    %c0_91 = arith.constant 0 : index
    %c0_92 = arith.constant 0 : index
    %64 = vector.load %arg2[%c0_89, %c1_90, %c0_91, %c0_92] : memref<3x3x4x3xf32, #tpu.memory_space<vmem>>, vector<1x1x4x3xf32>
    %65 = vector.shape_cast %64 : vector<1x1x4x3xf32> to vector<4x3xf32>
    %cst_93 = arith.constant dense<0.000000e+00> : vector<4x1056xf32>
    %66 = tpu.matmul %65, %63, %cst_93 {dimension_numbers = #tpu.dot_dimension_numbers<[1], [0], [0], [1], [0, 0, 1, 1], [], []>} : vector<4x3xf32>, vector<3x1056xf32>, vector<4x1056xf32> -> vector<4x1056xf32>
    %67 = arith.addf %61, %66 : vector<4x1056xf32>
    %c1_94 = arith.constant 1 : index
    %c0_95 = arith.constant 0 : index
    %c0_96 = arith.constant 0 : index
    %c1_97 = arith.constant 1 : index
    %68 = vector.load %arg1[%c1_94, %c0_95, %c0_96, %c1_97] : memref<4x1x3x1122xf32, #tpu.memory_space<vmem>>, vector<1x1x3x1056xf32>
    %69 = vector.shape_cast %68 : vector<1x1x3x1056xf32> to vector<3x1056xf32>
    %c0_98 = arith.constant 0 : index
    %c2_99 = arith.constant 2 : index
    %c0_100 = arith.constant 0 : index
    %c0_101 = arith.constant 0 : index
    %70 = vector.load %arg2[%c0_98, %c2_99, %c0_100, %c0_101] : memref<3x3x4x3xf32, #tpu.memory_space<vmem>>, vector<1x1x4x3xf32>
    %71 = vector.shape_cast %70 : vector<1x1x4x3xf32> to vector<4x3xf32>
    %cst_102 = arith.constant dense<0.000000e+00> : vector<4x1056xf32>
    %72 = tpu.matmul %71, %69, %cst_102 {dimension_numbers = #tpu.dot_dimension_numbers<[1], [0], [0], [1], [0, 0, 1, 1], [], []>} : vector<4x3xf32>, vector<3x1056xf32>, vector<4x1056xf32> -> vector<4x1056xf32>
    %73 = arith.addf %67, %72 : vector<4x1056xf32>
    %c3_103 = arith.constant 3 : index
    %c0_104 = arith.constant 0 : index
    %c0_105 = arith.constant 0 : index
    %c0_106 = arith.constant 0 : index
    %74 = vector.load %arg1[%c3_103, %c0_104, %c0_105, %c0_106] : memref<4x1x3x1122xf32, #tpu.memory_space<vmem>>, vector<1x1x3x1056xf32>
    %75 = vector.shape_cast %74 : vector<1x1x3x1056xf32> to vector<3x1056xf32>
    %c1_107 = arith.constant 1 : index
    %c0_108 = arith.constant 0 : index
    %c0_109 = arith.constant 0 : index
    %c0_110 = arith.constant 0 : index
    %76 = vector.load %arg2[%c1_107, %c0_108, %c0_109, %c0_110] : memref<3x3x4x3xf32, #tpu.memory_space<vmem>>, vector<1x1x4x3xf32>
    %77 = vector.shape_cast %76 : vector<1x1x4x3xf32> to vector<4x3xf32>
    %cst_111 = arith.constant dense<0.000000e+00> : vector<4x1056xf32>
    %78 = tpu.matmul %77, %75, %cst_111 {dimension_numbers = #tpu.dot_dimension_numbers<[1], [0], [0], [1], [0, 0, 1, 1], [], []>} : vector<4x3xf32>, vector<3x1056xf32>, vector<4x1056xf32> -> vector<4x1056xf32>
    %79 = arith.addf %73, %78 : vector<4x1056xf32>
    %c2_112 = arith.constant 2 : index
    %c0_113 = arith.constant 0 : index
    %c0_114 = arith.constant 0 : index
    %c1_115 = arith.constant 1 : index
    %80 = vector.load %arg1[%c2_112, %c0_113, %c0_114, %c1_115] : memref<4x1x3x1122xf32, #tpu.memory_space<vmem>>, vector<1x1x3x1056xf32>
    %81 = vector.shape_cast %80 : vector<1x1x3x1056xf32> to vector<3x1056xf32>
    %c1_116 = arith.constant 1 : index
    %c1_117 = arith.constant 1 : index
    %c0_118 = arith.constant 0 : index
    %c0_119 = arith.constant 0 : index
    %82 = vector.load %arg2[%c1_116, %c1_117, %c0_118, %c0_119] : memref<3x3x4x3xf32, #tpu.memory_space<vmem>>, vector<1x1x4x3xf32>
    %83 = vector.shape_cast %82 : vector<1x1x4x3xf32> to vector<4x3xf32>
    %cst_120 = arith.constant dense<0.000000e+00> : vector<4x1056xf32>
    %84 = tpu.matmul %83, %81, %cst_120 {dimension_numbers = #tpu.dot_dimension_numbers<[1], [0], [0], [1], [0, 0, 1, 1], [], []>} : vector<4x3xf32>, vector<3x1056xf32>, vector<4x1056xf32> -> vector<4x1056xf32>
    %85 = arith.addf %79, %84 : vector<4x1056xf32>
    %c3_121 = arith.constant 3 : index
    %c0_122 = arith.constant 0 : index
    %c0_123 = arith.constant 0 : index
    %c1_124 = arith.constant 1 : index
    %86 = vector.load %arg1[%c3_121, %c0_122, %c0_123, %c1_124] : memref<4x1x3x1122xf32, #tpu.memory_space<vmem>>, vector<1x1x3x1056xf32>
    %87 = vector.shape_cast %86 : vector<1x1x3x1056xf32> to vector<3x1056xf32>
    %c1_125 = arith.constant 1 : index
    %c2_126 = arith.constant 2 : index
    %c0_127 = arith.constant 0 : index
    %c0_128 = arith.constant 0 : index
    %88 = vector.load %arg2[%c1_125, %c2_126, %c0_127, %c0_128] : memref<3x3x4x3xf32, #tpu.memory_space<vmem>>, vector<1x1x4x3xf32>
    %89 = vector.shape_cast %88 : vector<1x1x4x3xf32> to vector<4x3xf32>
    %cst_129 = arith.constant dense<0.000000e+00> : vector<4x1056xf32>
    %90 = tpu.matmul %89, %87, %cst_129 {dimension_numbers = #tpu.dot_dimension_numbers<[1], [0], [0], [1], [0, 0, 1, 1], [], []>} : vector<4x3xf32>, vector<3x1056xf32>, vector<4x1056xf32> -> vector<4x1056xf32>
    %91 = arith.addf %85, %90 : vector<4x1056xf32>
    %c1_130 = arith.constant 1 : index
    %c0_131 = arith.constant 0 : index
    %c0_132 = arith.constant 0 : index
    %c33_133 = arith.constant 33 : index
    %92 = vector.load %arg1[%c1_130, %c0_131, %c0_132, %c33_133] : memref<4x1x3x1122xf32, #tpu.memory_space<vmem>>, vector<1x1x3x1056xf32>
    %93 = vector.shape_cast %92 : vector<1x1x3x1056xf32> to vector<3x1056xf32>
    %c2_134 = arith.constant 2 : index
    %c0_135 = arith.constant 0 : index
    %c0_136 = arith.constant 0 : index
    %c0_137 = arith.constant 0 : index
    %94 = vector.load %arg2[%c2_134, %c0_135, %c0_136, %c0_137] : memref<3x3x4x3xf32, #tpu.memory_space<vmem>>, vector<1x1x4x3xf32>
    %95 = vector.shape_cast %94 : vector<1x1x4x3xf32> to vector<4x3xf32>
    %cst_138 = arith.constant dense<0.000000e+00> : vector<4x1056xf32>
    %96 = tpu.matmul %95, %93, %cst_138 {dimension_numbers = #tpu.dot_dimension_numbers<[1], [0], [0], [1], [0, 0, 1, 1], [], []>} : vector<4x3xf32>, vector<3x1056xf32>, vector<4x1056xf32> -> vector<4x1056xf32>
    %97 = arith.addf %91, %96 : vector<4x1056xf32>
    %c0_139 = arith.constant 0 : index
    %c0_140 = arith.constant 0 : index
    %c0_141 = arith.constant 0 : index
    %c34_142 = arith.constant 34 : index
    %98 = vector.load %arg1[%c0_139, %c0_140, %c0_141, %c34_142] : memref<4x1x3x1122xf32, #tpu.memory_space<vmem>>, vector<1x1x3x1056xf32>
    %99 = vector.shape_cast %98 : vector<1x1x3x1056xf32> to vector<3x1056xf32>
    %c2_143 = arith.constant 2 : index
    %c1_144 = arith.constant 1 : index
    %c0_145 = arith.constant 0 : index
    %c0_146 = arith.constant 0 : index
    %100 = vector.load %arg2[%c2_143, %c1_144, %c0_145, %c0_146] : memref<3x3x4x3xf32, #tpu.memory_space<vmem>>, vector<1x1x4x3xf32>
    %101 = vector.shape_cast %100 : vector<1x1x4x3xf32> to vector<4x3xf32>
    %cst_147 = arith.constant dense<0.000000e+00> : vector<4x1056xf32>
    %102 = tpu.matmul %101, %99, %cst_147 {dimension_numbers = #tpu.dot_dimension_numbers<[1], [0], [0], [1], [0, 0, 1, 1], [], []>} : vector<4x3xf32>, vector<3x1056xf32>, vector<4x1056xf32> -> vector<4x1056xf32>
    %103 = arith.addf %97, %102 : vector<4x1056xf32>
    %c1_148 = arith.constant 1 : index
    %c0_149 = arith.constant 0 : index
    %c0_150 = arith.constant 0 : index
    %c34_151 = arith.constant 34 : index
    %104 = vector.load %arg1[%c1_148, %c0_149, %c0_150, %c34_151] : memref<4x1x3x1122xf32, #tpu.memory_space<vmem>>, vector<1x1x3x1056xf32>
    %105 = vector.shape_cast %104 : vector<1x1x3x1056xf32> to vector<3x1056xf32>
    %c2_152 = arith.constant 2 : index
    %c2_153 = arith.constant 2 : index
    %c0_154 = arith.constant 0 : index
    %c0_155 = arith.constant 0 : index
    %106 = vector.load %arg2[%c2_152, %c2_153, %c0_154, %c0_155] : memref<3x3x4x3xf32, #tpu.memory_space<vmem>>, vector<1x1x4x3xf32>
    %107 = vector.shape_cast %106 : vector<1x1x4x3xf32> to vector<4x3xf32>
    %cst_156 = arith.constant dense<0.000000e+00> : vector<4x1056xf32>
    %108 = tpu.matmul %107, %105, %cst_156 {dimension_numbers = #tpu.dot_dimension_numbers<[1], [0], [0], [1], [0, 0, 1, 1], [], []>} : vector<4x3xf32>, vector<3x1056xf32>, vector<4x1056xf32> -> vector<4x1056xf32>
    %109 = arith.addf %103, %108 : vector<4x1056xf32>
    %110 = arith.maximumf %54, %109 : vector<4x1056xf32>
    %cst_157 = arith.constant 0.000000e+00 : f32
    %111 = vector.broadcast %cst_157 : f32 to vector<4x1056xf32>
    %c2_158 = arith.constant 2 : index
    %c0_159 = arith.constant 0 : index
    %c0_160 = arith.constant 0 : index
    %c0_161 = arith.constant 0 : index
    %112 = vector.load %arg1[%c2_158, %c0_159, %c0_160, %c0_161] : memref<4x1x3x1122xf32, #tpu.memory_space<vmem>>, vector<1x1x3x1056xf32>
    %113 = vector.shape_cast %112 : vector<1x1x3x1056xf32> to vector<3x1056xf32>
    %c0_162 = arith.constant 0 : index
    %c0_163 = arith.constant 0 : index
    %c0_164 = arith.constant 0 : index
    %c0_165 = arith.constant 0 : index
    %114 = vector.load %arg2[%c0_162, %c0_163, %c0_164, %c0_165] : memref<3x3x4x3xf32, #tpu.memory_space<vmem>>, vector<1x1x4x3xf32>
    %115 = vector.shape_cast %114 : vector<1x1x4x3xf32> to vector<4x3xf32>
    %cst_166 = arith.constant dense<0.000000e+00> : vector<4x1056xf32>
    %116 = tpu.matmul %115, %113, %cst_166 {dimension_numbers = #tpu.dot_dimension_numbers<[1], [0], [0], [1], [0, 0, 1, 1], [], []>} : vector<4x3xf32>, vector<3x1056xf32>, vector<4x1056xf32> -> vector<4x1056xf32>
    %117 = arith.addf %111, %116 : vector<4x1056xf32>
    %c3_167 = arith.constant 3 : index
    %c0_168 = arith.constant 0 : index
    %c0_169 = arith.constant 0 : index
    %c0_170 = arith.constant 0 : index
    %118 = vector.load %arg1[%c3_167, %c0_168, %c0_169, %c0_170] : memref<4x1x3x1122xf32, #tpu.memory_space<vmem>>, vector<1x1x3x1056xf32>
    %119 = vector.shape_cast %118 : vector<1x1x3x1056xf32> to vector<3x1056xf32>
    %c0_171 = arith.constant 0 : index
    %c1_172 = arith.constant 1 : index
    %c0_173 = arith.constant 0 : index
    %c0_174 = arith.constant 0 : index
    %120 = vector.load %arg2[%c0_171, %c1_172, %c0_173, %c0_174] : memref<3x3x4x3xf32, #tpu.memory_space<vmem>>, vector<1x1x4x3xf32>
    %121 = vector.shape_cast %120 : vector<1x1x4x3xf32> to vector<4x3xf32>
    %cst_175 = arith.constant dense<0.000000e+00> : vector<4x1056xf32>
    %122 = tpu.matmul %121, %119, %cst_175 {dimension_numbers = #tpu.dot_dimension_numbers<[1], [0], [0], [1], [0, 0, 1, 1], [], []>} : vector<4x3xf32>, vector<3x1056xf32>, vector<4x1056xf32> -> vector<4x1056xf32>
    %123 = arith.addf %117, %122 : vector<4x1056xf32>
    %c2_176 = arith.constant 2 : index
    %c0_177 = arith.constant 0 : index
    %c0_178 = arith.constant 0 : index
    %c1_179 = arith.constant 1 : index
    %124 = vector.load %arg1[%c2_176, %c0_177, %c0_178, %c1_179] : memref<4x1x3x1122xf32, #tpu.memory_space<vmem>>, vector<1x1x3x1056xf32>
    %125 = vector.shape_cast %124 : vector<1x1x3x1056xf32> to vector<3x1056xf32>
    %c0_180 = arith.constant 0 : index
    %c2_181 = arith.constant 2 : index
    %c0_182 = arith.constant 0 : index
    %c0_183 = arith.constant 0 : index
    %126 = vector.load %arg2[%c0_180, %c2_181, %c0_182, %c0_183] : memref<3x3x4x3xf32, #tpu.memory_space<vmem>>, vector<1x1x4x3xf32>
    %127 = vector.shape_cast %126 : vector<1x1x4x3xf32> to vector<4x3xf32>
    %cst_184 = arith.constant dense<0.000000e+00> : vector<4x1056xf32>
    %128 = tpu.matmul %127, %125, %cst_184 {dimension_numbers = #tpu.dot_dimension_numbers<[1], [0], [0], [1], [0, 0, 1, 1], [], []>} : vector<4x3xf32>, vector<3x1056xf32>, vector<4x1056xf32> -> vector<4x1056xf32>
    %129 = arith.addf %123, %128 : vector<4x1056xf32>
    %c0_185 = arith.constant 0 : index
    %c0_186 = arith.constant 0 : index
    %c0_187 = arith.constant 0 : index
    %c33_188 = arith.constant 33 : index
    %130 = vector.load %arg1[%c0_185, %c0_186, %c0_187, %c33_188] : memref<4x1x3x1122xf32, #tpu.memory_space<vmem>>, vector<1x1x3x1056xf32>
    %131 = vector.shape_cast %130 : vector<1x1x3x1056xf32> to vector<3x1056xf32>
    %c1_189 = arith.constant 1 : index
    %c0_190 = arith.constant 0 : index
    %c0_191 = arith.constant 0 : index
    %c0_192 = arith.constant 0 : index
    %132 = vector.load %arg2[%c1_189, %c0_190, %c0_191, %c0_192] : memref<3x3x4x3xf32, #tpu.memory_space<vmem>>, vector<1x1x4x3xf32>
    %133 = vector.shape_cast %132 : vector<1x1x4x3xf32> to vector<4x3xf32>
    %cst_193 = arith.constant dense<0.000000e+00> : vector<4x1056xf32>
    %134 = tpu.matmul %133, %131, %cst_193 {dimension_numbers = #tpu.dot_dimension_numbers<[1], [0], [0], [1], [0, 0, 1, 1], [], []>} : vector<4x3xf32>, vector<3x1056xf32>, vector<4x1056xf32> -> vector<4x1056xf32>
    %135 = arith.addf %129, %134 : vector<4x1056xf32>
    %c1_194 = arith.constant 1 : index
    %c0_195 = arith.constant 0 : index
    %c0_196 = arith.constant 0 : index
    %c33_197 = arith.constant 33 : index
    %136 = vector.load %arg1[%c1_194, %c0_195, %c0_196, %c33_197] : memref<4x1x3x1122xf32, #tpu.memory_space<vmem>>, vector<1x1x3x1056xf32>
    %137 = vector.shape_cast %136 : vector<1x1x3x1056xf32> to vector<3x1056xf32>
    %c1_198 = arith.constant 1 : index
    %c1_199 = arith.constant 1 : index
    %c0_200 = arith.constant 0 : index
    %c0_201 = arith.constant 0 : index
    %138 = vector.load %arg2[%c1_198, %c1_199, %c0_200, %c0_201] : memref<3x3x4x3xf32, #tpu.memory_space<vmem>>, vector<1x1x4x3xf32>
    %139 = vector.shape_cast %138 : vector<1x1x4x3xf32> to vector<4x3xf32>
    %cst_202 = arith.constant dense<0.000000e+00> : vector<4x1056xf32>
    %140 = tpu.matmul %139, %137, %cst_202 {dimension_numbers = #tpu.dot_dimension_numbers<[1], [0], [0], [1], [0, 0, 1, 1], [], []>} : vector<4x3xf32>, vector<3x1056xf32>, vector<4x1056xf32> -> vector<4x1056xf32>
    %141 = arith.addf %135, %140 : vector<4x1056xf32>
    %c0_203 = arith.constant 0 : index
    %c0_204 = arith.constant 0 : index
    %c0_205 = arith.constant 0 : index
    %c34_206 = arith.constant 34 : index
    %142 = vector.load %arg1[%c0_203, %c0_204, %c0_205, %c34_206] : memref<4x1x3x1122xf32, #tpu.memory_space<vmem>>, vector<1x1x3x1056xf32>
    %143 = vector.shape_cast %142 : vector<1x1x3x1056xf32> to vector<3x1056xf32>
    %c1_207 = arith.constant 1 : index
    %c2_208 = arith.constant 2 : index
    %c0_209 = arith.constant 0 : index
    %c0_210 = arith.constant 0 : index
    %144 = vector.load %arg2[%c1_207, %c2_208, %c0_209, %c0_210] : memref<3x3x4x3xf32, #tpu.memory_space<vmem>>, vector<1x1x4x3xf32>
    %145 = vector.shape_cast %144 : vector<1x1x4x3xf32> to vector<4x3xf32>
    %cst_211 = arith.constant dense<0.000000e+00> : vector<4x1056xf32>
    %146 = tpu.matmul %145, %143, %cst_211 {dimension_numbers = #tpu.dot_dimension_numbers<[1], [0], [0], [1], [0, 0, 1, 1], [], []>} : vector<4x3xf32>, vector<3x1056xf32>, vector<4x1056xf32> -> vector<4x1056xf32>
    %147 = arith.addf %141, %146 : vector<4x1056xf32>
    %c2_212 = arith.constant 2 : index
    %c0_213 = arith.constant 0 : index
    %c0_214 = arith.constant 0 : index
    %c33_215 = arith.constant 33 : index
    %148 = vector.load %arg1[%c2_212, %c0_213, %c0_214, %c33_215] : memref<4x1x3x1122xf32, #tpu.memory_space<vmem>>, vector<1x1x3x1056xf32>
    %149 = vector.shape_cast %148 : vector<1x1x3x1056xf32> to vector<3x1056xf32>
    %c2_216 = arith.constant 2 : index
    %c0_217 = arith.constant 0 : index
    %c0_218 = arith.constant 0 : index
    %c0_219 = arith.constant 0 : index
    %150 = vector.load %arg2[%c2_216, %c0_217, %c0_218, %c0_219] : memref<3x3x4x3xf32, #tpu.memory_space<vmem>>, vector<1x1x4x3xf32>
    %151 = vector.shape_cast %150 : vector<1x1x4x3xf32> to vector<4x3xf32>
    %cst_220 = arith.constant dense<0.000000e+00> : vector<4x1056xf32>
    %152 = tpu.matmul %151, %149, %cst_220 {dimension_numbers = #tpu.dot_dimension_numbers<[1], [0], [0], [1], [0, 0, 1, 1], [], []>} : vector<4x3xf32>, vector<3x1056xf32>, vector<4x1056xf32> -> vector<4x1056xf32>
    %153 = arith.addf %147, %152 : vector<4x1056xf32>
    %c3_221 = arith.constant 3 : index
    %c0_222 = arith.constant 0 : index
    %c0_223 = arith.constant 0 : index
    %c33_224 = arith.constant 33 : index
    %154 = vector.load %arg1[%c3_221, %c0_222, %c0_223, %c33_224] : memref<4x1x3x1122xf32, #tpu.memory_space<vmem>>, vector<1x1x3x1056xf32>
    %155 = vector.shape_cast %154 : vector<1x1x3x1056xf32> to vector<3x1056xf32>
    %c2_225 = arith.constant 2 : index
    %c1_226 = arith.constant 1 : index
    %c0_227 = arith.constant 0 : index
    %c0_228 = arith.constant 0 : index
    %156 = vector.load %arg2[%c2_225, %c1_226, %c0_227, %c0_228] : memref<3x3x4x3xf32, #tpu.memory_space<vmem>>, vector<1x1x4x3xf32>
    %157 = vector.shape_cast %156 : vector<1x1x4x3xf32> to vector<4x3xf32>
    %cst_229 = arith.constant dense<0.000000e+00> : vector<4x1056xf32>
    %158 = tpu.matmul %157, %155, %cst_229 {dimension_numbers = #tpu.dot_dimension_numbers<[1], [0], [0], [1], [0, 0, 1, 1], [], []>} : vector<4x3xf32>, vector<3x1056xf32>, vector<4x1056xf32> -> vector<4x1056xf32>
    %159 = arith.addf %153, %158 : vector<4x1056xf32>
    %c2_230 = arith.constant 2 : index
    %c0_231 = arith.constant 0 : index
    %c0_232 = arith.constant 0 : index
    %c34_233 = arith.constant 34 : index
    %160 = vector.load %arg1[%c2_230, %c0_231, %c0_232, %c34_233] : memref<4x1x3x1122xf32, #tpu.memory_space<vmem>>, vector<1x1x3x1056xf32>
    %161 = vector.shape_cast %160 : vector<1x1x3x1056xf32> to vector<3x1056xf32>
    %c2_234 = arith.constant 2 : index
    %c2_235 = arith.constant 2 : index
    %c0_236 = arith.constant 0 : index
    %c0_237 = arith.constant 0 : index
    %162 = vector.load %arg2[%c2_234, %c2_235, %c0_236, %c0_237] : memref<3x3x4x3xf32, #tpu.memory_space<vmem>>, vector<1x1x4x3xf32>
    %163 = vector.shape_cast %162 : vector<1x1x4x3xf32> to vector<4x3xf32>
    %cst_238 = arith.constant dense<0.000000e+00> : vector<4x1056xf32>
    %164 = tpu.matmul %163, %161, %cst_238 {dimension_numbers = #tpu.dot_dimension_numbers<[1], [0], [0], [1], [0, 0, 1, 1], [], []>} : vector<4x3xf32>, vector<3x1056xf32>, vector<4x1056xf32> -> vector<4x1056xf32>
    %165 = arith.addf %159, %164 : vector<4x1056xf32>
    %166 = arith.maximumf %110, %165 : vector<4x1056xf32>
    %cst_239 = arith.constant 0.000000e+00 : f32
    %167 = vector.broadcast %cst_239 : f32 to vector<4x1056xf32>
    %c3_240 = arith.constant 3 : index
    %c0_241 = arith.constant 0 : index
    %c0_242 = arith.constant 0 : index
    %c0_243 = arith.constant 0 : index
    %168 = vector.load %arg1[%c3_240, %c0_241, %c0_242, %c0_243] : memref<4x1x3x1122xf32, #tpu.memory_space<vmem>>, vector<1x1x3x1056xf32>
    %169 = vector.shape_cast %168 : vector<1x1x3x1056xf32> to vector<3x1056xf32>
    %c0_244 = arith.constant 0 : index
    %c0_245 = arith.constant 0 : index
    %c0_246 = arith.constant 0 : index
    %c0_247 = arith.constant 0 : index
    %170 = vector.load %arg2[%c0_244, %c0_245, %c0_246, %c0_247] : memref<3x3x4x3xf32, #tpu.memory_space<vmem>>, vector<1x1x4x3xf32>
    %171 = vector.shape_cast %170 : vector<1x1x4x3xf32> to vector<4x3xf32>
    %cst_248 = arith.constant dense<0.000000e+00> : vector<4x1056xf32>
    %172 = tpu.matmul %171, %169, %cst_248 {dimension_numbers = #tpu.dot_dimension_numbers<[1], [0], [0], [1], [0, 0, 1, 1], [], []>} : vector<4x3xf32>, vector<3x1056xf32>, vector<4x1056xf32> -> vector<4x1056xf32>
    %173 = arith.addf %167, %172 : vector<4x1056xf32>
    %c2_249 = arith.constant 2 : index
    %c0_250 = arith.constant 0 : index
    %c0_251 = arith.constant 0 : index
    %c1_252 = arith.constant 1 : index
    %174 = vector.load %arg1[%c2_249, %c0_250, %c0_251, %c1_252] : memref<4x1x3x1122xf32, #tpu.memory_space<vmem>>, vector<1x1x3x1056xf32>
    %175 = vector.shape_cast %174 : vector<1x1x3x1056xf32> to vector<3x1056xf32>
    %c0_253 = arith.constant 0 : index
    %c1_254 = arith.constant 1 : index
    %c0_255 = arith.constant 0 : index
    %c0_256 = arith.constant 0 : index
    %176 = vector.load %arg2[%c0_253, %c1_254, %c0_255, %c0_256] : memref<3x3x4x3xf32, #tpu.memory_space<vmem>>, vector<1x1x4x3xf32>
    %177 = vector.shape_cast %176 : vector<1x1x4x3xf32> to vector<4x3xf32>
    %cst_257 = arith.constant dense<0.000000e+00> : vector<4x1056xf32>
    %178 = tpu.matmul %177, %175, %cst_257 {dimension_numbers = #tpu.dot_dimension_numbers<[1], [0], [0], [1], [0, 0, 1, 1], [], []>} : vector<4x3xf32>, vector<3x1056xf32>, vector<4x1056xf32> -> vector<4x1056xf32>
    %179 = arith.addf %173, %178 : vector<4x1056xf32>
    %c3_258 = arith.constant 3 : index
    %c0_259 = arith.constant 0 : index
    %c0_260 = arith.constant 0 : index
    %c1_261 = arith.constant 1 : index
    %180 = vector.load %arg1[%c3_258, %c0_259, %c0_260, %c1_261] : memref<4x1x3x1122xf32, #tpu.memory_space<vmem>>, vector<1x1x3x1056xf32>
    %181 = vector.shape_cast %180 : vector<1x1x3x1056xf32> to vector<3x1056xf32>
    %c0_262 = arith.constant 0 : index
    %c2_263 = arith.constant 2 : index
    %c0_264 = arith.constant 0 : index
    %c0_265 = arith.constant 0 : index
    %182 = vector.load %arg2[%c0_262, %c2_263, %c0_264, %c0_265] : memref<3x3x4x3xf32, #tpu.memory_space<vmem>>, vector<1x1x4x3xf32>
    %183 = vector.shape_cast %182 : vector<1x1x4x3xf32> to vector<4x3xf32>
    %cst_266 = arith.constant dense<0.000000e+00> : vector<4x1056xf32>
    %184 = tpu.matmul %183, %181, %cst_266 {dimension_numbers = #tpu.dot_dimension_numbers<[1], [0], [0], [1], [0, 0, 1, 1], [], []>} : vector<4x3xf32>, vector<3x1056xf32>, vector<4x1056xf32> -> vector<4x1056xf32>
    %185 = arith.addf %179, %184 : vector<4x1056xf32>
    %c1_267 = arith.constant 1 : index
    %c0_268 = arith.constant 0 : index
    %c0_269 = arith.constant 0 : index
    %c33_270 = arith.constant 33 : index
    %186 = vector.load %arg1[%c1_267, %c0_268, %c0_269, %c33_270] : memref<4x1x3x1122xf32, #tpu.memory_space<vmem>>, vector<1x1x3x1056xf32>
    %187 = vector.shape_cast %186 : vector<1x1x3x1056xf32> to vector<3x1056xf32>
    %c1_271 = arith.constant 1 : index
    %c0_272 = arith.constant 0 : index
    %c0_273 = arith.constant 0 : index
    %c0_274 = arith.constant 0 : index
    %188 = vector.load %arg2[%c1_271, %c0_272, %c0_273, %c0_274] : memref<3x3x4x3xf32, #tpu.memory_space<vmem>>, vector<1x1x4x3xf32>
    %189 = vector.shape_cast %188 : vector<1x1x4x3xf32> to vector<4x3xf32>
    %cst_275 = arith.constant dense<0.000000e+00> : vector<4x1056xf32>
    %190 = tpu.matmul %189, %187, %cst_275 {dimension_numbers = #tpu.dot_dimension_numbers<[1], [0], [0], [1], [0, 0, 1, 1], [], []>} : vector<4x3xf32>, vector<3x1056xf32>, vector<4x1056xf32> -> vector<4x1056xf32>
    %191 = arith.addf %185, %190 : vector<4x1056xf32>
    %c0_276 = arith.constant 0 : index
    %c0_277 = arith.constant 0 : index
    %c0_278 = arith.constant 0 : index
    %c34_279 = arith.constant 34 : index
    %192 = vector.load %arg1[%c0_276, %c0_277, %c0_278, %c34_279] : memref<4x1x3x1122xf32, #tpu.memory_space<vmem>>, vector<1x1x3x1056xf32>
    %193 = vector.shape_cast %192 : vector<1x1x3x1056xf32> to vector<3x1056xf32>
    %c1_280 = arith.constant 1 : index
    %c1_281 = arith.constant 1 : index
    %c0_282 = arith.constant 0 : index
    %c0_283 = arith.constant 0 : index
    %194 = vector.load %arg2[%c1_280, %c1_281, %c0_282, %c0_283] : memref<3x3x4x3xf32, #tpu.memory_space<vmem>>, vector<1x1x4x3xf32>
    %195 = vector.shape_cast %194 : vector<1x1x4x3xf32> to vector<4x3xf32>
    %cst_284 = arith.constant dense<0.000000e+00> : vector<4x1056xf32>
    %196 = tpu.matmul %195, %193, %cst_284 {dimension_numbers = #tpu.dot_dimension_numbers<[1], [0], [0], [1], [0, 0, 1, 1], [], []>} : vector<4x3xf32>, vector<3x1056xf32>, vector<4x1056xf32> -> vector<4x1056xf32>
    %197 = arith.addf %191, %196 : vector<4x1056xf32>
    %c1_285 = arith.constant 1 : index
    %c0_286 = arith.constant 0 : index
    %c0_287 = arith.constant 0 : index
    %c34_288 = arith.constant 34 : index
    %198 = vector.load %arg1[%c1_285, %c0_286, %c0_287, %c34_288] : memref<4x1x3x1122xf32, #tpu.memory_space<vmem>>, vector<1x1x3x1056xf32>
    %199 = vector.shape_cast %198 : vector<1x1x3x1056xf32> to vector<3x1056xf32>
    %c1_289 = arith.constant 1 : index
    %c2_290 = arith.constant 2 : index
    %c0_291 = arith.constant 0 : index
    %c0_292 = arith.constant 0 : index
    %200 = vector.load %arg2[%c1_289, %c2_290, %c0_291, %c0_292] : memref<3x3x4x3xf32, #tpu.memory_space<vmem>>, vector<1x1x4x3xf32>
    %201 = vector.shape_cast %200 : vector<1x1x4x3xf32> to vector<4x3xf32>
    %cst_293 = arith.constant dense<0.000000e+00> : vector<4x1056xf32>
    %202 = tpu.matmul %201, %199, %cst_293 {dimension_numbers = #tpu.dot_dimension_numbers<[1], [0], [0], [1], [0, 0, 1, 1], [], []>} : vector<4x3xf32>, vector<3x1056xf32>, vector<4x1056xf32> -> vector<4x1056xf32>
    %203 = arith.addf %197, %202 : vector<4x1056xf32>
    %c3_294 = arith.constant 3 : index
    %c0_295 = arith.constant 0 : index
    %c0_296 = arith.constant 0 : index
    %c33_297 = arith.constant 33 : index
    %204 = vector.load %arg1[%c3_294, %c0_295, %c0_296, %c33_297] : memref<4x1x3x1122xf32, #tpu.memory_space<vmem>>, vector<1x1x3x1056xf32>
    %205 = vector.shape_cast %204 : vector<1x1x3x1056xf32> to vector<3x1056xf32>
    %c2_298 = arith.constant 2 : index
    %c0_299 = arith.constant 0 : index
    %c0_300 = arith.constant 0 : index
    %c0_301 = arith.constant 0 : index
    %206 = vector.load %arg2[%c2_298, %c0_299, %c0_300, %c0_301] : memref<3x3x4x3xf32, #tpu.memory_space<vmem>>, vector<1x1x4x3xf32>
    %207 = vector.shape_cast %206 : vector<1x1x4x3xf32> to vector<4x3xf32>
    %cst_302 = arith.constant dense<0.000000e+00> : vector<4x1056xf32>
    %208 = tpu.matmul %207, %205, %cst_302 {dimension_numbers = #tpu.dot_dimension_numbers<[1], [0], [0], [1], [0, 0, 1, 1], [], []>} : vector<4x3xf32>, vector<3x1056xf32>, vector<4x1056xf32> -> vector<4x1056xf32>
    %209 = arith.addf %203, %208 : vector<4x1056xf32>
    %c2_303 = arith.constant 2 : index
    %c0_304 = arith.constant 0 : index
    %c0_305 = arith.constant 0 : index
    %c34_306 = arith.constant 34 : index
    %210 = vector.load %arg1[%c2_303, %c0_304, %c0_305, %c34_306] : memref<4x1x3x1122xf32, #tpu.memory_space<vmem>>, vector<1x1x3x1056xf32>
    %211 = vector.shape_cast %210 : vector<1x1x3x1056xf32> to vector<3x1056xf32>
    %c2_307 = arith.constant 2 : index
    %c1_308 = arith.constant 1 : index
    %c0_309 = arith.constant 0 : index
    %c0_310 = arith.constant 0 : index
    %212 = vector.load %arg2[%c2_307, %c1_308, %c0_309, %c0_310] : memref<3x3x4x3xf32, #tpu.memory_space<vmem>>, vector<1x1x4x3xf32>
    %213 = vector.shape_cast %212 : vector<1x1x4x3xf32> to vector<4x3xf32>
    %cst_311 = arith.constant dense<0.000000e+00> : vector<4x1056xf32>
    %214 = tpu.matmul %213, %211, %cst_311 {dimension_numbers = #tpu.dot_dimension_numbers<[1], [0], [0], [1], [0, 0, 1, 1], [], []>} : vector<4x3xf32>, vector<3x1056xf32>, vector<4x1056xf32> -> vector<4x1056xf32>
    %215 = arith.addf %209, %214 : vector<4x1056xf32>
    %c3_312 = arith.constant 3 : index
    %c0_313 = arith.constant 0 : index
    %c0_314 = arith.constant 0 : index
    %c34_315 = arith.constant 34 : index
    %216 = vector.load %arg1[%c3_312, %c0_313, %c0_314, %c34_315] : memref<4x1x3x1122xf32, #tpu.memory_space<vmem>>, vector<1x1x3x1056xf32>
    %217 = vector.shape_cast %216 : vector<1x1x3x1056xf32> to vector<3x1056xf32>
    %c2_316 = arith.constant 2 : index
    %c2_317 = arith.constant 2 : index
    %c0_318 = arith.constant 0 : index
    %c0_319 = arith.constant 0 : index
    %218 = vector.load %arg2[%c2_316, %c2_317, %c0_318, %c0_319] : memref<3x3x4x3xf32, #tpu.memory_space<vmem>>, vector<1x1x4x3xf32>
    %219 = vector.shape_cast %218 : vector<1x1x4x3xf32> to vector<4x3xf32>
    %cst_320 = arith.constant dense<0.000000e+00> : vector<4x1056xf32>
    %220 = tpu.matmul %219, %217, %cst_320 {dimension_numbers = #tpu.dot_dimension_numbers<[1], [0], [0], [1], [0, 0, 1, 1], [], []>} : vector<4x3xf32>, vector<3x1056xf32>, vector<4x1056xf32> -> vector<4x1056xf32>
    %221 = arith.addf %215, %220 : vector<4x1056xf32>
    %222 = arith.maximumf %166, %221 : vector<4x1056xf32>
    %c0_321 = arith.constant 0 : index
    %c0_322 = arith.constant 0 : index
    %223 = vector.load %arg3[%c0_321, %c0_322] : memref<4x1xf32, #tpu.memory_space<vmem>>, vector<4x1xf32>
    %224 = vector.broadcast %223 : vector<4x1xf32> to vector<4x1056xf32>
    %225 = arith.addf %222, %224 : vector<4x1056xf32>
    %cst_323 = arith.constant 0.000000e+00 : f32
    %226 = vector.broadcast %cst_323 : f32 to vector<4x1056xf32>
    %227 = arith.maximumf %225, %226 : vector<4x1056xf32>
    %c0_324 = arith.constant 0 : index
    %c0_325 = arith.constant 0 : index
    %c0_326 = arith.constant 0 : index
    %228 = vector.load %arg4[%c0_324, %c0_325, %c0_326] : memref<1x4x1056xf32, #tpu.memory_space<vmem>>, vector<1x4x1056xf32>
    %229 = vector.shape_cast %228 : vector<1x4x1056xf32> to vector<4x1056xf32>
    %230 = vector.shape_cast %227 : vector<4x1056xf32> to vector<1x4x1056xf32>
    tpu.vector_store %arg4[%c0_324, %c0_325, %c0_326], %230 {strides = array<i32>} : memref<1x4x1056xf32, #tpu.memory_space<vmem>>, vector<1x4x1056xf32>,
    return
  }
  func.func @transform_0(%arg0: i32) -> (i32, i32, i32, i32) {
    %c0_i32 = arith.constant 0 : i32
    %c0_i32_0 = arith.constant 0 : i32
    %c0_i32_1 = arith.constant 0 : i32
    %c0_i32_2 = arith.constant 0 : i32
    return %c0_i32, %arg0, %c0_i32_0, %c0_i32_1 : i32, i32, i32, i32
  }
  func.func @transform_1(%arg0: i32) -> (i32, i32, i32, i32) {
    %c0_i32 = arith.constant 0 : i32
    %c0_i32_0 = arith.constant 0 : i32
    %c0_i32_1 = arith.constant 0 : i32
    %c0_i32_2 = arith.constant 0 : i32
    %c0_i32_3 = arith.constant 0 : i32
    return %c0_i32, %c0_i32_0, %c0_i32_1, %c0_i32_2 : i32, i32, i32, i32
  }
  func.func @transform_2(%arg0: i32) -> (i32, i32) {
    %c0_i32 = arith.constant 0 : i32
    %c0_i32_0 = arith.constant 0 : i32
    %c0_i32_1 = arith.constant 0 : i32
    return %c0_i32, %c0_i32_0 : i32, i32
  }
  func.func @transform_3(%arg0: i32) -> (i32, i32, i32) {
    %c0_i32 = arith.constant 0 : i32
    %c0_i32_0 = arith.constant 0 : i32
    %c0_i32_1 = arith.constant 0 : i32
    return %arg0, %c0_i32, %c0_i32_0 : i32, i32, i32
  }
}

module attributes {stable_mosaic.version = 11 : i64} {
  func.func @_conv_pool_kernel(%arg0: i32, %arg1: memref<4x1x4x306xf32, #tpu.memory_space<vmem>>, %arg2: memref<3x3x8x4xf32, #tpu.memory_space<vmem>>, %arg3: memref<8x1xf32, #tpu.memory_space<vmem>>, %arg4: memref<1x8x272xf32, #tpu.memory_space<vmem>>) attributes {dimension_semantics = [#tpu.dimension_semantics<parallel>], iteration_bounds = array<i64: 2>, scalar_prefetch = 0 : i64, scratch_operands = 0 : i64, tpu.core_type = #tpu.core_type<tc>, window_params = [{transform_indices = @transform_0, window_bounds = array<i64: 4, 1, 4, 306>}, {pipeline_mode = #tpu.pipeline_mode<synchronous>, transform_indices = @transform_1, window_bounds = array<i64: 3, 3, 8, 4>}, {pipeline_mode = #tpu.pipeline_mode<synchronous>, transform_indices = @transform_2, window_bounds = array<i64: 8, 1>}, {transform_indices = @transform_3, window_bounds = array<i64: 1, 8, 272>}]} {
    %cst = arith.constant 0.000000e+00 : f32
    %0 = vector.broadcast %cst : f32 to vector<8x272xf32>
    %c0 = arith.constant 0 : index
    %c0_0 = arith.constant 0 : index
    %c0_1 = arith.constant 0 : index
    %c0_2 = arith.constant 0 : index
    %1 = vector.load %arg1[%c0, %c0_0, %c0_1, %c0_2] : memref<4x1x4x306xf32, #tpu.memory_space<vmem>>, vector<1x1x4x272xf32>
    %2 = vector.shape_cast %1 : vector<1x1x4x272xf32> to vector<4x272xf32>
    %c0_3 = arith.constant 0 : index
    %c0_4 = arith.constant 0 : index
    %c0_5 = arith.constant 0 : index
    %c0_6 = arith.constant 0 : index
    %3 = vector.load %arg2[%c0_3, %c0_4, %c0_5, %c0_6] : memref<3x3x8x4xf32, #tpu.memory_space<vmem>>, vector<1x1x8x4xf32>
    %4 = vector.shape_cast %3 : vector<1x1x8x4xf32> to vector<8x4xf32>
    %cst_7 = arith.constant dense<0.000000e+00> : vector<8x272xf32>
    %5 = tpu.matmul %4, %2, %cst_7 {dimension_numbers = #tpu.dot_dimension_numbers<[1], [0], [0], [1], [0, 0, 1, 1], [], []>} : vector<8x4xf32>, vector<4x272xf32>, vector<8x272xf32> -> vector<8x272xf32>
    %6 = arith.addf %0, %5 : vector<8x272xf32>
    %c1 = arith.constant 1 : index
    %c0_8 = arith.constant 0 : index
    %c0_9 = arith.constant 0 : index
    %c0_10 = arith.constant 0 : index
    %7 = vector.load %arg1[%c1, %c0_8, %c0_9, %c0_10] : memref<4x1x4x306xf32, #tpu.memory_space<vmem>>, vector<1x1x4x272xf32>
    %8 = vector.shape_cast %7 : vector<1x1x4x272xf32> to vector<4x272xf32>
    %c0_11 = arith.constant 0 : index
    %c1_12 = arith.constant 1 : index
    %c0_13 = arith.constant 0 : index
    %c0_14 = arith.constant 0 : index
    %9 = vector.load %arg2[%c0_11, %c1_12, %c0_13, %c0_14] : memref<3x3x8x4xf32, #tpu.memory_space<vmem>>, vector<1x1x8x4xf32>
    %10 = vector.shape_cast %9 : vector<1x1x8x4xf32> to vector<8x4xf32>
    %cst_15 = arith.constant dense<0.000000e+00> : vector<8x272xf32>
    %11 = tpu.matmul %10, %8, %cst_15 {dimension_numbers = #tpu.dot_dimension_numbers<[1], [0], [0], [1], [0, 0, 1, 1], [], []>} : vector<8x4xf32>, vector<4x272xf32>, vector<8x272xf32> -> vector<8x272xf32>
    %12 = arith.addf %6, %11 : vector<8x272xf32>
    %c0_16 = arith.constant 0 : index
    %c0_17 = arith.constant 0 : index
    %c0_18 = arith.constant 0 : index
    %c1_19 = arith.constant 1 : index
    %13 = vector.load %arg1[%c0_16, %c0_17, %c0_18, %c1_19] : memref<4x1x4x306xf32, #tpu.memory_space<vmem>>, vector<1x1x4x272xf32>
    %14 = vector.shape_cast %13 : vector<1x1x4x272xf32> to vector<4x272xf32>
    %c0_20 = arith.constant 0 : index
    %c2 = arith.constant 2 : index
    %c0_21 = arith.constant 0 : index
    %c0_22 = arith.constant 0 : index
    %15 = vector.load %arg2[%c0_20, %c2, %c0_21, %c0_22] : memref<3x3x8x4xf32, #tpu.memory_space<vmem>>, vector<1x1x8x4xf32>
    %16 = vector.shape_cast %15 : vector<1x1x8x4xf32> to vector<8x4xf32>
    %cst_23 = arith.constant dense<0.000000e+00> : vector<8x272xf32>
    %17 = tpu.matmul %16, %14, %cst_23 {dimension_numbers = #tpu.dot_dimension_numbers<[1], [0], [0], [1], [0, 0, 1, 1], [], []>} : vector<8x4xf32>, vector<4x272xf32>, vector<8x272xf32> -> vector<8x272xf32>
    %18 = arith.addf %12, %17 : vector<8x272xf32>
    %c2_24 = arith.constant 2 : index
    %c0_25 = arith.constant 0 : index
    %c0_26 = arith.constant 0 : index
    %c0_27 = arith.constant 0 : index
    %19 = vector.load %arg1[%c2_24, %c0_25, %c0_26, %c0_27] : memref<4x1x4x306xf32, #tpu.memory_space<vmem>>, vector<1x1x4x272xf32>
    %20 = vector.shape_cast %19 : vector<1x1x4x272xf32> to vector<4x272xf32>
    %c1_28 = arith.constant 1 : index
    %c0_29 = arith.constant 0 : index
    %c0_30 = arith.constant 0 : index
    %c0_31 = arith.constant 0 : index
    %21 = vector.load %arg2[%c1_28, %c0_29, %c0_30, %c0_31] : memref<3x3x8x4xf32, #tpu.memory_space<vmem>>, vector<1x1x8x4xf32>
    %22 = vector.shape_cast %21 : vector<1x1x8x4xf32> to vector<8x4xf32>
    %cst_32 = arith.constant dense<0.000000e+00> : vector<8x272xf32>
    %23 = tpu.matmul %22, %20, %cst_32 {dimension_numbers = #tpu.dot_dimension_numbers<[1], [0], [0], [1], [0, 0, 1, 1], [], []>} : vector<8x4xf32>, vector<4x272xf32>, vector<8x272xf32> -> vector<8x272xf32>
    %24 = arith.addf %18, %23 : vector<8x272xf32>
    %c3 = arith.constant 3 : index
    %c0_33 = arith.constant 0 : index
    %c0_34 = arith.constant 0 : index
    %c0_35 = arith.constant 0 : index
    %25 = vector.load %arg1[%c3, %c0_33, %c0_34, %c0_35] : memref<4x1x4x306xf32, #tpu.memory_space<vmem>>, vector<1x1x4x272xf32>
    %26 = vector.shape_cast %25 : vector<1x1x4x272xf32> to vector<4x272xf32>
    %c1_36 = arith.constant 1 : index
    %c1_37 = arith.constant 1 : index
    %c0_38 = arith.constant 0 : index
    %c0_39 = arith.constant 0 : index
    %27 = vector.load %arg2[%c1_36, %c1_37, %c0_38, %c0_39] : memref<3x3x8x4xf32, #tpu.memory_space<vmem>>, vector<1x1x8x4xf32>
    %28 = vector.shape_cast %27 : vector<1x1x8x4xf32> to vector<8x4xf32>
    %cst_40 = arith.constant dense<0.000000e+00> : vector<8x272xf32>
    %29 = tpu.matmul %28, %26, %cst_40 {dimension_numbers = #tpu.dot_dimension_numbers<[1], [0], [0], [1], [0, 0, 1, 1], [], []>} : vector<8x4xf32>, vector<4x272xf32>, vector<8x272xf32> -> vector<8x272xf32>
    %30 = arith.addf %24, %29 : vector<8x272xf32>
    %c2_41 = arith.constant 2 : index
    %c0_42 = arith.constant 0 : index
    %c0_43 = arith.constant 0 : index
    %c1_44 = arith.constant 1 : index
    %31 = vector.load %arg1[%c2_41, %c0_42, %c0_43, %c1_44] : memref<4x1x4x306xf32, #tpu.memory_space<vmem>>, vector<1x1x4x272xf32>
    %32 = vector.shape_cast %31 : vector<1x1x4x272xf32> to vector<4x272xf32>
    %c1_45 = arith.constant 1 : index
    %c2_46 = arith.constant 2 : index
    %c0_47 = arith.constant 0 : index
    %c0_48 = arith.constant 0 : index
    %33 = vector.load %arg2[%c1_45, %c2_46, %c0_47, %c0_48] : memref<3x3x8x4xf32, #tpu.memory_space<vmem>>, vector<1x1x8x4xf32>
    %34 = vector.shape_cast %33 : vector<1x1x8x4xf32> to vector<8x4xf32>
    %cst_49 = arith.constant dense<0.000000e+00> : vector<8x272xf32>
    %35 = tpu.matmul %34, %32, %cst_49 {dimension_numbers = #tpu.dot_dimension_numbers<[1], [0], [0], [1], [0, 0, 1, 1], [], []>} : vector<8x4xf32>, vector<4x272xf32>, vector<8x272xf32> -> vector<8x272xf32>
    %36 = arith.addf %30, %35 : vector<8x272xf32>
    %c0_50 = arith.constant 0 : index
    %c0_51 = arith.constant 0 : index
    %c0_52 = arith.constant 0 : index
    %c17 = arith.constant 17 : index
    %37 = vector.load %arg1[%c0_50, %c0_51, %c0_52, %c17] : memref<4x1x4x306xf32, #tpu.memory_space<vmem>>, vector<1x1x4x272xf32>
    %38 = vector.shape_cast %37 : vector<1x1x4x272xf32> to vector<4x272xf32>
    %c2_53 = arith.constant 2 : index
    %c0_54 = arith.constant 0 : index
    %c0_55 = arith.constant 0 : index
    %c0_56 = arith.constant 0 : index
    %39 = vector.load %arg2[%c2_53, %c0_54, %c0_55, %c0_56] : memref<3x3x8x4xf32, #tpu.memory_space<vmem>>, vector<1x1x8x4xf32>
    %40 = vector.shape_cast %39 : vector<1x1x8x4xf32> to vector<8x4xf32>
    %cst_57 = arith.constant dense<0.000000e+00> : vector<8x272xf32>
    %41 = tpu.matmul %40, %38, %cst_57 {dimension_numbers = #tpu.dot_dimension_numbers<[1], [0], [0], [1], [0, 0, 1, 1], [], []>} : vector<8x4xf32>, vector<4x272xf32>, vector<8x272xf32> -> vector<8x272xf32>
    %42 = arith.addf %36, %41 : vector<8x272xf32>
    %c1_58 = arith.constant 1 : index
    %c0_59 = arith.constant 0 : index
    %c0_60 = arith.constant 0 : index
    %c17_61 = arith.constant 17 : index
    %43 = vector.load %arg1[%c1_58, %c0_59, %c0_60, %c17_61] : memref<4x1x4x306xf32, #tpu.memory_space<vmem>>, vector<1x1x4x272xf32>
    %44 = vector.shape_cast %43 : vector<1x1x4x272xf32> to vector<4x272xf32>
    %c2_62 = arith.constant 2 : index
    %c1_63 = arith.constant 1 : index
    %c0_64 = arith.constant 0 : index
    %c0_65 = arith.constant 0 : index
    %45 = vector.load %arg2[%c2_62, %c1_63, %c0_64, %c0_65] : memref<3x3x8x4xf32, #tpu.memory_space<vmem>>, vector<1x1x8x4xf32>
    %46 = vector.shape_cast %45 : vector<1x1x8x4xf32> to vector<8x4xf32>
    %cst_66 = arith.constant dense<0.000000e+00> : vector<8x272xf32>
    %47 = tpu.matmul %46, %44, %cst_66 {dimension_numbers = #tpu.dot_dimension_numbers<[1], [0], [0], [1], [0, 0, 1, 1], [], []>} : vector<8x4xf32>, vector<4x272xf32>, vector<8x272xf32> -> vector<8x272xf32>
    %48 = arith.addf %42, %47 : vector<8x272xf32>
    %c0_67 = arith.constant 0 : index
    %c0_68 = arith.constant 0 : index
    %c0_69 = arith.constant 0 : index
    %c18 = arith.constant 18 : index
    %49 = vector.load %arg1[%c0_67, %c0_68, %c0_69, %c18] : memref<4x1x4x306xf32, #tpu.memory_space<vmem>>, vector<1x1x4x272xf32>
    %50 = vector.shape_cast %49 : vector<1x1x4x272xf32> to vector<4x272xf32>
    %c2_70 = arith.constant 2 : index
    %c2_71 = arith.constant 2 : index
    %c0_72 = arith.constant 0 : index
    %c0_73 = arith.constant 0 : index
    %51 = vector.load %arg2[%c2_70, %c2_71, %c0_72, %c0_73] : memref<3x3x8x4xf32, #tpu.memory_space<vmem>>, vector<1x1x8x4xf32>
    %52 = vector.shape_cast %51 : vector<1x1x8x4xf32> to vector<8x4xf32>
    %cst_74 = arith.constant dense<0.000000e+00> : vector<8x272xf32>
    %53 = tpu.matmul %52, %50, %cst_74 {dimension_numbers = #tpu.dot_dimension_numbers<[1], [0], [0], [1], [0, 0, 1, 1], [], []>} : vector<8x4xf32>, vector<4x272xf32>, vector<8x272xf32> -> vector<8x272xf32>
    %54 = arith.addf %48, %53 : vector<8x272xf32>
    %cst_75 = arith.constant 0.000000e+00 : f32
    %55 = vector.broadcast %cst_75 : f32 to vector<8x272xf32>
    %c1_76 = arith.constant 1 : index
    %c0_77 = arith.constant 0 : index
    %c0_78 = arith.constant 0 : index
    %c0_79 = arith.constant 0 : index
    %56 = vector.load %arg1[%c1_76, %c0_77, %c0_78, %c0_79] : memref<4x1x4x306xf32, #tpu.memory_space<vmem>>, vector<1x1x4x272xf32>
    %57 = vector.shape_cast %56 : vector<1x1x4x272xf32> to vector<4x272xf32>
    %c0_80 = arith.constant 0 : index
    %c0_81 = arith.constant 0 : index
    %c0_82 = arith.constant 0 : index
    %c0_83 = arith.constant 0 : index
    %58 = vector.load %arg2[%c0_80, %c0_81, %c0_82, %c0_83] : memref<3x3x8x4xf32, #tpu.memory_space<vmem>>, vector<1x1x8x4xf32>
    %59 = vector.shape_cast %58 : vector<1x1x8x4xf32> to vector<8x4xf32>
    %cst_84 = arith.constant dense<0.000000e+00> : vector<8x272xf32>
    %60 = tpu.matmul %59, %57, %cst_84 {dimension_numbers = #tpu.dot_dimension_numbers<[1], [0], [0], [1], [0, 0, 1, 1], [], []>} : vector<8x4xf32>, vector<4x272xf32>, vector<8x272xf32> -> vector<8x272xf32>
    %61 = arith.addf %55, %60 : vector<8x272xf32>
    %c0_85 = arith.constant 0 : index
    %c0_86 = arith.constant 0 : index
    %c0_87 = arith.constant 0 : index
    %c1_88 = arith.constant 1 : index
    %62 = vector.load %arg1[%c0_85, %c0_86, %c0_87, %c1_88] : memref<4x1x4x306xf32, #tpu.memory_space<vmem>>, vector<1x1x4x272xf32>
    %63 = vector.shape_cast %62 : vector<1x1x4x272xf32> to vector<4x272xf32>
    %c0_89 = arith.constant 0 : index
    %c1_90 = arith.constant 1 : index
    %c0_91 = arith.constant 0 : index
    %c0_92 = arith.constant 0 : index
    %64 = vector.load %arg2[%c0_89, %c1_90, %c0_91, %c0_92] : memref<3x3x8x4xf32, #tpu.memory_space<vmem>>, vector<1x1x8x4xf32>
    %65 = vector.shape_cast %64 : vector<1x1x8x4xf32> to vector<8x4xf32>
    %cst_93 = arith.constant dense<0.000000e+00> : vector<8x272xf32>
    %66 = tpu.matmul %65, %63, %cst_93 {dimension_numbers = #tpu.dot_dimension_numbers<[1], [0], [0], [1], [0, 0, 1, 1], [], []>} : vector<8x4xf32>, vector<4x272xf32>, vector<8x272xf32> -> vector<8x272xf32>
    %67 = arith.addf %61, %66 : vector<8x272xf32>
    %c1_94 = arith.constant 1 : index
    %c0_95 = arith.constant 0 : index
    %c0_96 = arith.constant 0 : index
    %c1_97 = arith.constant 1 : index
    %68 = vector.load %arg1[%c1_94, %c0_95, %c0_96, %c1_97] : memref<4x1x4x306xf32, #tpu.memory_space<vmem>>, vector<1x1x4x272xf32>
    %69 = vector.shape_cast %68 : vector<1x1x4x272xf32> to vector<4x272xf32>
    %c0_98 = arith.constant 0 : index
    %c2_99 = arith.constant 2 : index
    %c0_100 = arith.constant 0 : index
    %c0_101 = arith.constant 0 : index
    %70 = vector.load %arg2[%c0_98, %c2_99, %c0_100, %c0_101] : memref<3x3x8x4xf32, #tpu.memory_space<vmem>>, vector<1x1x8x4xf32>
    %71 = vector.shape_cast %70 : vector<1x1x8x4xf32> to vector<8x4xf32>
    %cst_102 = arith.constant dense<0.000000e+00> : vector<8x272xf32>
    %72 = tpu.matmul %71, %69, %cst_102 {dimension_numbers = #tpu.dot_dimension_numbers<[1], [0], [0], [1], [0, 0, 1, 1], [], []>} : vector<8x4xf32>, vector<4x272xf32>, vector<8x272xf32> -> vector<8x272xf32>
    %73 = arith.addf %67, %72 : vector<8x272xf32>
    %c3_103 = arith.constant 3 : index
    %c0_104 = arith.constant 0 : index
    %c0_105 = arith.constant 0 : index
    %c0_106 = arith.constant 0 : index
    %74 = vector.load %arg1[%c3_103, %c0_104, %c0_105, %c0_106] : memref<4x1x4x306xf32, #tpu.memory_space<vmem>>, vector<1x1x4x272xf32>
    %75 = vector.shape_cast %74 : vector<1x1x4x272xf32> to vector<4x272xf32>
    %c1_107 = arith.constant 1 : index
    %c0_108 = arith.constant 0 : index
    %c0_109 = arith.constant 0 : index
    %c0_110 = arith.constant 0 : index
    %76 = vector.load %arg2[%c1_107, %c0_108, %c0_109, %c0_110] : memref<3x3x8x4xf32, #tpu.memory_space<vmem>>, vector<1x1x8x4xf32>
    %77 = vector.shape_cast %76 : vector<1x1x8x4xf32> to vector<8x4xf32>
    %cst_111 = arith.constant dense<0.000000e+00> : vector<8x272xf32>
    %78 = tpu.matmul %77, %75, %cst_111 {dimension_numbers = #tpu.dot_dimension_numbers<[1], [0], [0], [1], [0, 0, 1, 1], [], []>} : vector<8x4xf32>, vector<4x272xf32>, vector<8x272xf32> -> vector<8x272xf32>
    %79 = arith.addf %73, %78 : vector<8x272xf32>
    %c2_112 = arith.constant 2 : index
    %c0_113 = arith.constant 0 : index
    %c0_114 = arith.constant 0 : index
    %c1_115 = arith.constant 1 : index
    %80 = vector.load %arg1[%c2_112, %c0_113, %c0_114, %c1_115] : memref<4x1x4x306xf32, #tpu.memory_space<vmem>>, vector<1x1x4x272xf32>
    %81 = vector.shape_cast %80 : vector<1x1x4x272xf32> to vector<4x272xf32>
    %c1_116 = arith.constant 1 : index
    %c1_117 = arith.constant 1 : index
    %c0_118 = arith.constant 0 : index
    %c0_119 = arith.constant 0 : index
    %82 = vector.load %arg2[%c1_116, %c1_117, %c0_118, %c0_119] : memref<3x3x8x4xf32, #tpu.memory_space<vmem>>, vector<1x1x8x4xf32>
    %83 = vector.shape_cast %82 : vector<1x1x8x4xf32> to vector<8x4xf32>
    %cst_120 = arith.constant dense<0.000000e+00> : vector<8x272xf32>
    %84 = tpu.matmul %83, %81, %cst_120 {dimension_numbers = #tpu.dot_dimension_numbers<[1], [0], [0], [1], [0, 0, 1, 1], [], []>} : vector<8x4xf32>, vector<4x272xf32>, vector<8x272xf32> -> vector<8x272xf32>
    %85 = arith.addf %79, %84 : vector<8x272xf32>
    %c3_121 = arith.constant 3 : index
    %c0_122 = arith.constant 0 : index
    %c0_123 = arith.constant 0 : index
    %c1_124 = arith.constant 1 : index
    %86 = vector.load %arg1[%c3_121, %c0_122, %c0_123, %c1_124] : memref<4x1x4x306xf32, #tpu.memory_space<vmem>>, vector<1x1x4x272xf32>
    %87 = vector.shape_cast %86 : vector<1x1x4x272xf32> to vector<4x272xf32>
    %c1_125 = arith.constant 1 : index
    %c2_126 = arith.constant 2 : index
    %c0_127 = arith.constant 0 : index
    %c0_128 = arith.constant 0 : index
    %88 = vector.load %arg2[%c1_125, %c2_126, %c0_127, %c0_128] : memref<3x3x8x4xf32, #tpu.memory_space<vmem>>, vector<1x1x8x4xf32>
    %89 = vector.shape_cast %88 : vector<1x1x8x4xf32> to vector<8x4xf32>
    %cst_129 = arith.constant dense<0.000000e+00> : vector<8x272xf32>
    %90 = tpu.matmul %89, %87, %cst_129 {dimension_numbers = #tpu.dot_dimension_numbers<[1], [0], [0], [1], [0, 0, 1, 1], [], []>} : vector<8x4xf32>, vector<4x272xf32>, vector<8x272xf32> -> vector<8x272xf32>
    %91 = arith.addf %85, %90 : vector<8x272xf32>
    %c1_130 = arith.constant 1 : index
    %c0_131 = arith.constant 0 : index
    %c0_132 = arith.constant 0 : index
    %c17_133 = arith.constant 17 : index
    %92 = vector.load %arg1[%c1_130, %c0_131, %c0_132, %c17_133] : memref<4x1x4x306xf32, #tpu.memory_space<vmem>>, vector<1x1x4x272xf32>
    %93 = vector.shape_cast %92 : vector<1x1x4x272xf32> to vector<4x272xf32>
    %c2_134 = arith.constant 2 : index
    %c0_135 = arith.constant 0 : index
    %c0_136 = arith.constant 0 : index
    %c0_137 = arith.constant 0 : index
    %94 = vector.load %arg2[%c2_134, %c0_135, %c0_136, %c0_137] : memref<3x3x8x4xf32, #tpu.memory_space<vmem>>, vector<1x1x8x4xf32>
    %95 = vector.shape_cast %94 : vector<1x1x8x4xf32> to vector<8x4xf32>
    %cst_138 = arith.constant dense<0.000000e+00> : vector<8x272xf32>
    %96 = tpu.matmul %95, %93, %cst_138 {dimension_numbers = #tpu.dot_dimension_numbers<[1], [0], [0], [1], [0, 0, 1, 1], [], []>} : vector<8x4xf32>, vector<4x272xf32>, vector<8x272xf32> -> vector<8x272xf32>
    %97 = arith.addf %91, %96 : vector<8x272xf32>
    %c0_139 = arith.constant 0 : index
    %c0_140 = arith.constant 0 : index
    %c0_141 = arith.constant 0 : index
    %c18_142 = arith.constant 18 : index
    %98 = vector.load %arg1[%c0_139, %c0_140, %c0_141, %c18_142] : memref<4x1x4x306xf32, #tpu.memory_space<vmem>>, vector<1x1x4x272xf32>
    %99 = vector.shape_cast %98 : vector<1x1x4x272xf32> to vector<4x272xf32>
    %c2_143 = arith.constant 2 : index
    %c1_144 = arith.constant 1 : index
    %c0_145 = arith.constant 0 : index
    %c0_146 = arith.constant 0 : index
    %100 = vector.load %arg2[%c2_143, %c1_144, %c0_145, %c0_146] : memref<3x3x8x4xf32, #tpu.memory_space<vmem>>, vector<1x1x8x4xf32>
    %101 = vector.shape_cast %100 : vector<1x1x8x4xf32> to vector<8x4xf32>
    %cst_147 = arith.constant dense<0.000000e+00> : vector<8x272xf32>
    %102 = tpu.matmul %101, %99, %cst_147 {dimension_numbers = #tpu.dot_dimension_numbers<[1], [0], [0], [1], [0, 0, 1, 1], [], []>} : vector<8x4xf32>, vector<4x272xf32>, vector<8x272xf32> -> vector<8x272xf32>
    %103 = arith.addf %97, %102 : vector<8x272xf32>
    %c1_148 = arith.constant 1 : index
    %c0_149 = arith.constant 0 : index
    %c0_150 = arith.constant 0 : index
    %c18_151 = arith.constant 18 : index
    %104 = vector.load %arg1[%c1_148, %c0_149, %c0_150, %c18_151] : memref<4x1x4x306xf32, #tpu.memory_space<vmem>>, vector<1x1x4x272xf32>
    %105 = vector.shape_cast %104 : vector<1x1x4x272xf32> to vector<4x272xf32>
    %c2_152 = arith.constant 2 : index
    %c2_153 = arith.constant 2 : index
    %c0_154 = arith.constant 0 : index
    %c0_155 = arith.constant 0 : index
    %106 = vector.load %arg2[%c2_152, %c2_153, %c0_154, %c0_155] : memref<3x3x8x4xf32, #tpu.memory_space<vmem>>, vector<1x1x8x4xf32>
    %107 = vector.shape_cast %106 : vector<1x1x8x4xf32> to vector<8x4xf32>
    %cst_156 = arith.constant dense<0.000000e+00> : vector<8x272xf32>
    %108 = tpu.matmul %107, %105, %cst_156 {dimension_numbers = #tpu.dot_dimension_numbers<[1], [0], [0], [1], [0, 0, 1, 1], [], []>} : vector<8x4xf32>, vector<4x272xf32>, vector<8x272xf32> -> vector<8x272xf32>
    %109 = arith.addf %103, %108 : vector<8x272xf32>
    %110 = arith.maximumf %54, %109 : vector<8x272xf32>
    %cst_157 = arith.constant 0.000000e+00 : f32
    %111 = vector.broadcast %cst_157 : f32 to vector<8x272xf32>
    %c2_158 = arith.constant 2 : index
    %c0_159 = arith.constant 0 : index
    %c0_160 = arith.constant 0 : index
    %c0_161 = arith.constant 0 : index
    %112 = vector.load %arg1[%c2_158, %c0_159, %c0_160, %c0_161] : memref<4x1x4x306xf32, #tpu.memory_space<vmem>>, vector<1x1x4x272xf32>
    %113 = vector.shape_cast %112 : vector<1x1x4x272xf32> to vector<4x272xf32>
    %c0_162 = arith.constant 0 : index
    %c0_163 = arith.constant 0 : index
    %c0_164 = arith.constant 0 : index
    %c0_165 = arith.constant 0 : index
    %114 = vector.load %arg2[%c0_162, %c0_163, %c0_164, %c0_165] : memref<3x3x8x4xf32, #tpu.memory_space<vmem>>, vector<1x1x8x4xf32>
    %115 = vector.shape_cast %114 : vector<1x1x8x4xf32> to vector<8x4xf32>
    %cst_166 = arith.constant dense<0.000000e+00> : vector<8x272xf32>
    %116 = tpu.matmul %115, %113, %cst_166 {dimension_numbers = #tpu.dot_dimension_numbers<[1], [0], [0], [1], [0, 0, 1, 1], [], []>} : vector<8x4xf32>, vector<4x272xf32>, vector<8x272xf32> -> vector<8x272xf32>
    %117 = arith.addf %111, %116 : vector<8x272xf32>
    %c3_167 = arith.constant 3 : index
    %c0_168 = arith.constant 0 : index
    %c0_169 = arith.constant 0 : index
    %c0_170 = arith.constant 0 : index
    %118 = vector.load %arg1[%c3_167, %c0_168, %c0_169, %c0_170] : memref<4x1x4x306xf32, #tpu.memory_space<vmem>>, vector<1x1x4x272xf32>
    %119 = vector.shape_cast %118 : vector<1x1x4x272xf32> to vector<4x272xf32>
    %c0_171 = arith.constant 0 : index
    %c1_172 = arith.constant 1 : index
    %c0_173 = arith.constant 0 : index
    %c0_174 = arith.constant 0 : index
    %120 = vector.load %arg2[%c0_171, %c1_172, %c0_173, %c0_174] : memref<3x3x8x4xf32, #tpu.memory_space<vmem>>, vector<1x1x8x4xf32>
    %121 = vector.shape_cast %120 : vector<1x1x8x4xf32> to vector<8x4xf32>
    %cst_175 = arith.constant dense<0.000000e+00> : vector<8x272xf32>
    %122 = tpu.matmul %121, %119, %cst_175 {dimension_numbers = #tpu.dot_dimension_numbers<[1], [0], [0], [1], [0, 0, 1, 1], [], []>} : vector<8x4xf32>, vector<4x272xf32>, vector<8x272xf32> -> vector<8x272xf32>
    %123 = arith.addf %117, %122 : vector<8x272xf32>
    %c2_176 = arith.constant 2 : index
    %c0_177 = arith.constant 0 : index
    %c0_178 = arith.constant 0 : index
    %c1_179 = arith.constant 1 : index
    %124 = vector.load %arg1[%c2_176, %c0_177, %c0_178, %c1_179] : memref<4x1x4x306xf32, #tpu.memory_space<vmem>>, vector<1x1x4x272xf32>
    %125 = vector.shape_cast %124 : vector<1x1x4x272xf32> to vector<4x272xf32>
    %c0_180 = arith.constant 0 : index
    %c2_181 = arith.constant 2 : index
    %c0_182 = arith.constant 0 : index
    %c0_183 = arith.constant 0 : index
    %126 = vector.load %arg2[%c0_180, %c2_181, %c0_182, %c0_183] : memref<3x3x8x4xf32, #tpu.memory_space<vmem>>, vector<1x1x8x4xf32>
    %127 = vector.shape_cast %126 : vector<1x1x8x4xf32> to vector<8x4xf32>
    %cst_184 = arith.constant dense<0.000000e+00> : vector<8x272xf32>
    %128 = tpu.matmul %127, %125, %cst_184 {dimension_numbers = #tpu.dot_dimension_numbers<[1], [0], [0], [1], [0, 0, 1, 1], [], []>} : vector<8x4xf32>, vector<4x272xf32>, vector<8x272xf32> -> vector<8x272xf32>
    %129 = arith.addf %123, %128 : vector<8x272xf32>
    %c0_185 = arith.constant 0 : index
    %c0_186 = arith.constant 0 : index
    %c0_187 = arith.constant 0 : index
    %c17_188 = arith.constant 17 : index
    %130 = vector.load %arg1[%c0_185, %c0_186, %c0_187, %c17_188] : memref<4x1x4x306xf32, #tpu.memory_space<vmem>>, vector<1x1x4x272xf32>
    %131 = vector.shape_cast %130 : vector<1x1x4x272xf32> to vector<4x272xf32>
    %c1_189 = arith.constant 1 : index
    %c0_190 = arith.constant 0 : index
    %c0_191 = arith.constant 0 : index
    %c0_192 = arith.constant 0 : index
    %132 = vector.load %arg2[%c1_189, %c0_190, %c0_191, %c0_192] : memref<3x3x8x4xf32, #tpu.memory_space<vmem>>, vector<1x1x8x4xf32>
    %133 = vector.shape_cast %132 : vector<1x1x8x4xf32> to vector<8x4xf32>
    %cst_193 = arith.constant dense<0.000000e+00> : vector<8x272xf32>
    %134 = tpu.matmul %133, %131, %cst_193 {dimension_numbers = #tpu.dot_dimension_numbers<[1], [0], [0], [1], [0, 0, 1, 1], [], []>} : vector<8x4xf32>, vector<4x272xf32>, vector<8x272xf32> -> vector<8x272xf32>
    %135 = arith.addf %129, %134 : vector<8x272xf32>
    %c1_194 = arith.constant 1 : index
    %c0_195 = arith.constant 0 : index
    %c0_196 = arith.constant 0 : index
    %c17_197 = arith.constant 17 : index
    %136 = vector.load %arg1[%c1_194, %c0_195, %c0_196, %c17_197] : memref<4x1x4x306xf32, #tpu.memory_space<vmem>>, vector<1x1x4x272xf32>
    %137 = vector.shape_cast %136 : vector<1x1x4x272xf32> to vector<4x272xf32>
    %c1_198 = arith.constant 1 : index
    %c1_199 = arith.constant 1 : index
    %c0_200 = arith.constant 0 : index
    %c0_201 = arith.constant 0 : index
    %138 = vector.load %arg2[%c1_198, %c1_199, %c0_200, %c0_201] : memref<3x3x8x4xf32, #tpu.memory_space<vmem>>, vector<1x1x8x4xf32>
    %139 = vector.shape_cast %138 : vector<1x1x8x4xf32> to vector<8x4xf32>
    %cst_202 = arith.constant dense<0.000000e+00> : vector<8x272xf32>
    %140 = tpu.matmul %139, %137, %cst_202 {dimension_numbers = #tpu.dot_dimension_numbers<[1], [0], [0], [1], [0, 0, 1, 1], [], []>} : vector<8x4xf32>, vector<4x272xf32>, vector<8x272xf32> -> vector<8x272xf32>
    %141 = arith.addf %135, %140 : vector<8x272xf32>
    %c0_203 = arith.constant 0 : index
    %c0_204 = arith.constant 0 : index
    %c0_205 = arith.constant 0 : index
    %c18_206 = arith.constant 18 : index
    %142 = vector.load %arg1[%c0_203, %c0_204, %c0_205, %c18_206] : memref<4x1x4x306xf32, #tpu.memory_space<vmem>>, vector<1x1x4x272xf32>
    %143 = vector.shape_cast %142 : vector<1x1x4x272xf32> to vector<4x272xf32>
    %c1_207 = arith.constant 1 : index
    %c2_208 = arith.constant 2 : index
    %c0_209 = arith.constant 0 : index
    %c0_210 = arith.constant 0 : index
    %144 = vector.load %arg2[%c1_207, %c2_208, %c0_209, %c0_210] : memref<3x3x8x4xf32, #tpu.memory_space<vmem>>, vector<1x1x8x4xf32>
    %145 = vector.shape_cast %144 : vector<1x1x8x4xf32> to vector<8x4xf32>
    %cst_211 = arith.constant dense<0.000000e+00> : vector<8x272xf32>
    %146 = tpu.matmul %145, %143, %cst_211 {dimension_numbers = #tpu.dot_dimension_numbers<[1], [0], [0], [1], [0, 0, 1, 1], [], []>} : vector<8x4xf32>, vector<4x272xf32>, vector<8x272xf32> -> vector<8x272xf32>
    %147 = arith.addf %141, %146 : vector<8x272xf32>
    %c2_212 = arith.constant 2 : index
    %c0_213 = arith.constant 0 : index
    %c0_214 = arith.constant 0 : index
    %c17_215 = arith.constant 17 : index
    %148 = vector.load %arg1[%c2_212, %c0_213, %c0_214, %c17_215] : memref<4x1x4x306xf32, #tpu.memory_space<vmem>>, vector<1x1x4x272xf32>
    %149 = vector.shape_cast %148 : vector<1x1x4x272xf32> to vector<4x272xf32>
    %c2_216 = arith.constant 2 : index
    %c0_217 = arith.constant 0 : index
    %c0_218 = arith.constant 0 : index
    %c0_219 = arith.constant 0 : index
    %150 = vector.load %arg2[%c2_216, %c0_217, %c0_218, %c0_219] : memref<3x3x8x4xf32, #tpu.memory_space<vmem>>, vector<1x1x8x4xf32>
    %151 = vector.shape_cast %150 : vector<1x1x8x4xf32> to vector<8x4xf32>
    %cst_220 = arith.constant dense<0.000000e+00> : vector<8x272xf32>
    %152 = tpu.matmul %151, %149, %cst_220 {dimension_numbers = #tpu.dot_dimension_numbers<[1], [0], [0], [1], [0, 0, 1, 1], [], []>} : vector<8x4xf32>, vector<4x272xf32>, vector<8x272xf32> -> vector<8x272xf32>
    %153 = arith.addf %147, %152 : vector<8x272xf32>
    %c3_221 = arith.constant 3 : index
    %c0_222 = arith.constant 0 : index
    %c0_223 = arith.constant 0 : index
    %c17_224 = arith.constant 17 : index
    %154 = vector.load %arg1[%c3_221, %c0_222, %c0_223, %c17_224] : memref<4x1x4x306xf32, #tpu.memory_space<vmem>>, vector<1x1x4x272xf32>
    %155 = vector.shape_cast %154 : vector<1x1x4x272xf32> to vector<4x272xf32>
    %c2_225 = arith.constant 2 : index
    %c1_226 = arith.constant 1 : index
    %c0_227 = arith.constant 0 : index
    %c0_228 = arith.constant 0 : index
    %156 = vector.load %arg2[%c2_225, %c1_226, %c0_227, %c0_228] : memref<3x3x8x4xf32, #tpu.memory_space<vmem>>, vector<1x1x8x4xf32>
    %157 = vector.shape_cast %156 : vector<1x1x8x4xf32> to vector<8x4xf32>
    %cst_229 = arith.constant dense<0.000000e+00> : vector<8x272xf32>
    %158 = tpu.matmul %157, %155, %cst_229 {dimension_numbers = #tpu.dot_dimension_numbers<[1], [0], [0], [1], [0, 0, 1, 1], [], []>} : vector<8x4xf32>, vector<4x272xf32>, vector<8x272xf32> -> vector<8x272xf32>
    %159 = arith.addf %153, %158 : vector<8x272xf32>
    %c2_230 = arith.constant 2 : index
    %c0_231 = arith.constant 0 : index
    %c0_232 = arith.constant 0 : index
    %c18_233 = arith.constant 18 : index
    %160 = vector.load %arg1[%c2_230, %c0_231, %c0_232, %c18_233] : memref<4x1x4x306xf32, #tpu.memory_space<vmem>>, vector<1x1x4x272xf32>
    %161 = vector.shape_cast %160 : vector<1x1x4x272xf32> to vector<4x272xf32>
    %c2_234 = arith.constant 2 : index
    %c2_235 = arith.constant 2 : index
    %c0_236 = arith.constant 0 : index
    %c0_237 = arith.constant 0 : index
    %162 = vector.load %arg2[%c2_234, %c2_235, %c0_236, %c0_237] : memref<3x3x8x4xf32, #tpu.memory_space<vmem>>, vector<1x1x8x4xf32>
    %163 = vector.shape_cast %162 : vector<1x1x8x4xf32> to vector<8x4xf32>
    %cst_238 = arith.constant dense<0.000000e+00> : vector<8x272xf32>
    %164 = tpu.matmul %163, %161, %cst_238 {dimension_numbers = #tpu.dot_dimension_numbers<[1], [0], [0], [1], [0, 0, 1, 1], [], []>} : vector<8x4xf32>, vector<4x272xf32>, vector<8x272xf32> -> vector<8x272xf32>
    %165 = arith.addf %159, %164 : vector<8x272xf32>
    %166 = arith.maximumf %110, %165 : vector<8x272xf32>
    %cst_239 = arith.constant 0.000000e+00 : f32
    %167 = vector.broadcast %cst_239 : f32 to vector<8x272xf32>
    %c3_240 = arith.constant 3 : index
    %c0_241 = arith.constant 0 : index
    %c0_242 = arith.constant 0 : index
    %c0_243 = arith.constant 0 : index
    %168 = vector.load %arg1[%c3_240, %c0_241, %c0_242, %c0_243] : memref<4x1x4x306xf32, #tpu.memory_space<vmem>>, vector<1x1x4x272xf32>
    %169 = vector.shape_cast %168 : vector<1x1x4x272xf32> to vector<4x272xf32>
    %c0_244 = arith.constant 0 : index
    %c0_245 = arith.constant 0 : index
    %c0_246 = arith.constant 0 : index
    %c0_247 = arith.constant 0 : index
    %170 = vector.load %arg2[%c0_244, %c0_245, %c0_246, %c0_247] : memref<3x3x8x4xf32, #tpu.memory_space<vmem>>, vector<1x1x8x4xf32>
    %171 = vector.shape_cast %170 : vector<1x1x8x4xf32> to vector<8x4xf32>
    %cst_248 = arith.constant dense<0.000000e+00> : vector<8x272xf32>
    %172 = tpu.matmul %171, %169, %cst_248 {dimension_numbers = #tpu.dot_dimension_numbers<[1], [0], [0], [1], [0, 0, 1, 1], [], []>} : vector<8x4xf32>, vector<4x272xf32>, vector<8x272xf32> -> vector<8x272xf32>
    %173 = arith.addf %167, %172 : vector<8x272xf32>
    %c2_249 = arith.constant 2 : index
    %c0_250 = arith.constant 0 : index
    %c0_251 = arith.constant 0 : index
    %c1_252 = arith.constant 1 : index
    %174 = vector.load %arg1[%c2_249, %c0_250, %c0_251, %c1_252] : memref<4x1x4x306xf32, #tpu.memory_space<vmem>>, vector<1x1x4x272xf32>
    %175 = vector.shape_cast %174 : vector<1x1x4x272xf32> to vector<4x272xf32>
    %c0_253 = arith.constant 0 : index
    %c1_254 = arith.constant 1 : index
    %c0_255 = arith.constant 0 : index
    %c0_256 = arith.constant 0 : index
    %176 = vector.load %arg2[%c0_253, %c1_254, %c0_255, %c0_256] : memref<3x3x8x4xf32, #tpu.memory_space<vmem>>, vector<1x1x8x4xf32>
    %177 = vector.shape_cast %176 : vector<1x1x8x4xf32> to vector<8x4xf32>
    %cst_257 = arith.constant dense<0.000000e+00> : vector<8x272xf32>
    %178 = tpu.matmul %177, %175, %cst_257 {dimension_numbers = #tpu.dot_dimension_numbers<[1], [0], [0], [1], [0, 0, 1, 1], [], []>} : vector<8x4xf32>, vector<4x272xf32>, vector<8x272xf32> -> vector<8x272xf32>
    %179 = arith.addf %173, %178 : vector<8x272xf32>
    %c3_258 = arith.constant 3 : index
    %c0_259 = arith.constant 0 : index
    %c0_260 = arith.constant 0 : index
    %c1_261 = arith.constant 1 : index
    %180 = vector.load %arg1[%c3_258, %c0_259, %c0_260, %c1_261] : memref<4x1x4x306xf32, #tpu.memory_space<vmem>>, vector<1x1x4x272xf32>
    %181 = vector.shape_cast %180 : vector<1x1x4x272xf32> to vector<4x272xf32>
    %c0_262 = arith.constant 0 : index
    %c2_263 = arith.constant 2 : index
    %c0_264 = arith.constant 0 : index
    %c0_265 = arith.constant 0 : index
    %182 = vector.load %arg2[%c0_262, %c2_263, %c0_264, %c0_265] : memref<3x3x8x4xf32, #tpu.memory_space<vmem>>, vector<1x1x8x4xf32>
    %183 = vector.shape_cast %182 : vector<1x1x8x4xf32> to vector<8x4xf32>
    %cst_266 = arith.constant dense<0.000000e+00> : vector<8x272xf32>
    %184 = tpu.matmul %183, %181, %cst_266 {dimension_numbers = #tpu.dot_dimension_numbers<[1], [0], [0], [1], [0, 0, 1, 1], [], []>} : vector<8x4xf32>, vector<4x272xf32>, vector<8x272xf32> -> vector<8x272xf32>
    %185 = arith.addf %179, %184 : vector<8x272xf32>
    %c1_267 = arith.constant 1 : index
    %c0_268 = arith.constant 0 : index
    %c0_269 = arith.constant 0 : index
    %c17_270 = arith.constant 17 : index
    %186 = vector.load %arg1[%c1_267, %c0_268, %c0_269, %c17_270] : memref<4x1x4x306xf32, #tpu.memory_space<vmem>>, vector<1x1x4x272xf32>
    %187 = vector.shape_cast %186 : vector<1x1x4x272xf32> to vector<4x272xf32>
    %c1_271 = arith.constant 1 : index
    %c0_272 = arith.constant 0 : index
    %c0_273 = arith.constant 0 : index
    %c0_274 = arith.constant 0 : index
    %188 = vector.load %arg2[%c1_271, %c0_272, %c0_273, %c0_274] : memref<3x3x8x4xf32, #tpu.memory_space<vmem>>, vector<1x1x8x4xf32>
    %189 = vector.shape_cast %188 : vector<1x1x8x4xf32> to vector<8x4xf32>
    %cst_275 = arith.constant dense<0.000000e+00> : vector<8x272xf32>
    %190 = tpu.matmul %189, %187, %cst_275 {dimension_numbers = #tpu.dot_dimension_numbers<[1], [0], [0], [1], [0, 0, 1, 1], [], []>} : vector<8x4xf32>, vector<4x272xf32>, vector<8x272xf32> -> vector<8x272xf32>
    %191 = arith.addf %185, %190 : vector<8x272xf32>
    %c0_276 = arith.constant 0 : index
    %c0_277 = arith.constant 0 : index
    %c0_278 = arith.constant 0 : index
    %c18_279 = arith.constant 18 : index
    %192 = vector.load %arg1[%c0_276, %c0_277, %c0_278, %c18_279] : memref<4x1x4x306xf32, #tpu.memory_space<vmem>>, vector<1x1x4x272xf32>
    %193 = vector.shape_cast %192 : vector<1x1x4x272xf32> to vector<4x272xf32>
    %c1_280 = arith.constant 1 : index
    %c1_281 = arith.constant 1 : index
    %c0_282 = arith.constant 0 : index
    %c0_283 = arith.constant 0 : index
    %194 = vector.load %arg2[%c1_280, %c1_281, %c0_282, %c0_283] : memref<3x3x8x4xf32, #tpu.memory_space<vmem>>, vector<1x1x8x4xf32>
    %195 = vector.shape_cast %194 : vector<1x1x8x4xf32> to vector<8x4xf32>
    %cst_284 = arith.constant dense<0.000000e+00> : vector<8x272xf32>
    %196 = tpu.matmul %195, %193, %cst_284 {dimension_numbers = #tpu.dot_dimension_numbers<[1], [0], [0], [1], [0, 0, 1, 1], [], []>} : vector<8x4xf32>, vector<4x272xf32>, vector<8x272xf32> -> vector<8x272xf32>
    %197 = arith.addf %191, %196 : vector<8x272xf32>
    %c1_285 = arith.constant 1 : index
    %c0_286 = arith.constant 0 : index
    %c0_287 = arith.constant 0 : index
    %c18_288 = arith.constant 18 : index
    %198 = vector.load %arg1[%c1_285, %c0_286, %c0_287, %c18_288] : memref<4x1x4x306xf32, #tpu.memory_space<vmem>>, vector<1x1x4x272xf32>
    %199 = vector.shape_cast %198 : vector<1x1x4x272xf32> to vector<4x272xf32>
    %c1_289 = arith.constant 1 : index
    %c2_290 = arith.constant 2 : index
    %c0_291 = arith.constant 0 : index
    %c0_292 = arith.constant 0 : index
    %200 = vector.load %arg2[%c1_289, %c2_290, %c0_291, %c0_292] : memref<3x3x8x4xf32, #tpu.memory_space<vmem>>, vector<1x1x8x4xf32>
    %201 = vector.shape_cast %200 : vector<1x1x8x4xf32> to vector<8x4xf32>
    %cst_293 = arith.constant dense<0.000000e+00> : vector<8x272xf32>
    %202 = tpu.matmul %201, %199, %cst_293 {dimension_numbers = #tpu.dot_dimension_numbers<[1], [0], [0], [1], [0, 0, 1, 1], [], []>} : vector<8x4xf32>, vector<4x272xf32>, vector<8x272xf32> -> vector<8x272xf32>
    %203 = arith.addf %197, %202 : vector<8x272xf32>
    %c3_294 = arith.constant 3 : index
    %c0_295 = arith.constant 0 : index
    %c0_296 = arith.constant 0 : index
    %c17_297 = arith.constant 17 : index
    %204 = vector.load %arg1[%c3_294, %c0_295, %c0_296, %c17_297] : memref<4x1x4x306xf32, #tpu.memory_space<vmem>>, vector<1x1x4x272xf32>
    %205 = vector.shape_cast %204 : vector<1x1x4x272xf32> to vector<4x272xf32>
    %c2_298 = arith.constant 2 : index
    %c0_299 = arith.constant 0 : index
    %c0_300 = arith.constant 0 : index
    %c0_301 = arith.constant 0 : index
    %206 = vector.load %arg2[%c2_298, %c0_299, %c0_300, %c0_301] : memref<3x3x8x4xf32, #tpu.memory_space<vmem>>, vector<1x1x8x4xf32>
    %207 = vector.shape_cast %206 : vector<1x1x8x4xf32> to vector<8x4xf32>
    %cst_302 = arith.constant dense<0.000000e+00> : vector<8x272xf32>
    %208 = tpu.matmul %207, %205, %cst_302 {dimension_numbers = #tpu.dot_dimension_numbers<[1], [0], [0], [1], [0, 0, 1, 1], [], []>} : vector<8x4xf32>, vector<4x272xf32>, vector<8x272xf32> -> vector<8x272xf32>
    %209 = arith.addf %203, %208 : vector<8x272xf32>
    %c2_303 = arith.constant 2 : index
    %c0_304 = arith.constant 0 : index
    %c0_305 = arith.constant 0 : index
    %c18_306 = arith.constant 18 : index
    %210 = vector.load %arg1[%c2_303, %c0_304, %c0_305, %c18_306] : memref<4x1x4x306xf32, #tpu.memory_space<vmem>>, vector<1x1x4x272xf32>
    %211 = vector.shape_cast %210 : vector<1x1x4x272xf32> to vector<4x272xf32>
    %c2_307 = arith.constant 2 : index
    %c1_308 = arith.constant 1 : index
    %c0_309 = arith.constant 0 : index
    %c0_310 = arith.constant 0 : index
    %212 = vector.load %arg2[%c2_307, %c1_308, %c0_309, %c0_310] : memref<3x3x8x4xf32, #tpu.memory_space<vmem>>, vector<1x1x8x4xf32>
    %213 = vector.shape_cast %212 : vector<1x1x8x4xf32> to vector<8x4xf32>
    %cst_311 = arith.constant dense<0.000000e+00> : vector<8x272xf32>
    %214 = tpu.matmul %213, %211, %cst_311 {dimension_numbers = #tpu.dot_dimension_numbers<[1], [0], [0], [1], [0, 0, 1, 1], [], []>} : vector<8x4xf32>, vector<4x272xf32>, vector<8x272xf32> -> vector<8x272xf32>
    %215 = arith.addf %209, %214 : vector<8x272xf32>
    %c3_312 = arith.constant 3 : index
    %c0_313 = arith.constant 0 : index
    %c0_314 = arith.constant 0 : index
    %c18_315 = arith.constant 18 : index
    %216 = vector.load %arg1[%c3_312, %c0_313, %c0_314, %c18_315] : memref<4x1x4x306xf32, #tpu.memory_space<vmem>>, vector<1x1x4x272xf32>
    %217 = vector.shape_cast %216 : vector<1x1x4x272xf32> to vector<4x272xf32>
    %c2_316 = arith.constant 2 : index
    %c2_317 = arith.constant 2 : index
    %c0_318 = arith.constant 0 : index
    %c0_319 = arith.constant 0 : index
    %218 = vector.load %arg2[%c2_316, %c2_317, %c0_318, %c0_319] : memref<3x3x8x4xf32, #tpu.memory_space<vmem>>, vector<1x1x8x4xf32>
    %219 = vector.shape_cast %218 : vector<1x1x8x4xf32> to vector<8x4xf32>
    %cst_320 = arith.constant dense<0.000000e+00> : vector<8x272xf32>
    %220 = tpu.matmul %219, %217, %cst_320 {dimension_numbers = #tpu.dot_dimension_numbers<[1], [0], [0], [1], [0, 0, 1, 1], [], []>} : vector<8x4xf32>, vector<4x272xf32>, vector<8x272xf32> -> vector<8x272xf32>
    %221 = arith.addf %215, %220 : vector<8x272xf32>
    %222 = arith.maximumf %166, %221 : vector<8x272xf32>
    %c0_321 = arith.constant 0 : index
    %c0_322 = arith.constant 0 : index
    %223 = vector.load %arg3[%c0_321, %c0_322] : memref<8x1xf32, #tpu.memory_space<vmem>>, vector<8x1xf32>
    %224 = vector.broadcast %223 : vector<8x1xf32> to vector<8x272xf32>
    %225 = arith.addf %222, %224 : vector<8x272xf32>
    %cst_323 = arith.constant 0.000000e+00 : f32
    %226 = vector.broadcast %cst_323 : f32 to vector<8x272xf32>
    %227 = arith.maximumf %225, %226 : vector<8x272xf32>
    %c0_324 = arith.constant 0 : index
    %c0_325 = arith.constant 0 : index
    %c0_326 = arith.constant 0 : index
    %228 = vector.load %arg4[%c0_324, %c0_325, %c0_326] : memref<1x8x272xf32, #tpu.memory_space<vmem>>, vector<1x8x272xf32>
    %229 = vector.shape_cast %228 : vector<1x8x272xf32> to vector<8x272xf32>
    %230 = vector.shape_cast %227 : vector<8x272xf32> to vector<1x8x272xf32>
    tpu.vector_store %arg4[%c0_324, %c0_325, %c0_326], %230 {strides = array<i32>} : memref<1x8x272xf32, #tpu.memory_space<vmem>>, vector<1x8x272xf32>,
    return
  }
  func.func @transform_0(%arg0: i32) -> (i32, i32, i32, i32) {
    %c0_i32 = arith.constant 0 : i32
    %c0_i32_0 = arith.constant 0 : i32
    %c0_i32_1 = arith.constant 0 : i32
    %c0_i32_2 = arith.constant 0 : i32
    return %c0_i32, %arg0, %c0_i32_0, %c0_i32_1 : i32, i32, i32, i32
  }
  func.func @transform_1(%arg0: i32) -> (i32, i32, i32, i32) {
    %c0_i32 = arith.constant 0 : i32
    %c0_i32_0 = arith.constant 0 : i32
    %c0_i32_1 = arith.constant 0 : i32
    %c0_i32_2 = arith.constant 0 : i32
    %c0_i32_3 = arith.constant 0 : i32
    return %c0_i32, %c0_i32_0, %c0_i32_1, %c0_i32_2 : i32, i32, i32, i32
  }
  func.func @transform_2(%arg0: i32) -> (i32, i32) {
    %c0_i32 = arith.constant 0 : i32
    %c0_i32_0 = arith.constant 0 : i32
    %c0_i32_1 = arith.constant 0 : i32
    return %c0_i32, %c0_i32_0 : i32, i32
  }
  func.func @transform_3(%arg0: i32) -> (i32, i32, i32) {
    %c0_i32 = arith.constant 0 : i32
    %c0_i32_0 = arith.constant 0 : i32
    %c0_i32_1 = arith.constant 0 : i32
    return %arg0, %c0_i32, %c0_i32_0 : i32, i32, i32
  }
}

module attributes {stable_mosaic.version = 11 : i64} {
  func.func @_conv_pool_kernel(%arg0: i32, %arg1: memref<4x1x8x90xf32, #tpu.memory_space<vmem>>, %arg2: memref<3x3x16x8xf32, #tpu.memory_space<vmem>>, %arg3: memref<16x1xf32, #tpu.memory_space<vmem>>, %arg4: memref<1x16x72xf32, #tpu.memory_space<vmem>>) attributes {dimension_semantics = [#tpu.dimension_semantics<parallel>], iteration_bounds = array<i64: 2>, scalar_prefetch = 0 : i64, scratch_operands = 0 : i64, tpu.core_type = #tpu.core_type<tc>, window_params = [{transform_indices = @transform_0, window_bounds = array<i64: 4, 1, 8, 90>}, {pipeline_mode = #tpu.pipeline_mode<synchronous>, transform_indices = @transform_1, window_bounds = array<i64: 3, 3, 16, 8>}, {pipeline_mode = #tpu.pipeline_mode<synchronous>, transform_indices = @transform_2, window_bounds = array<i64: 16, 1>}, {transform_indices = @transform_3, window_bounds = array<i64: 1, 16, 72>}]} {
    %cst = arith.constant 0.000000e+00 : f32
    %0 = vector.broadcast %cst : f32 to vector<16x72xf32>
    %c0 = arith.constant 0 : index
    %c0_0 = arith.constant 0 : index
    %c0_1 = arith.constant 0 : index
    %c0_2 = arith.constant 0 : index
    %1 = vector.load %arg1[%c0, %c0_0, %c0_1, %c0_2] : memref<4x1x8x90xf32, #tpu.memory_space<vmem>>, vector<1x1x8x72xf32>
    %2 = vector.shape_cast %1 : vector<1x1x8x72xf32> to vector<8x72xf32>
    %c0_3 = arith.constant 0 : index
    %c0_4 = arith.constant 0 : index
    %c0_5 = arith.constant 0 : index
    %c0_6 = arith.constant 0 : index
    %3 = vector.load %arg2[%c0_3, %c0_4, %c0_5, %c0_6] : memref<3x3x16x8xf32, #tpu.memory_space<vmem>>, vector<1x1x16x8xf32>
    %4 = vector.shape_cast %3 : vector<1x1x16x8xf32> to vector<16x8xf32>
    %cst_7 = arith.constant dense<0.000000e+00> : vector<16x72xf32>
    %5 = tpu.matmul %4, %2, %cst_7 {dimension_numbers = #tpu.dot_dimension_numbers<[1], [0], [0], [1], [0, 0, 1, 1], [], []>} : vector<16x8xf32>, vector<8x72xf32>, vector<16x72xf32> -> vector<16x72xf32>
    %6 = arith.addf %0, %5 : vector<16x72xf32>
    %c1 = arith.constant 1 : index
    %c0_8 = arith.constant 0 : index
    %c0_9 = arith.constant 0 : index
    %c0_10 = arith.constant 0 : index
    %7 = vector.load %arg1[%c1, %c0_8, %c0_9, %c0_10] : memref<4x1x8x90xf32, #tpu.memory_space<vmem>>, vector<1x1x8x72xf32>
    %8 = vector.shape_cast %7 : vector<1x1x8x72xf32> to vector<8x72xf32>
    %c0_11 = arith.constant 0 : index
    %c1_12 = arith.constant 1 : index
    %c0_13 = arith.constant 0 : index
    %c0_14 = arith.constant 0 : index
    %9 = vector.load %arg2[%c0_11, %c1_12, %c0_13, %c0_14] : memref<3x3x16x8xf32, #tpu.memory_space<vmem>>, vector<1x1x16x8xf32>
    %10 = vector.shape_cast %9 : vector<1x1x16x8xf32> to vector<16x8xf32>
    %cst_15 = arith.constant dense<0.000000e+00> : vector<16x72xf32>
    %11 = tpu.matmul %10, %8, %cst_15 {dimension_numbers = #tpu.dot_dimension_numbers<[1], [0], [0], [1], [0, 0, 1, 1], [], []>} : vector<16x8xf32>, vector<8x72xf32>, vector<16x72xf32> -> vector<16x72xf32>
    %12 = arith.addf %6, %11 : vector<16x72xf32>
    %c0_16 = arith.constant 0 : index
    %c0_17 = arith.constant 0 : index
    %c0_18 = arith.constant 0 : index
    %c1_19 = arith.constant 1 : index
    %13 = vector.load %arg1[%c0_16, %c0_17, %c0_18, %c1_19] : memref<4x1x8x90xf32, #tpu.memory_space<vmem>>, vector<1x1x8x72xf32>
    %14 = vector.shape_cast %13 : vector<1x1x8x72xf32> to vector<8x72xf32>
    %c0_20 = arith.constant 0 : index
    %c2 = arith.constant 2 : index
    %c0_21 = arith.constant 0 : index
    %c0_22 = arith.constant 0 : index
    %15 = vector.load %arg2[%c0_20, %c2, %c0_21, %c0_22] : memref<3x3x16x8xf32, #tpu.memory_space<vmem>>, vector<1x1x16x8xf32>
    %16 = vector.shape_cast %15 : vector<1x1x16x8xf32> to vector<16x8xf32>
    %cst_23 = arith.constant dense<0.000000e+00> : vector<16x72xf32>
    %17 = tpu.matmul %16, %14, %cst_23 {dimension_numbers = #tpu.dot_dimension_numbers<[1], [0], [0], [1], [0, 0, 1, 1], [], []>} : vector<16x8xf32>, vector<8x72xf32>, vector<16x72xf32> -> vector<16x72xf32>
    %18 = arith.addf %12, %17 : vector<16x72xf32>
    %c2_24 = arith.constant 2 : index
    %c0_25 = arith.constant 0 : index
    %c0_26 = arith.constant 0 : index
    %c0_27 = arith.constant 0 : index
    %19 = vector.load %arg1[%c2_24, %c0_25, %c0_26, %c0_27] : memref<4x1x8x90xf32, #tpu.memory_space<vmem>>, vector<1x1x8x72xf32>
    %20 = vector.shape_cast %19 : vector<1x1x8x72xf32> to vector<8x72xf32>
    %c1_28 = arith.constant 1 : index
    %c0_29 = arith.constant 0 : index
    %c0_30 = arith.constant 0 : index
    %c0_31 = arith.constant 0 : index
    %21 = vector.load %arg2[%c1_28, %c0_29, %c0_30, %c0_31] : memref<3x3x16x8xf32, #tpu.memory_space<vmem>>, vector<1x1x16x8xf32>
    %22 = vector.shape_cast %21 : vector<1x1x16x8xf32> to vector<16x8xf32>
    %cst_32 = arith.constant dense<0.000000e+00> : vector<16x72xf32>
    %23 = tpu.matmul %22, %20, %cst_32 {dimension_numbers = #tpu.dot_dimension_numbers<[1], [0], [0], [1], [0, 0, 1, 1], [], []>} : vector<16x8xf32>, vector<8x72xf32>, vector<16x72xf32> -> vector<16x72xf32>
    %24 = arith.addf %18, %23 : vector<16x72xf32>
    %c3 = arith.constant 3 : index
    %c0_33 = arith.constant 0 : index
    %c0_34 = arith.constant 0 : index
    %c0_35 = arith.constant 0 : index
    %25 = vector.load %arg1[%c3, %c0_33, %c0_34, %c0_35] : memref<4x1x8x90xf32, #tpu.memory_space<vmem>>, vector<1x1x8x72xf32>
    %26 = vector.shape_cast %25 : vector<1x1x8x72xf32> to vector<8x72xf32>
    %c1_36 = arith.constant 1 : index
    %c1_37 = arith.constant 1 : index
    %c0_38 = arith.constant 0 : index
    %c0_39 = arith.constant 0 : index
    %27 = vector.load %arg2[%c1_36, %c1_37, %c0_38, %c0_39] : memref<3x3x16x8xf32, #tpu.memory_space<vmem>>, vector<1x1x16x8xf32>
    %28 = vector.shape_cast %27 : vector<1x1x16x8xf32> to vector<16x8xf32>
    %cst_40 = arith.constant dense<0.000000e+00> : vector<16x72xf32>
    %29 = tpu.matmul %28, %26, %cst_40 {dimension_numbers = #tpu.dot_dimension_numbers<[1], [0], [0], [1], [0, 0, 1, 1], [], []>} : vector<16x8xf32>, vector<8x72xf32>, vector<16x72xf32> -> vector<16x72xf32>
    %30 = arith.addf %24, %29 : vector<16x72xf32>
    %c2_41 = arith.constant 2 : index
    %c0_42 = arith.constant 0 : index
    %c0_43 = arith.constant 0 : index
    %c1_44 = arith.constant 1 : index
    %31 = vector.load %arg1[%c2_41, %c0_42, %c0_43, %c1_44] : memref<4x1x8x90xf32, #tpu.memory_space<vmem>>, vector<1x1x8x72xf32>
    %32 = vector.shape_cast %31 : vector<1x1x8x72xf32> to vector<8x72xf32>
    %c1_45 = arith.constant 1 : index
    %c2_46 = arith.constant 2 : index
    %c0_47 = arith.constant 0 : index
    %c0_48 = arith.constant 0 : index
    %33 = vector.load %arg2[%c1_45, %c2_46, %c0_47, %c0_48] : memref<3x3x16x8xf32, #tpu.memory_space<vmem>>, vector<1x1x16x8xf32>
    %34 = vector.shape_cast %33 : vector<1x1x16x8xf32> to vector<16x8xf32>
    %cst_49 = arith.constant dense<0.000000e+00> : vector<16x72xf32>
    %35 = tpu.matmul %34, %32, %cst_49 {dimension_numbers = #tpu.dot_dimension_numbers<[1], [0], [0], [1], [0, 0, 1, 1], [], []>} : vector<16x8xf32>, vector<8x72xf32>, vector<16x72xf32> -> vector<16x72xf32>
    %36 = arith.addf %30, %35 : vector<16x72xf32>
    %c0_50 = arith.constant 0 : index
    %c0_51 = arith.constant 0 : index
    %c0_52 = arith.constant 0 : index
    %c9 = arith.constant 9 : index
    %37 = vector.load %arg1[%c0_50, %c0_51, %c0_52, %c9] : memref<4x1x8x90xf32, #tpu.memory_space<vmem>>, vector<1x1x8x72xf32>
    %38 = vector.shape_cast %37 : vector<1x1x8x72xf32> to vector<8x72xf32>
    %c2_53 = arith.constant 2 : index
    %c0_54 = arith.constant 0 : index
    %c0_55 = arith.constant 0 : index
    %c0_56 = arith.constant 0 : index
    %39 = vector.load %arg2[%c2_53, %c0_54, %c0_55, %c0_56] : memref<3x3x16x8xf32, #tpu.memory_space<vmem>>, vector<1x1x16x8xf32>
    %40 = vector.shape_cast %39 : vector<1x1x16x8xf32> to vector<16x8xf32>
    %cst_57 = arith.constant dense<0.000000e+00> : vector<16x72xf32>
    %41 = tpu.matmul %40, %38, %cst_57 {dimension_numbers = #tpu.dot_dimension_numbers<[1], [0], [0], [1], [0, 0, 1, 1], [], []>} : vector<16x8xf32>, vector<8x72xf32>, vector<16x72xf32> -> vector<16x72xf32>
    %42 = arith.addf %36, %41 : vector<16x72xf32>
    %c1_58 = arith.constant 1 : index
    %c0_59 = arith.constant 0 : index
    %c0_60 = arith.constant 0 : index
    %c9_61 = arith.constant 9 : index
    %43 = vector.load %arg1[%c1_58, %c0_59, %c0_60, %c9_61] : memref<4x1x8x90xf32, #tpu.memory_space<vmem>>, vector<1x1x8x72xf32>
    %44 = vector.shape_cast %43 : vector<1x1x8x72xf32> to vector<8x72xf32>
    %c2_62 = arith.constant 2 : index
    %c1_63 = arith.constant 1 : index
    %c0_64 = arith.constant 0 : index
    %c0_65 = arith.constant 0 : index
    %45 = vector.load %arg2[%c2_62, %c1_63, %c0_64, %c0_65] : memref<3x3x16x8xf32, #tpu.memory_space<vmem>>, vector<1x1x16x8xf32>
    %46 = vector.shape_cast %45 : vector<1x1x16x8xf32> to vector<16x8xf32>
    %cst_66 = arith.constant dense<0.000000e+00> : vector<16x72xf32>
    %47 = tpu.matmul %46, %44, %cst_66 {dimension_numbers = #tpu.dot_dimension_numbers<[1], [0], [0], [1], [0, 0, 1, 1], [], []>} : vector<16x8xf32>, vector<8x72xf32>, vector<16x72xf32> -> vector<16x72xf32>
    %48 = arith.addf %42, %47 : vector<16x72xf32>
    %c0_67 = arith.constant 0 : index
    %c0_68 = arith.constant 0 : index
    %c0_69 = arith.constant 0 : index
    %c10 = arith.constant 10 : index
    %49 = vector.load %arg1[%c0_67, %c0_68, %c0_69, %c10] : memref<4x1x8x90xf32, #tpu.memory_space<vmem>>, vector<1x1x8x72xf32>
    %50 = vector.shape_cast %49 : vector<1x1x8x72xf32> to vector<8x72xf32>
    %c2_70 = arith.constant 2 : index
    %c2_71 = arith.constant 2 : index
    %c0_72 = arith.constant 0 : index
    %c0_73 = arith.constant 0 : index
    %51 = vector.load %arg2[%c2_70, %c2_71, %c0_72, %c0_73] : memref<3x3x16x8xf32, #tpu.memory_space<vmem>>, vector<1x1x16x8xf32>
    %52 = vector.shape_cast %51 : vector<1x1x16x8xf32> to vector<16x8xf32>
    %cst_74 = arith.constant dense<0.000000e+00> : vector<16x72xf32>
    %53 = tpu.matmul %52, %50, %cst_74 {dimension_numbers = #tpu.dot_dimension_numbers<[1], [0], [0], [1], [0, 0, 1, 1], [], []>} : vector<16x8xf32>, vector<8x72xf32>, vector<16x72xf32> -> vector<16x72xf32>
    %54 = arith.addf %48, %53 : vector<16x72xf32>
    %cst_75 = arith.constant 0.000000e+00 : f32
    %55 = vector.broadcast %cst_75 : f32 to vector<16x72xf32>
    %c1_76 = arith.constant 1 : index
    %c0_77 = arith.constant 0 : index
    %c0_78 = arith.constant 0 : index
    %c0_79 = arith.constant 0 : index
    %56 = vector.load %arg1[%c1_76, %c0_77, %c0_78, %c0_79] : memref<4x1x8x90xf32, #tpu.memory_space<vmem>>, vector<1x1x8x72xf32>
    %57 = vector.shape_cast %56 : vector<1x1x8x72xf32> to vector<8x72xf32>
    %c0_80 = arith.constant 0 : index
    %c0_81 = arith.constant 0 : index
    %c0_82 = arith.constant 0 : index
    %c0_83 = arith.constant 0 : index
    %58 = vector.load %arg2[%c0_80, %c0_81, %c0_82, %c0_83] : memref<3x3x16x8xf32, #tpu.memory_space<vmem>>, vector<1x1x16x8xf32>
    %59 = vector.shape_cast %58 : vector<1x1x16x8xf32> to vector<16x8xf32>
    %cst_84 = arith.constant dense<0.000000e+00> : vector<16x72xf32>
    %60 = tpu.matmul %59, %57, %cst_84 {dimension_numbers = #tpu.dot_dimension_numbers<[1], [0], [0], [1], [0, 0, 1, 1], [], []>} : vector<16x8xf32>, vector<8x72xf32>, vector<16x72xf32> -> vector<16x72xf32>
    %61 = arith.addf %55, %60 : vector<16x72xf32>
    %c0_85 = arith.constant 0 : index
    %c0_86 = arith.constant 0 : index
    %c0_87 = arith.constant 0 : index
    %c1_88 = arith.constant 1 : index
    %62 = vector.load %arg1[%c0_85, %c0_86, %c0_87, %c1_88] : memref<4x1x8x90xf32, #tpu.memory_space<vmem>>, vector<1x1x8x72xf32>
    %63 = vector.shape_cast %62 : vector<1x1x8x72xf32> to vector<8x72xf32>
    %c0_89 = arith.constant 0 : index
    %c1_90 = arith.constant 1 : index
    %c0_91 = arith.constant 0 : index
    %c0_92 = arith.constant 0 : index
    %64 = vector.load %arg2[%c0_89, %c1_90, %c0_91, %c0_92] : memref<3x3x16x8xf32, #tpu.memory_space<vmem>>, vector<1x1x16x8xf32>
    %65 = vector.shape_cast %64 : vector<1x1x16x8xf32> to vector<16x8xf32>
    %cst_93 = arith.constant dense<0.000000e+00> : vector<16x72xf32>
    %66 = tpu.matmul %65, %63, %cst_93 {dimension_numbers = #tpu.dot_dimension_numbers<[1], [0], [0], [1], [0, 0, 1, 1], [], []>} : vector<16x8xf32>, vector<8x72xf32>, vector<16x72xf32> -> vector<16x72xf32>
    %67 = arith.addf %61, %66 : vector<16x72xf32>
    %c1_94 = arith.constant 1 : index
    %c0_95 = arith.constant 0 : index
    %c0_96 = arith.constant 0 : index
    %c1_97 = arith.constant 1 : index
    %68 = vector.load %arg1[%c1_94, %c0_95, %c0_96, %c1_97] : memref<4x1x8x90xf32, #tpu.memory_space<vmem>>, vector<1x1x8x72xf32>
    %69 = vector.shape_cast %68 : vector<1x1x8x72xf32> to vector<8x72xf32>
    %c0_98 = arith.constant 0 : index
    %c2_99 = arith.constant 2 : index
    %c0_100 = arith.constant 0 : index
    %c0_101 = arith.constant 0 : index
    %70 = vector.load %arg2[%c0_98, %c2_99, %c0_100, %c0_101] : memref<3x3x16x8xf32, #tpu.memory_space<vmem>>, vector<1x1x16x8xf32>
    %71 = vector.shape_cast %70 : vector<1x1x16x8xf32> to vector<16x8xf32>
    %cst_102 = arith.constant dense<0.000000e+00> : vector<16x72xf32>
    %72 = tpu.matmul %71, %69, %cst_102 {dimension_numbers = #tpu.dot_dimension_numbers<[1], [0], [0], [1], [0, 0, 1, 1], [], []>} : vector<16x8xf32>, vector<8x72xf32>, vector<16x72xf32> -> vector<16x72xf32>
    %73 = arith.addf %67, %72 : vector<16x72xf32>
    %c3_103 = arith.constant 3 : index
    %c0_104 = arith.constant 0 : index
    %c0_105 = arith.constant 0 : index
    %c0_106 = arith.constant 0 : index
    %74 = vector.load %arg1[%c3_103, %c0_104, %c0_105, %c0_106] : memref<4x1x8x90xf32, #tpu.memory_space<vmem>>, vector<1x1x8x72xf32>
    %75 = vector.shape_cast %74 : vector<1x1x8x72xf32> to vector<8x72xf32>
    %c1_107 = arith.constant 1 : index
    %c0_108 = arith.constant 0 : index
    %c0_109 = arith.constant 0 : index
    %c0_110 = arith.constant 0 : index
    %76 = vector.load %arg2[%c1_107, %c0_108, %c0_109, %c0_110] : memref<3x3x16x8xf32, #tpu.memory_space<vmem>>, vector<1x1x16x8xf32>
    %77 = vector.shape_cast %76 : vector<1x1x16x8xf32> to vector<16x8xf32>
    %cst_111 = arith.constant dense<0.000000e+00> : vector<16x72xf32>
    %78 = tpu.matmul %77, %75, %cst_111 {dimension_numbers = #tpu.dot_dimension_numbers<[1], [0], [0], [1], [0, 0, 1, 1], [], []>} : vector<16x8xf32>, vector<8x72xf32>, vector<16x72xf32> -> vector<16x72xf32>
    %79 = arith.addf %73, %78 : vector<16x72xf32>
    %c2_112 = arith.constant 2 : index
    %c0_113 = arith.constant 0 : index
    %c0_114 = arith.constant 0 : index
    %c1_115 = arith.constant 1 : index
    %80 = vector.load %arg1[%c2_112, %c0_113, %c0_114, %c1_115] : memref<4x1x8x90xf32, #tpu.memory_space<vmem>>, vector<1x1x8x72xf32>
    %81 = vector.shape_cast %80 : vector<1x1x8x72xf32> to vector<8x72xf32>
    %c1_116 = arith.constant 1 : index
    %c1_117 = arith.constant 1 : index
    %c0_118 = arith.constant 0 : index
    %c0_119 = arith.constant 0 : index
    %82 = vector.load %arg2[%c1_116, %c1_117, %c0_118, %c0_119] : memref<3x3x16x8xf32, #tpu.memory_space<vmem>>, vector<1x1x16x8xf32>
    %83 = vector.shape_cast %82 : vector<1x1x16x8xf32> to vector<16x8xf32>
    %cst_120 = arith.constant dense<0.000000e+00> : vector<16x72xf32>
    %84 = tpu.matmul %83, %81, %cst_120 {dimension_numbers = #tpu.dot_dimension_numbers<[1], [0], [0], [1], [0, 0, 1, 1], [], []>} : vector<16x8xf32>, vector<8x72xf32>, vector<16x72xf32> -> vector<16x72xf32>
    %85 = arith.addf %79, %84 : vector<16x72xf32>
    %c3_121 = arith.constant 3 : index
    %c0_122 = arith.constant 0 : index
    %c0_123 = arith.constant 0 : index
    %c1_124 = arith.constant 1 : index
    %86 = vector.load %arg1[%c3_121, %c0_122, %c0_123, %c1_124] : memref<4x1x8x90xf32, #tpu.memory_space<vmem>>, vector<1x1x8x72xf32>
    %87 = vector.shape_cast %86 : vector<1x1x8x72xf32> to vector<8x72xf32>
    %c1_125 = arith.constant 1 : index
    %c2_126 = arith.constant 2 : index
    %c0_127 = arith.constant 0 : index
    %c0_128 = arith.constant 0 : index
    %88 = vector.load %arg2[%c1_125, %c2_126, %c0_127, %c0_128] : memref<3x3x16x8xf32, #tpu.memory_space<vmem>>, vector<1x1x16x8xf32>
    %89 = vector.shape_cast %88 : vector<1x1x16x8xf32> to vector<16x8xf32>
    %cst_129 = arith.constant dense<0.000000e+00> : vector<16x72xf32>
    %90 = tpu.matmul %89, %87, %cst_129 {dimension_numbers = #tpu.dot_dimension_numbers<[1], [0], [0], [1], [0, 0, 1, 1], [], []>} : vector<16x8xf32>, vector<8x72xf32>, vector<16x72xf32> -> vector<16x72xf32>
    %91 = arith.addf %85, %90 : vector<16x72xf32>
    %c1_130 = arith.constant 1 : index
    %c0_131 = arith.constant 0 : index
    %c0_132 = arith.constant 0 : index
    %c9_133 = arith.constant 9 : index
    %92 = vector.load %arg1[%c1_130, %c0_131, %c0_132, %c9_133] : memref<4x1x8x90xf32, #tpu.memory_space<vmem>>, vector<1x1x8x72xf32>
    %93 = vector.shape_cast %92 : vector<1x1x8x72xf32> to vector<8x72xf32>
    %c2_134 = arith.constant 2 : index
    %c0_135 = arith.constant 0 : index
    %c0_136 = arith.constant 0 : index
    %c0_137 = arith.constant 0 : index
    %94 = vector.load %arg2[%c2_134, %c0_135, %c0_136, %c0_137] : memref<3x3x16x8xf32, #tpu.memory_space<vmem>>, vector<1x1x16x8xf32>
    %95 = vector.shape_cast %94 : vector<1x1x16x8xf32> to vector<16x8xf32>
    %cst_138 = arith.constant dense<0.000000e+00> : vector<16x72xf32>
    %96 = tpu.matmul %95, %93, %cst_138 {dimension_numbers = #tpu.dot_dimension_numbers<[1], [0], [0], [1], [0, 0, 1, 1], [], []>} : vector<16x8xf32>, vector<8x72xf32>, vector<16x72xf32> -> vector<16x72xf32>
    %97 = arith.addf %91, %96 : vector<16x72xf32>
    %c0_139 = arith.constant 0 : index
    %c0_140 = arith.constant 0 : index
    %c0_141 = arith.constant 0 : index
    %c10_142 = arith.constant 10 : index
    %98 = vector.load %arg1[%c0_139, %c0_140, %c0_141, %c10_142] : memref<4x1x8x90xf32, #tpu.memory_space<vmem>>, vector<1x1x8x72xf32>
    %99 = vector.shape_cast %98 : vector<1x1x8x72xf32> to vector<8x72xf32>
    %c2_143 = arith.constant 2 : index
    %c1_144 = arith.constant 1 : index
    %c0_145 = arith.constant 0 : index
    %c0_146 = arith.constant 0 : index
    %100 = vector.load %arg2[%c2_143, %c1_144, %c0_145, %c0_146] : memref<3x3x16x8xf32, #tpu.memory_space<vmem>>, vector<1x1x16x8xf32>
    %101 = vector.shape_cast %100 : vector<1x1x16x8xf32> to vector<16x8xf32>
    %cst_147 = arith.constant dense<0.000000e+00> : vector<16x72xf32>
    %102 = tpu.matmul %101, %99, %cst_147 {dimension_numbers = #tpu.dot_dimension_numbers<[1], [0], [0], [1], [0, 0, 1, 1], [], []>} : vector<16x8xf32>, vector<8x72xf32>, vector<16x72xf32> -> vector<16x72xf32>
    %103 = arith.addf %97, %102 : vector<16x72xf32>
    %c1_148 = arith.constant 1 : index
    %c0_149 = arith.constant 0 : index
    %c0_150 = arith.constant 0 : index
    %c10_151 = arith.constant 10 : index
    %104 = vector.load %arg1[%c1_148, %c0_149, %c0_150, %c10_151] : memref<4x1x8x90xf32, #tpu.memory_space<vmem>>, vector<1x1x8x72xf32>
    %105 = vector.shape_cast %104 : vector<1x1x8x72xf32> to vector<8x72xf32>
    %c2_152 = arith.constant 2 : index
    %c2_153 = arith.constant 2 : index
    %c0_154 = arith.constant 0 : index
    %c0_155 = arith.constant 0 : index
    %106 = vector.load %arg2[%c2_152, %c2_153, %c0_154, %c0_155] : memref<3x3x16x8xf32, #tpu.memory_space<vmem>>, vector<1x1x16x8xf32>
    %107 = vector.shape_cast %106 : vector<1x1x16x8xf32> to vector<16x8xf32>
    %cst_156 = arith.constant dense<0.000000e+00> : vector<16x72xf32>
    %108 = tpu.matmul %107, %105, %cst_156 {dimension_numbers = #tpu.dot_dimension_numbers<[1], [0], [0], [1], [0, 0, 1, 1], [], []>} : vector<16x8xf32>, vector<8x72xf32>, vector<16x72xf32> -> vector<16x72xf32>
    %109 = arith.addf %103, %108 : vector<16x72xf32>
    %110 = arith.maximumf %54, %109 : vector<16x72xf32>
    %cst_157 = arith.constant 0.000000e+00 : f32
    %111 = vector.broadcast %cst_157 : f32 to vector<16x72xf32>
    %c2_158 = arith.constant 2 : index
    %c0_159 = arith.constant 0 : index
    %c0_160 = arith.constant 0 : index
    %c0_161 = arith.constant 0 : index
    %112 = vector.load %arg1[%c2_158, %c0_159, %c0_160, %c0_161] : memref<4x1x8x90xf32, #tpu.memory_space<vmem>>, vector<1x1x8x72xf32>
    %113 = vector.shape_cast %112 : vector<1x1x8x72xf32> to vector<8x72xf32>
    %c0_162 = arith.constant 0 : index
    %c0_163 = arith.constant 0 : index
    %c0_164 = arith.constant 0 : index
    %c0_165 = arith.constant 0 : index
    %114 = vector.load %arg2[%c0_162, %c0_163, %c0_164, %c0_165] : memref<3x3x16x8xf32, #tpu.memory_space<vmem>>, vector<1x1x16x8xf32>
    %115 = vector.shape_cast %114 : vector<1x1x16x8xf32> to vector<16x8xf32>
    %cst_166 = arith.constant dense<0.000000e+00> : vector<16x72xf32>
    %116 = tpu.matmul %115, %113, %cst_166 {dimension_numbers = #tpu.dot_dimension_numbers<[1], [0], [0], [1], [0, 0, 1, 1], [], []>} : vector<16x8xf32>, vector<8x72xf32>, vector<16x72xf32> -> vector<16x72xf32>
    %117 = arith.addf %111, %116 : vector<16x72xf32>
    %c3_167 = arith.constant 3 : index
    %c0_168 = arith.constant 0 : index
    %c0_169 = arith.constant 0 : index
    %c0_170 = arith.constant 0 : index
    %118 = vector.load %arg1[%c3_167, %c0_168, %c0_169, %c0_170] : memref<4x1x8x90xf32, #tpu.memory_space<vmem>>, vector<1x1x8x72xf32>
    %119 = vector.shape_cast %118 : vector<1x1x8x72xf32> to vector<8x72xf32>
    %c0_171 = arith.constant 0 : index
    %c1_172 = arith.constant 1 : index
    %c0_173 = arith.constant 0 : index
    %c0_174 = arith.constant 0 : index
    %120 = vector.load %arg2[%c0_171, %c1_172, %c0_173, %c0_174] : memref<3x3x16x8xf32, #tpu.memory_space<vmem>>, vector<1x1x16x8xf32>
    %121 = vector.shape_cast %120 : vector<1x1x16x8xf32> to vector<16x8xf32>
    %cst_175 = arith.constant dense<0.000000e+00> : vector<16x72xf32>
    %122 = tpu.matmul %121, %119, %cst_175 {dimension_numbers = #tpu.dot_dimension_numbers<[1], [0], [0], [1], [0, 0, 1, 1], [], []>} : vector<16x8xf32>, vector<8x72xf32>, vector<16x72xf32> -> vector<16x72xf32>
    %123 = arith.addf %117, %122 : vector<16x72xf32>
    %c2_176 = arith.constant 2 : index
    %c0_177 = arith.constant 0 : index
    %c0_178 = arith.constant 0 : index
    %c1_179 = arith.constant 1 : index
    %124 = vector.load %arg1[%c2_176, %c0_177, %c0_178, %c1_179] : memref<4x1x8x90xf32, #tpu.memory_space<vmem>>, vector<1x1x8x72xf32>
    %125 = vector.shape_cast %124 : vector<1x1x8x72xf32> to vector<8x72xf32>
    %c0_180 = arith.constant 0 : index
    %c2_181 = arith.constant 2 : index
    %c0_182 = arith.constant 0 : index
    %c0_183 = arith.constant 0 : index
    %126 = vector.load %arg2[%c0_180, %c2_181, %c0_182, %c0_183] : memref<3x3x16x8xf32, #tpu.memory_space<vmem>>, vector<1x1x16x8xf32>
    %127 = vector.shape_cast %126 : vector<1x1x16x8xf32> to vector<16x8xf32>
    %cst_184 = arith.constant dense<0.000000e+00> : vector<16x72xf32>
    %128 = tpu.matmul %127, %125, %cst_184 {dimension_numbers = #tpu.dot_dimension_numbers<[1], [0], [0], [1], [0, 0, 1, 1], [], []>} : vector<16x8xf32>, vector<8x72xf32>, vector<16x72xf32> -> vector<16x72xf32>
    %129 = arith.addf %123, %128 : vector<16x72xf32>
    %c0_185 = arith.constant 0 : index
    %c0_186 = arith.constant 0 : index
    %c0_187 = arith.constant 0 : index
    %c9_188 = arith.constant 9 : index
    %130 = vector.load %arg1[%c0_185, %c0_186, %c0_187, %c9_188] : memref<4x1x8x90xf32, #tpu.memory_space<vmem>>, vector<1x1x8x72xf32>
    %131 = vector.shape_cast %130 : vector<1x1x8x72xf32> to vector<8x72xf32>
    %c1_189 = arith.constant 1 : index
    %c0_190 = arith.constant 0 : index
    %c0_191 = arith.constant 0 : index
    %c0_192 = arith.constant 0 : index
    %132 = vector.load %arg2[%c1_189, %c0_190, %c0_191, %c0_192] : memref<3x3x16x8xf32, #tpu.memory_space<vmem>>, vector<1x1x16x8xf32>
    %133 = vector.shape_cast %132 : vector<1x1x16x8xf32> to vector<16x8xf32>
    %cst_193 = arith.constant dense<0.000000e+00> : vector<16x72xf32>
    %134 = tpu.matmul %133, %131, %cst_193 {dimension_numbers = #tpu.dot_dimension_numbers<[1], [0], [0], [1], [0, 0, 1, 1], [], []>} : vector<16x8xf32>, vector<8x72xf32>, vector<16x72xf32> -> vector<16x72xf32>
    %135 = arith.addf %129, %134 : vector<16x72xf32>
    %c1_194 = arith.constant 1 : index
    %c0_195 = arith.constant 0 : index
    %c0_196 = arith.constant 0 : index
    %c9_197 = arith.constant 9 : index
    %136 = vector.load %arg1[%c1_194, %c0_195, %c0_196, %c9_197] : memref<4x1x8x90xf32, #tpu.memory_space<vmem>>, vector<1x1x8x72xf32>
    %137 = vector.shape_cast %136 : vector<1x1x8x72xf32> to vector<8x72xf32>
    %c1_198 = arith.constant 1 : index
    %c1_199 = arith.constant 1 : index
    %c0_200 = arith.constant 0 : index
    %c0_201 = arith.constant 0 : index
    %138 = vector.load %arg2[%c1_198, %c1_199, %c0_200, %c0_201] : memref<3x3x16x8xf32, #tpu.memory_space<vmem>>, vector<1x1x16x8xf32>
    %139 = vector.shape_cast %138 : vector<1x1x16x8xf32> to vector<16x8xf32>
    %cst_202 = arith.constant dense<0.000000e+00> : vector<16x72xf32>
    %140 = tpu.matmul %139, %137, %cst_202 {dimension_numbers = #tpu.dot_dimension_numbers<[1], [0], [0], [1], [0, 0, 1, 1], [], []>} : vector<16x8xf32>, vector<8x72xf32>, vector<16x72xf32> -> vector<16x72xf32>
    %141 = arith.addf %135, %140 : vector<16x72xf32>
    %c0_203 = arith.constant 0 : index
    %c0_204 = arith.constant 0 : index
    %c0_205 = arith.constant 0 : index
    %c10_206 = arith.constant 10 : index
    %142 = vector.load %arg1[%c0_203, %c0_204, %c0_205, %c10_206] : memref<4x1x8x90xf32, #tpu.memory_space<vmem>>, vector<1x1x8x72xf32>
    %143 = vector.shape_cast %142 : vector<1x1x8x72xf32> to vector<8x72xf32>
    %c1_207 = arith.constant 1 : index
    %c2_208 = arith.constant 2 : index
    %c0_209 = arith.constant 0 : index
    %c0_210 = arith.constant 0 : index
    %144 = vector.load %arg2[%c1_207, %c2_208, %c0_209, %c0_210] : memref<3x3x16x8xf32, #tpu.memory_space<vmem>>, vector<1x1x16x8xf32>
    %145 = vector.shape_cast %144 : vector<1x1x16x8xf32> to vector<16x8xf32>
    %cst_211 = arith.constant dense<0.000000e+00> : vector<16x72xf32>
    %146 = tpu.matmul %145, %143, %cst_211 {dimension_numbers = #tpu.dot_dimension_numbers<[1], [0], [0], [1], [0, 0, 1, 1], [], []>} : vector<16x8xf32>, vector<8x72xf32>, vector<16x72xf32> -> vector<16x72xf32>
    %147 = arith.addf %141, %146 : vector<16x72xf32>
    %c2_212 = arith.constant 2 : index
    %c0_213 = arith.constant 0 : index
    %c0_214 = arith.constant 0 : index
    %c9_215 = arith.constant 9 : index
    %148 = vector.load %arg1[%c2_212, %c0_213, %c0_214, %c9_215] : memref<4x1x8x90xf32, #tpu.memory_space<vmem>>, vector<1x1x8x72xf32>
    %149 = vector.shape_cast %148 : vector<1x1x8x72xf32> to vector<8x72xf32>
    %c2_216 = arith.constant 2 : index
    %c0_217 = arith.constant 0 : index
    %c0_218 = arith.constant 0 : index
    %c0_219 = arith.constant 0 : index
    %150 = vector.load %arg2[%c2_216, %c0_217, %c0_218, %c0_219] : memref<3x3x16x8xf32, #tpu.memory_space<vmem>>, vector<1x1x16x8xf32>
    %151 = vector.shape_cast %150 : vector<1x1x16x8xf32> to vector<16x8xf32>
    %cst_220 = arith.constant dense<0.000000e+00> : vector<16x72xf32>
    %152 = tpu.matmul %151, %149, %cst_220 {dimension_numbers = #tpu.dot_dimension_numbers<[1], [0], [0], [1], [0, 0, 1, 1], [], []>} : vector<16x8xf32>, vector<8x72xf32>, vector<16x72xf32> -> vector<16x72xf32>
    %153 = arith.addf %147, %152 : vector<16x72xf32>
    %c3_221 = arith.constant 3 : index
    %c0_222 = arith.constant 0 : index
    %c0_223 = arith.constant 0 : index
    %c9_224 = arith.constant 9 : index
    %154 = vector.load %arg1[%c3_221, %c0_222, %c0_223, %c9_224] : memref<4x1x8x90xf32, #tpu.memory_space<vmem>>, vector<1x1x8x72xf32>
    %155 = vector.shape_cast %154 : vector<1x1x8x72xf32> to vector<8x72xf32>
    %c2_225 = arith.constant 2 : index
    %c1_226 = arith.constant 1 : index
    %c0_227 = arith.constant 0 : index
    %c0_228 = arith.constant 0 : index
    %156 = vector.load %arg2[%c2_225, %c1_226, %c0_227, %c0_228] : memref<3x3x16x8xf32, #tpu.memory_space<vmem>>, vector<1x1x16x8xf32>
    %157 = vector.shape_cast %156 : vector<1x1x16x8xf32> to vector<16x8xf32>
    %cst_229 = arith.constant dense<0.000000e+00> : vector<16x72xf32>
    %158 = tpu.matmul %157, %155, %cst_229 {dimension_numbers = #tpu.dot_dimension_numbers<[1], [0], [0], [1], [0, 0, 1, 1], [], []>} : vector<16x8xf32>, vector<8x72xf32>, vector<16x72xf32> -> vector<16x72xf32>
    %159 = arith.addf %153, %158 : vector<16x72xf32>
    %c2_230 = arith.constant 2 : index
    %c0_231 = arith.constant 0 : index
    %c0_232 = arith.constant 0 : index
    %c10_233 = arith.constant 10 : index
    %160 = vector.load %arg1[%c2_230, %c0_231, %c0_232, %c10_233] : memref<4x1x8x90xf32, #tpu.memory_space<vmem>>, vector<1x1x8x72xf32>
    %161 = vector.shape_cast %160 : vector<1x1x8x72xf32> to vector<8x72xf32>
    %c2_234 = arith.constant 2 : index
    %c2_235 = arith.constant 2 : index
    %c0_236 = arith.constant 0 : index
    %c0_237 = arith.constant 0 : index
    %162 = vector.load %arg2[%c2_234, %c2_235, %c0_236, %c0_237] : memref<3x3x16x8xf32, #tpu.memory_space<vmem>>, vector<1x1x16x8xf32>
    %163 = vector.shape_cast %162 : vector<1x1x16x8xf32> to vector<16x8xf32>
    %cst_238 = arith.constant dense<0.000000e+00> : vector<16x72xf32>
    %164 = tpu.matmul %163, %161, %cst_238 {dimension_numbers = #tpu.dot_dimension_numbers<[1], [0], [0], [1], [0, 0, 1, 1], [], []>} : vector<16x8xf32>, vector<8x72xf32>, vector<16x72xf32> -> vector<16x72xf32>
    %165 = arith.addf %159, %164 : vector<16x72xf32>
    %166 = arith.maximumf %110, %165 : vector<16x72xf32>
    %cst_239 = arith.constant 0.000000e+00 : f32
    %167 = vector.broadcast %cst_239 : f32 to vector<16x72xf32>
    %c3_240 = arith.constant 3 : index
    %c0_241 = arith.constant 0 : index
    %c0_242 = arith.constant 0 : index
    %c0_243 = arith.constant 0 : index
    %168 = vector.load %arg1[%c3_240, %c0_241, %c0_242, %c0_243] : memref<4x1x8x90xf32, #tpu.memory_space<vmem>>, vector<1x1x8x72xf32>
    %169 = vector.shape_cast %168 : vector<1x1x8x72xf32> to vector<8x72xf32>
    %c0_244 = arith.constant 0 : index
    %c0_245 = arith.constant 0 : index
    %c0_246 = arith.constant 0 : index
    %c0_247 = arith.constant 0 : index
    %170 = vector.load %arg2[%c0_244, %c0_245, %c0_246, %c0_247] : memref<3x3x16x8xf32, #tpu.memory_space<vmem>>, vector<1x1x16x8xf32>
    %171 = vector.shape_cast %170 : vector<1x1x16x8xf32> to vector<16x8xf32>
    %cst_248 = arith.constant dense<0.000000e+00> : vector<16x72xf32>
    %172 = tpu.matmul %171, %169, %cst_248 {dimension_numbers = #tpu.dot_dimension_numbers<[1], [0], [0], [1], [0, 0, 1, 1], [], []>} : vector<16x8xf32>, vector<8x72xf32>, vector<16x72xf32> -> vector<16x72xf32>
    %173 = arith.addf %167, %172 : vector<16x72xf32>
    %c2_249 = arith.constant 2 : index
    %c0_250 = arith.constant 0 : index
    %c0_251 = arith.constant 0 : index
    %c1_252 = arith.constant 1 : index
    %174 = vector.load %arg1[%c2_249, %c0_250, %c0_251, %c1_252] : memref<4x1x8x90xf32, #tpu.memory_space<vmem>>, vector<1x1x8x72xf32>
    %175 = vector.shape_cast %174 : vector<1x1x8x72xf32> to vector<8x72xf32>
    %c0_253 = arith.constant 0 : index
    %c1_254 = arith.constant 1 : index
    %c0_255 = arith.constant 0 : index
    %c0_256 = arith.constant 0 : index
    %176 = vector.load %arg2[%c0_253, %c1_254, %c0_255, %c0_256] : memref<3x3x16x8xf32, #tpu.memory_space<vmem>>, vector<1x1x16x8xf32>
    %177 = vector.shape_cast %176 : vector<1x1x16x8xf32> to vector<16x8xf32>
    %cst_257 = arith.constant dense<0.000000e+00> : vector<16x72xf32>
    %178 = tpu.matmul %177, %175, %cst_257 {dimension_numbers = #tpu.dot_dimension_numbers<[1], [0], [0], [1], [0, 0, 1, 1], [], []>} : vector<16x8xf32>, vector<8x72xf32>, vector<16x72xf32> -> vector<16x72xf32>
    %179 = arith.addf %173, %178 : vector<16x72xf32>
    %c3_258 = arith.constant 3 : index
    %c0_259 = arith.constant 0 : index
    %c0_260 = arith.constant 0 : index
    %c1_261 = arith.constant 1 : index
    %180 = vector.load %arg1[%c3_258, %c0_259, %c0_260, %c1_261] : memref<4x1x8x90xf32, #tpu.memory_space<vmem>>, vector<1x1x8x72xf32>
    %181 = vector.shape_cast %180 : vector<1x1x8x72xf32> to vector<8x72xf32>
    %c0_262 = arith.constant 0 : index
    %c2_263 = arith.constant 2 : index
    %c0_264 = arith.constant 0 : index
    %c0_265 = arith.constant 0 : index
    %182 = vector.load %arg2[%c0_262, %c2_263, %c0_264, %c0_265] : memref<3x3x16x8xf32, #tpu.memory_space<vmem>>, vector<1x1x16x8xf32>
    %183 = vector.shape_cast %182 : vector<1x1x16x8xf32> to vector<16x8xf32>
    %cst_266 = arith.constant dense<0.000000e+00> : vector<16x72xf32>
    %184 = tpu.matmul %183, %181, %cst_266 {dimension_numbers = #tpu.dot_dimension_numbers<[1], [0], [0], [1], [0, 0, 1, 1], [], []>} : vector<16x8xf32>, vector<8x72xf32>, vector<16x72xf32> -> vector<16x72xf32>
    %185 = arith.addf %179, %184 : vector<16x72xf32>
    %c1_267 = arith.constant 1 : index
    %c0_268 = arith.constant 0 : index
    %c0_269 = arith.constant 0 : index
    %c9_270 = arith.constant 9 : index
    %186 = vector.load %arg1[%c1_267, %c0_268, %c0_269, %c9_270] : memref<4x1x8x90xf32, #tpu.memory_space<vmem>>, vector<1x1x8x72xf32>
    %187 = vector.shape_cast %186 : vector<1x1x8x72xf32> to vector<8x72xf32>
    %c1_271 = arith.constant 1 : index
    %c0_272 = arith.constant 0 : index
    %c0_273 = arith.constant 0 : index
    %c0_274 = arith.constant 0 : index
    %188 = vector.load %arg2[%c1_271, %c0_272, %c0_273, %c0_274] : memref<3x3x16x8xf32, #tpu.memory_space<vmem>>, vector<1x1x16x8xf32>
    %189 = vector.shape_cast %188 : vector<1x1x16x8xf32> to vector<16x8xf32>
    %cst_275 = arith.constant dense<0.000000e+00> : vector<16x72xf32>
    %190 = tpu.matmul %189, %187, %cst_275 {dimension_numbers = #tpu.dot_dimension_numbers<[1], [0], [0], [1], [0, 0, 1, 1], [], []>} : vector<16x8xf32>, vector<8x72xf32>, vector<16x72xf32> -> vector<16x72xf32>
    %191 = arith.addf %185, %190 : vector<16x72xf32>
    %c0_276 = arith.constant 0 : index
    %c0_277 = arith.constant 0 : index
    %c0_278 = arith.constant 0 : index
    %c10_279 = arith.constant 10 : index
    %192 = vector.load %arg1[%c0_276, %c0_277, %c0_278, %c10_279] : memref<4x1x8x90xf32, #tpu.memory_space<vmem>>, vector<1x1x8x72xf32>
    %193 = vector.shape_cast %192 : vector<1x1x8x72xf32> to vector<8x72xf32>
    %c1_280 = arith.constant 1 : index
    %c1_281 = arith.constant 1 : index
    %c0_282 = arith.constant 0 : index
    %c0_283 = arith.constant 0 : index
    %194 = vector.load %arg2[%c1_280, %c1_281, %c0_282, %c0_283] : memref<3x3x16x8xf32, #tpu.memory_space<vmem>>, vector<1x1x16x8xf32>
    %195 = vector.shape_cast %194 : vector<1x1x16x8xf32> to vector<16x8xf32>
    %cst_284 = arith.constant dense<0.000000e+00> : vector<16x72xf32>
    %196 = tpu.matmul %195, %193, %cst_284 {dimension_numbers = #tpu.dot_dimension_numbers<[1], [0], [0], [1], [0, 0, 1, 1], [], []>} : vector<16x8xf32>, vector<8x72xf32>, vector<16x72xf32> -> vector<16x72xf32>
    %197 = arith.addf %191, %196 : vector<16x72xf32>
    %c1_285 = arith.constant 1 : index
    %c0_286 = arith.constant 0 : index
    %c0_287 = arith.constant 0 : index
    %c10_288 = arith.constant 10 : index
    %198 = vector.load %arg1[%c1_285, %c0_286, %c0_287, %c10_288] : memref<4x1x8x90xf32, #tpu.memory_space<vmem>>, vector<1x1x8x72xf32>
    %199 = vector.shape_cast %198 : vector<1x1x8x72xf32> to vector<8x72xf32>
    %c1_289 = arith.constant 1 : index
    %c2_290 = arith.constant 2 : index
    %c0_291 = arith.constant 0 : index
    %c0_292 = arith.constant 0 : index
    %200 = vector.load %arg2[%c1_289, %c2_290, %c0_291, %c0_292] : memref<3x3x16x8xf32, #tpu.memory_space<vmem>>, vector<1x1x16x8xf32>
    %201 = vector.shape_cast %200 : vector<1x1x16x8xf32> to vector<16x8xf32>
    %cst_293 = arith.constant dense<0.000000e+00> : vector<16x72xf32>
    %202 = tpu.matmul %201, %199, %cst_293 {dimension_numbers = #tpu.dot_dimension_numbers<[1], [0], [0], [1], [0, 0, 1, 1], [], []>} : vector<16x8xf32>, vector<8x72xf32>, vector<16x72xf32> -> vector<16x72xf32>
    %203 = arith.addf %197, %202 : vector<16x72xf32>
    %c3_294 = arith.constant 3 : index
    %c0_295 = arith.constant 0 : index
    %c0_296 = arith.constant 0 : index
    %c9_297 = arith.constant 9 : index
    %204 = vector.load %arg1[%c3_294, %c0_295, %c0_296, %c9_297] : memref<4x1x8x90xf32, #tpu.memory_space<vmem>>, vector<1x1x8x72xf32>
    %205 = vector.shape_cast %204 : vector<1x1x8x72xf32> to vector<8x72xf32>
    %c2_298 = arith.constant 2 : index
    %c0_299 = arith.constant 0 : index
    %c0_300 = arith.constant 0 : index
    %c0_301 = arith.constant 0 : index
    %206 = vector.load %arg2[%c2_298, %c0_299, %c0_300, %c0_301] : memref<3x3x16x8xf32, #tpu.memory_space<vmem>>, vector<1x1x16x8xf32>
    %207 = vector.shape_cast %206 : vector<1x1x16x8xf32> to vector<16x8xf32>
    %cst_302 = arith.constant dense<0.000000e+00> : vector<16x72xf32>
    %208 = tpu.matmul %207, %205, %cst_302 {dimension_numbers = #tpu.dot_dimension_numbers<[1], [0], [0], [1], [0, 0, 1, 1], [], []>} : vector<16x8xf32>, vector<8x72xf32>, vector<16x72xf32> -> vector<16x72xf32>
    %209 = arith.addf %203, %208 : vector<16x72xf32>
    %c2_303 = arith.constant 2 : index
    %c0_304 = arith.constant 0 : index
    %c0_305 = arith.constant 0 : index
    %c10_306 = arith.constant 10 : index
    %210 = vector.load %arg1[%c2_303, %c0_304, %c0_305, %c10_306] : memref<4x1x8x90xf32, #tpu.memory_space<vmem>>, vector<1x1x8x72xf32>
    %211 = vector.shape_cast %210 : vector<1x1x8x72xf32> to vector<8x72xf32>
    %c2_307 = arith.constant 2 : index
    %c1_308 = arith.constant 1 : index
    %c0_309 = arith.constant 0 : index
    %c0_310 = arith.constant 0 : index
    %212 = vector.load %arg2[%c2_307, %c1_308, %c0_309, %c0_310] : memref<3x3x16x8xf32, #tpu.memory_space<vmem>>, vector<1x1x16x8xf32>
    %213 = vector.shape_cast %212 : vector<1x1x16x8xf32> to vector<16x8xf32>
    %cst_311 = arith.constant dense<0.000000e+00> : vector<16x72xf32>
    %214 = tpu.matmul %213, %211, %cst_311 {dimension_numbers = #tpu.dot_dimension_numbers<[1], [0], [0], [1], [0, 0, 1, 1], [], []>} : vector<16x8xf32>, vector<8x72xf32>, vector<16x72xf32> -> vector<16x72xf32>
    %215 = arith.addf %209, %214 : vector<16x72xf32>
    %c3_312 = arith.constant 3 : index
    %c0_313 = arith.constant 0 : index
    %c0_314 = arith.constant 0 : index
    %c10_315 = arith.constant 10 : index
    %216 = vector.load %arg1[%c3_312, %c0_313, %c0_314, %c10_315] : memref<4x1x8x90xf32, #tpu.memory_space<vmem>>, vector<1x1x8x72xf32>
    %217 = vector.shape_cast %216 : vector<1x1x8x72xf32> to vector<8x72xf32>
    %c2_316 = arith.constant 2 : index
    %c2_317 = arith.constant 2 : index
    %c0_318 = arith.constant 0 : index
    %c0_319 = arith.constant 0 : index
    %218 = vector.load %arg2[%c2_316, %c2_317, %c0_318, %c0_319] : memref<3x3x16x8xf32, #tpu.memory_space<vmem>>, vector<1x1x16x8xf32>
    %219 = vector.shape_cast %218 : vector<1x1x16x8xf32> to vector<16x8xf32>
    %cst_320 = arith.constant dense<0.000000e+00> : vector<16x72xf32>
    %220 = tpu.matmul %219, %217, %cst_320 {dimension_numbers = #tpu.dot_dimension_numbers<[1], [0], [0], [1], [0, 0, 1, 1], [], []>} : vector<16x8xf32>, vector<8x72xf32>, vector<16x72xf32> -> vector<16x72xf32>
    %221 = arith.addf %215, %220 : vector<16x72xf32>
    %222 = arith.maximumf %166, %221 : vector<16x72xf32>
    %c0_321 = arith.constant 0 : index
    %c0_322 = arith.constant 0 : index
    %223 = vector.load %arg3[%c0_321, %c0_322] : memref<16x1xf32, #tpu.memory_space<vmem>>, vector<16x1xf32>
    %224 = vector.broadcast %223 : vector<16x1xf32> to vector<16x72xf32>
    %225 = arith.addf %222, %224 : vector<16x72xf32>
    %cst_323 = arith.constant 0.000000e+00 : f32
    %226 = vector.broadcast %cst_323 : f32 to vector<16x72xf32>
    %227 = arith.maximumf %225, %226 : vector<16x72xf32>
    %c0_324 = arith.constant 0 : index
    %c0_325 = arith.constant 0 : index
    %c0_326 = arith.constant 0 : index
    %228 = vector.load %arg4[%c0_324, %c0_325, %c0_326] : memref<1x16x72xf32, #tpu.memory_space<vmem>>, vector<1x16x72xf32>
    %229 = vector.shape_cast %228 : vector<1x16x72xf32> to vector<16x72xf32>
    %230 = vector.shape_cast %227 : vector<16x72xf32> to vector<1x16x72xf32>
    tpu.vector_store %arg4[%c0_324, %c0_325, %c0_326], %230 {strides = array<i32>} : memref<1x16x72xf32, #tpu.memory_space<vmem>>, vector<1x16x72xf32>,
    return
  }
  func.func @transform_0(%arg0: i32) -> (i32, i32, i32, i32) {
    %c0_i32 = arith.constant 0 : i32
    %c0_i32_0 = arith.constant 0 : i32
    %c0_i32_1 = arith.constant 0 : i32
    %c0_i32_2 = arith.constant 0 : i32
    return %c0_i32, %arg0, %c0_i32_0, %c0_i32_1 : i32, i32, i32, i32
  }
  func.func @transform_1(%arg0: i32) -> (i32, i32, i32, i32) {
    %c0_i32 = arith.constant 0 : i32
    %c0_i32_0 = arith.constant 0 : i32
    %c0_i32_1 = arith.constant 0 : i32
    %c0_i32_2 = arith.constant 0 : i32
    %c0_i32_3 = arith.constant 0 : i32
    return %c0_i32, %c0_i32_0, %c0_i32_1, %c0_i32_2 : i32, i32, i32, i32
  }
  func.func @transform_2(%arg0: i32) -> (i32, i32) {
    %c0_i32 = arith.constant 0 : i32
    %c0_i32_0 = arith.constant 0 : i32
    %c0_i32_1 = arith.constant 0 : i32
    return %c0_i32, %c0_i32_0 : i32, i32
  }
  func.func @transform_3(%arg0: i32) -> (i32, i32, i32) {
    %c0_i32 = arith.constant 0 : i32
    %c0_i32_0 = arith.constant 0 : i32
    %c0_i32_1 = arith.constant 0 : i32
    return %arg0, %c0_i32, %c0_i32_0 : i32, i32, i32
  }
}

module attributes {stable_mosaic.version = 11 : i64} {
  func.func @_fc_head_kernel(%arg0: memref<2x1024xf32, #tpu.memory_space<vmem>>, %arg1: memref<1024x16xf32, #tpu.memory_space<vmem>>, %arg2: memref<1x16xf32, #tpu.memory_space<vmem>>, %arg3: memref<16x6xf32, #tpu.memory_space<vmem>>, %arg4: memref<1x6xf32, #tpu.memory_space<vmem>>, %arg5: memref<2x6xf32, #tpu.memory_space<vmem>>) attributes {dimension_semantics = [], scalar_prefetch = 0 : i64, scratch_operands = 0 : i64, tpu.core_type = #tpu.core_type<tc>} {
    %c0 = arith.constant 0 : index
    %c0_0 = arith.constant 0 : index
    %0 = vector.load %arg0[%c0, %c0_0] : memref<2x1024xf32, #tpu.memory_space<vmem>>, vector<2x1024xf32>
    %c0_1 = arith.constant 0 : index
    %c0_2 = arith.constant 0 : index
    %1 = vector.load %arg1[%c0_1, %c0_2] : memref<1024x16xf32, #tpu.memory_space<vmem>>, vector<1024x16xf32>
    %cst = arith.constant dense<0.000000e+00> : vector<2x16xf32>
    %2 = tpu.matmul %0, %1, %cst {dimension_numbers = #tpu.dot_dimension_numbers<[1], [0], [0], [1], [0, 0, 1, 1], [], []>} : vector<2x1024xf32>, vector<1024x16xf32>, vector<2x16xf32> -> vector<2x16xf32>
    %c0_3 = arith.constant 0 : index
    %c0_4 = arith.constant 0 : index
    %3 = vector.load %arg2[%c0_3, %c0_4] : memref<1x16xf32, #tpu.memory_space<vmem>>, vector<1x16xf32>
    %4 = vector.broadcast %3 : vector<1x16xf32> to vector<2x16xf32>
    %5 = arith.addf %2, %4 : vector<2x16xf32>
    %cst_5 = arith.constant 0.000000e+00 : f32
    %6 = vector.broadcast %cst_5 : f32 to vector<2x16xf32>
    %7 = arith.maximumf %5, %6 : vector<2x16xf32>
    %c0_6 = arith.constant 0 : index
    %c0_7 = arith.constant 0 : index
    %8 = vector.load %arg3[%c0_6, %c0_7] : memref<16x6xf32, #tpu.memory_space<vmem>>, vector<16x6xf32>
    %cst_8 = arith.constant dense<0.000000e+00> : vector<2x6xf32>
    %9 = tpu.matmul %7, %8, %cst_8 {dimension_numbers = #tpu.dot_dimension_numbers<[1], [0], [0], [1], [0, 0, 1, 1], [], []>} : vector<2x16xf32>, vector<16x6xf32>, vector<2x6xf32> -> vector<2x6xf32>
    %c0_9 = arith.constant 0 : index
    %c0_10 = arith.constant 0 : index
    %10 = vector.load %arg4[%c0_9, %c0_10] : memref<1x6xf32, #tpu.memory_space<vmem>>, vector<1x6xf32>
    %11 = vector.broadcast %10 : vector<1x6xf32> to vector<2x6xf32>
    %12 = arith.addf %9, %11 : vector<2x6xf32>
    %cst_11 = arith.constant dense<0xFF800000> : vector<2xf32>
    %13 = vector.multi_reduction <maximumf>, %12, %cst_11 [1] : vector<2x6xf32> to vector<2xf32>
    %14 = vector.shape_cast %13 : vector<2xf32> to vector<2x1xf32>
    %15 = vector.broadcast %14 : vector<2x1xf32> to vector<2x6xf32>
    %16 = arith.subf %12, %15 : vector<2x6xf32>
    %17 = math.exp %16 : vector<2x6xf32>
    %cst_12 = arith.constant dense<0.000000e+00> : vector<2xf32>
    %18 = vector.multi_reduction <add>, %17, %cst_12 [1] : vector<2x6xf32> to vector<2xf32>
    %19 = vector.shape_cast %18 : vector<2xf32> to vector<2x1xf32>
    %20 = math.log %19 : vector<2x1xf32>
    %21 = vector.broadcast %20 : vector<2x1xf32> to vector<2x6xf32>
    %22 = arith.subf %16, %21 : vector<2x6xf32>
    %c0_13 = arith.constant 0 : index
    %c0_14 = arith.constant 0 : index
    %23 = vector.load %arg5[%c0_13, %c0_14] : memref<2x6xf32, #tpu.memory_space<vmem>>, vector<2x6xf32>
    tpu.vector_store %arg5[%c0_13, %c0_14], %22 {strides = array<i32>} : memref<2x6xf32, #tpu.memory_space<vmem>>, vector<2x6xf32>,
    return
  }
}

</mosaic_0001>

<bundles_post_ra>
// kernel: image_regression_forward.4
= control target key start
LH: loop header
LB: loop body
LE: loop exit
PB: predicated region body
PF: predicated region fallthrough
CT: control target
= control target key end

     0   :  { %s15568_s12 = smov 0   ;;  %s15570_s13 = smov 0   ;;  %s17621_s0 = inlined_call_operand.vmem [shape: f32[4,2,3,1122], index: 0, kind: input, shape index: {}]   ;;  %s17622_s1 = inlined_call_operand.vmem [shape: f32[3,3,4,3], index: 1, kind: input, shape index: {}]   ;;  %s17623_s2 = inlined_call_operand.vmem [shape: f32[4,1], index: 2, kind: input, shape index: {}]   ;;  %s17624_s3 = inlined_call_operand.vmem [shape: f32[2,4,1056], index: 3, kind: output, shape index: {}]  }
   0x1   :  { %s15572_s14 = smov 0  }
   0x2 LB: > { %s14248_s15 = sadd.s32 4294967295, %s15540_s14   ;;  %s15585_s16 = sadd.s32 1, %s15540_s14   ;;  %s15540_s14 = sphi %s15572_s14, %s17684_s14   ;;  %s15536_s13 = sphi %s15570_s13, %s17683_s13   ;;  %s15532_s12 = sphi %s15568_s12, %s17682_s12  }
   0x3   : > { %s17_s17 = ssub.s32 %s15540_s14, %s15585_s16  ;;  %s20_s18 = sadd.s32 1, %s15536_s13 }
   0x4   : > { %p18_p0 = scmp.eq.s32.totalorder %s17_s17, 0  ;;  %p27_p1 = scmp.ne.s32.totalorder %s15536_s13, %s15532_s12 }
   0x5   : > { %p28_p2 = scmp.eq.s32.totalorder %s15540_s14, 0  ;;  %p14251_p4 = scmp.ge.s32.totalorder %s15540_s14, 2 }
   0x6   : > { %s15594_s19 = scalar_select %p18_p0, %s15536_s13, %s20_s18  }
   0x7   : > { %p29_p3 = por %p28_p2, %p27_p1  ;;  %127 = sbr.rel (%p14251_p4) target bundleno = 29 (0x1d), region = 24 }
   0xe   : > { %130 = sbr.rel (!%p29_p3) target bundleno = 29 (0x1d), region = 28  ;;  %s132_s20 = sand.u32 (%p29_p3), 1, %s15536_s13  }
   0xf   : > { %s15410_s21 = smul.u32 (%p29_p3), 36, %s15540_s14 }
  0x10   : > { %s15409_s22 = smul.u32 (%p29_p3), 144, %s132_s20 }
  0x11   : > { %s15602_s25 = scalar_lea.vmem (%p29_p3), %s17621_s0, %s15410_s21 }
  0x12   : > { %v152_v0 = vld [vmem:[%s15602_s25] sm:$0xff] (%p29_p3)  ;;  %v154_v1 = vld [vmem:[%s15602_s25 + $0x8] sm:$0xff] (%p29_p3)  ;;  %v156_v2 = vld [vmem:[%s15602_s25 + $0x10] sm:$0xff] (%p29_p3)  ;;  %s15607_s26 = scalar_lea.vmem (%p29_p3), [#allocation2], %s15409_s22 }
  0x13   : > { %153 = vst [vmem:[%s15607_s26] sm:$0xff] (%p29_p3), %v152_v0  ;;  %155 = vst [vmem:[%s15607_s26 + $0x8] sm:$0xff] (%p29_p3), %v154_v1  ;;  %v158_v3 = vld [vmem:[%s15602_s25 + $0x18] sm:$0xff] (%p29_p3)  ;;  %v160_v4 = vld [vmem:[%s15602_s25 + $0x48] sm:$0xff] (%p29_p3) }
  0x14   : > { %157 = vst [vmem:[%s15607_s26 + $0x10] sm:$0xff] (%p29_p3), %v156_v2  ;;  %v162_v5 = vld [vmem:[%s15602_s25 + $0x50] sm:$0xff] (%p29_p3)  ;;  %159 = vst [vmem:[%s15607_s26 + $0x18] sm:$0xff] (%p29_p3), %v158_v3  ;;  %v164_v6 = vld [vmem:[%s15602_s25 + $0x58] sm:$0xff] (%p29_p3) }
  0x15   : > { %161 = vst [vmem:[%s15607_s26 + $0x24] sm:$0xff] %v160_v4  ;;  %163 = vst [vmem:[%s15607_s26 + $0x2c] sm:$0xff] %v162_v5  ;;  %v166_v7 = vld [vmem:[%s15602_s25 + $0x60] sm:$0xff]  ;;  %v168_v8 = vld [vmem:[%s15602_s25 + $0x90] sm:$0xff] }
  0x16   : > { %165 = vst [vmem:[%s15607_s26 + $0x34] sm:$0xff] %v164_v6  ;;  %167 = vst [vmem:[%s15607_s26 + $0x3c] sm:$0xff] %v166_v7  ;;  %v170_v9 = vld [vmem:[%s15602_s25 + $0x98] sm:$0xff]  ;;  %v172_v10 = vld [vmem:[%s15602_s25 + $0xa0] sm:$0xff] }
  0x17   : > { %169 = vst [vmem:[%s15607_s26 + $0x48] sm:$0xff] %v168_v8  ;;  %v174_v11 = vld [vmem:[%s15602_s25 + $0xa8] sm:$0xff]  ;;  %171 = vst [vmem:[%s15607_s26 + $0x50] sm:$0xff] %v170_v9  ;;  %v176_v12 = vld [vmem:[%s15602_s25 + $0xd8] sm:$0xff] }
  0x18   : > { %173 = vst [vmem:[%s15607_s26 + $0x58] sm:$0xff] %v172_v10  ;;  %175 = vst [vmem:[%s15607_s26 + $0x60] sm:$0xff] %v174_v11  ;;  %v178_v13 = vld [vmem:[%s15602_s25 + $0xe0] sm:$0xff]  ;;  %v180_v14 = vld [vmem:[%s15602_s25 + $0xe8] sm:$0xff] }
  0x19   : > { %177 = vst [vmem:[%s15607_s26 + $0x6c] sm:$0xff] %v176_v12  ;;  %179 = vst [vmem:[%s15607_s26 + $0x74] sm:$0xff] %v178_v13  ;;  %v182_v15 = vld [vmem:[%s15602_s25 + $0xf0] sm:$0xff]  ;;  %v14253_v16 = vld [vmem:[%s15602_s25 + $0x20] sm:$0xf] }
  0x1a   : > { %181 = vst [vmem:[%s15607_s26 + $0x7c] sm:$0xff] %v180_v14  ;;  %v14255_v17 = vld [vmem:[%s15602_s25 + $0x68] sm:$0xf]  ;;  %183 = vst [vmem:[%s15607_s26 + $0x84] sm:$0xff] %v182_v15  ;;  %v14257_v18 = vld [vmem:[%s15602_s25 + $0xb0] sm:$0xf] }
  0x1b   : > { %14254 = vst [vmem:[%s15607_s26 + $0x20] sm:$0xf] %v14253_v16  ;;  %14256 = vst [vmem:[%s15607_s26 + $0x44] sm:$0xf] %v14255_v17  ;;  %v14259_v19 = vld [vmem:[%s15602_s25 + $0xf8] sm:$0xf] }
  0x1c   : > { %14258 = vst [vmem:[%s15607_s26 + $0x68] sm:$0xf] %v14257_v18  ;;  %14260 = vst [vmem:[%s15607_s26 + $0x8c] sm:$0xf] %v14259_v19 }
  0x1d PF: > { %p14261_p5 = scmp.ge.s32.totalorder %s15540_s14, 1  ;;  %p203_p6 = scmp.lt.s32.totalorder %s15540_s14, 3 }
  0x1f   : > { %p204_p7 = pnand %p14261_p5, %p203_p6 }
  0x21   : > { %207 = sbr.rel (%p204_p7) target bundleno = 765 (0x2fd), region = 54 }
  0x28   : > { %s210_s27 = sand.u32 1, %s15532_s12   ;;  %v17635_v20 = vmov 0.0   ;;  %s15543_s30 = smov 127   ;;  %vm265_vm0 = vcmask 1042432   ;;  %v15686_v35 = vld [vmem:[%s17622_s1 + $0x4] sm:$0xf] }
  0x29   : > { %s15411_s28 = smul.u32 144, %s210_s27  ;;  %348 = vmatprep.mubr.f32.mxu0 %v17635_v20  ;;  %4021 = vmatprep.mubr.f32.mxu1 %v17635_v20  ;;  %vm261_vm1 = vcmask 23552   ;;  %vm15544_vm2 = vmmov 0   ;;  %v15759_v55 = vld [vmem:[%s17622_s1] sm:$0xf]  ;;  %s15545_s8 = smov 95  }
  0x2a   : > { %s15546_s9 = smov 94   ;;  %vm1056_vm3 = vcmask 1039360   ;;  %vm2711_vm4 = vcmask 777216   ;;  %vm3564_vm5 = vcmask 769024   ;;  %p233_p8 = scmp.lt.s32.totalorder %s14248_s15, 1  ;;  %vm14181_vm6 = vcmask 257024  }
  0x2b   : > { %s15651_s29 = scalar_lea.vmem [#allocation2], %s15411_s28 }
  0x2c   : > { %v1023_v21 = vld [vmem:[%s15651_s29 + $0x8] sm:$0x77]  ;;  %v1022_v22 = vld [vmem:[%s15651_s29] sm:$0x77]  ;;  %v1024_v25 = vld [vmem:[%s15651_s29 + $0x10] sm:$0x77] }
  0x2d   : > { %1042 = vrot.lane.b32.xlu0 %v1023_v21, %s15543_s30  ;;  %v1035_v23 = vcombine.high %v1023_v21, %v1023_v21  ;;  %1038 = vrot.lane.b32.xlu1 %v1022_v22, %s15543_s30  ;;  %v1034_v24 = vcombine.high %v1022_v22, %v1022_v22  ;;  %v1036_v26 = vcombine.high %v1024_v25, %v1024_v25  ;;  %v1025_v27 = vld [vmem:[%s15651_s29 + $0x18] sm:$0x77]  ;;  %v15662_v28 = vld [vmem:[%s15651_s29 + $0x24] sm:$0x77]  ;;  %s17686_s15 = smov (!%p233_p8, %s14248_s15), 1 }
  0x2e   : > { %v1037_v29 = vcombine.high %v1025_v27, %v1025_v27  ;;  %v15668_v30 = vcombine.high %v15662_v28, %v15662_v28  ;;  %v15671_v31 = vld [vmem:[%s15651_s29 + $0x2c] sm:$0x77]  ;;  %v14450_v32 = vld [vmem:[%s15651_s29 + $0x24] sm:$0x77]  ;;  %v15679_v34 = vld [vmem:[%s15651_s29 + $0x34] sm:$0x77] }
  0x2f   : > { %v15676_v33 = vcombine.high %v15671_v31, %v15671_v31  ;;  %v15692_v36 = vcombine.high %v15679_v34, %v15679_v34  ;;  %v4675_v37 = vcombine.high %v14450_v32, %v14450_v32  ;;  %v15697_v38 = vld [vmem:[%s15651_s29 + $0x3c] sm:$0x77]  ;;  %v14451_v41 = vld [vmem:[%s15651_s29 + $0x2c] sm:$0x77]  ;;  %v14452_v44 = vld [vmem:[%s15651_s29 + $0x34] sm:$0x77] }
  0x30   : > { %14269 = vmatprep.subr.msk.mxu0 %vm265_vm0, %v15668_v30  ;;  %v1026_v39 = vld [vmem:[%s15651_s29 + $0x20] sm:$0x7]  ;;  %v15711_v40 = vcombine.high %v15697_v38, %v15697_v38  ;;  %v4676_v42 = vcombine.high %v14451_v41, %v14451_v41  ;;  %v15734_v45 = vld [vmem:[%s15651_s29 + $0x44] sm:$0x7]  ;;  %v4677_v47 = vcombine.high %v14452_v44, %v14452_v44  ;;  %v239_v48 = vld [vmem:[%s15651_s29 + $0x8] sm:$0x77] }
  0x31   : > { %1044 = vrot.lane.b32.xlu1 %v1035_v23, %s15543_s30  ;;  %1040 = vrot.lane.b32.xlu0 %v1034_v24, %s15543_s30  ;;  %v238_v43 = vld [vmem:[%s15651_s29] sm:$0x77]  ;;  %v644_v50 = vcombine.high %v239_v48, %v239_v48  ;;  %v240_v52 = vld [vmem:[%s15651_s29 + $0x10] sm:$0x77]  ;;  %s15412_s27 = smul.u32 36, %s17686_s15 }
  0x32   : > { %14270 = vmatpush1.msk.msra.mxu0 %vm265_vm0, %v15662_v28  ;;  %v643_v46 = vcombine.high %v238_v43, %v238_v43  ;;  %v14453_v49 = vld [vmem:[%s15651_s29 + $0x3c] sm:$0x77]  ;;  %v14454_v53 = vld [vmem:[%s15651_s29 + $0x44] sm:$0x7]  ;;  %v14352_v54 = vld [vmem:[%s15651_s29 + $0x48] sm:$0x77]  ;;  %v645_v56 = vcombine.high %v240_v52, %v240_v52 }
  0x33   : > { %14271 = vmatmul.mubr.msk.f32.vlgmr.msra.gmra.mrb[0].mxu0 %vm261_vm1, %v15686_v35  ;;  %14272 = vmatprep.subr.msk.mxu0 %vm265_vm0, %v15676_v33  ;;  %v4678_v51 = vcombine.high %v14453_v49, %v14453_v49  ;;  %v2263_v57 = vcombine.high %v14352_v54, %v14352_v54  ;;  %v241_v58 = vld [vmem:[%s15651_s29 + $0x18] sm:$0x77]  ;;  %v14353_v59 = vld [vmem:[%s15651_s29 + $0x50] sm:$0x77]  ;;  %v14355_v0 = vld [vmem:[%s15651_s29 + $0x60] sm:$0x77]  ;;  %s17604_s14 = scalar_lea.vmem %s17624_s3, %s15412_s27 }
  0x34   : > { %14273 = vmatpush1.msk.msra.mxu0 %vm265_vm0, %v15671_v31  ;;  %419 = vmatprep.mubr.f32.mxu0 %v17635_v20  ;;  %v646_v60 = vcombine.high %v241_v58, %v241_v58  ;;  %v2264_v61 = vcombine.high %v14353_v59, %v14353_v59  ;;  %v14354_v62 = vld [vmem:[%s15651_s29 + $0x58] sm:$0x77]  ;;  %v242_v1 = vld [vmem:[%s15651_s29 + $0x20] sm:$0x7]  ;;  %v2266_v2 = vcombine.high %v14355_v0, %v14355_v0  ;;  %v14497_v3 = vld [vmem:[%s15651_s29 + $0x6c] sm:$0x77] }
  0x35   : > { %1048 = vrot.lane.b32.xlu1 %v1036_v26, %s15543_s30  ;;  %1046 = vrot.lane.b32.xlu0 %v1024_v25, %s15543_s30  ;;  %v2265_v63 = vcombine.high %v14354_v62, %v14354_v62  ;;  %v5822_v4 = vcombine.high %v14497_v3, %v14497_v3  ;;  %v14356_v5 = vld [vmem:[%s15651_s29 + $0x68] sm:$0x7]  ;;  %v14498_v6 = vld [vmem:[%s15651_s29 + $0x74] sm:$0x77] }
  0x36   : > { %14275 = vmatprep.subr.msk.mxu0 %vm265_vm0, %v15692_v36  ;;  %v5823_v7 = vcombine.high %v14498_v6, %v14498_v6  ;;  %v14499_v8 = vld [vmem:[%s15651_s29 + $0x7c] sm:$0x77]  ;;  %v14500_v10 = vld [vmem:[%s15651_s29 + $0x84] sm:$0x77]  ;;  %v14501_v12 = vld [vmem:[%s15651_s29 + $0x8c] sm:$0x7] }
  0x37   : > { %14274 = vmatmul.mubr.msk.f32.vlgmr.msra.gmra.mrb[2].mxu0 %vm261_vm1, %v15686_v35  ;;  %v5824_v9 = vcombine.high %v14499_v8, %v14499_v8  ;;  %v5825_v11 = vcombine.high %v14500_v10, %v14500_v10  ;;  %v2677_v13 = vld [vmem:[%s15651_s29] sm:$0x77]  ;;  %v2678_v15 = vld [vmem:[%s15651_s29 + $0x8] sm:$0x77]  ;;  %v2679_v21 = vld [vmem:[%s15651_s29 + $0x10] sm:$0x77] }
  0x38   : > { %14276 = vmatpush1.msk.msra.mxu0 %vm265_vm0, %v15679_v34  ;;  %490 = vmatprep.mubr.f32.mxu0 %v17635_v20  ;;  %v2689_v14 = vcombine.high %v2677_v13, %v2677_v13  ;;  %v14387_v16 = vld [vmem:[%s15651_s29 + $0x24] sm:$0x77]  ;;  %v14388_v18 = vld [vmem:[%s15651_s29 + $0x2c] sm:$0x77]  ;;  %v2690_v19 = vcombine.high %v2678_v15, %v2678_v15  ;;  %v14389_v23 = vld [vmem:[%s15651_s29 + $0x34] sm:$0x77]  ;;  %v2691_v24 = vcombine.high %v2679_v21, %v2679_v21 }
  0x39   : > { %1052 = vrot.lane.b32.xlu1 %v1037_v29, %s15543_s30  ;;  %1050 = vrot.lane.b32.xlu0 %v1025_v27, %s15543_s30  ;;  %v3116_v17 = vcombine.high %v14387_v16, %v14387_v16  ;;  %v3117_v22 = vcombine.high %v14388_v18, %v14388_v18  ;;  %v2680_v25 = vld [vmem:[%s15651_s29 + $0x18] sm:$0x77]  ;;  %v3118_v26 = vcombine.high %v14389_v23, %v14389_v23 }
  0x3a   : > { %14278 = vmatprep.subr.msk.mxu0 %vm265_vm0, %v15711_v40  ;;  %v14390_v27 = vld [vmem:[%s15651_s29 + $0x3c] sm:$0x77]  ;;  %v2692_v29 = vcombine.high %v2680_v25, %v2680_v25 }
  0x3b   : > { %14277 = vmatmul.mubr.msk.f32.vlgmr.msra.gmra.mrb[4].mxu0 %vm261_vm1, %v15686_v35 }
  0x3c   : > { %14279 = vmatpush1.msk.msra.mxu0 %vm265_vm0, %v15697_v38  ;;  %561 = vmatprep.mubr.f32.mxu0 %v17635_v20 }
  0x3d   : > { %4681 = vrot.lane.b32.xlu1 %v4675_v37, %s15543_s30  ;;  %1054 = vrot.lane.b32.xlu0 %v1026_v39, %s15543_s30  ;;  %v3119_v37 = vcombine.high %v14390_v27, %v14390_v27  ;;  %v14391_v39 = vld [vmem:[%s15651_s29 + $0x44] sm:$0x7] }
  0x3e   : > { %14909 = vmatprep.subr.mxu0 %v17635_v20 }
  0x3f   : > { %14280 = vmatmul.mubr.msk.f32.vlgmr.msra.gmra.mrb[6].mxu0 %vm261_vm1, %v15686_v35 }
  0x40   : > { %14910 = vmatpush3.msk.msra.mxu0 %vm265_vm0, %v15734_v45  ;;  %14911 = vmatprep.mubr.msk.f32.mxu0 %vm15544_vm2, %v17635_v20 }
  0x41   : > { %4679 = vrot.lane.b32.xlu1 %v14450_v32, %s15543_s30  ;;  %4683 = vrot.lane.b32.xlu0 %v14451_v41, %s15543_s30  ;;  %v2681_v32 = vld [vmem:[%s15651_s29 + $0x20] sm:$0x7] }
  0x42   : > { %14283 = vmatprep.subr.msk.mxu0 %vm265_vm0, %v643_v46  ;;  %v3530_v41 = vld [vmem:[%s15651_s29] sm:$0x77]  ;;  %v3532_v46 = vld [vmem:[%s15651_s29 + $0x10] sm:$0x77] }
  0x43   : > { %14912 = vmatmul.mubr.msk.f32.vlgmr.msra.gmra.mrb[8].mxu0 %vm261_vm1, %v15686_v35 }
  0x44   : > { %14284 = vmatpush1.msk.msra.mxu0 %vm265_vm0, %v238_v43  ;;  %732 = vmatprep.mubr.f32.mxu0 %v17635_v20  ;;  %v3531_v43 = vld [vmem:[%s15651_s29 + $0x8] sm:$0x77] }
  0x45   : > { %4687 = vrot.lane.b32.xlu1 %v14452_v44, %s15543_s30  ;;  %4685 = vrot.lane.b32.xlu0 %v4676_v42, %s15543_s30  ;;  %v3542_v42 = vcombine.high %v3530_v41, %v3530_v41  ;;  %v3543_v44 = vcombine.high %v3531_v43, %v3531_v43 }
  0x46   : > { %14286 = vmatprep.subr.msk.mxu0 %vm265_vm0, %v644_v50 }
  0x47   : > { %14285 = vmatmul.mubr.msk.f32.vlgmr.msra.gmra.mrb[0].mxu0 %vm261_vm1, %v15759_v55 }
  0x48   : > { %14287 = vmatpush1.msk.msra.mxu0 %vm265_vm0, %v239_v48  ;;  %803 = vmatprep.mubr.f32.mxu0 %v17635_v20 }
  0x49   : > { %4691 = vrot.lane.b32.xlu1 %v14453_v49, %s15543_s30  ;;  %4689 = vrot.lane.b32.xlu0 %v4677_v47, %s15543_s30  ;;  %v3544_v47 = vcombine.high %v3532_v46, %v3532_v46 }
  0x4a   : > { %14289 = vmatprep.subr.msk.mxu0 %vm265_vm0, %v645_v56 }
  0x4b   : > { %14288 = vmatmul.mubr.msk.f32.vlgmr.msra.gmra.mrb[2].mxu0 %vm261_vm1, %v15759_v55 }
  0x4c   : > { %14290 = vmatpush1.msk.msra.mxu0 %vm265_vm0, %v240_v52  ;;  %874 = vmatprep.mubr.f32.mxu0 %v17635_v20 }
  0x4d   : > { %4695 = vrot.lane.b32.xlu1 %v14454_v53, %s15543_s30  ;;  %4693 = vrot.lane.b32.xlu0 %v4678_v51, %s15543_s30 }
  0x4e   : > { %14292 = vmatprep.subr.msk.mxu0 %vm265_vm0, %v646_v60 }
  0x4f   : > { %14291 = vmatmul.mubr.msk.f32.vlgmr.msra.gmra.mrb[4].mxu0 %vm261_vm1, %v15759_v55 }
  0x50   : > { %14293 = vmatpush1.msk.msra.mxu0 %vm265_vm0, %v241_v58  ;;  %945 = vmatprep.mubr.f32.mxu0 %v17635_v20 }
  0x51   : > { %2271 = vrot.lane.b32.xlu1 %v14353_v59, %s15543_s30  ;;  %2269 = vrot.lane.b32.xlu0 %v2263_v57, %s15543_s30 }
  0x52   : > { %14914 = vmatprep.subr.mxu0 %v17635_v20 }
  0x53   : > { %14294 = vmatmul.mubr.msk.f32.vlgmr.msra.gmra.mrb[6].mxu0 %vm261_vm1, %v15759_v55 }
  0x54   : > { %14915 = vmatpush3.msk.msra.mxu0 %vm265_vm0, %v242_v1  ;;  %14916 = vmatprep.mubr.msk.f32.mxu0 %vm15544_vm2, %v17635_v20 }
  0x55   : > { %2273 = vrot.lane.b32.xlu1 %v2264_v61, %s15543_s30  ;;  %2267 = vrot.lane.b32.xlu0 %v14352_v54, %s15543_s30  ;;  %v15858_v54 = vld [vmem:[%s17622_s1 + $0x8] sm:$0xf] }
  0x57   : > { %14917 = vmatmul.mubr.msk.f32.vlgmr.msra.gmra.mrb[8].mxu0 %vm261_vm1, %v15759_v55 }
  0x58   : > { %1150 = vmatprep.mubr.f32.mxu0 %v17635_v20 }
  0x59   : > { %2277 = vrot.lane.b32.xlu1 %v2265_v63, %s15543_s30  ;;  %2275 = vrot.lane.b32.xlu0 %v14354_v62, %s15543_s30 }
  0x5d   : > { %2281 = vrot.lane.b32.xlu1 %v2266_v2, %s15543_s30  ;;  %2279 = vrot.lane.b32.xlu0 %v14355_v0, %s15543_s30 }
  0x61   : > { %5828 = vrot.lane.b32.xlu1 %v5822_v4, %s15543_s30  ;;  %2283 = vrot.lane.b32.xlu0 %v14356_v5, %s15543_s30 }
  0x65   : > { %5826 = vrot.lane.b32.xlu1 %v14497_v3, %s15543_s30  ;;  %5830 = vrot.lane.b32.xlu0 %v14498_v6, %s15543_s30  ;;  %v3533_v6 = vld [vmem:[%s15651_s29 + $0x18] sm:$0x77] }
  0x69   : > { %5834 = vrot.lane.b32.xlu1 %v14499_v8, %s15543_s30  ;;  %5832 = vrot.lane.b32.xlu0 %v5823_v7, %s15543_s30  ;;  %v3545_v7 = vcombine.high %v3533_v6, %v3533_v6  ;;  %v15914_v8 = vld [vmem:[%s15651_s29 + $0x48] sm:$0x77] }
  0x6d   : > { %5838 = vrot.lane.b32.xlu1 %v14500_v10, %s15543_s30  ;;  %5836 = vrot.lane.b32.xlu0 %v5824_v9, %s15543_s30 }
  0x71   : > { %5842 = vrot.lane.b32.xlu1 %v14501_v12, %s15543_s30  ;;  %5840 = vrot.lane.b32.xlu0 %v5825_v11, %s15543_s30  ;;  %v3534_v11 = vld [vmem:[%s15651_s29 + $0x20] sm:$0x7]  ;;  %v15932_v12 = vcombine.high %v15914_v8, %v15914_v8 }
  0x75   : > { %2697 = vrot.lane.b32.xlu1 %v2678_v15, %s15545_s8  ;;  %2695 = vrot.lane.b32.xlu0 %v2689_v14, %s15545_s8 }
  0x79   : > { %3122 = vrot.lane.b32.xlu1 %v3116_v17, %s15545_s8  ;;  %2693 = vrot.lane.b32.xlu0 %v2677_v13, %s15545_s8  ;;  %v15938_v13 = vld [vmem:[%s15651_s29 + $0x50] sm:$0x77] }
  0x7d   : > { %3120 = vrot.lane.b32.xlu1 %v14387_v16, %s15545_s8  ;;  %3124 = vrot.lane.b32.xlu0 %v14388_v18, %s15545_s8 }
  0x81   : > { %2701 = vrot.lane.b32.xlu1 %v2679_v21, %s15545_s8  ;;  %2699 = vrot.lane.b32.xlu0 %v2690_v19, %s15545_s8 }
  0x85   : > { %3128 = vrot.lane.b32.xlu1 %v14389_v23, %s15545_s8  ;;  %3126 = vrot.lane.b32.xlu0 %v3117_v22, %s15545_s8 }
  0x89   : > { %2705 = vrot.lane.b32.xlu1 %v2680_v25, %s15545_s8  ;;  %2703 = vrot.lane.b32.xlu0 %v2691_v24, %s15545_s8  ;;  %v16048_v24 = vld [vmem:[%s15651_s29 + $0x6c] sm:$0x77] }
  0x8d   : > { %3132 = vrot.lane.b32.xlu1 %v14390_v27, %s15545_s8  ;;  %3130 = vrot.lane.b32.xlu0 %v3118_v26, %s15545_s8  ;;  %v14545_v27 = vld [vmem:[%s15651_s29 + $0x2c] sm:$0x77] }
  0x91   : > { %2709 = vrot.lane.b32.xlu1 %v2681_v32, %s15545_s8  ;;  %2707 = vrot.lane.b32.xlu0 %v2692_v29, %s15545_s8  ;;  %v16072_v32 = vcombine.high %v16048_v24, %v16048_v24 }
  0x95   : > { %3136 = vrot.lane.b32.xlu1 %v14391_v39, %s15545_s8  ;;  %3134 = vrot.lane.b32.xlu0 %v3119_v37, %s15545_s8 }
  0x99   : > { %3548 = vrot.lane.b32.xlu0 %v3542_v42, %s15546_s9  ;;  %3550 = vrot.lane.b32.xlu1 %v3531_v43, %s15546_s9  ;;  %v16099_v43 = vld [vmem:[%s17622_s1 + $0x10] sm:$0xf] }
  0x9d   : > { %3546 = vrot.lane.b32.xlu0 %v3530_v41, %s15546_s9  ;;  %3552 = vrot.lane.b32.xlu1 %v3543_v44, %s15546_s9  ;;  %v16085_v41 = vld [vmem:[%s15651_s29 + $0x74] sm:$0x77] }
  0x9e   : > { %v14546_v44 = vld [vmem:[%s15651_s29 + $0x34] sm:$0x77] }
  0x9f   : > { %v1043_v48 = vpop.permute.xlu0 %1042  ;;  %v1039_v49 = vpop.permute.xlu1 %1038 }
  0xa1   : > { %3554 = vrot.lane.b32.xlu0 %v3532_v46, %s15546_s9  ;;  %3556 = vrot.lane.b32.xlu1 %v3544_v47, %s15546_s9  ;;  %v16110_v47 = vcombine.high %v16085_v41, %v16085_v41 }
  0xa3   : > { %v1045_v50 = vpop.permute.xlu1 %1044  ;;  %v1041_v51 = vpop.permute.xlu0 %1040 }
  0xa4   : > { %v1057_v52 = vsel %vm1056_vm3, %v1039_v49, %v1041_v51  ;;  %v1058_v53 = vsel %vm1056_vm3, %v1041_v51, %v1043_v48  ;;  %v1059_v59 = vsel %vm1056_vm3, %v1043_v48, %v1045_v50  ;;  %v16122_v51 = vld [vmem:[%s15651_s29 + $0x7c] sm:$0x77] }
  0xa5   : > { %14298 = vmatprep.subr.msk.mxu0 %vm265_vm0, %v1058_v53  ;;  %14422 = vmatprep.subr.msk.mxu1 %vm265_vm0, %v1058_v53  ;;  %v14547_v53 = vld [vmem:[%s15651_s29 + $0x3c] sm:$0x77] }
  0xa6   : > { %14299 = vmatpush1.msk.msra.mxu0 %vm265_vm0, %v1057_v52  ;;  %14423 = vmatpush1.msk.msra.mxu1 %vm265_vm0, %v1057_v52 }
  0xa7   : > { %v1049_v56 = vpop.permute.xlu1 %1048  ;;  %14424 = vmatmul.mubr.msk.f32.vlgmr.msra.gmra.mrb[0].mxu1 %vm261_vm1, %v15686_v35  ;;  %v1047_v57 = vpop.permute.xlu0 %1046  ;;  %14300 = vmatmul.mubr.msk.f32.vlgmr.msra.gmra.mrb[0].mxu0 %vm261_vm1, %v15858_v54 }
  0xa8   : > { %v1060_v58 = vsel %vm1056_vm3, %v1045_v50, %v1047_v57  ;;  %4092 = vmatprep.mubr.f32.mxu1 %v17635_v20  ;;  %1221 = vmatprep.mubr.f32.mxu0 %v17635_v20  ;;  %v1061_v63 = vsel %vm1056_vm3, %v1047_v57, %v1049_v56  ;;  %v6971_v50 = vcombine.high %v14546_v44, %v14546_v44 }
  0xa9   : > { %14301 = vmatprep.subr.msk.mxu0 %vm265_vm0, %v1060_v58  ;;  %14425 = vmatprep.subr.msk.mxu1 %vm265_vm0, %v1060_v58 }
  0xaa   : > { %14302 = vmatpush1.msk.msra.mxu0 %vm265_vm0, %v1059_v59  ;;  %14426 = vmatpush1.msk.msra.mxu1 %vm265_vm0, %v1059_v59  ;;  %v16146_v59 = vcombine.high %v16122_v51, %v16122_v51 }
  0xab   : > { %v1053_v60 = vpop.permute.xlu1 %1052  ;;  %14427 = vmatmul.mubr.msk.f32.vlgmr.msra.gmra.mrb[2].mxu1 %vm261_vm1, %v15686_v35  ;;  %v1051_v61 = vpop.permute.xlu0 %1050  ;;  %14303 = vmatmul.mubr.msk.f32.vlgmr.msra.gmra.mrb[2].mxu0 %vm261_vm1, %v15858_v54 }
  0xac   : > { %v1062_v62 = vsel %vm1056_vm3, %v1049_v56, %v1051_v61  ;;  %4163 = vmatprep.mubr.f32.mxu1 %v17635_v20  ;;  %1292 = vmatprep.mubr.f32.mxu0 %v17635_v20  ;;  %v1063_v3 = vsel %vm1056_vm3, %v1051_v61, %v1053_v60  ;;  %v16154_v61 = vld [vmem:[%s15651_s29 + $0x84] sm:$0x77] }
  0xad   : > { %14304 = vmatprep.subr.msk.mxu0 %vm265_vm0, %v1062_v62  ;;  %14428 = vmatprep.subr.msk.mxu1 %vm265_vm0, %v1062_v62 }
  0xae   : > { %14305 = vmatpush1.msk.msra.mxu0 %vm265_vm0, %v1061_v63  ;;  %14429 = vmatpush1.msk.msra.mxu1 %vm265_vm0, %v1061_v63  ;;  %v14548_v63 = vld [vmem:[%s15651_s29 + $0x44] sm:$0x7] }
  0xaf   : > { %v15888_v0 = vpop.permute.xlu1 %4681  ;;  %14430 = vmatmul.mubr.msk.f32.vlgmr.msra.gmra.mrb[4].mxu1 %vm261_vm1, %v15686_v35  ;;  %v1055_v1 = vpop.permute.xlu0 %1054  ;;  %14306 = vmatmul.mubr.msk.f32.vlgmr.msra.gmra.mrb[4].mxu0 %vm261_vm1, %v15858_v54 }
  0xb0   : > { %v1064_v2 = vsel %vm1056_vm3, %v1053_v60, %v1055_v1  ;;  %4234 = vmatprep.mubr.f32.mxu1 %v17635_v20  ;;  %1363 = vmatprep.mubr.f32.mxu0 %v17635_v20  ;;  %v6972_v60 = vcombine.high %v14547_v53, %v14547_v53 }
  0xb1   : > { %14307 = vmatprep.subr.msk.mxu0 %vm265_vm0, %v1064_v2  ;;  %14431 = vmatprep.subr.msk.mxu1 %vm265_vm0, %v1064_v2  ;;  %v16175_v2 = vcombine.high %v16154_v61, %v16154_v61 }
  0xb2   : > { %14308 = vmatpush1.msk.msra.mxu0 %vm265_vm0, %v1063_v3  ;;  %14432 = vmatpush1.msk.msra.mxu1 %vm265_vm0, %v1063_v3 }
  0xb3   : > { %v15902_v4 = vpop.permute.xlu1 %4679  ;;  %14433 = vmatmul.mubr.msk.f32.vlgmr.msra.gmra.mrb[6].mxu1 %vm261_vm1, %v15686_v35  ;;  %14954 = vmatprep.subr.mxu1 %v17635_v20  ;;  %v15907_v5 = vpop.permute.xlu0 %4683 }
  0xb4   : > { %14919 = vmatprep.subr.mxu0 %v17635_v20  ;;  %14309 = vmatmul.mubr.msk.f32.vlgmr.msra.gmra.mrb[6].mxu0 %vm261_vm1, %v15858_v54 }
  0xb5   : > { %14920 = vmatpush3.msk.msra.mxu0 %vm265_vm0, %v1055_v1  ;;  %14955 = vmatpush3.msk.msra.mxu1 %vm265_vm0, %v1055_v1 }
  0xb6   : > { %3558 = vrot.lane.b32.xlu0 %v3533_v6, %s15546_s9  ;;  %14956 = vmatprep.mubr.msk.f32.mxu1 %vm15544_vm2, %v17635_v20 }
  0xb7   : > { %v15921_v9 = vpop.permute.xlu1 %4687  ;;  %14957 = vmatmul.mubr.msk.f32.vlgmr.msra.gmra.mrb[8].mxu1 %vm261_vm1, %v15686_v35  ;;  %v15925_v10 = vpop.permute.xlu0 %4685  ;;  %14921 = vmatprep.mubr.msk.f32.mxu0 %vm15544_vm2, %v17635_v20  ;;  %v15949_v35 = vld [vmem:[%s17622_s1 + $0xc] sm:$0xf] }
  0xb8   : > { %3560 = vrot.lane.b32.xlu1 %v3545_v7, %s15546_s9  ;;  %14922 = vmatmul.mubr.msk.f32.vlgmr.msra.gmra.mrb[8].mxu0 %vm261_vm1, %v15858_v54  ;;  %v4700_v29 = vsel %vm1056_vm3, %v15925_v10, %v15921_v9  ;;  %v4699_v42 = vsel %vm1056_vm3, %v15907_v5, %v15925_v10 }
  0xb9   : > { %14436 = vmatprep.subr.msk.mxu1 %vm265_vm0, %v15668_v30  ;;  %4375 = vmatprep.mubr.f32.mxu1 %v17635_v20  ;;  %v15961_v30 = vcombine.high %v15938_v13, %v15938_v13 }
  0xba   : > { %3562 = vrot.lane.b32.xlu0 %v3534_v11, %s15546_s9  ;;  %14437 = vmatpush1.msk.msra.mxu1 %vm265_vm0, %v15662_v28  ;;  %v15967_v28 = vld [vmem:[%s15651_s29 + $0x58] sm:$0x77] }
  0xbb   : > { %v15951_v14 = vpop.permute.xlu1 %4691  ;;  %v15953_v15 = vpop.permute.xlu0 %4689  ;;  %14318 = vmatprep.subr.msk.mxu0 %vm265_vm0, %v15932_v12  ;;  %14438 = vmatmul.mubr.msk.f32.vlgmr.msra.gmra.mrb[0].mxu1 %vm261_vm1, %v15759_v55  ;;  %v15986_v18 = vcombine.high %v15967_v28, %v15967_v28 }
  0xbc   : > { %14319 = vmatpush1.msk.msra.mxu0 %vm265_vm0, %v15914_v8  ;;  %1551 = vmatprep.mubr.f32.mxu0 %v17635_v20  ;;  %v4702_v46 = vsel %vm1056_vm3, %v15953_v15, %v15951_v14  ;;  %v4701_v52 = vsel %vm1056_vm3, %v15921_v9, %v15953_v15  ;;  %v16248_v15 = vld [vmem:[%s17622_s1 + $0x14] sm:$0xf] }
  0xbd   : > { %14320 = vmatmul.mubr.msk.f32.vlgmr.msra.gmra.mrb[0].mxu0 %vm261_vm1, %v15949_v35  ;;  %14439 = vmatprep.subr.msk.mxu1 %vm265_vm0, %v15676_v33 }
  0xbe   : > { %14440 = vmatpush1.msk.msra.mxu1 %vm265_vm0, %v15671_v31  ;;  %4446 = vmatprep.mubr.f32.mxu1 %v17635_v20  ;;  %v15992_v31 = vld [vmem:[%s15651_s29 + $0x60] sm:$0x77] }
  0xbf   : > { %v15976_v16 = vpop.permute.xlu1 %4695  ;;  %v15978_v17 = vpop.permute.xlu0 %4693  ;;  %14321 = vmatprep.subr.msk.mxu0 %vm265_vm0, %v15961_v30  ;;  %14441 = vmatmul.mubr.msk.f32.vlgmr.msra.gmra.mrb[2].mxu1 %vm261_vm1, %v15759_v55  ;;  %v16011_v21 = vcombine.high %v15992_v31, %v15992_v31 }
  0xc0   : > { %14322 = vmatpush1.msk.msra.mxu0 %vm265_vm0, %v15938_v13  ;;  %1622 = vmatprep.mubr.f32.mxu0 %v17635_v20  ;;  %v4704_v56 = vsel %vm1056_vm3, %v15978_v17, %v15976_v16  ;;  %v4703_v62 = vsel %vm1056_vm3, %v15951_v14, %v15978_v17 }
  0xc1   : > { %14323 = vmatmul.mubr.msk.f32.vlgmr.msra.gmra.mrb[2].mxu0 %vm261_vm1, %v15949_v35  ;;  %14442 = vmatprep.subr.msk.mxu1 %vm265_vm0, %v15692_v36  ;;  %v14544_v36 = vld [vmem:[%s15651_s29 + $0x24] sm:$0x77] }
  0xc2   : > { %14443 = vmatpush1.msk.msra.mxu1 %vm265_vm0, %v15679_v34  ;;  %4517 = vmatprep.mubr.f32.mxu1 %v17635_v20  ;;  %v6969_v34 = vcombine.high %v14544_v36, %v14544_v36 }
  0xc3   : > { %v16001_v33 = vpop.permute.xlu1 %2271  ;;  %v16003_v19 = vpop.permute.xlu0 %2269  ;;  %14324 = vmatprep.subr.msk.mxu0 %vm265_vm0, %v15986_v18  ;;  %14444 = vmatmul.mubr.msk.f32.vlgmr.msra.gmra.mrb[4].mxu1 %vm261_vm1, %v15759_v55 }
  0xc4   : > { %14325 = vmatpush1.msk.msra.mxu0 %vm265_vm0, %v15967_v28  ;;  %1693 = vmatprep.mubr.f32.mxu0 %v17635_v20  ;;  %v16205_v6 = vsel %vm1056_vm3, %v16003_v19, %v16001_v33 }
  0xc5   : > { %14326 = vmatmul.mubr.msk.f32.vlgmr.msra.gmra.mrb[4].mxu0 %vm261_vm1, %v15949_v35  ;;  %14445 = vmatprep.subr.msk.mxu1 %vm265_vm0, %v15711_v40  ;;  %v16045_v40 = vld [vmem:[%s15651_s29 + $0x68] sm:$0x7] }
  0xc6   : > { %14446 = vmatpush1.msk.msra.mxu1 %vm265_vm0, %v15697_v38  ;;  %4588 = vmatprep.mubr.f32.mxu1 %v17635_v20  ;;  %v4698_v38 = vsel %vm1056_vm3, %v15888_v0, %v15907_v5  ;;  %v16197_v5 = vld [vmem:[%s15651_s29 + $0x8c] sm:$0x7] }
  0xc7   : > { %v16024_v22 = vpop.permute.xlu1 %2273  ;;  %v16026_v23 = vpop.permute.xlu0 %2267  ;;  %14327 = vmatprep.subr.msk.mxu0 %vm265_vm0, %v16011_v21  ;;  %14447 = vmatmul.mubr.msk.f32.vlgmr.msra.gmra.mrb[6].mxu1 %vm261_vm1, %v15759_v55 }
  0xc8   : > { %14959 = vmatprep.subr.mxu1 %v17635_v20  ;;  %14328 = vmatpush1.msk.msra.mxu0 %vm265_vm0, %v15992_v31  ;;  %v16221_v10 = vsel %vm1056_vm3, %v16026_v23, %v16003_v19 }
  0xc9   : > { %1764 = vmatprep.mubr.f32.mxu0 %v17635_v20  ;;  %14960 = vmatpush3.msk.msra.mxu1 %vm265_vm0, %v15734_v45  ;;  %v4697_v45 = vsel %vm1056_vm3, %v15902_v4, %v15888_v0 }
  0xca   : > { %6975 = vrot.lane.b32.xlu1 %v6969_v34, %s15546_s9  ;;  %14329 = vmatmul.mubr.msk.f32.vlgmr.msra.gmra.mrb[6].mxu0 %vm261_vm1, %v15949_v35 }
  0xcb   : > { %14455 = vmatprep.subr.msk.mxu1 %vm265_vm0, %v4698_v38  ;;  %14961 = vmatprep.mubr.msk.f32.mxu1 %vm15544_vm2, %v17635_v20  ;;  %v16053_v25 = vpop.permute.xlu1 %2277  ;;  %v16055_v26 = vpop.permute.xlu0 %2275 }
  0xcc   : > { %14924 = vmatprep.subr.mxu0 %v17635_v20  ;;  %14962 = vmatmul.mubr.msk.f32.vlgmr.msra.gmra.mrb[8].mxu1 %vm261_vm1, %v15759_v55  ;;  %v6970_v55 = vcombine.high %v14545_v27, %v14545_v27  ;;  %v16230_v11 = vsel %vm1056_vm3, %v16024_v22, %v16055_v26 }
  0xcd   : > { %14456 = vmatpush1.msk.msra.mxu1 %vm265_vm0, %v4697_v45  ;;  %14925 = vmatpush3.msk.msra.mxu0 %vm265_vm0, %v16045_v40 }
  0xce   : > { %14926 = vmatprep.mubr.msk.f32.mxu0 %vm15544_vm2, %v17635_v20  ;;  %6973 = vrot.lane.b32.xlu1 %v14544_v36, %s15546_s9  ;;  %v16282_v36 = vsel %vm1056_vm3, %v16055_v26, %v16053_v25 }
  0xcf   : > { %6977 = vrot.lane.b32.xlu0 %v14545_v27, %s15546_s9  ;;  %14927 = vmatmul.mubr.msk.f32.vlgmr.msra.gmra.mrb[8].mxu0 %vm261_vm1, %v15949_v35  ;;  %v16080_v37 = vpop.permute.xlu1 %2281  ;;  %v16082_v39 = vpop.permute.xlu0 %2279 }
  0xd0   : > { %4787 = vmatprep.mubr.f32.mxu1 %v17635_v20  ;;  %14458 = vmatprep.subr.msk.mxu1 %vm265_vm0, %v4700_v29  ;;  %v16270_v19 = vsel %vm1056_vm3, %v16053_v25, %v16082_v39  ;;  %v16311_v38 = vsel %vm1056_vm3, %v16082_v39, %v16080_v37  ;;  %v16365_v39 = vld [vmem:[%s17622_s1 + $0x18] sm:$0xf] }
  0xd1   : > { %14338 = vmatprep.subr.msk.mxu0 %vm265_vm0, %v16072_v32  ;;  %14457 = vmatmul.mubr.msk.f32.vlgmr.msra.gmra.mrb[0].mxu1 %vm261_vm1, %v15858_v54 }
  0xd2   : > { %14459 = vmatpush1.msk.msra.mxu1 %vm265_vm0, %v4699_v42  ;;  %14339 = vmatpush1.msk.msra.mxu0 %vm265_vm0, %v16048_v24 }
  0xd3   : > { %1952 = vmatprep.mubr.f32.mxu0 %v17635_v20  ;;  %6979 = vrot.lane.b32.xlu0 %v6970_v55, %s15546_s9  ;;  %v16114_v48 = vpop.permute.xlu1 %5828  ;;  %v16116_v49 = vpop.permute.xlu0 %2283 }
  0xd4   : > { %14340 = vmatmul.mubr.msk.f32.vlgmr.msra.gmra.mrb[0].mxu0 %vm261_vm1, %v16099_v43  ;;  %6981 = vrot.lane.b32.xlu1 %v14546_v44, %s15546_s9  ;;  %v16306_v23 = vsel %vm1056_vm3, %v16080_v37, %v16116_v49 }
  0xd5   : > { %4858 = vmatprep.mubr.f32.mxu1 %v17635_v20  ;;  %14461 = vmatprep.subr.msk.mxu1 %vm265_vm0, %v4702_v46 }
  0xd6   : > { %14341 = vmatprep.subr.msk.mxu0 %vm265_vm0, %v16110_v47  ;;  %14460 = vmatmul.mubr.msk.f32.vlgmr.msra.gmra.mrb[2].mxu1 %vm261_vm1, %v15858_v54 }
  0xd7   : > { %14462 = vmatpush1.msk.msra.mxu1 %vm265_vm0, %v4701_v52  ;;  %14342 = vmatpush1.msk.msra.mxu0 %vm265_vm0, %v16085_v41  ;;  %v16140_v57 = vpop.permute.xlu1 %5826  ;;  %v16142_v58 = vpop.permute.xlu0 %5830 }
  0xd8   : > { %2023 = vmatprep.mubr.f32.mxu0 %v17635_v20  ;;  %6983 = vrot.lane.b32.xlu0 %v6971_v50, %s15546_s9 }
  0xd9   : > { %14343 = vmatmul.mubr.msk.f32.vlgmr.msra.gmra.mrb[2].mxu0 %vm261_vm1, %v16099_v43  ;;  %6985 = vrot.lane.b32.xlu1 %v14547_v53, %s15546_s9 }
  0xda   : > { %4929 = vmatprep.mubr.f32.mxu1 %v17635_v20  ;;  %14464 = vmatprep.subr.msk.mxu1 %vm265_vm0, %v4704_v56 }
  0xdb   : > { %14344 = vmatprep.subr.msk.mxu0 %vm265_vm0, %v16146_v59  ;;  %14463 = vmatmul.mubr.msk.f32.vlgmr.msra.gmra.mrb[4].mxu1 %vm261_vm1, %v15858_v54  ;;  %v16166_v0 = vpop.permute.xlu1 %5834  ;;  %v16168_v1 = vpop.permute.xlu0 %5832 }
  0xdc   : > { %14465 = vmatpush1.msk.msra.mxu1 %vm265_vm0, %v4703_v62  ;;  %14345 = vmatpush1.msk.msra.mxu0 %vm265_vm0, %v16122_v51 }
  0xdd   : > { %2094 = vmatprep.mubr.f32.mxu0 %v17635_v20  ;;  %6987 = vrot.lane.b32.xlu0 %v6972_v60, %s15546_s9 }
  0xde   : > { %14346 = vmatmul.mubr.msk.f32.vlgmr.msra.gmra.mrb[4].mxu0 %vm261_vm1, %v16099_v43  ;;  %6989 = vrot.lane.b32.xlu1 %v14548_v63, %s15546_s9 }
  0xdf   : > { %5000 = vmatprep.mubr.f32.mxu1 %v17635_v20  ;;  %14964 = vmatprep.subr.mxu1 %v17635_v20  ;;  %v16184_v3 = vpop.permute.xlu1 %5838  ;;  %v16186_v4 = vpop.permute.xlu0 %5836 }
  0xe0   : > { %14347 = vmatprep.subr.msk.mxu0 %vm265_vm0, %v16175_v2  ;;  %14466 = vmatmul.mubr.msk.f32.vlgmr.msra.gmra.mrb[6].mxu1 %vm261_vm1, %v15858_v54 }
  0xe1   : > { %14965 = vmatpush3.msk.msra.mxu1 %vm265_vm0, %v15976_v16  ;;  %14348 = vmatpush1.msk.msra.mxu0 %vm265_vm0, %v16154_v61  ;;  %v16253_v16 = vsel %vm1056_vm3, %v16001_v33, %v16024_v22 }
  0xe2   : > { %2165 = vmatprep.mubr.f32.mxu0 %v17635_v20  ;;  %14966 = vmatprep.mubr.msk.f32.mxu1 %vm15544_vm2, %v17635_v20 }
  0xe3   : > { %14349 = vmatmul.mubr.msk.f32.vlgmr.msra.gmra.mrb[6].mxu0 %vm261_vm1, %v16099_v43  ;;  %14929 = vmatprep.subr.mxu0 %v17635_v20  ;;  %v16210_v7 = vpop.permute.xlu1 %5842  ;;  %v16212_v9 = vpop.permute.xlu0 %5840 }
  0xe4   : > { %17651 = vst [vmem:[#allocation3_spill] sm:$0xff] %v16210_v7  ;;  %14967 = vmatmul.mubr.msk.f32.vlgmr.msra.gmra.mrb[8].mxu1 %vm261_vm1, %v15858_v54  ;;  %14930 = vmatpush3.msk.msra.mxu0 %vm265_vm0, %v16197_v5 }
  0xe5   : > { %14931 = vmatprep.mubr.msk.f32.mxu0 %vm15544_vm2, %v17635_v20  ;;  %14469 = vmatprep.subr.msk.mxu1 %vm265_vm0, %v16072_v32 }
  0xe6   : > { %14358 = vmatprep.subr.msk.mxu0 %vm265_vm0, %v16205_v6  ;;  %14470 = vmatpush1.msk.msra.mxu1 %vm265_vm0, %v16048_v24 }
  0xe7   : > { %14932 = vmatmul.mubr.msk.f32.vlgmr.msra.gmra.mrb[8].mxu0 %vm261_vm1, %v16099_v43  ;;  %5150 = vmatprep.mubr.f32.mxu1 %v17635_v20  ;;  %v16239_v54 = vpop.permute.xlu1 %2697  ;;  %v2696_v14 = vpop.permute.xlu0 %2695 }
  0xe8   : > { %14359 = vmatpush1.msk.msra.mxu0 %vm265_vm0, %v16221_v10  ;;  %14471 = vmatmul.mubr.msk.f32.vlgmr.msra.gmra.mrb[0].mxu1 %vm261_vm1, %v15949_v35  ;;  %v16342_v29 = vsel %vm2711_vm4, %v2696_v14, %v16239_v54 }
  0xe9   : > { %2378 = vmatprep.mubr.f32.mxu0 %v17635_v20  ;;  %14361 = vmatprep.subr.msk.mxu0 %vm265_vm0, %v16230_v11 }
  0xea   : > { %14472 = vmatprep.subr.msk.mxu1 %vm265_vm0, %v16110_v47  ;;  %5221 = vmatprep.mubr.f32.mxu1 %v17635_v20 }
  0xeb   : > { %14360 = vmatmul.mubr.msk.f32.vlgmr.msra.gmra.mrb[0].mxu0 %vm261_vm1, %v16248_v15  ;;  %14473 = vmatpush1.msk.msra.mxu1 %vm265_vm0, %v16085_v41  ;;  %v16265_v17 = vpop.permute.xlu1 %3122  ;;  %v2694_v33 = vpop.permute.xlu0 %2693 }
  0xec   : > { %14362 = vmatpush1.msk.msra.mxu0 %vm265_vm0, %v16253_v16  ;;  %14474 = vmatmul.mubr.msk.f32.vlgmr.msra.gmra.mrb[2].mxu1 %vm261_vm1, %v15949_v35  ;;  %v16349_v55 = vsel %vm2711_vm4, %v2694_v33, %v2696_v14  ;;  %v16453_v14 = vsel %vm1056_vm3, %v16140_v57, %v16114_v48  ;;  %v16461_v33 = vsel %vm1056_vm3, %v16168_v1, %v16166_v0  ;;  %v16496_v57 = vld [vmem:[%s17622_s1 + $0x1c] sm:$0xf] }
  0xed   : > { %14475 = vmatprep.subr.msk.mxu1 %vm265_vm0, %v16146_v59  ;;  %2449 = vmatprep.mubr.f32.mxu0 %v17635_v20 }
  0xee   : > { %14476 = vmatpush1.msk.msra.mxu1 %vm265_vm0, %v16122_v51  ;;  %5292 = vmatprep.mubr.f32.mxu1 %v17635_v20 }
  0xef   : > { %14363 = vmatmul.mubr.msk.f32.vlgmr.msra.gmra.mrb[2].mxu0 %vm261_vm1, %v16248_v15  ;;  %14364 = vmatprep.subr.msk.mxu0 %vm265_vm0, %v16270_v19  ;;  %v16291_v34 = vpop.permute.xlu1 %3120  ;;  %v16293_v22 = vpop.permute.xlu0 %3124 }
  0xf0   : > { %14477 = vmatmul.mubr.msk.f32.vlgmr.msra.gmra.mrb[4].mxu1 %vm261_vm1, %v15949_v35  ;;  %14478 = vmatprep.subr.msk.mxu1 %vm265_vm0, %v16175_v2 }
  0xf1   : > { %14365 = vmatpush1.msk.msra.mxu0 %vm265_vm0, %v16282_v36  ;;  %14479 = vmatpush1.msk.msra.mxu1 %vm265_vm0, %v16154_v61 }
  0xf2   : > { %2520 = vmatprep.mubr.f32.mxu0 %v17635_v20  ;;  %5363 = vmatprep.mubr.f32.mxu1 %v17635_v20 }
  0xf3   : > { %14969 = vmatprep.subr.mxu1 %v17635_v20  ;;  %14366 = vmatmul.mubr.msk.f32.vlgmr.msra.gmra.mrb[4].mxu0 %vm261_vm1, %v16248_v15  ;;  %v2702_v25 = vpop.permute.xlu1 %2701  ;;  %v2700_v26 = vpop.permute.xlu0 %2699 }
  0xf4   : > { %14480 = vmatmul.mubr.msk.f32.vlgmr.msra.gmra.mrb[6].mxu1 %vm261_vm1, %v15949_v35  ;;  %14367 = vmatprep.subr.msk.mxu0 %vm265_vm0, %v16306_v23  ;;  %v16368_v42 = vsel %vm2711_vm4, %v2700_v26, %v2702_v25  ;;  %v16376_v44 = vsel %vm2711_vm4, %v16239_v54, %v2700_v26  ;;  %v16437_v54 = vsel %vm1056_vm3, %v16114_v48, %v16142_v58 }
  0xf5   : > { %14970 = vmatpush3.msk.msra.mxu1 %vm265_vm0, %v16197_v5  ;;  %14368 = vmatpush1.msk.msra.mxu0 %vm265_vm0, %v16311_v38  ;;  %v16487_v48 = vsel %vm1056_vm3, %v16142_v58, %v16168_v1  ;;  %v16526_v26 = vsel %vm1056_vm3, %v16166_v0, %v16186_v4 }
  0xf6   : > { %14483 = vmatprep.subr.msk.mxu1 %vm265_vm0, %v16205_v6  ;;  %2591 = vmatprep.mubr.f32.mxu0 %v17635_v20  ;;  %17655 = vst [vmem:[#allocation7_spill] sm:$0xff] %v16526_v26 }
  0xf7   : > { %14971 = vmatprep.mubr.msk.f32.mxu1 %vm15544_vm2, %v17635_v20  ;;  %14369 = vmatmul.mubr.msk.f32.vlgmr.msra.gmra.mrb[6].mxu0 %vm261_vm1, %v16248_v15  ;;  %v16333_v45 = vpop.permute.xlu1 %3128  ;;  %v16335_v27 = vpop.permute.xlu0 %3126 }
  0xf8   : > { %14934 = vmatprep.subr.mxu0 %v17635_v20  ;;  %14972 = vmatmul.mubr.msk.f32.vlgmr.msra.gmra.mrb[8].mxu1 %vm261_vm1, %v15949_v35  ;;  %v16506_v58 = vsel %vm2711_vm4, %v16335_v27, %v16333_v45  ;;  %v16515_v1 = vsel %vm2711_vm4, %v16293_v22, %v16335_v27 }
  0xf9   : > { %14484 = vmatpush1.msk.msra.mxu1 %vm265_vm0, %v16221_v10  ;;  %14935 = vmatpush3.msk.msra.mxu0 %vm265_vm0, %v16116_v49  ;;  %17653 = vst [vmem:[#allocation5_spill] sm:$0xff] %v16506_v58  ;;  %17654 = vst [vmem:[#allocation6_spill] sm:$0xff] %v16515_v1 }
  0xfa   : > { %14486 = vmatprep.subr.msk.mxu1 %vm265_vm0, %v16230_v11  ;;  %14936 = vmatprep.mubr.msk.f32.mxu0 %vm15544_vm2, %v17635_v20 }
  0xfb   : > { %5513 = vmatprep.mubr.f32.mxu1 %v17635_v20  ;;  %14937 = vmatmul.mubr.msk.f32.vlgmr.msra.gmra.mrb[8].mxu0 %vm261_vm1, %v16248_v15  ;;  %v2706_v35 = vpop.permute.xlu1 %2705  ;;  %v2704_v37 = vpop.permute.xlu0 %2703 }
  0xfc   : > { %14485 = vmatmul.mubr.msk.f32.vlgmr.msra.gmra.mrb[0].mxu1 %vm261_vm1, %v16099_v43  ;;  %14373 = vmatprep.subr.msk.mxu0 %vm265_vm0, %v16342_v29  ;;  %v16393_v52 = vsel %vm2711_vm4, %v2704_v37, %v2706_v35  ;;  %v16400_v53 = vsel %vm2711_vm4, %v2702_v25, %v2704_v37  ;;  %v16466_v25 = vsel %vm2711_vm4, %v16265_v17, %v16293_v22 }
  0xfd   : > { %14487 = vmatpush1.msk.msra.mxu1 %vm265_vm0, %v16253_v16  ;;  %14374 = vmatpush1.msk.msra.mxu0 %vm265_vm0, %v16349_v55  ;;  %v16535_v22 = vsel %vm1056_vm3, %v16212_v9, %v16210_v7  ;;  %v16562_v37 = vsel %vm1056_vm3, %v16184_v3, %v16212_v9 }
  0xfe   : > { %14489 = vmatprep.subr.msk.mxu1 %vm265_vm0, %v16270_v19  ;;  %2805 = vmatprep.mubr.f32.mxu0 %v17635_v20  ;;  %17656 = vst [vmem:[#allocation8_spill] sm:$0xff] %v16535_v22  ;;  %17659 = vst [vmem:[#allocation11_spill] sm:$0xff] %v16562_v37 }
  0xff   : > { %5584 = vmatprep.mubr.f32.mxu1 %v17635_v20  ;;  %14375 = vmatmul.mubr.msk.f32.vlgmr.msra.gmra.mrb[0].mxu0 %vm261_vm1, %v16365_v39  ;;  %v16384_v46 = vpop.permute.xlu1 %3132  ;;  %v16386_v50 = vpop.permute.xlu0 %3130 }
 0x100   : > { %14488 = vmatmul.mubr.msk.f32.vlgmr.msra.gmra.mrb[2].mxu1 %vm261_vm1, %v16099_v43  ;;  %14376 = vmatprep.subr.msk.mxu0 %vm265_vm0, %v16368_v42  ;;  %v16540_v27 = vsel %vm2711_vm4, %v16386_v50, %v16384_v46  ;;  %v16549_v0 = vsel %vm2711_vm4, %v16333_v45, %v16386_v50 }
 0x101   : > { %14490 = vmatpush1.msk.msra.mxu1 %vm265_vm0, %v16282_v36  ;;  %14377 = vmatpush1.msk.msra.mxu0 %vm265_vm0, %v16376_v44  ;;  %17657 = vst [vmem:[#allocation9_spill] sm:$0xff] %v16540_v27  ;;  %17658 = vst [vmem:[#allocation10_spill] sm:$0xff] %v16549_v0 }
 0x102   : > { %14492 = vmatprep.subr.msk.mxu1 %vm265_vm0, %v16306_v23  ;;  %2876 = vmatprep.mubr.f32.mxu0 %v17635_v20 }
 0x103   : > { %5655 = vmatprep.mubr.f32.mxu1 %v17635_v20  ;;  %14378 = vmatmul.mubr.msk.f32.vlgmr.msra.gmra.mrb[2].mxu0 %vm261_vm1, %v16365_v39  ;;  %v16408_v56 = vpop.permute.xlu1 %2709  ;;  %v2708_v60 = vpop.permute.xlu0 %2707 }
 0x104   : > { %14491 = vmatmul.mubr.msk.f32.vlgmr.msra.gmra.mrb[4].mxu1 %vm261_vm1, %v16099_v43  ;;  %14379 = vmatprep.subr.msk.mxu0 %vm265_vm0, %v16393_v52  ;;  %v16420_v62 = vsel %vm2711_vm4, %v2708_v60, %v16408_v56  ;;  %v16425_v63 = vsel %vm2711_vm4, %v2706_v35, %v2708_v60 }
 0x105   : > { %14493 = vmatpush1.msk.msra.mxu1 %vm265_vm0, %v16311_v38  ;;  %14380 = vmatpush1.msk.msra.mxu0 %vm265_vm0, %v16400_v53 }
 0x106   : > { %2947 = vmatprep.mubr.f32.mxu0 %v17635_v20  ;;  %5726 = vmatprep.mubr.f32.mxu1 %v17635_v20 }
 0x107   : > { %14974 = vmatprep.subr.mxu1 %v17635_v20  ;;  %14381 = vmatmul.mubr.msk.f32.vlgmr.msra.gmra.mrb[4].mxu0 %vm261_vm1, %v16365_v39 }
 0x108   : > { %14494 = vmatmul.mubr.msk.f32.vlgmr.msra.gmra.mrb[6].mxu1 %vm261_vm1, %v16099_v43  ;;  %14382 = vmatprep.subr.msk.mxu0 %vm265_vm0, %v16420_v62 }
 0x109   : > { %14975 = vmatpush3.msk.msra.mxu1 %vm265_vm0, %v16116_v49  ;;  %14383 = vmatpush1.msk.msra.mxu0 %vm265_vm0, %v16425_v63 }
 0x10a   : > { %14502 = vmatprep.subr.msk.mxu1 %vm265_vm0, %v16437_v54  ;;  %3018 = vmatprep.mubr.f32.mxu0 %v17635_v20 }
 0x10b   : > { %14976 = vmatprep.mubr.msk.f32.mxu1 %vm15544_vm2, %v17635_v20  ;;  %14384 = vmatmul.mubr.msk.f32.vlgmr.msra.gmra.mrb[6].mxu0 %vm261_vm1, %v16365_v39 }
 0x10c   : > { %14977 = vmatmul.mubr.msk.f32.vlgmr.msra.gmra.mrb[8].mxu1 %vm261_vm1, %v16099_v43  ;;  %14939 = vmatprep.subr.mxu0 %v17635_v20  ;;  %v16475_v43 = vsel %vm2711_vm4, %v16291_v34, %v16265_v17  ;;  %v3135_v17 = vpop.permute.xlu0 %3134  ;;  %v16501_v34 = vsel %vm1056_vm3, %v16186_v4, %v16184_v3  ;;  %v16554_v4 = vpop.permute.xlu1 %3136 }
 0x10d   : > { %14503 = vmatpush1.msk.msra.mxu1 %vm265_vm0, %v16453_v14  ;;  %14940 = vmatpush3.msk.msra.mxu0 %vm265_vm0, %v16408_v56  ;;  %17652 = vst [vmem:[#allocation4_spill] sm:$0xff] %v16501_v34  ;;  %v16574_v45 = vsel %vm2711_vm4, %v3135_v17, %v16554_v4  ;;  %v16580_v3 = vsel %vm2711_vm4, %v16384_v46, %v3135_v17 }
 0x10e   : > { %14505 = vmatprep.subr.msk.mxu1 %vm265_vm0, %v16461_v33  ;;  %14941 = vmatprep.mubr.msk.f32.mxu0 %vm15544_vm2, %v17635_v20  ;;  %17660 = vst [vmem:[#allocation12_spill] sm:$0xff] %v16574_v45 }
 0x10f   : > { %5934 = vmatprep.mubr.f32.mxu1 %v17635_v20  ;;  %14942 = vmatmul.mubr.msk.f32.vlgmr.msra.gmra.mrb[8].mxu0 %vm261_vm1, %v16365_v39 }
 0x110   : > { %14504 = vmatmul.mubr.msk.f32.vlgmr.msra.gmra.mrb[0].mxu1 %vm261_vm1, %v16248_v15  ;;  %14393 = vmatprep.subr.msk.mxu0 %vm265_vm0, %v16466_v25  ;;  %v3549_v35 = vpop.permute.xlu0 %3548  ;;  %v3551_v9 = vpop.permute.xlu1 %3550 }
 0x111   : > { %14506 = vmatpush1.msk.msra.mxu1 %vm265_vm0, %v16487_v48  ;;  %14394 = vmatpush1.msk.msra.mxu0 %vm265_vm0, %v16475_v43  ;;  %v16608_v46 = vsel %vm3564_vm5, %v3549_v35, %v3551_v9 }
 0x112   : > { %14508 = vmatprep.subr.msk.mxu1 %vm265_vm0, %v16501_v34  ;;  %3231 = vmatprep.mubr.f32.mxu0 %v17635_v20 }
 0x113   : > { %6005 = vmatprep.mubr.f32.mxu1 %v17635_v20  ;;  %14395 = vmatmul.mubr.msk.f32.vlgmr.msra.gmra.mrb[0].mxu0 %vm261_vm1, %v16496_v57 }
 0x114   : > { %14507 = vmatmul.mubr.msk.f32.vlgmr.msra.gmra.mrb[2].mxu1 %vm261_vm1, %v16248_v15  ;;  %14396 = vmatprep.subr.msk.mxu0 %vm265_vm0, %v16506_v58  ;;  %v3547_v50 = vpop.permute.xlu0 %3546  ;;  %v3553_v60 = vpop.permute.xlu1 %3552 }
 0x115   : > { %14509 = vmatpush1.msk.msra.mxu1 %vm265_vm0, %v16526_v26  ;;  %14397 = vmatpush1.msk.msra.mxu0 %vm265_vm0, %v16515_v1  ;;  %v14666_v26 = vld [vmem:[%s15651_s29 + $0x6c] sm:$0x77] }
 0x116   : > { %14511 = vmatprep.subr.msk.mxu1 %vm265_vm0, %v16535_v22  ;;  %3302 = vmatprep.mubr.f32.mxu0 %v17635_v20  ;;  %v9980_v34 = vcombine.high %v14666_v26, %v14666_v26 }
 0x117   : > { %6076 = vmatprep.mubr.f32.mxu1 %v17635_v20  ;;  %14398 = vmatmul.mubr.msk.f32.vlgmr.msra.gmra.mrb[2].mxu0 %vm261_vm1, %v16496_v57 }
 0x118   : > { %14510 = vmatmul.mubr.msk.f32.vlgmr.msra.gmra.mrb[4].mxu1 %vm261_vm1, %v16248_v15  ;;  %14399 = vmatprep.subr.msk.mxu0 %vm265_vm0, %v16540_v27  ;;  %v3555_v17 = vpop.permute.xlu0 %3554  ;;  %v3557_v22 = vpop.permute.xlu1 %3556 }
 0x119   : > { %14512 = vmatpush1.msk.msra.mxu1 %vm265_vm0, %v16562_v37  ;;  %14400 = vmatpush1.msk.msra.mxu0 %vm265_vm0, %v16549_v0  ;;  %v14647_v37 = vld [vmem:[%s15651_s29 + $0x48] sm:$0x77] }
 0x11a   : > { %3373 = vmatprep.mubr.f32.mxu0 %v17635_v20  ;;  %6147 = vmatprep.mubr.f32.mxu1 %v17635_v20 }
 0x11b   : > { %14979 = vmatprep.subr.mxu1 %v17635_v20  ;;  %14401 = vmatmul.mubr.msk.f32.vlgmr.msra.gmra.mrb[4].mxu0 %vm261_vm1, %v16496_v57 }
 0x11c   : > { %14513 = vmatmul.mubr.msk.f32.vlgmr.msra.gmra.mrb[6].mxu1 %vm261_vm1, %v16248_v15  ;;  %14402 = vmatprep.subr.msk.mxu0 %vm265_vm0, %v16574_v45 }
 0x11d   : > { %14980 = vmatpush3.msk.msra.mxu1 %vm265_vm0, %v16210_v7  ;;  %14403 = vmatpush1.msk.msra.mxu0 %vm265_vm0, %v16580_v3  ;;  %v16627_v7 = vld [vmem:[%s17622_s1 + $0x20] sm:$0xf] }
 0x11e   : > { %14516 = vmatprep.subr.msk.mxu1 %vm265_vm0, %v16466_v25  ;;  %3444 = vmatprep.mubr.f32.mxu0 %v17635_v20 }
 0x11f   : > { %14981 = vmatprep.mubr.msk.f32.mxu1 %vm15544_vm2, %v17635_v20  ;;  %14404 = vmatmul.mubr.msk.f32.vlgmr.msra.gmra.mrb[6].mxu0 %vm261_vm1, %v16496_v57 }
 0x120   : > { %14982 = vmatmul.mubr.msk.f32.vlgmr.msra.gmra.mrb[8].mxu1 %vm261_vm1, %v16248_v15  ;;  %14944 = vmatprep.subr.mxu0 %v17635_v20  ;;  %v16615_v15 = vsel %vm3564_vm5, %v3547_v50, %v3549_v35  ;;  %v16634_v35 = vsel %vm3564_vm5, %v3553_v60, %v3555_v17  ;;  %v16640_v50 = vsel %vm3564_vm5, %v3551_v9, %v3553_v60  ;;  %v14648_v9 = vld [vmem:[%s15651_s29 + $0x50] sm:$0x77] }
 0x121   : > { %14517 = vmatpush1.msk.msra.mxu1 %vm265_vm0, %v16475_v43  ;;  %14945 = vmatpush3.msk.msra.mxu0 %vm265_vm0, %v16554_v4  ;;  %v9559_v60 = vcombine.high %v14647_v37, %v14647_v37 }
 0x122   : > { %14519 = vmatprep.subr.msk.mxu1 %vm265_vm0, %v16506_v58  ;;  %14946 = vmatprep.mubr.msk.f32.mxu0 %vm15544_vm2, %v17635_v20  ;;  %v17663_v58 = vmov 0.0  }
 0x123   : > { %6297 = vmatprep.mubr.f32.mxu1 %v17635_v20  ;;  %14947 = vmatmul.mubr.msk.f32.vlgmr.msra.gmra.mrb[8].mxu0 %vm261_vm1, %v16496_v57 }
 0x124   : > { %14518 = vmatmul.mubr.msk.f32.vlgmr.msra.gmra.mrb[0].mxu1 %vm261_vm1, %v16365_v39  ;;  %14408 = vmatprep.subr.msk.mxu0 %vm265_vm0, %v16608_v46 }
 0x125   : > { %14520 = vmatpush1.msk.msra.mxu1 %vm265_vm0, %v16515_v1  ;;  %14409 = vmatpush1.msk.msra.mxu0 %vm265_vm0, %v16615_v15 }
 0x126   : > { %14522 = vmatprep.subr.msk.mxu1 %vm265_vm0, %v16540_v27  ;;  %3658 = vmatprep.mubr.f32.mxu0 %v17635_v20 }
 0x127   : > { %6368 = vmatprep.mubr.f32.mxu1 %v17635_v20  ;;  %14410 = vmatmul.mubr.msk.f32.vlgmr.msra.gmra.mrb[0].mxu0 %vm261_vm1, %v16627_v7 }
 0x128   : > { %14521 = vmatmul.mubr.msk.f32.vlgmr.msra.gmra.mrb[2].mxu1 %vm261_vm1, %v16365_v39  ;;  %14411 = vmatprep.subr.msk.mxu0 %vm265_vm0, %v16634_v35  ;;  %v3559_v27 = vpop.permute.xlu0 %3558 }
 0x129   : > { %14523 = vmatpush1.msk.msra.mxu1 %vm265_vm0, %v16549_v0  ;;  %14412 = vmatpush1.msk.msra.mxu0 %vm265_vm0, %v16640_v50  ;;  %v16661_v1 = vsel %vm3564_vm5, %v3557_v22, %v3559_v27  ;;  %v16666_v0 = vsel %vm3564_vm5, %v3555_v17, %v3557_v22 }
 0x12a   : > { %3729 = vmatprep.mubr.f32.mxu0 %v17635_v20  ;;  %6439 = vmatprep.mubr.f32.mxu1 %v17635_v20  ;;  %17661 = vst [vmem:[#allocation13_spill] sm:$0xff] %v16666_v0  ;;  %v3561_v20 = vpop.permute.xlu1 %3560 }
 0x12b   : > { %14525 = vmatprep.subr.msk.mxu1 %vm265_vm0, %v16574_v45  ;;  %14413 = vmatmul.mubr.msk.f32.vlgmr.msra.gmra.mrb[2].mxu0 %vm261_vm1, %v16627_v7  ;;  %v16690_v17 = vsel %vm3564_vm5, %v3559_v27, %v3561_v20  ;;  %v14649_v27 = vld [vmem:[%s15651_s29 + $0x58] sm:$0x77] }
 0x12c   : > { %14524 = vmatmul.mubr.msk.f32.vlgmr.msra.gmra.mrb[4].mxu1 %vm261_vm1, %v16365_v39  ;;  %9567 = vrot.lane.b32.xlu1 %v14648_v9, %s15545_s8  ;;  %v16674_v45 = vpop.permute.xlu0 %3562  ;;  %17665 = vst [vmem:[#allocation16_spill] sm:$0xff] %v16690_v17 }
 0x12d   : > { %14526 = vmatpush1.msk.msra.mxu1 %vm265_vm0, %v16580_v3  ;;  %9565 = vrot.lane.b32.xlu0 %v9559_v60, %s15545_s8  ;;  %17662 = vst [vmem:[#allocation14_spill] sm:$0xff] %v16674_v45  ;;  %v16687_v22 = vsel %vm3564_vm5, %v3561_v20, %v16674_v45  ;;  %v14667_v20 = vld [vmem:[%s15651_s29 + $0x74] sm:$0x77] }
 0x12e   : > { %14414 = vmatprep.subr.msk.mxu0 %vm265_vm0, %v16661_v1  ;;  %3800 = vmatprep.mubr.f32.mxu0 %v17663_v58  ;;  %17664 = vst [vmem:[#allocation15_spill] sm:$0xff] %v16687_v22 }
 0x12f   : > { %14415 = vmatpush1.msk.msra.mxu0 %vm265_vm0, %v16666_v0  ;;  %6510 = vmatprep.mubr.f32.mxu1 %v17663_v58 }
 0x130   : > { %14984 = vmatprep.subr.mxu1 %v17663_v58  ;;  %14416 = vmatmul.mubr.msk.f32.vlgmr.msra.gmra.mrb[4].mxu0 %vm261_vm1, %v16627_v7 }
 0x131   : > { %14527 = vmatmul.mubr.msk.f32.vlgmr.msra.gmra.mrb[6].mxu1 %vm261_vm1, %v16365_v39  ;;  %9986 = vrot.lane.b32.xlu1 %v9980_v34, %s15545_s8  ;;  %v9560_v34 = vcombine.high %v14648_v9, %v14648_v9  ;;  %v16749_v9 = vld [vmem:[%s17622_s1 + $0x4] sm:$0xf] }
 0x132   : > { %14985 = vmatpush3.msk.msra.mxu1 %vm265_vm0, %v16554_v4  ;;  %9563 = vrot.lane.b32.xlu0 %v14647_v37, %s15545_s8  ;;  %v14668_v37 = vld [vmem:[%s15651_s29 + $0x7c] sm:$0x77] }
 0x133   : > { %14417 = vmatprep.subr.msk.mxu0 %vm265_vm0, %v16687_v22  ;;  %14530 = vmatprep.subr.msk.mxu1 %vm265_vm0, %v16608_v46 }
 0x134   : > { %14418 = vmatpush1.msk.msra.mxu0 %vm265_vm0, %v16690_v17  ;;  %3871 = vmatprep.mubr.f32.mxu0 %v17663_v58 }
 0x135   : > { %14986 = vmatprep.mubr.msk.f32.mxu1 %vm15544_vm2, %v17663_v58  ;;  %14419 = vmatmul.mubr.msk.f32.vlgmr.msra.gmra.mrb[6].mxu0 %vm261_vm1, %v16627_v7 }
 0x136   : > { %14987 = vmatmul.mubr.msk.f32.vlgmr.msra.gmra.mrb[8].mxu1 %vm261_vm1, %v16365_v39  ;;  %9984 = vrot.lane.b32.xlu1 %v14666_v26, %s15545_s8  ;;  %v9981_v26 = vcombine.high %v14667_v20, %v14667_v20 }
 0x137   : > { %14531 = vmatpush1.msk.msra.mxu1 %vm265_vm0, %v16615_v15  ;;  %9988 = vrot.lane.b32.xlu0 %v14667_v20, %s15545_s8 }
 0x138   : > { %14949 = vmatprep.subr.mxu0 %v17663_v58  ;;  %14951 = vmatprep.mubr.msk.f32.mxu0 %vm15544_vm2, %v17663_v58 }
 0x139   : > { %14950 = vmatpush3.msk.msra.mxu0 %vm265_vm0, %v16674_v45  ;;  %6660 = vmatprep.mubr.f32.mxu1 %v17663_v58 }
 0x13a   : > { %14533 = vmatprep.subr.msk.mxu1 %vm265_vm0, %v16634_v35  ;;  %14952 = vmatmul.mubr.msk.f32.vlgmr.msra.gmra.mrb[8].mxu0 %vm261_vm1, %v16627_v7 }
 0x13b   : > { %14532 = vmatmul.mubr.msk.f32.vlgmr.msra.gmra.mrb[0].mxu1 %vm261_vm1, %v16496_v57  ;;  %9571 = vrot.lane.b32.xlu1 %v14649_v27, %s15545_s8 }
 0x13c   : > { %14534 = vmatpush1.msk.msra.mxu1 %vm265_vm0, %v16640_v50  ;;  %9569 = vrot.lane.b32.xlu0 %v9560_v34, %s15545_s8  ;;  %v6976_v39 = vpop.permute.xlu1 %6975  ;;  %v14650_v34 = vld [vmem:[%s15651_s29 + $0x60] sm:$0x77] }
 0x13d   : > { %14563 = vmatprep.subr.msk.mxu0 %vm265_vm0, %v16072_v32  ;;  %6731 = vmatprep.mubr.f32.mxu1 %v17663_v58 }
 0x13e   : > { %14536 = vmatprep.subr.msk.mxu1 %vm265_vm0, %v16661_v1  ;;  %14564 = vmatpush1.msk.msra.mxu0 %vm265_vm0, %v16048_v24  ;;  %v9561_v24 = vcombine.high %v14649_v27, %v14649_v27  ;;  %v9982_v27 = vcombine.high %v14668_v37, %v14668_v37 }
 0x13f   : > { %7453 = vmatprep.mubr.f32.mxu0 %v17663_v58  ;;  %14535 = vmatmul.mubr.msk.f32.vlgmr.msra.gmra.mrb[2].mxu1 %vm261_vm1, %v16496_v57 }
 0x140   : > { %14537 = vmatpush1.msk.msra.mxu1 %vm265_vm0, %v16666_v0  ;;  %14565 = vmatmul.mubr.msk.f32.vlgmr.msra.gmra.mrb[10].mxu0 %vm261_vm1, %v16749_v9  ;;  %v6974_v60 = vpop.permute.xlu1 %6973 }
 0x141   : > { %9992 = vrot.lane.b32.xlu1 %v14668_v37, %s15545_s8  ;;  %9990 = vrot.lane.b32.xlu0 %v9981_v26, %s15545_s8  ;;  %v6978_v20 = vpop.permute.xlu0 %6977  ;;  %v16779_v26 = vld [vmem:[%s15651_s29 + $0x84] sm:$0x77]  ;;  %v9562_v37 = vcombine.high %v14650_v34, %v14650_v34  ;;  %v16804_v0 = vsel %vm3564_vm5, %v6974_v60, %v6976_v39 }
 0x142   : > { %14566 = vmatprep.subr.msk.mxu0 %vm265_vm0, %v16110_v47  ;;  %6802 = vmatprep.mubr.f32.mxu1 %v17663_v58 }
 0x143   : > { %14539 = vmatprep.subr.msk.mxu1 %vm265_vm0, %v16687_v22  ;;  %14567 = vmatpush1.msk.msra.mxu0 %vm265_vm0, %v16085_v41 }
 0x144   : > { %7524 = vmatprep.mubr.f32.mxu0 %v17663_v58  ;;  %14538 = vmatmul.mubr.msk.f32.vlgmr.msra.gmra.mrb[4].mxu1 %vm261_vm1, %v16496_v57 }
 0x145   : > { %14540 = vmatpush1.msk.msra.mxu1 %vm265_vm0, %v16690_v17  ;;  %14568 = vmatmul.mubr.msk.f32.vlgmr.msra.gmra.mrb[12].mxu0 %vm261_vm1, %v16749_v9  ;;  %v6980_v17 = vpop.permute.xlu0 %6979 }
 0x146   : > { %9575 = vrot.lane.b32.xlu1 %v14650_v34, %s15545_s8  ;;  %9573 = vrot.lane.b32.xlu0 %v9561_v24, %s15545_s8  ;;  %v6982_v22 = vpop.permute.xlu1 %6981  ;;  %v16783_v24 = vsel %vm3564_vm5, %v6976_v39, %v6978_v20 }
 0x147   : > { %14569 = vmatprep.subr.msk.mxu0 %vm265_vm0, %v16146_v59  ;;  %6873 = vmatprep.mubr.f32.mxu1 %v17663_v58  ;;  %17666 = vst [vmem:[#allocation17_spill] sm:$0xff] %v16783_v24 }
 0x148   : > { %14989 = vmatprep.subr.mxu1 %v17663_v58  ;;  %14570 = vmatpush1.msk.msra.mxu0 %vm265_vm0, %v16122_v51 }
 0x149   : > { %7595 = vmatprep.mubr.f32.mxu0 %v17663_v58  ;;  %14541 = vmatmul.mubr.msk.f32.vlgmr.msra.gmra.mrb[6].mxu1 %vm261_vm1, %v16496_v57 }
 0x14a   : > { %14990 = vmatpush3.msk.msra.mxu1 %vm265_vm0, %v16674_v45  ;;  %14571 = vmatmul.mubr.msk.f32.vlgmr.msra.gmra.mrb[14].mxu0 %vm261_vm1, %v16749_v9  ;;  %v14651_v45 = vld [vmem:[%s15651_s29 + $0x68] sm:$0x7]  ;;  %v6984_v34 = vpop.permute.xlu0 %6983 }
 0x14b   : > { %9996 = vrot.lane.b32.xlu1 %v16779_v26, %s15545_s8  ;;  %9994 = vrot.lane.b32.xlu0 %v9982_v27, %s15545_s8  ;;  %v6986_v27 = vpop.permute.xlu1 %6985 }
 0x14c   : > { %14549 = vmatprep.subr.msk.mxu1 %vm265_vm0, %v16783_v24  ;;  %14572 = vmatprep.subr.msk.mxu0 %vm265_vm0, %v16175_v2  ;;  %v16814_v24 = vsel %vm3564_vm5, %v6980_v17, %v6982_v22 }
 0x14d   : > { %14991 = vmatprep.mubr.msk.f32.mxu1 %vm15544_vm2, %v17663_v58  ;;  %14573 = vmatpush1.msk.msra.mxu0 %vm265_vm0, %v16154_v61 }
 0x14e   : > { %7666 = vmatprep.mubr.f32.mxu0 %v17663_v58  ;;  %14992 = vmatmul.mubr.msk.f32.vlgmr.msra.gmra.mrb[8].mxu1 %vm261_vm1, %v16496_v57  ;;  %v16825_v57 = vsel %vm3564_vm5, %v6978_v20, %v6980_v17  ;;  %v16848_v17 = vsel %vm3564_vm5, %v6982_v22, %v6984_v34  ;;  %v17676_v22 = vld [vmem:[#allocation3_spill] sm:$0xff] }
 0x14f   : > { %14550 = vmatpush1.msk.msra.mxu1 %vm265_vm0, %v16804_v0  ;;  %14574 = vmatmul.mubr.msk.f32.vlgmr.msra.gmra.mrb[16].mxu0 %vm261_vm1, %v16749_v9  ;;  %v6988_v39 = vpop.permute.xlu0 %6987 }
 0x150   : > { %9579 = vrot.lane.b32.xlu1 %v14651_v45, %s15545_s8  ;;  %9577 = vrot.lane.b32.xlu0 %v9562_v37, %s15545_s8  ;;  %v16832_v45 = vsel %vm3564_vm5, %v6984_v34, %v6986_v27  ;;  %v16838_v60 = vpop.permute.xlu1 %6989  ;;  %v17210_v37 = vld [vmem:[%s17622_s1 + $0x14] sm:$0xf] }
 0x151   : > { %14999 = vmatprep.subr.mxu0 %v17663_v58  ;;  %7081 = vmatprep.mubr.f32.mxu1 %v17663_v58  ;;  %v16855_v20 = vsel %vm3564_vm5, %v6988_v39, %v16838_v60 }
 0x152   : > { %14552 = vmatprep.subr.msk.mxu1 %vm265_vm0, %v16814_v24  ;;  %15000 = vmatpush3.msk.msra.mxu0 %vm265_vm0, %v16197_v5 }
 0x153   : > { %15001 = vmatprep.mubr.msk.f32.mxu0 %vm15544_vm2, %v17663_v58  ;;  %14551 = vmatmul.mubr.msk.f32.vlgmr.msra.gmra.mrb[0].mxu1 %vm261_vm1, %v16627_v7 }
 0x154   : > { %14553 = vmatpush1.msk.msra.mxu1 %vm265_vm0, %v16825_v57  ;;  %15002 = vmatmul.mubr.msk.f32.vlgmr.msra.gmra.mrb[18].mxu0 %vm261_vm1, %v16749_v9 }
 0x155   : > { %14577 = vmatprep.subr.msk.mxu0 %vm265_vm0, %v15932_v12  ;;  %7152 = vmatprep.mubr.f32.mxu1 %v17663_v58  ;;  %v16862_v12 = vld [vmem:[%s17622_s1] sm:$0xf] }
 0x156   : > { %14555 = vmatprep.subr.msk.mxu1 %vm265_vm0, %v16832_v45  ;;  %14578 = vmatpush1.msk.msra.mxu0 %vm265_vm0, %v15914_v8  ;;  %v16874_v8 = vsel %vm3564_vm5, %v6986_v27, %v6988_v39  ;;  %v17677_v39 = vld [vmem:[#allocation13_spill] sm:$0xff] }
 0x157   : > { %7807 = vmatprep.mubr.f32.mxu0 %v17663_v58  ;;  %14554 = vmatmul.mubr.msk.f32.vlgmr.msra.gmra.mrb[2].mxu1 %vm261_vm1, %v16627_v7 }
 0x158   : > { %14556 = vmatpush1.msk.msra.mxu1 %vm265_vm0, %v16848_v17  ;;  %14579 = vmatmul.mubr.msk.f32.vlgmr.msra.gmra.mrb[10].mxu0 %vm261_vm1, %v16862_v12 }
 0x159   : > { %14580 = vmatprep.subr.msk.mxu0 %vm265_vm0, %v15961_v30  ;;  %7223 = vmatprep.mubr.f32.mxu1 %v17663_v58  ;;  %v14670_v30 = vld [vmem:[%s15651_s29 + $0x8c] sm:$0x7] }
 0x15a   : > { %14558 = vmatprep.subr.msk.mxu1 %vm265_vm0, %v16855_v20  ;;  %14581 = vmatpush1.msk.msra.mxu0 %vm265_vm0, %v15938_v13  ;;  %v9983_v13 = vcombine.high %v16779_v26, %v16779_v26 }
 0x15b   : > { %7878 = vmatprep.mubr.f32.mxu0 %v17663_v58  ;;  %14557 = vmatmul.mubr.msk.f32.vlgmr.msra.gmra.mrb[4].mxu1 %vm261_vm1, %v16627_v7 }
 0x15c   : > { %14559 = vmatpush1.msk.msra.mxu1 %vm265_vm0, %v16874_v8  ;;  %14582 = vmatmul.mubr.msk.f32.vlgmr.msra.gmra.mrb[12].mxu0 %vm261_vm1, %v16862_v12 }
 0x15d   : > { %14583 = vmatprep.subr.msk.mxu0 %vm265_vm0, %v15986_v18  ;;  %7294 = vmatprep.mubr.f32.mxu1 %v17663_v58 }
 0x15e   : > { %14994 = vmatprep.subr.mxu1 %v17663_v58  ;;  %14584 = vmatpush1.msk.msra.mxu0 %vm265_vm0, %v15967_v28  ;;  %v14685_v28 = vld [vmem:[%s15651_s29 + $0x48] sm:$0x77] }
 0x15f   : > { %7949 = vmatprep.mubr.f32.mxu0 %v17663_v58  ;;  %14560 = vmatmul.mubr.msk.f32.vlgmr.msra.gmra.mrb[6].mxu1 %vm261_vm1, %v16627_v7  ;;  %v10401_v18 = vcombine.high %v14685_v28, %v14685_v28 }
 0x160   : > { %14995 = vmatpush3.msk.msra.mxu1 %vm265_vm0, %v16838_v60  ;;  %14585 = vmatmul.mubr.msk.f32.vlgmr.msra.gmra.mrb[14].mxu0 %vm261_vm1, %v16862_v12 }
 0x161   : > { %14586 = vmatprep.subr.msk.mxu0 %vm265_vm0, %v16011_v21  ;;  %14704 = vmatprep.subr.msk.mxu1 %vm265_vm0, %v16205_v6  ;;  %v14686_v21 = vld [vmem:[%s15651_s29 + $0x50] sm:$0x77] }
 0x162   : > { %14587 = vmatpush1.msk.msra.mxu0 %vm265_vm0, %v15992_v31  ;;  %14996 = vmatprep.mubr.msk.f32.mxu1 %vm15544_vm2, %v17663_v58  ;;  %v16945_v31 = vld [vmem:[%s17622_s1 + $0x8] sm:$0xf] }
 0x163   : > { %8020 = vmatprep.mubr.f32.mxu0 %v17663_v58  ;;  %15004 = vmatprep.subr.mxu0 %v17663_v58 }
 0x164   : > { %14997 = vmatmul.mubr.msk.f32.vlgmr.msra.gmra.mrb[8].mxu1 %vm261_vm1, %v16627_v7  ;;  %14588 = vmatmul.mubr.msk.f32.vlgmr.msra.gmra.mrb[16].mxu0 %vm261_vm1, %v16862_v12 }
 0x165   : > { %15005 = vmatpush3.msk.msra.mxu0 %vm265_vm0, %v16045_v40  ;;  %14705 = vmatpush1.msk.msra.mxu1 %vm265_vm0, %v16221_v10  ;;  %v10402_v40 = vcombine.high %v14686_v21, %v14686_v21 }
 0x166   : > { %14591 = vmatprep.subr.msk.mxu0 %vm265_vm0, %v16205_v6  ;;  %14707 = vmatprep.subr.msk.mxu1 %vm265_vm0, %v16230_v11  ;;  %v14687_v6 = vld [vmem:[%s15651_s29 + $0x58] sm:$0x77] }
 0x167   : > { %10000 = vrot.lane.b32.xlu1 %v14670_v30, %s15545_s8  ;;  %9998 = vrot.lane.b32.xlu0 %v9983_v13, %s15545_s8  ;;  %v17679_v13 = vld [vmem:[#allocation16_spill] sm:$0xff] }
 0x168   : > { %15006 = vmatprep.mubr.msk.f32.mxu0 %vm15544_vm2, %v17663_v58  ;;  %10885 = vmatprep.mubr.f32.mxu1 %v17663_v58 }
 0x169   : > { %15007 = vmatmul.mubr.msk.f32.vlgmr.msra.gmra.mrb[18].mxu0 %vm261_vm1, %v16862_v12  ;;  %14706 = vmatmul.mubr.msk.f32.vlgmr.msra.gmra.mrb[10].mxu1 %vm261_vm1, %v16749_v9 }
 0x16a   : > { %14592 = vmatpush1.msk.msra.mxu0 %vm265_vm0, %v16221_v10  ;;  %14708 = vmatpush1.msk.msra.mxu1 %vm265_vm0, %v16253_v16  ;;  %v10403_v10 = vcombine.high %v14687_v6, %v14687_v6 }
 0x16b   : > { %14594 = vmatprep.subr.msk.mxu0 %vm265_vm0, %v16230_v11  ;;  %14710 = vmatprep.subr.msk.mxu1 %vm265_vm0, %v16270_v19  ;;  %v14688_v11 = vld [vmem:[%s15651_s29 + $0x60] sm:$0x77] }
 0x16c   : > { %10407 = vrot.lane.b32.xlu0 %v10401_v18, %s15546_s9  ;;  %8161 = vmatprep.mubr.f32.mxu0 %v17663_v58 }
 0x16d   : > { %10956 = vmatprep.mubr.f32.mxu1 %v17663_v58  ;;  %14593 = vmatmul.mubr.msk.f32.vlgmr.msra.gmra.mrb[10].mxu0 %vm261_vm1, %v16945_v31 }
 0x16e   : > { %14595 = vmatpush1.msk.msra.mxu0 %vm265_vm0, %v16253_v16  ;;  %14709 = vmatmul.mubr.msk.f32.vlgmr.msra.gmra.mrb[12].mxu1 %vm261_vm1, %v16749_v9  ;;  %v10404_v16 = vcombine.high %v14688_v11, %v14688_v11 }
 0x16f   : > { %14711 = vmatpush1.msk.msra.mxu1 %vm265_vm0, %v16282_v36  ;;  %14597 = vmatprep.subr.msk.mxu0 %vm265_vm0, %v16270_v19  ;;  %v14689_v19 = vld [vmem:[%s15651_s29 + $0x68] sm:$0x7] }
 0x170   : > { %14713 = vmatprep.subr.msk.mxu1 %vm265_vm0, %v16306_v23  ;;  %10409 = vrot.lane.b32.xlu1 %v14686_v21, %s15546_s9 }
 0x171   : > { %10405 = vrot.lane.b32.xlu0 %v14685_v28, %s15546_s9  ;;  %8232 = vmatprep.mubr.f32.mxu0 %v17663_v58 }
 0x172   : > { %11027 = vmatprep.mubr.f32.mxu1 %v17663_v58  ;;  %14596 = vmatmul.mubr.msk.f32.vlgmr.msra.gmra.mrb[12].mxu0 %vm261_vm1, %v16945_v31 }
 0x173   : > { %14598 = vmatpush1.msk.msra.mxu0 %vm265_vm0, %v16282_v36  ;;  %14712 = vmatmul.mubr.msk.f32.vlgmr.msra.gmra.mrb[14].mxu1 %vm261_vm1, %v16749_v9  ;;  %v15511_v36 = vld [vmem:[%s15651_s29 + $0x6c] sm:$0x77] }
 0x174   : > { %14714 = vmatpush1.msk.msra.mxu1 %vm265_vm0, %v16311_v38  ;;  %14600 = vmatprep.subr.msk.mxu0 %vm265_vm0, %v16306_v23  ;;  %v17115_v23 = vld [vmem:[%s17622_s1 + $0x10] sm:$0xf] }
 0x175   : > { %10411 = vrot.lane.b32.xlu1 %v10402_v40, %s15546_s9  ;;  %10413 = vrot.lane.b32.xlu0 %v14687_v6, %s15546_s9 }
 0x176   : > { %8303 = vmatprep.mubr.f32.mxu0 %v17663_v58  ;;  %11098 = vmatprep.mubr.f32.mxu1 %v17663_v58 }
 0x177   : > { %15044 = vmatprep.subr.mxu1 %v17663_v58  ;;  %14599 = vmatmul.mubr.msk.f32.vlgmr.msra.gmra.mrb[14].mxu0 %vm261_vm1, %v16945_v31 }
 0x178   : > { %14601 = vmatpush1.msk.msra.mxu0 %vm265_vm0, %v16311_v38  ;;  %14715 = vmatmul.mubr.msk.f32.vlgmr.msra.gmra.mrb[16].mxu1 %vm261_vm1, %v16749_v9  ;;  %v14819_v38 = vld [vmem:[%s15651_s29 + $0x84] sm:$0x77] }
 0x179   : > { %15045 = vmatpush3.msk.msra.mxu1 %vm265_vm0, %v16116_v49  ;;  %10415 = vrot.lane.b32.xlu1 %v10403_v10, %s15546_s9 }
 0x17a   : > { %10417 = vrot.lane.b32.xlu0 %v14688_v11, %s15546_s9  ;;  %8374 = vmatprep.mubr.f32.mxu0 %v17663_v58 }
 0x17b   : > { %15009 = vmatprep.subr.mxu0 %v17663_v58  ;;  %15046 = vmatprep.mubr.msk.f32.mxu1 %vm15544_vm2, %v17663_v58 }
 0x17c   : > { %14602 = vmatmul.mubr.msk.f32.vlgmr.msra.gmra.mrb[16].mxu0 %vm261_vm1, %v16945_v31  ;;  %15047 = vmatmul.mubr.msk.f32.vlgmr.msra.gmra.mrb[18].mxu1 %vm261_vm1, %v16749_v9 }
 0x17d   : > { %15010 = vmatpush3.msk.msra.mxu0 %vm265_vm0, %v16116_v49  ;;  %10419 = vrot.lane.b32.xlu1 %v10404_v16, %s15546_s9  ;;  %v14817_v49 = vld [vmem:[%s15651_s29 + $0x74] sm:$0x77] }
 0x17e   : > { %14605 = vmatprep.subr.msk.mxu0 %vm265_vm0, %v16342_v29  ;;  %10421 = vrot.lane.b32.xlu0 %v14689_v19, %s15546_s9  ;;  %v17669_v29 = vld [vmem:[#allocation6_spill] sm:$0xff]  ;;  %v17681_v16 = vld [vmem:[#allocation17_spill] sm:$0xff] }
 0x17f   : > { %14718 = vmatprep.subr.msk.mxu1 %vm265_vm0, %v16072_v32  ;;  %15011 = vmatprep.mubr.msk.f32.mxu0 %vm15544_vm2, %v17663_v58  ;;  %v17030_v32 = vld [vmem:[%s17622_s1 + $0xc] sm:$0xf] }
 0x180   : > { %14719 = vmatpush1.msk.msra.mxu1 %vm265_vm0, %v15511_v36  ;;  %11239 = vmatprep.mubr.f32.mxu1 %v17663_v58 }
 0x181   : > { %15012 = vmatmul.mubr.msk.f32.vlgmr.msra.gmra.mrb[18].mxu0 %vm261_vm1, %v16945_v31  ;;  %14720 = vmatmul.mubr.msk.f32.vlgmr.msra.gmra.mrb[10].mxu1 %vm261_vm1, %v16862_v12 }
 0x182   : > { %14606 = vmatpush1.msk.msra.mxu0 %vm265_vm0, %v16349_v55  ;;  %14721 = vmatprep.subr.msk.mxu1 %vm265_vm0, %v16110_v47  ;;  %v17670_v55 = vld [vmem:[#allocation7_spill] sm:$0xff] }
 0x183   : > { %14608 = vmatprep.subr.msk.mxu0 %vm265_vm0, %v16368_v42  ;;  %8524 = vmatprep.mubr.f32.mxu0 %v17663_v58  ;;  %v17671_v42 = vld [vmem:[#allocation9_spill] sm:$0xff] }
 0x184   : > { %14722 = vmatpush1.msk.msra.mxu1 %vm265_vm0, %v16085_v41  ;;  %11310 = vmatprep.mubr.f32.mxu1 %v17663_v58  ;;  %v14816_v41 = vld [vmem:[%s15651_s29 + $0x6c] sm:$0x77] }
 0x185   : > { %14607 = vmatmul.mubr.msk.f32.vlgmr.msra.gmra.mrb[10].mxu0 %vm261_vm1, %v17030_v32  ;;  %14723 = vmatmul.mubr.msk.f32.vlgmr.msra.gmra.mrb[12].mxu1 %vm261_vm1, %v16862_v12  ;;  %v13717_v47 = vcombine.high %v14816_v41, %v14816_v41 }
 0x186   : > { %14609 = vmatpush1.msk.msra.mxu0 %vm265_vm0, %v16376_v44  ;;  %14724 = vmatprep.subr.msk.mxu1 %vm265_vm0, %v16146_v59  ;;  %v14818_v59 = vld [vmem:[%s15651_s29 + $0x7c] sm:$0x77] }
 0x187   : > { %14611 = vmatprep.subr.msk.mxu0 %vm265_vm0, %v16393_v52  ;;  %8595 = vmatprep.mubr.f32.mxu0 %v17663_v58  ;;  %v17672_v44 = vld [vmem:[#allocation8_spill] sm:$0xff] }
 0x188   : > { %14725 = vmatpush1.msk.msra.mxu1 %vm265_vm0, %v16122_v51  ;;  %11381 = vmatprep.mubr.f32.mxu1 %v17663_v58  ;;  %v13718_v51 = vcombine.high %v14817_v49, %v14817_v49 }
 0x189   : > { %14610 = vmatmul.mubr.msk.f32.vlgmr.msra.gmra.mrb[12].mxu0 %vm261_vm1, %v17030_v32  ;;  %14726 = vmatmul.mubr.msk.f32.vlgmr.msra.gmra.mrb[14].mxu1 %vm261_vm1, %v16862_v12 }
 0x18a   : > { %14612 = vmatpush1.msk.msra.mxu0 %vm265_vm0, %v16400_v53  ;;  %14727 = vmatprep.subr.msk.mxu1 %vm265_vm0, %v16175_v2  ;;  %v17668_v2 = vld [vmem:[#allocation4_spill] sm:$0xff]  ;;  %v13720_v53 = vcombine.high %v14819_v38, %v14819_v38 }
 0x18b   : > { %14614 = vmatprep.subr.msk.mxu0 %vm265_vm0, %v16420_v62  ;;  %14728 = vmatpush1.msk.msra.mxu1 %vm265_vm0, %v16154_v61  ;;  %v17667_v61 = vld [vmem:[#allocation5_spill] sm:$0xff]  ;;  %v14820_v62 = vld [vmem:[%s15651_s29 + $0x8c] sm:$0x7] }
 0x18c   : > { %8666 = vmatprep.mubr.f32.mxu0 %v17663_v58  ;;  %11452 = vmatprep.mubr.f32.mxu1 %v17663_v58 }
 0x18d   : > { %15049 = vmatprep.subr.mxu1 %v17663_v58  ;;  %14613 = vmatmul.mubr.msk.f32.vlgmr.msra.gmra.mrb[14].mxu0 %vm261_vm1, %v17030_v32 }
 0x18e   : > { %14615 = vmatpush1.msk.msra.mxu0 %vm265_vm0, %v16425_v63  ;;  %14729 = vmatmul.mubr.msk.f32.vlgmr.msra.gmra.mrb[16].mxu1 %vm261_vm1, %v16862_v12  ;;  %v17673_v63 = vld [vmem:[#allocation10_spill] sm:$0xff] }
 0x18f   : > { %15050 = vmatpush3.msk.msra.mxu1 %vm265_vm0, %v16197_v5  ;;  %13723 = vrot.lane.b32.xlu1 %v13717_v47, %s15546_s9  ;;  %v13719_v5 = vcombine.high %v14818_v59, %v14818_v59 }
 0x190   : > { %14732 = vmatprep.subr.msk.mxu1 %vm265_vm0, %v16437_v54  ;;  %8737 = vmatprep.mubr.f32.mxu0 %v17663_v58  ;;  %v17674_v54 = vld [vmem:[#allocation11_spill] sm:$0xff] }
 0x191   : > { %15014 = vmatprep.subr.mxu0 %v17663_v58  ;;  %15051 = vmatprep.mubr.msk.f32.mxu1 %vm15544_vm2, %v17663_v58 }
 0x192   : > { %14616 = vmatmul.mubr.msk.f32.vlgmr.msra.gmra.mrb[16].mxu0 %vm261_vm1, %v17030_v32  ;;  %15052 = vmatmul.mubr.msk.f32.vlgmr.msra.gmra.mrb[18].mxu1 %vm261_vm1, %v16862_v12  ;;  %v17678_v12 = vld [vmem:[#allocation15_spill] sm:$0xff] }
 0x193   : > { %15015 = vmatpush3.msk.msra.mxu0 %vm265_vm0, %v16408_v56  ;;  %14733 = vmatpush1.msk.msra.mxu1 %vm265_vm0, %v16453_v14  ;;  %v17675_v14 = vld [vmem:[#allocation12_spill] sm:$0xff] }
 0x194   : > { %14619 = vmatprep.subr.msk.mxu0 %vm265_vm0, %v16466_v25  ;;  %14735 = vmatprep.subr.msk.mxu1 %vm265_vm0, %v16461_v33 }
 0x195   : > { %13721 = vrot.lane.b32.xlu1 %v14816_v41, %s15546_s9  ;;  %13725 = vrot.lane.b32.xlu0 %v14817_v49, %s15546_s9  ;;  %v17386_v41 = vld [vmem:[%s17622_s1 + $0x1c] sm:$0xf] }
 0x196   : > { %15016 = vmatprep.mubr.msk.f32.mxu0 %vm15544_vm2, %v17663_v58  ;;  %11593 = vmatprep.mubr.f32.mxu1 %v17663_v58 }
 0x197   : > { %15017 = vmatmul.mubr.msk.f32.vlgmr.msra.gmra.mrb[18].mxu0 %vm261_vm1, %v17030_v32  ;;  %14734 = vmatmul.mubr.msk.f32.vlgmr.msra.gmra.mrb[10].mxu1 %vm261_vm1, %v16945_v31 }
 0x198   : > { %14620 = vmatpush1.msk.msra.mxu0 %vm265_vm0, %v16475_v43  ;;  %14736 = vmatpush1.msk.msra.mxu1 %vm265_vm0, %v16487_v48 }
 0x199   : > { %14622 = vmatprep.subr.msk.mxu0 %vm265_vm0, %v17667_v61  ;;  %14738 = vmatprep.subr.msk.mxu1 %vm265_vm0, %v17668_v2 }
 0x19a   : > { %13727 = vrot.lane.b32.xlu0 %v13718_v51, %s15546_s9  ;;  %13729 = vrot.lane.b32.xlu1 %v14818_v59, %s15546_s9 }
 0x19b   : > { %8887 = vmatprep.mubr.f32.mxu0 %v17663_v58  ;;  %11664 = vmatprep.mubr.f32.mxu1 %v17663_v58 }
 0x19c   : > { %14621 = vmatmul.mubr.msk.f32.vlgmr.msra.gmra.mrb[10].mxu0 %vm261_vm1, %v17115_v23  ;;  %14737 = vmatmul.mubr.msk.f32.vlgmr.msra.gmra.mrb[12].mxu1 %vm261_vm1, %v16945_v31 }
 0x19d   : > { %14623 = vmatpush1.msk.msra.mxu0 %vm265_vm0, %v17669_v29  ;;  %14739 = vmatpush1.msk.msra.mxu1 %vm265_vm0, %v17670_v55 }
 0x19e   : > { %14625 = vmatprep.subr.msk.mxu0 %vm265_vm0, %v17671_v42  ;;  %14741 = vmatprep.subr.msk.mxu1 %vm265_vm0, %v17672_v44  ;;  %v17130_v52 = vpop.permute.xlu1 %9567 }
 0x19f   : > { %13731 = vrot.lane.b32.xlu0 %v13719_v5, %s15546_s9  ;;  %13733 = vrot.lane.b32.xlu1 %v14819_v38, %s15546_s9  ;;  %v17134_v56 = vpop.permute.xlu0 %9565 }
 0x1a0   : > { %8958 = vmatprep.mubr.f32.mxu0 %v17663_v58  ;;  %11735 = vmatprep.mubr.f32.mxu1 %v17663_v58  ;;  %v9582_v28 = vsel %vm2711_vm4, %v17134_v56, %v17130_v52 }
 0x1a1   : > { %14624 = vmatmul.mubr.msk.f32.vlgmr.msra.gmra.mrb[12].mxu0 %vm261_vm1, %v17115_v23  ;;  %14740 = vmatmul.mubr.msk.f32.vlgmr.msra.gmra.mrb[14].mxu1 %vm261_vm1, %v16945_v31 }
 0x1a2   : > { %14626 = vmatpush1.msk.msra.mxu0 %vm265_vm0, %v17673_v63  ;;  %14742 = vmatpush1.msk.msra.mxu1 %vm265_vm0, %v17674_v54  ;;  %v15547_v54 = vmov 0  }
 0x1a3   : > { %14628 = vmatprep.subr.msk.mxu0 %vm265_vm0, %v17675_v14  ;;  %13735 = vrot.lane.b32.xlu0 %v13720_v53, %s15546_s9  ;;  %v17150_v33 = vpop.permute.xlu1 %9986 }
 0x1a4   : > { %13737 = vrot.lane.b32.xlu1 %v14820_v62, %s15546_s9  ;;  %9029 = vmatprep.mubr.f32.mxu0 %v17663_v58  ;;  %v17154_v48 = vpop.permute.xlu0 %9563 }
 0x1a5   : > { %11806 = vmatprep.mubr.f32.mxu1 %v17663_v58  ;;  %15054 = vmatprep.subr.mxu1 %v17663_v58 }
 0x1a6   : > { %14627 = vmatmul.mubr.msk.f32.vlgmr.msra.gmra.mrb[14].mxu0 %vm261_vm1, %v17115_v23  ;;  %14743 = vmatmul.mubr.msk.f32.vlgmr.msra.gmra.mrb[16].mxu1 %vm261_vm1, %v16945_v31 }
 0x1a7   : > { %14629 = vmatpush1.msk.msra.mxu0 %vm265_vm0, %v16580_v3  ;;  %15055 = vmatpush3.msk.msra.mxu1 %vm265_vm0, %v17676_v22 }
 0x1a8   : > { %14746 = vmatprep.subr.msk.mxu1 %vm265_vm0, %v16466_v25  ;;  %9100 = vmatprep.mubr.f32.mxu0 %v17663_v58  ;;  %v17172_v9 = vpop.permute.xlu1 %9984 }
 0x1a9   : > { %15019 = vmatprep.subr.mxu0 %v17663_v58  ;;  %15056 = vmatprep.mubr.msk.f32.mxu1 %vm15544_vm2, %v17663_v58  ;;  %v17174_v26 = vpop.permute.xlu0 %9988  ;;  %v10002_v36 = vsel %vm2711_vm4, %v17172_v9, %v17150_v33 }
 0x1aa   : > { %14630 = vmatmul.mubr.msk.f32.vlgmr.msra.gmra.mrb[16].mxu0 %vm261_vm1, %v17115_v23  ;;  %15057 = vmatmul.mubr.msk.f32.vlgmr.msra.gmra.mrb[18].mxu1 %vm261_vm1, %v16945_v31  ;;  %v10003_v19 = vsel %vm2711_vm4, %v17150_v33, %v17174_v26 }
 0x1ab   : > { %15020 = vmatpush3.msk.msra.mxu0 %vm265_vm0, %v16554_v4  ;;  %14747 = vmatpush1.msk.msra.mxu1 %vm265_vm0, %v16475_v43 }
 0x1ac   : > { %14633 = vmatprep.subr.msk.mxu0 %vm265_vm0, %v16608_v46  ;;  %14749 = vmatprep.subr.msk.mxu1 %vm265_vm0, %v17667_v61 }
 0x1ad   : > { %15021 = vmatprep.mubr.msk.f32.mxu0 %vm15544_vm2, %v17663_v58  ;;  %11956 = vmatprep.mubr.f32.mxu1 %v17663_v58  ;;  %v17199_v25 = vpop.permute.xlu1 %9571 }
 0x1ae   : > { %15022 = vmatmul.mubr.msk.f32.vlgmr.msra.gmra.mrb[18].mxu0 %vm261_vm1, %v17115_v23  ;;  %14748 = vmatmul.mubr.msk.f32.vlgmr.msra.gmra.mrb[10].mxu1 %vm261_vm1, %v17030_v32  ;;  %v9570_v43 = vpop.permute.xlu0 %9569 }
 0x1af   : > { %14634 = vmatpush1.msk.msra.mxu0 %vm265_vm0, %v16615_v15  ;;  %14750 = vmatpush1.msk.msra.mxu1 %vm265_vm0, %v17669_v29 }
 0x1b0   : > { %14636 = vmatprep.subr.msk.mxu0 %vm265_vm0, %v16634_v35  ;;  %14752 = vmatprep.subr.msk.mxu1 %vm265_vm0, %v17671_v42 }
 0x1b1   : > { %9250 = vmatprep.mubr.f32.mxu0 %v17663_v58  ;;  %12027 = vmatprep.mubr.f32.mxu1 %v17663_v58 }
 0x1b2   : > { %14635 = vmatmul.mubr.msk.f32.vlgmr.msra.gmra.mrb[10].mxu0 %vm261_vm1, %v17210_v37  ;;  %14751 = vmatmul.mubr.msk.f32.vlgmr.msra.gmra.mrb[12].mxu1 %vm261_vm1, %v17030_v32 }
 0x1b3   : > { %14637 = vmatpush1.msk.msra.mxu0 %vm265_vm0, %v16640_v50  ;;  %14753 = vmatpush1.msk.msra.mxu1 %vm265_vm0, %v17673_v63  ;;  %v17226_v34 = vpop.permute.xlu1 %9992  ;;  %v17228_v27 = vpop.permute.xlu0 %9990 }
 0x1b4   : > { %14639 = vmatprep.subr.msk.mxu0 %vm265_vm0, %v16661_v1  ;;  %14755 = vmatprep.subr.msk.mxu1 %vm265_vm0, %v17675_v14  ;;  %v14137_v14 = vld [vmem:[%s17623_s2] sm:$0xf] }
 0x1b5   : > { %9321 = vmatprep.mubr.f32.mxu0 %v17663_v58  ;;  %12098 = vmatprep.mubr.f32.mxu1 %v17663_v58 }
 0x1b6   : > { %14638 = vmatmul.mubr.msk.f32.vlgmr.msra.gmra.mrb[12].mxu0 %vm261_vm1, %v17210_v37  ;;  %14754 = vmatmul.mubr.msk.f32.vlgmr.msra.gmra.mrb[14].mxu1 %vm261_vm1, %v17030_v32 }
 0x1b7   : > { %14640 = vmatpush1.msk.msra.mxu0 %vm265_vm0, %v17677_v39  ;;  %14756 = vmatpush1.msk.msra.mxu1 %vm265_vm0, %v16580_v3 }
 0x1b8   : > { %14642 = vmatprep.subr.msk.mxu0 %vm265_vm0, %v17678_v12  ;;  %9392 = vmatprep.mubr.f32.mxu0 %v17663_v58  ;;  %v9576_v3 = vpop.permute.xlu1 %9575  ;;  %v9574_v30 = vpop.permute.xlu0 %9573 }
 0x1b9   : > { %12169 = vmatprep.mubr.f32.mxu1 %v17663_v58  ;;  %15059 = vmatprep.subr.mxu1 %v17663_v58  ;;  %v9586_v21 = vsel %vm2711_vm4, %v9574_v30, %v9576_v3  ;;  %v9585_v6 = vsel %vm2711_vm4, %v17199_v25, %v9574_v30 }
 0x1ba   : > { %14641 = vmatmul.mubr.msk.f32.vlgmr.msra.gmra.mrb[14].mxu0 %vm261_vm1, %v17210_v37  ;;  %14757 = vmatmul.mubr.msk.f32.vlgmr.msra.gmra.mrb[16].mxu1 %vm261_vm1, %v17030_v32 }
 0x1bb   : > { %14643 = vmatpush1.msk.msra.mxu0 %vm265_vm0, %v17679_v13  ;;  %15060 = vmatpush3.msk.msra.mxu1 %vm265_vm0, %v16554_v4  ;;  %v17680_v4 = vld [vmem:[#allocation14_spill] sm:$0xff] }
 0x1bc   : > { %14760 = vmatprep.subr.msk.mxu1 %vm265_vm0, %v16608_v46  ;;  %9463 = vmatprep.mubr.f32.mxu0 %v17663_v58  ;;  %v9581_v46 = vsel %vm2711_vm4, %v17154_v48, %v17134_v56 }
 0x1bd   : > { %15024 = vmatprep.subr.mxu0 %v17663_v58  ;;  %15061 = vmatprep.mubr.msk.f32.mxu1 %vm15544_vm2, %v17663_v58  ;;  %v17277_v18 = vpop.permute.xlu1 %9996  ;;  %v17279_v31 = vpop.permute.xlu0 %9994 }
 0x1be   : > { %14644 = vmatmul.mubr.msk.f32.vlgmr.msra.gmra.mrb[16].mxu0 %vm261_vm1, %v17210_v37  ;;  %15062 = vmatmul.mubr.msk.f32.vlgmr.msra.gmra.mrb[18].mxu1 %vm261_vm1, %v17030_v32  ;;  %v10006_v47 = vsel %vm2711_vm4, %v17226_v34, %v17279_v31 }
 0x1bf   : > { %15025 = vmatpush3.msk.msra.mxu0 %vm265_vm0, %v17680_v4  ;;  %14761 = vmatpush1.msk.msra.mxu1 %vm265_vm0, %v16615_v15  ;;  %v9584_v15 = vsel %vm2711_vm4, %v9570_v43, %v17199_v25 }
 0x1c0   : > { %14763 = vmatprep.subr.msk.mxu1 %vm265_vm0, %v16634_v35  ;;  %15026 = vmatprep.mubr.msk.f32.mxu0 %vm15544_vm2, %v17663_v58  ;;  %v9583_v35 = vsel %vm2711_vm4, %v17130_v52, %v9570_v43 }
 0x1c1   : > { %12319 = vmatprep.mubr.f32.mxu1 %v17663_v58  ;;  %14652 = vmatprep.subr.msk.mxu0 %vm265_vm0, %v9582_v28 }
 0x1c2   : > { %15027 = vmatmul.mubr.msk.f32.vlgmr.msra.gmra.mrb[18].mxu0 %vm261_vm1, %v17210_v37  ;;  %14762 = vmatmul.mubr.msk.f32.vlgmr.msra.gmra.mrb[10].mxu1 %vm261_vm1, %v17115_v23  ;;  %v9578_v40 = vpop.permute.xlu0 %9577 }
 0x1c3   : > { %14764 = vmatpush1.msk.msra.mxu1 %vm265_vm0, %v16640_v50  ;;  %14653 = vmatpush1.msk.msra.mxu0 %vm265_vm0, %v9581_v46  ;;  %v17301_v50 = vld [vmem:[%s17622_s1 + $0x18] sm:$0xf]  ;;  %v9587_v11 = vsel %vm2711_vm4, %v9576_v3, %v9578_v40 }
 0x1c4   : > { %14766 = vmatprep.subr.msk.mxu1 %vm265_vm0, %v16661_v1  ;;  %9671 = vmatprep.mubr.f32.mxu0 %v17663_v58  ;;  %v9580_v1 = vpop.permute.xlu1 %9579 }
 0x1c5   : > { %12390 = vmatprep.mubr.f32.mxu1 %v17663_v58  ;;  %14655 = vmatprep.subr.msk.mxu0 %vm265_vm0, %v9584_v15  ;;  %v9588_v10 = vsel %vm2711_vm4, %v9578_v40, %v9580_v1 }
 0x1c6   : > { %14654 = vmatmul.mubr.msk.f32.vlgmr.msra.gmra.mrb[10].mxu0 %vm261_vm1, %v17301_v50  ;;  %14765 = vmatmul.mubr.msk.f32.vlgmr.msra.gmra.mrb[12].mxu1 %vm261_vm1, %v17115_v23 }
 0x1c7   : > { %14767 = vmatpush1.msk.msra.mxu1 %vm265_vm0, %v17677_v39  ;;  %14656 = vmatpush1.msk.msra.mxu0 %vm265_vm0, %v9583_v35 }
 0x1c8   : > { %14769 = vmatprep.subr.msk.mxu1 %vm265_vm0, %v17678_v12  ;;  %9742 = vmatprep.mubr.f32.mxu0 %v17663_v58 }
 0x1c9   : > { %12461 = vmatprep.mubr.f32.mxu1 %v17663_v58  ;;  %14658 = vmatprep.subr.msk.mxu0 %vm265_vm0, %v9586_v21 }
 0x1ca   : > { %14657 = vmatmul.mubr.msk.f32.vlgmr.msra.gmra.mrb[12].mxu0 %vm261_vm1, %v17301_v50  ;;  %14768 = vmatmul.mubr.msk.f32.vlgmr.msra.gmra.mrb[14].mxu1 %vm261_vm1, %v17115_v23 }
 0x1cb   : > { %14770 = vmatpush1.msk.msra.mxu1 %vm265_vm0, %v17679_v13  ;;  %14659 = vmatpush1.msk.msra.mxu0 %vm265_vm0, %v9585_v6 }
 0x1cc   : > { %9813 = vmatprep.mubr.f32.mxu0 %v17663_v58  ;;  %12532 = vmatprep.mubr.f32.mxu1 %v17663_v58 }
 0x1cd   : > { %15064 = vmatprep.subr.mxu1 %v17663_v58  ;;  %14661 = vmatprep.subr.msk.mxu0 %vm265_vm0, %v9588_v10 }
 0x1ce   : > { %14660 = vmatmul.mubr.msk.f32.vlgmr.msra.gmra.mrb[14].mxu0 %vm261_vm1, %v17301_v50  ;;  %14771 = vmatmul.mubr.msk.f32.vlgmr.msra.gmra.mrb[16].mxu1 %vm261_vm1, %v17115_v23 }
 0x1cf   : > { %15065 = vmatpush3.msk.msra.mxu1 %vm265_vm0, %v17680_v4  ;;  %14662 = vmatpush1.msk.msra.mxu0 %vm265_vm0, %v9587_v11 }
 0x1d0   : > { %14774 = vmatprep.subr.msk.mxu1 %vm265_vm0, %v17681_v16  ;;  %9884 = vmatprep.mubr.f32.mxu0 %v17663_v58 }
 0x1d1   : > { %15066 = vmatprep.mubr.msk.f32.mxu1 %vm15544_vm2, %v17663_v58  ;;  %15029 = vmatprep.subr.mxu0 %v17663_v58 }
 0x1d2   : > { %14663 = vmatmul.mubr.msk.f32.vlgmr.msra.gmra.mrb[16].mxu0 %vm261_vm1, %v17301_v50  ;;  %15067 = vmatmul.mubr.msk.f32.vlgmr.msra.gmra.mrb[18].mxu1 %vm261_vm1, %v17115_v23 }
 0x1d3   : > { %14775 = vmatpush1.msk.msra.mxu1 %vm265_vm0, %v16804_v0  ;;  %15030 = vmatpush3.msk.msra.mxu0 %vm265_vm0, %v9580_v1  ;;  %v10005_v0 = vsel %vm2711_vm4, %v17228_v27, %v17226_v34 }
 0x1d4   : > { %14777 = vmatprep.subr.msk.mxu1 %vm265_vm0, %v16814_v24  ;;  %15031 = vmatprep.mubr.msk.f32.mxu0 %vm15544_vm2, %v17663_v58  ;;  %v10004_v24 = vsel %vm2711_vm4, %v17174_v26, %v17228_v27 }
 0x1d5   : > { %12682 = vmatprep.mubr.f32.mxu1 %v17663_v58  ;;  %14671 = vmatprep.subr.msk.mxu0 %vm265_vm0, %v10003_v19 }
 0x1d6   : > { %15032 = vmatmul.mubr.msk.f32.vlgmr.msra.gmra.mrb[18].mxu0 %vm261_vm1, %v17301_v50  ;;  %14776 = vmatmul.mubr.msk.f32.vlgmr.msra.gmra.mrb[10].mxu1 %vm261_vm1, %v17210_v37 }
 0x1d7   : > { %14778 = vmatpush1.msk.msra.mxu1 %vm265_vm0, %v16825_v57  ;;  %14672 = vmatpush1.msk.msra.mxu0 %vm265_vm0, %v10002_v36  ;;  %v10007_v57 = vsel %vm2711_vm4, %v17279_v31, %v17277_v18 }
 0x1d8   : > { %14780 = vmatprep.subr.msk.mxu1 %vm265_vm0, %v16832_v45  ;;  %10092 = vmatprep.mubr.f32.mxu0 %v17663_v58 }
 0x1d9   : > { %12753 = vmatprep.mubr.f32.mxu1 %v17663_v58  ;;  %14674 = vmatprep.subr.msk.mxu0 %vm265_vm0, %v10005_v0  ;;  %v9999_v32 = vpop.permute.xlu0 %9998  ;;  %v17395_v45 = vpop.permute.xlu1 %10000 }
 0x1da   : > { %14673 = vmatmul.mubr.msk.f32.vlgmr.msra.gmra.mrb[10].mxu0 %vm261_vm1, %v17386_v41  ;;  %14779 = vmatmul.mubr.msk.f32.vlgmr.msra.gmra.mrb[12].mxu1 %vm261_vm1, %v17210_v37 }
 0x1db   : > { %14781 = vmatpush1.msk.msra.mxu1 %vm265_vm0, %v16848_v17  ;;  %14675 = vmatpush1.msk.msra.mxu0 %vm265_vm0, %v10004_v24  ;;  %v10009_v17 = vsel %vm2711_vm4, %v9999_v32, %v17395_v45 }
 0x1dc   : > { %14783 = vmatprep.subr.msk.mxu1 %vm265_vm0, %v16855_v20  ;;  %10163 = vmatprep.mubr.f32.mxu0 %v17663_v58  ;;  %v10008_v20 = vsel %vm2711_vm4, %v17277_v18, %v9999_v32 }
 0x1dd   : > { %12824 = vmatprep.mubr.f32.mxu1 %v17663_v58  ;;  %14677 = vmatprep.subr.msk.mxu0 %vm265_vm0, %v10007_v57 }
 0x1de   : > { %14676 = vmatmul.mubr.msk.f32.vlgmr.msra.gmra.mrb[12].mxu0 %vm261_vm1, %v17386_v41  ;;  %14782 = vmatmul.mubr.msk.f32.vlgmr.msra.gmra.mrb[14].mxu1 %vm261_vm1, %v17210_v37  ;;  %v10408_v49 = vpop.permute.xlu0 %10407 }
 0x1df   : > { %14784 = vmatpush1.msk.msra.mxu1 %vm265_vm0, %v16874_v8  ;;  %14678 = vmatpush1.msk.msra.mxu0 %vm265_vm0, %v10006_v47 }
 0x1e0   : > { %10234 = vmatprep.mubr.f32.mxu0 %v17663_v58  ;;  %12895 = vmatprep.mubr.f32.mxu1 %v17663_v58 }
 0x1e1   : > { %15069 = vmatprep.subr.mxu1 %v17663_v58  ;;  %14680 = vmatprep.subr.msk.mxu0 %vm265_vm0, %v10009_v17 }
 0x1e2   : > { %14679 = vmatmul.mubr.msk.f32.vlgmr.msra.gmra.mrb[14].mxu0 %vm261_vm1, %v17386_v41  ;;  %14785 = vmatmul.mubr.msk.f32.vlgmr.msra.gmra.mrb[16].mxu1 %vm261_vm1, %v17210_v37  ;;  %v10410_v8 = vpop.permute.xlu1 %10409 }
 0x1e3   : > { %15070 = vmatpush3.msk.msra.mxu1 %vm265_vm0, %v16838_v60  ;;  %14681 = vmatpush1.msk.msra.mxu0 %vm265_vm0, %v10008_v20  ;;  %v10406_v51 = vpop.permute.xlu0 %10405  ;;  %v10424_v60 = vsel %vm3564_vm5, %v10408_v49, %v10410_v8 }
 0x1e4   : > { %14788 = vmatprep.subr.msk.mxu1 %vm265_vm0, %v10003_v19  ;;  %10305 = vmatprep.mubr.f32.mxu0 %v17663_v58  ;;  %v10423_v2 = vsel %vm3564_vm5, %v10406_v51, %v10408_v49 }
 0x1e5   : > { %15071 = vmatprep.mubr.msk.f32.mxu1 %vm15544_vm2, %v17663_v58  ;;  %15034 = vmatprep.subr.mxu0 %v17663_v58 }
 0x1e6   : > { %14682 = vmatmul.mubr.msk.f32.vlgmr.msra.gmra.mrb[16].mxu0 %vm261_vm1, %v17386_v41  ;;  %15072 = vmatmul.mubr.msk.f32.vlgmr.msra.gmra.mrb[18].mxu1 %vm261_vm1, %v17210_v37 }
 0x1e7   : > { %14789 = vmatpush1.msk.msra.mxu1 %vm265_vm0, %v10002_v36  ;;  %15035 = vmatpush3.msk.msra.mxu0 %vm265_vm0, %v17395_v45  ;;  %v10412_v59 = vpop.permute.xlu1 %10411  ;;  %v10414_v61 = vpop.permute.xlu0 %10413 }
 0x1e8   : > { %14791 = vmatprep.subr.msk.mxu1 %vm265_vm0, %v10005_v0  ;;  %15036 = vmatprep.mubr.msk.f32.mxu0 %vm15544_vm2, %v17663_v58  ;;  %v10426_v5 = vsel %vm3564_vm5, %v10412_v59, %v10414_v61  ;;  %v10425_v38 = vsel %vm3564_vm5, %v10410_v8, %v10412_v59 }
 0x1e9   : > { %13045 = vmatprep.mubr.f32.mxu1 %v17663_v58  ;;  %14690 = vmatprep.subr.msk.mxu0 %vm265_vm0, %v10424_v60 }
 0x1ea   : > { %15037 = vmatmul.mubr.msk.f32.vlgmr.msra.gmra.mrb[18].mxu0 %vm261_vm1, %v17386_v41  ;;  %14790 = vmatmul.mubr.msk.f32.vlgmr.msra.gmra.mrb[10].mxu1 %vm261_vm1, %v17301_v50 }
 0x1eb   : > { %14792 = vmatpush1.msk.msra.mxu1 %vm265_vm0, %v10004_v24  ;;  %14691 = vmatpush1.msk.msra.mxu0 %vm265_vm0, %v10423_v2  ;;  %v10416_v23 = vpop.permute.xlu1 %10415 }
 0x1ec   : > { %14794 = vmatprep.subr.msk.mxu1 %vm265_vm0, %v10007_v57  ;;  %10513 = vmatprep.mubr.f32.mxu0 %v17663_v58  ;;  %v10418_v29 = vpop.permute.xlu0 %10417  ;;  %v10427_v44 = vsel %vm3564_vm5, %v10414_v61, %v10416_v23 }
 0x1ed   : > { %13116 = vmatprep.mubr.f32.mxu1 %v17663_v58  ;;  %14693 = vmatprep.subr.msk.mxu0 %vm265_vm0, %v10426_v5  ;;  %v10428_v55 = vsel %vm3564_vm5, %v10416_v23, %v10418_v29 }
 0x1ee   : > { %14692 = vmatmul.mubr.msk.f32.vlgmr.msra.gmra.mrb[10].mxu0 %vm261_vm1, %v16627_v7  ;;  %14793 = vmatmul.mubr.msk.f32.vlgmr.msra.gmra.mrb[12].mxu1 %vm261_vm1, %v17301_v50  ;;  %v17473_v7 = vld [vmem:[%s17622_s1 + $0x20] sm:$0xf] }
 0x1ef   : > { %14795 = vmatpush1.msk.msra.mxu1 %vm265_vm0, %v10006_v47  ;;  %14694 = vmatpush1.msk.msra.mxu0 %vm265_vm0, %v10425_v38  ;;  %v10420_v42 = vpop.permute.xlu1 %10419 }
 0x1f0   : > { %10584 = vmatprep.mubr.f32.mxu0 %v17663_v58  ;;  %13187 = vmatprep.mubr.f32.mxu1 %v17663_v58  ;;  %v10422_v52 = vpop.permute.xlu0 %10421  ;;  %v10429_v56 = vsel %vm3564_vm5, %v10418_v29, %v10420_v42 }
 0x1f1   : > { %14797 = vmatprep.subr.msk.mxu1 %vm265_vm0, %v10009_v17  ;;  %14696 = vmatprep.subr.msk.mxu0 %vm265_vm0, %v10428_v55  ;;  %v10430_v53 = vsel %vm3564_vm5, %v10420_v42, %v10422_v52 }
 0x1f2   : > { %14695 = vmatmul.mubr.msk.f32.vlgmr.msra.gmra.mrb[12].mxu0 %vm261_vm1, %v17473_v7  ;;  %14796 = vmatmul.mubr.msk.f32.vlgmr.msra.gmra.mrb[14].mxu1 %vm261_vm1, %v17301_v50 }
 0x1f3   : > { %14798 = vmatpush1.msk.msra.mxu1 %vm265_vm0, %v10008_v20  ;;  %14697 = vmatpush1.msk.msra.mxu0 %vm265_vm0, %v10427_v44 }
 0x1f4   : > { %10655 = vmatprep.mubr.f32.mxu0 %v17663_v58  ;;  %13258 = vmatprep.mubr.f32.mxu1 %v17663_v58 }
 0x1f5   : > { %15074 = vmatprep.subr.mxu1 %v17663_v58  ;;  %14699 = vmatprep.subr.msk.mxu0 %vm265_vm0, %v10430_v53 }
 0x1f6   : > { %14698 = vmatmul.mubr.msk.f32.vlgmr.msra.gmra.mrb[14].mxu0 %vm261_vm1, %v17473_v7  ;;  %14799 = vmatmul.mubr.msk.f32.vlgmr.msra.gmra.mrb[16].mxu1 %vm261_vm1, %v17301_v50 }
 0x1f7   : > { %15075 = vmatpush3.msk.msra.mxu1 %vm265_vm0, %v17395_v45  ;;  %14700 = vmatpush1.msk.msra.mxu0 %vm265_vm0, %v10429_v56 }
 0x1f8   : > { %14802 = vmatprep.subr.msk.mxu1 %vm265_vm0, %v10424_v60  ;;  %10726 = vmatprep.mubr.f32.mxu0 %v17663_v58 }
 0x1f9   : > { %15076 = vmatprep.mubr.msk.f32.mxu1 %vm15544_vm2, %v17663_v58  ;;  %15039 = vmatprep.subr.mxu0 %v17663_v58 }
 0x1fa   : > { %14701 = vmatmul.mubr.msk.f32.vlgmr.msra.gmra.mrb[16].mxu0 %vm261_vm1, %v17473_v7  ;;  %15077 = vmatmul.mubr.msk.f32.vlgmr.msra.gmra.mrb[18].mxu1 %vm261_vm1, %v17301_v50  ;;  %v17503_v62 = vpop.f32.mrb[0].mxu0 }
 0x1fb   : > { %14803 = vmatpush1.msk.msra.mxu1 %vm265_vm0, %v10423_v2  ;;  %15040 = vmatpush3.msk.msra.mxu0 %vm265_vm0, %v10422_v52  ;;  %v17507_v63 = vpop.f32.mrb[1].mxu0 }
 0x1fc   : > { %15041 = vmatprep.mubr.msk.f32.mxu0 %vm15544_vm2, %v17663_v58  ;;  %13408 = vmatprep.mubr.f32.mxu1 %v17663_v58 }
 0x1fd   : > { %14805 = vmatprep.subr.msk.mxu1 %vm265_vm0, %v10426_v5  ;;  %15443 = vset.pattern.permute.xlu0 %v15547_v54 }
 0x1fe   : > { %15042 = vmatmul.mubr.msk.f32.vlgmr.msra.gmra.mrb[18].mxu0 %vm261_vm1, %v17473_v7  ;;  %14804 = vmatmul.mubr.msk.f32.vlgmr.msra.gmra.mrb[10].mxu1 %vm261_vm1, %v17386_v41  ;;  %v17520_v33 = vpop.f32.mrb[2].mxu0 }
 0x1ff   : > { %14806 = vmatpush1.msk.msra.mxu1 %vm265_vm0, %v10425_v38  ;;  %13479 = vmatprep.mubr.f32.mxu1 %v17663_v58  ;;  %v17524_v48 = vpop.f32.mrb[3].mxu0 }
 0x200   : > { %14808 = vmatprep.subr.msk.mxu1 %vm265_vm0, %v10428_v55  ;;  %14140 = vperm.xlu0 %15443, %v14137_v14  }
 0x201   : > { %v13724_v22 = vpop.permute.xlu1 %13723 }
 0x202   : > { %14807 = vmatmul.mubr.msk.f32.vlgmr.msra.gmra.mrb[12].mxu1 %vm261_vm1, %v17386_v41 }
 0x203   : > { %14809 = vmatpush1.msk.msra.mxu1 %vm265_vm0, %v10427_v44  ;;  %13550 = vmatprep.mubr.f32.mxu1 %v17663_v58  ;;  %v17531_v9 = vpop.f32.mrb[4].mxu0 }
 0x204   : > { %14811 = vmatprep.subr.msk.mxu1 %vm265_vm0, %v10430_v53  ;;  %v17534_v26 = vpop.f32.mrb[5].mxu0 }
 0x206   : > { %14810 = vmatmul.mubr.msk.f32.vlgmr.msra.gmra.mrb[14].mxu1 %vm261_vm1, %v17386_v41 }
 0x207   : > { %14812 = vmatpush1.msk.msra.mxu1 %vm265_vm0, %v10429_v56  ;;  %13621 = vmatprep.mubr.f32.mxu1 %v17663_v58  ;;  %v13722_v25 = vpop.permute.xlu1 %13721  ;;  %v13726_v43 = vpop.permute.xlu0 %13725 }
 0x208   : > { %15079 = vmatprep.subr.mxu1 %v17663_v58  ;;  %v17541_v37 = vpop.f32.mrb[6].mxu0  ;;  %v13740_v34 = vsel %vm3564_vm5, %v13724_v22, %v13726_v43  ;;  %v13739_v30 = vsel %vm3564_vm5, %v13722_v25, %v13724_v22 }
 0x209   : > { %v17544_v27 = vpop.f32.mrb[7].mxu0 }
 0x20a   : > { %14813 = vmatmul.mubr.msk.f32.vlgmr.msra.gmra.mrb[16].mxu1 %vm261_vm1, %v17386_v41 }
 0x20b   : > { %15080 = vmatpush3.msk.msra.mxu1 %vm265_vm0, %v10422_v52  ;;  %15081 = vmatprep.mubr.msk.f32.mxu1 %vm15544_vm2, %v17663_v58 }
 0x20c   : > { %14821 = vmatprep.subr.msk.mxu1 %vm265_vm0, %v13740_v34  ;;  %v13728_v39 = vpop.permute.xlu0 %13727  ;;  %v13730_v12 = vpop.permute.xlu1 %13729 }
 0x20d   : > { %v13742_v13 = vsel %vm3564_vm5, %v13728_v39, %v13730_v12  ;;  %v17553_v3 = vpop.f32.mrb[8].mxu0  ;;  %v13741_v18 = vsel %vm3564_vm5, %v13726_v43, %v13728_v39 }
 0x20e   : > { %15082 = vmatmul.mubr.msk.f32.vlgmr.msra.gmra.mrb[18].mxu1 %vm261_vm1, %v17386_v41  ;;  %v14953_v28 = vpop.f32.mrb[9].mxu0 }
 0x20f   : > { %14822 = vmatpush1.msk.msra.mxu1 %vm265_vm0, %v13739_v30  ;;  %13829 = vmatprep.mubr.f32.mxu1 %v17663_v58 }
 0x210   : > { %14824 = vmatprep.subr.msk.mxu1 %vm265_vm0, %v13742_v13 }
 0x211   : > { %v13732_v4 = vpop.permute.xlu0 %13731  ;;  %v13734_v46 = vpop.permute.xlu1 %13733 }
 0x212   : > { %14823 = vmatmul.mubr.msk.f32.vlgmr.msra.gmra.mrb[10].mxu1 %vm261_vm1, %v17473_v7  ;;  %v13744_v31 = vsel %vm3564_vm5, %v13732_v4, %v13734_v46  ;;  %v13743_v35 = vsel %vm3564_vm5, %v13730_v12, %v13732_v4 }
 0x213   : > { %14825 = vmatpush1.msk.msra.mxu1 %vm265_vm0, %v13741_v18  ;;  %13900 = vmatprep.mubr.f32.mxu1 %v17663_v58 }
 0x214   : > { %14827 = vmatprep.subr.msk.mxu1 %vm265_vm0, %v13744_v31 }
 0x215   : > { %v13736_v15 = vpop.permute.xlu0 %13735 }
 0x216   : > { %14826 = vmatmul.mubr.msk.f32.vlgmr.msra.gmra.mrb[12].mxu1 %vm261_vm1, %v17473_v7  ;;  %v13738_v21 = vpop.permute.xlu1 %13737  ;;  %v13745_v1 = vsel %vm3564_vm5, %v13734_v46, %v13736_v15 }
 0x217   : > { %14828 = vmatpush1.msk.msra.mxu1 %vm265_vm0, %v13743_v35  ;;  %v13746_v50 = vsel %vm3564_vm5, %v13736_v15, %v13738_v21  ;;  %13971 = vmatprep.mubr.f32.mxu1 %v17663_v58 }
 0x218   : > { %14830 = vmatprep.subr.msk.mxu1 %vm265_vm0, %v13746_v50 }
 0x21a   : > { %14829 = vmatmul.mubr.msk.f32.vlgmr.msra.gmra.mrb[14].mxu1 %vm261_vm1, %v17473_v7 }
 0x21b   : > { %14831 = vmatpush1.msk.msra.mxu1 %vm265_vm0, %v13745_v1  ;;  %14042 = vmatprep.mubr.f32.mxu1 %v17663_v58 }
 0x21c   : > { %15084 = vmatprep.subr.mxu1 %v17663_v58 }
 0x21e   : > { %14832 = vmatmul.mubr.msk.f32.vlgmr.msra.gmra.mrb[16].mxu1 %vm261_vm1, %v17473_v7 }
 0x21f   : > { %15085 = vmatpush3.msk.msra.mxu1 %vm265_vm0, %v13738_v21  ;;  %15086 = vmatprep.mubr.msk.f32.mxu1 %vm15544_vm2, %v17663_v58 }
 0x222   : > { %15087 = vmatmul.mubr.msk.f32.vlgmr.msra.gmra.mrb[18].mxu1 %vm261_vm1, %v17473_v7 }
 0x226   : > { %v7083_v40 = vpop.f32.mrb[0].mxu1 }
 0x227   : > { %v7380_v6 = vmax.f32 %v17503_v62, %v7083_v40  ;;  %v7085_v10 = vpop.f32.mrb[1].mxu1 }
 0x228   : > { %v7381_v11 = vmax.f32 %v17507_v63, %v7085_v10 }
 0x22a   : > { %v7154_v16 = vpop.f32.mrb[2].mxu1 }
 0x22b   : > { %v7382_v19 = vmax.f32 %v17520_v33, %v7154_v16  ;;  %v7156_v36 = vpop.f32.mrb[3].mxu1 }
 0x22c   : > { %v7383_v0 = vmax.f32 %v17524_v48, %v7156_v36 }
 0x22e   : > { %v7225_v24 = vpop.f32.mrb[4].mxu1 }
 0x22f   : > { %v7384_v32 = vmax.f32 %v17531_v9, %v7225_v24  ;;  %v7227_v57 = vpop.f32.mrb[5].mxu1 }
 0x230   : > { %v7385_v58 = vmax.f32 %v17534_v26, %v7227_v57 }
 0x232   : > { %v7296_v41 = vpop.f32.mrb[6].mxu1 }
 0x233   : > { %v7386_v45 = vmax.f32 %v17541_v37, %v7296_v41  ;;  %v7298_v47 = vpop.f32.mrb[7].mxu1 }
 0x234   : > { %v7387_v17 = vmax.f32 %v17544_v27, %v7298_v47 }
 0x237   : > { %v7367_v49 = vpop.f32.mrb[8].mxu1 }
 0x238   : > { %v7388_v20 = vmax.f32 %v17553_v3, %v7367_v49  ;;  %v14998_v8 = vpop.f32.mrb[9].mxu1 }
 0x27f   : > { %v14141_v33 = vpop.permute.xlu0 %14140 }
 0x2c1   : > { %v10515_v51 = vpop.f32.mrb[10].mxu0 }
 0x2c2   : > { %v10812_v60 = vmax.f32 %v7380_v6, %v10515_v51  ;;  %v10517_v59 = vpop.f32.mrb[11].mxu0 }
 0x2c3   : > { %v10813_v61 = vmax.f32 %v7381_v11, %v10517_v59 }
 0x2c5   : > { %v10586_v2 = vpop.f32.mrb[12].mxu0 }
 0x2c6   : > { %v10814_v5 = vmax.f32 %v7382_v19, %v10586_v2  ;;  %v10588_v23 = vpop.f32.mrb[13].mxu0 }
 0x2c7   : > { %v10815_v38 = vmax.f32 %v7383_v0, %v10588_v23 }
 0x2c9   : > { %v10657_v29 = vpop.f32.mrb[14].mxu0 }
 0x2ca   : > { %v10816_v55 = vmax.f32 %v7384_v32, %v10657_v29  ;;  %v10659_v42 = vpop.f32.mrb[15].mxu0 }
 0x2cb   : > { %v10817_v44 = vmax.f32 %v7385_v58, %v10659_v42 }
 0x2cd   : > { %v10728_v52 = vpop.f32.mrb[16].mxu0 }
 0x2ce   : > { %v10818_v7 = vmax.f32 %v7386_v45, %v10728_v52  ;;  %v10730_v53 = vpop.f32.mrb[17].mxu0 }
 0x2cf   : > { %v10819_v56 = vmax.f32 %v7387_v17, %v10730_v53 }
 0x2d1   : > { %v10799_v62 = vpop.f32.mrb[18].mxu0 }
 0x2d2   : > { %v10820_v63 = vmax.f32 %v7388_v20, %v10799_v62  ;;  %v15043_v54 = vpop.f32.mrb[19].mxu0 }
 0x2e5   : > { %v13831_v14 = vpop.f32.mrb[10].mxu1 }
 0x2e6   : > { %v14128_v48 = vmax.f32 %v10812_v60, %v13831_v14  ;;  %v13833_v22 = vpop.f32.mrb[11].mxu1 }
 0x2e7   : > { %v14129_v9 = vmax.f32 %v10813_v61, %v13833_v22 }
 0x2e8   : > { %v14143_v26 = vadd.f32 %v14141_v33, %v14128_v48 }
 0x2e9   : > { %v14144_v25 = vadd.f32 %v14141_v33, %v14129_v9  ;;  %v13902_v43 = vpop.f32.mrb[12].mxu1 }
 0x2ea   : > { %v14152_v37 = vmax.f32 %v14143_v26, 0.0  ;;  %v14130_v34 = vmax.f32 %v10814_v5, %v13902_v43  ;;  %v13904_v27 = vpop.f32.mrb[13].mxu1 }
 0x2eb   : > { %v14153_v39 = vmax.f32 %v14144_v25, 0.0  ;;  %v14131_v12 = vmax.f32 %v10815_v38, %v13904_v27 }
 0x2ec   : > { %v14145_v13 = vadd.f32 %v14141_v33, %v14130_v34 }
 0x2ed   : > { %v14146_v3 = vadd.f32 %v14141_v33, %v14131_v12  ;;  %v14169_v30 = vcombine.low %v14152_v37, %v14153_v39  ;;  %v13973_v28 = vpop.f32.mrb[14].mxu1 }
 0x2ee   : > { %v14154_v4 = vmax.f32 %v14145_v13, 0.0  ;;  %v14132_v46 = vmax.f32 %v10816_v55, %v13973_v28  ;;  %v13975_v18 = vpop.f32.mrb[15].mxu1 }
 0x2ef   : > { %v14155_v31 = vmax.f32 %v14146_v3, 0.0  ;;  %14177 = vst [vmem:[%s17604_s14] sm:$0xff] %v14169_v30  ;;  %v14133_v15 = vmax.f32 %v10817_v44, %v13975_v18 }
 0x2f0   : > { %v14147_v35 = vadd.f32 %v14141_v33, %v14132_v46 }
 0x2f1   : > { %v14170_v21 = vcombine.low %v14154_v4, %v14155_v31  ;;  %v14148_v50 = vadd.f32 %v14141_v33, %v14133_v15  ;;  %v14044_v1 = vpop.f32.mrb[16].mxu1 }
 0x2f2   : > { %v14156_v40 = vmax.f32 %v14147_v35, 0.0  ;;  %v14134_v6 = vmax.f32 %v10818_v7, %v14044_v1  ;;  %v14046_v10 = vpop.f32.mrb[17].mxu1 }
 0x2f3   : > { %14178 = vst [vmem:[%s17604_s14 + $0x8] sm:$0xff] %v14170_v21  ;;  %v14157_v11 = vmax.f32 %v14148_v50, 0.0  ;;  %v14135_v16 = vmax.f32 %v10819_v56, %v14046_v10 }
 0x2f4   : > { %v14149_v19 = vadd.f32 %v14141_v33, %v14134_v6 }
 0x2f5   : > { %v14171_v36 = vcombine.low %v14156_v40, %v14157_v11  ;;  %v14150_v0 = vadd.f32 %v14141_v33, %v14135_v16  ;;  %v14115_v24 = vpop.f32.mrb[18].mxu1 }
 0x2f6   : > { %v14158_v32 = vmax.f32 %v14149_v19, 0.0  ;;  %v14136_v57 = vmax.f32 %v10820_v63, %v14115_v24  ;;  %v15088_v58 = vpop.f32.mrb[19].mxu1 }
 0x2f7   : > { %14179 = vst [vmem:[%s17604_s14 + $0x10] sm:$0xff] %v14171_v36  ;;  %v14159_v41 = vmax.f32 %v14150_v0, 0.0 }
 0x2f8   : > { %v14151_v45 = vadd.f32 %v14141_v33, %v14136_v57 }
 0x2f9   : > { %v14172_v47 = vcombine.low %v14158_v32, %v14159_v41 }
 0x2fa   : > { %v14160_v17 = vmax.f32 %v14151_v45, 0.0 }
 0x2fb   : > { %14180 = vst [vmem:[%s17604_s14 + $0x18] sm:$0xff] %v14172_v47 }
 0x2fc   : > { %14182 = vst.msk [vmem:[%s17604_s14 + $0x20] sm:$0xf] %vm14181_vm6, %v14160_v17 }
 0x2fd PF: > { %p10_p9 = scmp.ge.s32.totalorder %s15585_s16, 4   ;;  %s17682_s12 = smov %s15536_s13 }
 0x2fe   : > { %s17683_s13 = smov %s15594_s19  ;;  %s17684_s14 = smov %s15585_s16 }
 0x2ff   :  { %12 = sbr.rel (!%p10_p9) target bundleno = 2 (0x2), region = 110 }

// kernel: image_regression_forward.5
= control target key start
LH: loop header
LB: loop body
LE: loop exit
PB: predicated region body
PF: predicated region fallthrough
CT: control target
= control target key end

     0   :  { %s6486_s12 = smov 0   ;;  %s6488_s13 = smov 0   ;;  %s7267_s0 = inlined_call_operand.vmem [shape: f32[4,2,4,306], index: 0, kind: input, shape index: {}]   ;;  %s7268_s1 = inlined_call_operand.vmem [shape: f32[3,3,8,4], index: 1, kind: input, shape index: {}]   ;;  %s7269_s2 = inlined_call_operand.vmem [shape: f32[8,1], index: 2, kind: input, shape index: {}]   ;;  %s7270_s3 = inlined_call_operand.vmem [shape: f32[2,8,272], index: 3, kind: output, shape index: {}]  }
   0x1   :  { %s6490_s14 = smov 0  }
   0x2 LB: > { %s5788_s15 = sadd.s32 4294967295, %s6458_s14   ;;  %s6503_s16 = sadd.s32 1, %s6458_s14   ;;  %s6458_s14 = sphi %s6490_s14, %s7273_s14   ;;  %s6454_s13 = sphi %s6488_s13, %s7272_s13   ;;  %s6450_s12 = sphi %s6486_s12, %s7271_s12  }
   0x3   : > { %s17_s17 = ssub.s32 %s6458_s14, %s6503_s16  ;;  %s20_s18 = sadd.s32 1, %s6454_s13 }
   0x4   : > { %p18_p0 = scmp.eq.s32.totalorder %s17_s17, 0  ;;  %p27_p1 = scmp.ne.s32.totalorder %s6454_s13, %s6450_s12 }
   0x5   : > { %p28_p2 = scmp.eq.s32.totalorder %s6458_s14, 0  ;;  %p5791_p4 = scmp.ge.s32.totalorder %s6458_s14, 2 }
   0x6   : > { %s6512_s19 = scalar_select %p18_p0, %s6454_s13, %s20_s18  }
   0x7   : > { %p29_p3 = por %p28_p2, %p27_p1  ;;  %127 = sbr.rel (%p5791_p4) target bundleno = 23 (0x17), region = 24 }
   0xe   : > { %130 = sbr.rel (!%p29_p3) target bundleno = 23 (0x17), region = 28  ;;  %s132_s20 = sand.u32 (%p29_p3), 1, %s6454_s13  }
   0xf   : > { %s6398_s21 = smul.u32 (%p29_p3), 12, %s6458_s14 }
  0x10   : > { %s6397_s22 = smul.u32 (%p29_p3), 48, %s132_s20 }
  0x11   : > { %s137_s25 = scalar_lea.vmem (%p29_p3), %s7267_s0, %s6398_s21 }
  0x12   : > { %v152_v0 = vld [vmem:[%s137_s25] sm:$0xff] (%p29_p3)  ;;  %v154_v1 = vld [vmem:[%s137_s25 + $0x18] sm:$0xff] (%p29_p3)  ;;  %v156_v2 = vld [vmem:[%s137_s25 + $0x30] sm:$0xff] (%p29_p3)  ;;  %s134_s26 = scalar_lea.vmem (%p29_p3), [#allocation2], %s6397_s22 }
  0x13   : > { %153 = vst [vmem:[%s134_s26] sm:$0xff] (%p29_p3), %v152_v0  ;;  %155 = vst [vmem:[%s134_s26 + $0xc] sm:$0xff] (%p29_p3), %v154_v1  ;;  %v158_v3 = vld [vmem:[%s137_s25 + $0x48] sm:$0xff] (%p29_p3)  ;;  %v5795_v5 = vld [vmem:[%s137_s25 + $0x20] sm:$0xf] (%p29_p3) }
  0x14   : > { %157 = vst [vmem:[%s134_s26 + $0x18] sm:$0xff] (%p29_p3), %v156_v2  ;;  %v5793_v4 = vld [vmem:[%s137_s25 + $0x8] sm:$0xf] (%p29_p3)  ;;  %159 = vst [vmem:[%s134_s26 + $0x24] sm:$0xff] (%p29_p3), %v158_v3  ;;  %v5797_v6 = vld [vmem:[%s137_s25 + $0x38] sm:$0xf] (%p29_p3) }
  0x15   : > { %5794 = vst [vmem:[%s134_s26 + $0x8] sm:$0xf] %v5793_v4  ;;  %5796 = vst [vmem:[%s134_s26 + $0x14] sm:$0xf] %v5795_v5  ;;  %v5799_v7 = vld [vmem:[%s137_s25 + $0x50] sm:$0xf] }
  0x16   : > { %5798 = vst [vmem:[%s134_s26 + $0x20] sm:$0xf] %v5797_v6  ;;  %5800 = vst [vmem:[%s134_s26 + $0x2c] sm:$0xf] %v5799_v7 }
  0x17 PF: > { %p5801_p5 = scmp.ge.s32.totalorder %s6458_s14, 1  ;;  %p179_p6 = scmp.lt.s32.totalorder %s6458_s14, 3 }
  0x19   : > { %p180_p7 = pnand %p5801_p5, %p179_p6 }
  0x1a   : > { %s186_s27 = sand.u32 (!%p180_p7), 1, %s6450_s12   ;;  %v6460_v8 = vmov (!%p180_p7), 0.0   ;;  %vm6461_vm0 = vmmov (!%p180_p7), 0   ;;  %s6462_s30 = smov (!%p180_p7), 127   ;;  %vm229_vm1 = vcmask (!%p180_p7), 1043456   ;;  %v6548_v15 = vld [vmem:[%s7268_s1 + $0x8] sm:$0xff] (!%p180_p7) }
  0x1b   : > { %183 = sbr.rel (%p180_p7) target bundleno = 628 (0x274), region = 54  ;;  %6089 = vmatprep.subr.mxu1 (!%p180_p7), %v6460_v8  ;;  %6091 = vmatprep.mubr.msk.f32.mxu1 (!%p180_p7), %vm6461_vm0, %v6460_v8  ;;  %vm225_vm2 = vcmask (!%p180_p7), 31744   ;;  %v6581_v21 = vld [vmem:[%s7268_s1] sm:$0xff] (!%p180_p7)  ;;  %s6463_s8 = smov (!%p180_p7), 111   ;;  %vm543_vm3 = vcmask (!%p180_p7), 1039360   ;;  %v6657_v34 = vld [vmem:[%s7268_s1 + $0x10] sm:$0xff] (!%p180_p7) }
  0x1c   : > { %s6399_s28 = smul.u32 (!%p180_p7), 48, %s186_s27  ;;  %300 = vmatprep.mubr.f32.mxu0 (!%p180_p7), %v6460_v8  ;;  %s6464_s9 = smov (!%p180_p7), 110   ;;  %v6695_v41 = vld [vmem:[%s7268_s1 + $0x18] sm:$0xff] (!%p180_p7)  ;;  %v6729_v48 = vld [vmem:[%s7268_s1 + $0x20] sm:$0xff] (!%p180_p7)  ;;  %vm1202_vm4 = vcmask (!%p180_p7), 908288   ;;  %v6755_v53 = vld [vmem:[%s7268_s1 + $0x28] sm:$0xff] (!%p180_p7) }
  0x1d   : > { %v6783_v58 = vld [vmem:[%s7268_s1 + $0x30] sm:$0xff] (!%p180_p7)  ;;  %vm1539_vm5 = vcmask (!%p180_p7), 900096   ;;  %v6811_v0 = vld [vmem:[%s7268_s1 + $0x38] sm:$0xff] (!%p180_p7)  ;;  %v6833_v2 = vld [vmem:[%s7268_s1 + $0x40] sm:$0xff] (!%p180_p7)  ;;  %p209_p8 = scmp.lt.s32.totalorder (!%p180_p7), %s5788_s15, 1  ;;  %vm5721_vm6 = vcmask (!%p180_p7), 130048  }
  0x1e   : > { %s6527_s29 = scalar_lea.vmem (!%p180_p7), [#allocation2], %s6399_s28 }
  0x1f   : > { %v530_v9 = vld [vmem:[%s6527_s29] sm:$0xff] (!%p180_p7)  ;;  %v6531_v10 = vld [vmem:[%s6527_s29 + $0x18] sm:$0xff] (!%p180_p7)  ;;  %v6539_v13 = vld [vmem:[%s6527_s29 + $0xc] sm:$0xff] (!%p180_p7) }
  0x20   : > { %537 = vrot.lane.b32.xlu1 (!%p180_p7), %v530_v9, %s6462_s30  ;;  %v536_v11 = vcombine.high (!%p180_p7), %v530_v9, %v530_v9  ;;  %v6536_v12 = vcombine.high (!%p180_p7), %v6531_v10, %v6531_v10  ;;  %v6543_v14 = vcombine.high (!%p180_p7), %v6539_v13, %v6539_v13  ;;  %v6552_v16 = vld [vmem:[%s6527_s29 + $0x14] sm:$0xf] (!%p180_p7)  ;;  %v531_v17 = vld [vmem:[%s6527_s29 + $0x8] sm:$0xf] (!%p180_p7)  ;;  %v5839_v19 = vld [vmem:[%s6527_s29 + $0x20] sm:$0xf] (!%p180_p7) }
  0x21   : > { %6090 = vmatpush3.msk.msra.mxu1 (!%p180_p7), %vm229_vm1, %v6552_v16  ;;  %v215_v18 = vld [vmem:[%s6527_s29 + $0x8] sm:$0xf] (!%p180_p7)  ;;  %v5853_v22 = vld [vmem:[%s6527_s29 + $0x14] sm:$0xf] (!%p180_p7)  ;;  %v5894_v26 = vld [vmem:[%s6527_s29 + $0x2c] sm:$0xf] (!%p180_p7) }
  0x22   : > { %539 = vrot.lane.b32.xlu0 %v536_v11, %s6462_s30  ;;  %5806 = vmatprep.subr.msk.mxu0 %vm229_vm1, %v6543_v14  ;;  %v1190_v20 = vld [vmem:[%s6527_s29 + $0x8] sm:$0xf]  ;;  %v5877_v24 = vld [vmem:[%s6527_s29 + $0x14] sm:$0xf]  ;;  %v5948_v29 = vld [vmem:[%s6527_s29 + $0x20] sm:$0xf] }
  0x23   : > { %6092 = vmatmul.mubr.msk.f32.vlgmr.msra.gmra.mrb[0].mxu1 %vm225_vm2, %v6548_v15  ;;  %5807 = vmatpush1.msk.msra.mxu0 %vm229_vm1, %v6539_v13  ;;  %v1527_v23 = vld [vmem:[%s6527_s29 + $0x8] sm:$0xf]  ;;  %v5911_v28 = vld [vmem:[%s6527_s29 + $0x14] sm:$0xf]  ;;  %v5955_v30 = vld [vmem:[%s6527_s29 + $0x2c] sm:$0xf] }
  0x24   : > { %1030 = vrot.lane.b32.xlu1 %v6536_v12, %s6462_s30  ;;  %6094 = vmatprep.subr.mxu1 %v6460_v8  ;;  %v6611_v25 = vld [vmem:[%s6527_s29 + $0x24] sm:$0xff]  ;;  %v5962_v31 = vld [vmem:[%s6527_s29 + $0x20] sm:$0xf]  ;;  %v6009_v40 = vld [vmem:[%s6527_s29 + $0x2c] sm:$0xf]  ;;  %s7275_s15 = smov (!%p209_p8, %s5788_s15), 1 }
  0x25   : > { %5808 = vmatmul.mubr.msk.f32.vlgmr.msra.gmra.mrb[0].mxu0 %vm225_vm2, %v6548_v15  ;;  %6095 = vmatpush3.msk.msra.mxu1 %vm229_vm1, %v215_v18  ;;  %v6619_v27 = vcombine.high %v6611_v25, %v6611_v25  ;;  %v6668_v37 = vld [vmem:[%s6527_s29 + $0x20] sm:$0xf]  ;;  %v6701_v42 = vld [vmem:[%s6527_s29 + $0x2c] sm:$0xf]  ;;  %s6400_s4 = smul.u32 24, %s7275_s15 }
  0x26   : > { %541 = vrot.lane.b32.xlu0 %v531_v17, %s6462_s30  ;;  %6096 = vmatprep.mubr.msk.f32.mxu1 %vm6461_vm0, %v6460_v8 }
  0x27   : > { %5811 = vmatprep.subr.msk.mxu0 %vm229_vm1, %v536_v11  ;;  %453 = vmatprep.mubr.f32.mxu0 %v6460_v8  ;;  %s213_s7 = scalar_lea.vmem %s7270_s3, %s6400_s4 }
  0x28   : > { %1028 = vrot.lane.b32.xlu1 %v6531_v10, %s6462_s30  ;;  %5812 = vmatpush1.msk.msra.mxu0 %vm229_vm1, %v530_v9 }
  0x29   : > { %6099 = vmatprep.subr.mxu1 %v6460_v8 }
  0x2a   : > { %1032 = vrot.lane.b32.xlu0 %v5839_v19, %s6462_s30 }
  0x2b   : > { %6097 = vmatmul.mubr.msk.f32.vlgmr.msra.gmra.mrb[0].mxu1 %vm225_vm2, %v6581_v21 }
  0x2c   : > { %1200 = vrot.lane.b32.xlu1 %v1190_v20, %s6463_s8  ;;  %6101 = vmatprep.mubr.msk.f32.mxu1 %vm6461_vm0, %v6460_v8 }
  0x2d   : > { %5813 = vmatmul.mubr.msk.f32.vlgmr.msra.gmra.mrb[0].mxu0 %vm225_vm2, %v6581_v21 }
  0x2e   : > { %1198 = vrot.lane.b32.xlu0 %v536_v11, %s6463_s8  ;;  %619 = vmatprep.mubr.f32.mxu0 %v6460_v8 }
  0x30   : > { %1367 = vrot.lane.b32.xlu1 %v6543_v14, %s6463_s8 }
  0x32   : > { %1196 = vrot.lane.b32.xlu0 %v530_v9, %s6463_s8 }
  0x34   : > { %1365 = vrot.lane.b32.xlu1 %v6539_v13, %s6463_s8 }
  0x36   : > { %1369 = vrot.lane.b32.xlu0 %v5853_v22, %s6463_s8 }
  0x38   : > { %1537 = vrot.lane.b32.xlu1 %v1527_v23, %s6464_s9 }
  0x3a   : > { %1535 = vrot.lane.b32.xlu0 %v536_v11, %s6464_s9 }
  0x3c   : > { %1984 = vrot.lane.b32.xlu1 %v6543_v14, %s6462_s30 }
  0x3e   : > { %1533 = vrot.lane.b32.xlu0 %v530_v9, %s6464_s9 }
  0x40   : > { %1982 = vrot.lane.b32.xlu1 %v6539_v13, %s6462_s30 }
  0x42   : > { %1986 = vrot.lane.b32.xlu0 %v5877_v24, %s6462_s30 }
  0x44   : > { %2437 = vrot.lane.b32.xlu1 %v5894_v26, %s6462_s30 }
  0x46   : > { %2435 = vrot.lane.b32.xlu0 %v6619_v27, %s6462_s30 }
  0x48   : > { %2886 = vrot.lane.b32.xlu1 %v6543_v14, %s6464_s9 }
  0x4a   : > { %2433 = vrot.lane.b32.xlu0 %v6611_v25, %s6462_s30 }
  0x4c   : > { %2884 = vrot.lane.b32.xlu1 %v6539_v13, %s6464_s9 }
  0x4e   : > { %2888 = vrot.lane.b32.xlu0 %v5911_v28, %s6464_s9 }
  0x50   : > { %3912 = vrot.lane.b32.xlu1 %v5948_v29, %s6463_s8 }
  0x52   : > { %3910 = vrot.lane.b32.xlu0 %v6536_v12, %s6463_s8 }
  0x54   : > { %4073 = vrot.lane.b32.xlu1 %v6619_v27, %s6463_s8 }
  0x56   : > { %3908 = vrot.lane.b32.xlu0 %v6531_v10, %s6463_s8 }
  0x58   : > { %4071 = vrot.lane.b32.xlu1 %v6611_v25, %s6463_s8 }
  0x5a   : > { %4075 = vrot.lane.b32.xlu0 %v5955_v30, %s6463_s8 }
  0x5c   : > { %4238 = vrot.lane.b32.xlu1 %v5962_v31, %s6464_s9 }
  0x5e   : > { %4236 = vrot.lane.b32.xlu0 %v6536_v12, %s6464_s9 }
  0x60   : > { %5548 = vrot.lane.b32.xlu1 %v6619_v27, %s6464_s9 }
  0x62   : > { %4234 = vrot.lane.b32.xlu0 %v6531_v10, %s6464_s9 }
  0x64   : > { %5546 = vrot.lane.b32.xlu1 %v6611_v25, %s6464_s9 }
  0x66   : > { %5550 = vrot.lane.b32.xlu0 %v6009_v40, %s6464_s9 }
  0x92   : > { %v538_v33 = vpop.permute.xlu1 %537 }
  0x94   : > { %v540_v32 = vpop.permute.xlu0 %539 }
  0x95   : > { %v6671_v38 = vsel %vm543_vm3, %v538_v33, %v540_v32 }
  0x96   : > { %v1031_v39 = vpop.permute.xlu1 %1030 }
  0x98   : > { %v6659_v35 = vpop.permute.xlu0 %541 }
  0x99   : > { %6100 = vmatpush3.msk.msra.mxu1 %vm229_vm1, %v6659_v35  ;;  %v6665_v36 = vsel %vm543_vm3, %v540_v32, %v6659_v35 }
  0x9a   : > { %5817 = vmatprep.subr.msk.mxu0 %vm229_vm1, %v6665_v36  ;;  %6102 = vmatmul.mubr.msk.f32.vlgmr.msra.gmra.mrb[0].mxu1 %vm225_vm2, %v6657_v34  ;;  %v1029_v44 = vpop.permute.xlu1 %1028 }
  0x9b   : > { %5818 = vmatpush1.msk.msra.mxu0 %vm229_vm1, %v6671_v38  ;;  %6104 = vmatprep.subr.mxu1 %v6460_v8  ;;  %v6734_v49 = vsel %vm543_vm3, %v1029_v44, %v1031_v39 }
  0x9c   : > { %5819 = vmatmul.mubr.msk.f32.vlgmr.msra.gmra.mrb[0].mxu0 %vm225_vm2, %v6657_v34  ;;  %6105 = vmatpush3.msk.msra.mxu1 %vm229_vm1, %v6668_v37  ;;  %v6703_v43 = vpop.permute.xlu0 %1032 }
  0x9d   : > { %6106 = vmatprep.mubr.msk.f32.mxu1 %vm6461_vm0, %v6460_v8  ;;  %5825 = vmatprep.subr.msk.mxu0 %vm229_vm1, %v6536_v12  ;;  %v6714_v45 = vsel %vm543_vm3, %v1031_v39, %v6703_v43 }
  0x9e   : > { %5826 = vmatpush1.msk.msra.mxu0 %vm229_vm1, %v6531_v10  ;;  %780 = vmatprep.mubr.f32.mxu0 %v6460_v8  ;;  %v6724_v47 = vpop.permute.xlu1 %1200 }
  0x9f   : > { %6109 = vmatprep.subr.mxu1 %v6460_v8  ;;  %5833 = vmatprep.subr.msk.mxu0 %vm229_vm1, %v6619_v27 }
  0xa0   : > { %v1199_v46 = vpop.permute.xlu0 %1198 }
  0xa1   : > { %v6742_v50 = vsel %vm1202_vm4, %v1199_v46, %v6724_v47 }
  0xa2   : > { %6107 = vmatmul.mubr.msk.f32.vlgmr.msra.gmra.mrb[0].mxu1 %vm225_vm2, %v6695_v41  ;;  %v1368_v52 = vpop.permute.xlu1 %1367 }
  0xa3   : > { %6110 = vmatpush3.msk.msra.mxu1 %vm229_vm1, %v6701_v42  ;;  %6111 = vmatprep.mubr.msk.f32.mxu1 %vm6461_vm0, %v6460_v8 }
  0xa4   : > { %5827 = vmatmul.mubr.msk.f32.vlgmr.msra.gmra.mrb[0].mxu0 %vm225_vm2, %v6695_v41  ;;  %6114 = vmatprep.subr.mxu1 %v6460_v8  ;;  %v1197_v51 = vpop.permute.xlu0 %1196 }
  0xa5   : > { %5834 = vmatpush1.msk.msra.mxu0 %vm229_vm1, %v6611_v25  ;;  %941 = vmatprep.mubr.f32.mxu0 %v6460_v8  ;;  %v6760_v54 = vsel %vm1202_vm4, %v1197_v51, %v1199_v46 }
  0xa6   : > { %5841 = vmatprep.subr.msk.mxu0 %vm229_vm1, %v6714_v45  ;;  %v1366_v56 = vpop.permute.xlu1 %1365 }
  0xa7   : > { %v6790_v61 = vsel %vm1202_vm4, %v1366_v56, %v1368_v52 }
  0xa8   : > { %v6762_v55 = vpop.permute.xlu0 %1369 }
  0xa9   : > { %v6770_v57 = vsel %vm1202_vm4, %v1368_v52, %v6762_v55 }
  0xaa   : > { %6112 = vmatmul.mubr.msk.f32.vlgmr.msra.gmra.mrb[0].mxu1 %vm225_vm2, %v6729_v48  ;;  %v6785_v59 = vpop.permute.xlu1 %1537 }
  0xab   : > { %6115 = vmatpush3.msk.msra.mxu1 %vm229_vm1, %v6703_v43  ;;  %6116 = vmatprep.mubr.msk.f32.mxu1 %vm6461_vm0, %v6460_v8 }
  0xac   : > { %5835 = vmatmul.mubr.msk.f32.vlgmr.msra.gmra.mrb[0].mxu0 %vm225_vm2, %v6729_v48  ;;  %6119 = vmatprep.subr.mxu1 %v6460_v8  ;;  %v1536_v60 = vpop.permute.xlu0 %1535 }
  0xad   : > { %5842 = vmatpush1.msk.msra.mxu0 %vm229_vm1, %v6734_v49  ;;  %1109 = vmatprep.mubr.f32.mxu0 %v6460_v8  ;;  %v6798_v62 = vsel %vm1539_vm5, %v1536_v60, %v6785_v59 }
  0xae   : > { %5847 = vmatprep.subr.msk.mxu0 %vm229_vm1, %v6742_v50  ;;  %v1985_v4 = vpop.permute.xlu1 %1984 }
  0xb0   : > { %v1534_v63 = vpop.permute.xlu0 %1533 }
  0xb1   : > { %v6814_v1 = vsel %vm1539_vm5, %v1534_v63, %v1536_v60 }
  0xb2   : > { %6117 = vmatmul.mubr.msk.f32.vlgmr.msra.gmra.mrb[0].mxu1 %vm225_vm2, %v6755_v53  ;;  %v1983_v6 = vpop.permute.xlu1 %1982 }
  0xb3   : > { %6120 = vmatpush3.msk.msra.mxu1 %vm229_vm1, %v6724_v47  ;;  %6121 = vmatprep.mubr.msk.f32.mxu1 %vm6461_vm0, %v6460_v8  ;;  %v1988_v7 = vsel %vm543_vm3, %v1983_v6, %v1985_v4 }
  0xb4   : > { %5843 = vmatmul.mubr.msk.f32.vlgmr.msra.gmra.mrb[0].mxu0 %vm225_vm2, %v6755_v53  ;;  %6124 = vmatprep.subr.mxu1 %v6460_v8  ;;  %v1987_v3 = vpop.permute.xlu0 %1986 }
  0xb5   : > { %5848 = vmatpush1.msk.msra.mxu0 %vm229_vm1, %v6760_v54  ;;  %1278 = vmatprep.mubr.f32.mxu0 %v6460_v8  ;;  %v1989_v5 = vsel %vm543_vm3, %v1985_v4, %v1987_v3 }
  0xb6   : > { %5855 = vmatprep.subr.msk.mxu0 %vm229_vm1, %v6770_v57  ;;  %v6890_v9 = vpop.permute.xlu1 %2437 }
  0xb8   : > { %v2436_v11 = vpop.permute.xlu0 %2435 }
  0xba   : > { %6122 = vmatmul.mubr.msk.f32.vlgmr.msra.gmra.mrb[0].mxu1 %vm225_vm2, %v6783_v58  ;;  %v2887_v18 = vpop.permute.xlu1 %2886 }
  0xbb   : > { %6125 = vmatpush3.msk.msra.mxu1 %vm229_vm1, %v6762_v55  ;;  %6126 = vmatprep.mubr.msk.f32.mxu1 %vm6461_vm0, %v6460_v8 }
  0xbc   : > { %5849 = vmatmul.mubr.msk.f32.vlgmr.msra.gmra.mrb[0].mxu0 %vm225_vm2, %v6783_v58  ;;  %6129 = vmatprep.subr.mxu1 %v6460_v8 }
  0xbd   : > { %5856 = vmatpush1.msk.msra.mxu0 %vm229_vm1, %v6790_v61  ;;  %1446 = vmatprep.mubr.f32.mxu0 %v6460_v8 }
  0xbe   : > { %5861 = vmatprep.subr.msk.mxu0 %vm229_vm1, %v6798_v62  ;;  %v2885_v20 = vpop.permute.xlu1 %2884 }
  0xbf   : > { %v6964_v22 = vsel %vm1539_vm5, %v2885_v20, %v2887_v18 }
  0xc2   : > { %6127 = vmatmul.mubr.msk.f32.vlgmr.msra.gmra.mrb[0].mxu1 %vm225_vm2, %v6811_v0 }
  0xc3   : > { %6130 = vmatpush3.msk.msra.mxu1 %vm229_vm1, %v6785_v59  ;;  %6131 = vmatprep.mubr.msk.f32.mxu1 %vm6461_vm0, %v6460_v8 }
  0xc4   : > { %5857 = vmatmul.mubr.msk.f32.vlgmr.msra.gmra.mrb[0].mxu0 %vm225_vm2, %v6811_v0  ;;  %6134 = vmatprep.subr.mxu1 %v6460_v8 }
  0xc5   : > { %5862 = vmatpush1.msk.msra.mxu0 %vm229_vm1, %v6814_v1  ;;  %1615 = vmatprep.mubr.f32.mxu0 %v6460_v8 }
  0xc6   : > { %5866 = vmatprep.subr.msk.mxu0 %vm229_vm1, %v6665_v36 }
  0xca   : > { %6132 = vmatmul.mubr.msk.f32.vlgmr.msra.gmra.mrb[0].mxu1 %vm225_vm2, %v6833_v2 }
  0xcb   : > { %6135 = vmatpush3.msk.msra.mxu1 %vm229_vm1, %v6659_v35  ;;  %6136 = vmatprep.mubr.msk.f32.mxu1 %vm6461_vm0, %v6460_v8 }
  0xcc   : > { %5863 = vmatmul.mubr.msk.f32.vlgmr.msra.gmra.mrb[0].mxu0 %vm225_vm2, %v6833_v2  ;;  %6139 = vmatprep.subr.mxu1 %v6460_v8 }
  0xcd   : > { %5867 = vmatpush1.msk.msra.mxu0 %vm229_vm1, %v6671_v38  ;;  %1759 = vmatprep.mubr.f32.mxu0 %v6460_v8 }
  0xce   : > { %6137 = vmatmul.mubr.msk.f32.vlgmr.msra.gmra.mrb[2].mxu1 %vm225_vm2, %v6548_v15  ;;  %5871 = vmatprep.subr.msk.mxu0 %vm229_vm1, %v6543_v14  ;;  %v2434_v14 = vpop.permute.xlu0 %2433 }
  0xcf   : > { %6140 = vmatpush3.msk.msra.mxu1 %vm229_vm1, %v6552_v16  ;;  %6141 = vmatprep.mubr.msk.f32.mxu1 %vm6461_vm0, %v6460_v8  ;;  %v6911_v16 = vsel %vm543_vm3, %v2434_v14, %v2436_v11 }
  0xd0   : > { %5868 = vmatmul.mubr.msk.f32.vlgmr.msra.gmra.mrb[2].mxu0 %vm225_vm2, %v6548_v15  ;;  %6144 = vmatprep.subr.mxu1 %v6460_v8 }
  0xd1   : > { %5872 = vmatpush1.msk.msra.mxu0 %vm229_vm1, %v6539_v13  ;;  %1900 = vmatprep.mubr.f32.mxu0 %v6460_v8  ;;  %v6900_v13 = vsel %vm543_vm3, %v2436_v11, %v6890_v9 }
  0xd2   : > { %5878 = vmatprep.subr.msk.mxu0 %vm229_vm1, %v1989_v5  ;;  %v6941_v17 = vpop.permute.xlu0 %2888 }
  0xd3   : > { %v6951_v19 = vsel %vm1539_vm5, %v2887_v18, %v6941_v17 }
  0xd6   : > { %6142 = vmatmul.mubr.msk.f32.vlgmr.msra.gmra.mrb[2].mxu1 %vm225_vm2, %v6581_v21 }
  0xd7   : > { %6145 = vmatpush3.msk.msra.mxu1 %vm229_vm1, %v1987_v3  ;;  %6146 = vmatprep.mubr.msk.f32.mxu1 %vm6461_vm0, %v6460_v8 }
  0xd8   : > { %5873 = vmatmul.mubr.msk.f32.vlgmr.msra.gmra.mrb[2].mxu0 %vm225_vm2, %v6581_v21  ;;  %6149 = vmatprep.subr.mxu1 %v6460_v8 }
  0xd9   : > { %5879 = vmatpush1.msk.msra.mxu0 %vm229_vm1, %v1988_v7  ;;  %2060 = vmatprep.mubr.f32.mxu0 %v6460_v8 }
  0xda   : > { %5883 = vmatprep.subr.msk.mxu0 %vm229_vm1, %v6619_v27 }
  0xde   : > { %6147 = vmatmul.mubr.msk.f32.vlgmr.msra.gmra.mrb[2].mxu1 %vm225_vm2, %v6657_v34 }
  0xdf   : > { %6150 = vmatpush3.msk.msra.mxu1 %vm229_vm1, %v6701_v42  ;;  %6151 = vmatprep.mubr.msk.f32.mxu1 %vm6461_vm0, %v6460_v8 }
  0xe0   : > { %5880 = vmatmul.mubr.msk.f32.vlgmr.msra.gmra.mrb[2].mxu0 %vm225_vm2, %v6657_v34  ;;  %6154 = vmatprep.subr.mxu1 %v6460_v8 }
  0xe1   : > { %5884 = vmatpush1.msk.msra.mxu0 %vm229_vm1, %v6611_v25  ;;  %2204 = vmatprep.mubr.f32.mxu0 %v6460_v8 }
  0xe2   : > { %5888 = vmatprep.subr.msk.mxu0 %vm229_vm1, %v6714_v45 }
  0xe6   : > { %6152 = vmatmul.mubr.msk.f32.vlgmr.msra.gmra.mrb[2].mxu1 %vm225_vm2, %v6695_v41 }
  0xe7   : > { %6155 = vmatpush3.msk.msra.mxu1 %vm229_vm1, %v6703_v43  ;;  %6156 = vmatprep.mubr.msk.f32.mxu1 %vm6461_vm0, %v6460_v8 }
  0xe8   : > { %5885 = vmatmul.mubr.msk.f32.vlgmr.msra.gmra.mrb[2].mxu0 %vm225_vm2, %v6695_v41  ;;  %6159 = vmatprep.subr.mxu1 %v6460_v8 }
  0xe9   : > { %5889 = vmatpush1.msk.msra.mxu0 %vm229_vm1, %v6734_v49  ;;  %2348 = vmatprep.mubr.f32.mxu0 %v6460_v8 }
  0xea   : > { %5895 = vmatprep.subr.msk.mxu0 %vm229_vm1, %v6900_v13 }
  0xee   : > { %6157 = vmatmul.mubr.msk.f32.vlgmr.msra.gmra.mrb[2].mxu1 %vm225_vm2, %v6729_v48 }
  0xef   : > { %6160 = vmatpush3.msk.msra.mxu1 %vm229_vm1, %v6890_v9  ;;  %6161 = vmatprep.mubr.msk.f32.mxu1 %vm6461_vm0, %v6460_v8 }
  0xf0   : > { %5890 = vmatmul.mubr.msk.f32.vlgmr.msra.gmra.mrb[2].mxu0 %vm225_vm2, %v6729_v48  ;;  %6164 = vmatprep.subr.mxu1 %v6460_v8 }
  0xf1   : > { %5896 = vmatpush1.msk.msra.mxu0 %vm229_vm1, %v6911_v16  ;;  %2511 = vmatprep.mubr.f32.mxu0 %v6460_v8 }
  0xf2   : > { %5900 = vmatprep.subr.msk.mxu0 %vm229_vm1, %v6770_v57 }
  0xf6   : > { %6162 = vmatmul.mubr.msk.f32.vlgmr.msra.gmra.mrb[2].mxu1 %vm225_vm2, %v6755_v53 }
  0xf7   : > { %6165 = vmatpush3.msk.msra.mxu1 %vm229_vm1, %v6762_v55  ;;  %6166 = vmatprep.mubr.msk.f32.mxu1 %vm6461_vm0, %v6460_v8 }
  0xf8   : > { %5897 = vmatmul.mubr.msk.f32.vlgmr.msra.gmra.mrb[2].mxu0 %vm225_vm2, %v6755_v53  ;;  %6169 = vmatprep.subr.mxu1 %v6460_v8 }
  0xf9   : > { %5901 = vmatpush1.msk.msra.mxu0 %vm229_vm1, %v6790_v61  ;;  %2655 = vmatprep.mubr.f32.mxu0 %v6460_v8 }
  0xfa   : > { %5905 = vmatprep.subr.msk.mxu0 %vm229_vm1, %v6798_v62 }
  0xfe   : > { %6167 = vmatmul.mubr.msk.f32.vlgmr.msra.gmra.mrb[2].mxu1 %vm225_vm2, %v6783_v58 }
  0xff   : > { %6170 = vmatpush3.msk.msra.mxu1 %vm229_vm1, %v6785_v59  ;;  %6171 = vmatprep.mubr.msk.f32.mxu1 %vm6461_vm0, %v6460_v8 }
 0x100   : > { %5902 = vmatmul.mubr.msk.f32.vlgmr.msra.gmra.mrb[2].mxu0 %vm225_vm2, %v6783_v58  ;;  %6174 = vmatprep.subr.mxu1 %v6460_v8 }
 0x101   : > { %5906 = vmatpush1.msk.msra.mxu0 %vm229_vm1, %v6814_v1  ;;  %2799 = vmatprep.mubr.f32.mxu0 %v6460_v8 }
 0x102   : > { %5912 = vmatprep.subr.msk.mxu0 %vm229_vm1, %v6951_v19 }
 0x106   : > { %6172 = vmatmul.mubr.msk.f32.vlgmr.msra.gmra.mrb[2].mxu1 %vm225_vm2, %v6811_v0 }
 0x107   : > { %6175 = vmatpush3.msk.msra.mxu1 %vm229_vm1, %v6941_v17  ;;  %6176 = vmatprep.mubr.msk.f32.mxu1 %vm6461_vm0, %v6460_v8 }
 0x108   : > { %5907 = vmatmul.mubr.msk.f32.vlgmr.msra.gmra.mrb[2].mxu0 %vm225_vm2, %v6811_v0  ;;  %6179 = vmatprep.subr.mxu1 %v6460_v8 }
 0x109   : > { %5913 = vmatpush1.msk.msra.mxu0 %vm229_vm1, %v6964_v22  ;;  %2962 = vmatprep.mubr.f32.mxu0 %v6460_v8 }
 0x10a   : > { %5917 = vmatprep.subr.msk.mxu0 %vm229_vm1, %v6619_v27 }
 0x10e   : > { %6177 = vmatmul.mubr.msk.f32.vlgmr.msra.gmra.mrb[2].mxu1 %vm225_vm2, %v6833_v2 }
 0x10f   : > { %6180 = vmatpush3.msk.msra.mxu1 %vm229_vm1, %v6701_v42  ;;  %6181 = vmatprep.mubr.msk.f32.mxu1 %vm6461_vm0, %v6460_v8 }
 0x110   : > { %5914 = vmatmul.mubr.msk.f32.vlgmr.msra.gmra.mrb[2].mxu0 %vm225_vm2, %v6833_v2  ;;  %6184 = vmatprep.subr.mxu1 %v6460_v8 }
 0x111   : > { %5918 = vmatpush1.msk.msra.mxu0 %vm229_vm1, %v6611_v25  ;;  %3109 = vmatprep.mubr.f32.mxu0 %v6460_v8 }
 0x112   : > { %6182 = vmatmul.mubr.msk.f32.vlgmr.msra.gmra.mrb[4].mxu1 %vm225_vm2, %v6548_v15  ;;  %5922 = vmatprep.subr.msk.mxu0 %vm229_vm1, %v6536_v12  ;;  %v3913_v12 = vpop.permute.xlu1 %3912 }
 0x113   : > { %6185 = vmatpush3.msk.msra.mxu1 %vm229_vm1, %v6668_v37  ;;  %6186 = vmatprep.mubr.msk.f32.mxu1 %vm6461_vm0, %v6460_v8 }
 0x114   : > { %5919 = vmatmul.mubr.msk.f32.vlgmr.msra.gmra.mrb[4].mxu0 %vm225_vm2, %v6548_v15  ;;  %6189 = vmatprep.subr.mxu1 %v6460_v8 }
 0x115   : > { %5923 = vmatpush1.msk.msra.mxu0 %vm229_vm1, %v6531_v10  ;;  %3250 = vmatprep.mubr.f32.mxu0 %v6460_v8  ;;  %v3911_v10 = vpop.permute.xlu0 %3910 }
 0x116   : > { %5927 = vmatprep.subr.msk.mxu0 %vm229_vm1, %v6714_v45  ;;  %v3915_v23 = vsel %vm1202_vm4, %v3911_v10, %v3913_v12  ;;  %v4074_v26 = vpop.permute.xlu1 %4073 }
 0x119   : > { %v3909_v24 = vpop.permute.xlu0 %3908 }
 0x11a   : > { %6187 = vmatmul.mubr.msk.f32.vlgmr.msra.gmra.mrb[4].mxu1 %vm225_vm2, %v6581_v21  ;;  %v3914_v28 = vsel %vm1202_vm4, %v3909_v24, %v3911_v10  ;;  %v4072_v30 = vpop.permute.xlu1 %4071 }
 0x11b   : > { %6190 = vmatpush3.msk.msra.mxu1 %vm229_vm1, %v6703_v43  ;;  %6191 = vmatprep.mubr.msk.f32.mxu1 %vm6461_vm0, %v6460_v8  ;;  %v7086_v35 = vsel %vm1202_vm4, %v4072_v30, %v4074_v26 }
 0x11c   : > { %5924 = vmatmul.mubr.msk.f32.vlgmr.msra.gmra.mrb[4].mxu0 %vm225_vm2, %v6581_v21  ;;  %6194 = vmatprep.subr.mxu1 %v6460_v8 }
 0x11d   : > { %5928 = vmatpush1.msk.msra.mxu0 %vm229_vm1, %v6734_v49  ;;  %3391 = vmatprep.mubr.f32.mxu0 %v6460_v8  ;;  %v7065_v29 = vpop.permute.xlu0 %4075 }
 0x11e   : > { %5932 = vmatprep.subr.msk.mxu0 %vm229_vm1, %v6742_v50  ;;  %v7072_v31 = vsel %vm1202_vm4, %v4074_v26, %v7065_v29  ;;  %v7081_v32 = vpop.permute.xlu1 %4238 }
 0x121   : > { %v4237_v33 = vpop.permute.xlu0 %4236 }
 0x122   : > { %6192 = vmatmul.mubr.msk.f32.vlgmr.msra.gmra.mrb[4].mxu1 %vm225_vm2, %v6657_v34  ;;  %v7094_v36 = vsel %vm1539_vm5, %v4237_v33, %v7081_v32 }
 0x123   : > { %6195 = vmatpush3.msk.msra.mxu1 %vm229_vm1, %v6724_v47  ;;  %6196 = vmatprep.mubr.msk.f32.mxu1 %vm6461_vm0, %v6460_v8 }
 0x124   : > { %5929 = vmatmul.mubr.msk.f32.vlgmr.msra.gmra.mrb[4].mxu0 %vm225_vm2, %v6657_v34  ;;  %6199 = vmatprep.subr.mxu1 %v6460_v8 }
 0x125   : > { %5933 = vmatpush1.msk.msra.mxu0 %vm229_vm1, %v6760_v54  ;;  %3535 = vmatprep.mubr.f32.mxu0 %v6460_v8  ;;  %v4235_v37 = vpop.permute.xlu0 %4234 }
 0x126   : > { %5937 = vmatprep.subr.msk.mxu0 %vm229_vm1, %v6770_v57  ;;  %v7105_v38 = vsel %vm1539_vm5, %v4235_v37, %v4237_v33 }
 0x12a   : > { %6197 = vmatmul.mubr.msk.f32.vlgmr.msra.gmra.mrb[4].mxu1 %vm225_vm2, %v6695_v41 }
 0x12b   : > { %6200 = vmatpush3.msk.msra.mxu1 %vm229_vm1, %v6762_v55  ;;  %6201 = vmatprep.mubr.msk.f32.mxu1 %vm6461_vm0, %v6460_v8 }
 0x12c   : > { %5934 = vmatmul.mubr.msk.f32.vlgmr.msra.gmra.mrb[4].mxu0 %vm225_vm2, %v6695_v41  ;;  %6204 = vmatprep.subr.mxu1 %v6460_v8 }
 0x12d   : > { %5938 = vmatpush1.msk.msra.mxu0 %vm229_vm1, %v6790_v61  ;;  %3679 = vmatprep.mubr.f32.mxu0 %v6460_v8 }
 0x12e   : > { %5942 = vmatprep.subr.msk.mxu0 %vm229_vm1, %v6798_v62 }
 0x132   : > { %6202 = vmatmul.mubr.msk.f32.vlgmr.msra.gmra.mrb[4].mxu1 %vm225_vm2, %v6729_v48 }
 0x133   : > { %6205 = vmatpush3.msk.msra.mxu1 %vm229_vm1, %v6785_v59  ;;  %6206 = vmatprep.mubr.msk.f32.mxu1 %vm6461_vm0, %v6460_v8 }
 0x134   : > { %5939 = vmatmul.mubr.msk.f32.vlgmr.msra.gmra.mrb[4].mxu0 %vm225_vm2, %v6729_v48  ;;  %6209 = vmatprep.subr.mxu1 %v6460_v8 }
 0x135   : > { %5943 = vmatpush1.msk.msra.mxu0 %vm229_vm1, %v6814_v1  ;;  %3823 = vmatprep.mubr.f32.mxu0 %v6460_v8 }
 0x136   : > { %5949 = vmatprep.subr.msk.mxu0 %vm229_vm1, %v3915_v23 }
 0x13a   : > { %6207 = vmatmul.mubr.msk.f32.vlgmr.msra.gmra.mrb[4].mxu1 %vm225_vm2, %v6755_v53 }
 0x13b   : > { %6210 = vmatpush3.msk.msra.mxu1 %vm229_vm1, %v3913_v12  ;;  %6211 = vmatprep.mubr.msk.f32.mxu1 %vm6461_vm0, %v6460_v8 }
 0x13c   : > { %5944 = vmatmul.mubr.msk.f32.vlgmr.msra.gmra.mrb[4].mxu0 %vm225_vm2, %v6755_v53  ;;  %6214 = vmatprep.subr.mxu1 %v6460_v8 }
 0x13d   : > { %5950 = vmatpush1.msk.msra.mxu0 %vm229_vm1, %v3914_v28  ;;  %3986 = vmatprep.mubr.f32.mxu0 %v6460_v8 }
 0x13e   : > { %5956 = vmatprep.subr.msk.mxu0 %vm229_vm1, %v7072_v31 }
 0x142   : > { %6212 = vmatmul.mubr.msk.f32.vlgmr.msra.gmra.mrb[4].mxu1 %vm225_vm2, %v6783_v58 }
 0x143   : > { %6215 = vmatpush3.msk.msra.mxu1 %vm229_vm1, %v7065_v29  ;;  %6216 = vmatprep.mubr.msk.f32.mxu1 %vm6461_vm0, %v6460_v8 }
 0x144   : > { %5951 = vmatmul.mubr.msk.f32.vlgmr.msra.gmra.mrb[4].mxu0 %vm225_vm2, %v6783_v58  ;;  %6219 = vmatprep.subr.mxu1 %v6460_v8 }
 0x145   : > { %5957 = vmatpush1.msk.msra.mxu0 %vm229_vm1, %v7086_v35  ;;  %4149 = vmatprep.mubr.f32.mxu0 %v6460_v8 }
 0x146   : > { %5963 = vmatprep.subr.msk.mxu0 %vm229_vm1, %v7094_v36 }
 0x14a   : > { %6217 = vmatmul.mubr.msk.f32.vlgmr.msra.gmra.mrb[4].mxu1 %vm225_vm2, %v6811_v0 }
 0x14b   : > { %6220 = vmatpush3.msk.msra.mxu1 %vm229_vm1, %v7081_v32  ;;  %6221 = vmatprep.mubr.msk.f32.mxu1 %vm6461_vm0, %v6460_v8 }
 0x14c   : > { %5958 = vmatmul.mubr.msk.f32.vlgmr.msra.gmra.mrb[4].mxu0 %vm225_vm2, %v6811_v0  ;;  %6224 = vmatprep.subr.mxu1 %v6460_v8 }
 0x14d   : > { %5964 = vmatpush1.msk.msra.mxu0 %vm229_vm1, %v7105_v38  ;;  %4312 = vmatprep.mubr.f32.mxu0 %v6460_v8 }
 0x14e   : > { %5968 = vmatprep.subr.msk.mxu0 %vm229_vm1, %v6714_v45 }
 0x152   : > { %6222 = vmatmul.mubr.msk.f32.vlgmr.msra.gmra.mrb[4].mxu1 %vm225_vm2, %v6833_v2 }
 0x153   : > { %6225 = vmatpush3.msk.msra.mxu1 %vm229_vm1, %v6703_v43  ;;  %6226 = vmatprep.mubr.msk.f32.mxu1 %vm6461_vm0, %v6460_v8 }
 0x154   : > { %5965 = vmatmul.mubr.msk.f32.vlgmr.msra.gmra.mrb[4].mxu0 %vm225_vm2, %v6833_v2  ;;  %6229 = vmatprep.subr.mxu1 %v6460_v8 }
 0x155   : > { %5969 = vmatpush1.msk.msra.mxu0 %vm229_vm1, %v6734_v49  ;;  %4459 = vmatprep.mubr.f32.mxu0 %v6460_v8 }
 0x156   : > { %6227 = vmatmul.mubr.msk.f32.vlgmr.msra.gmra.mrb[6].mxu1 %vm225_vm2, %v6548_v15  ;;  %5973 = vmatprep.subr.msk.mxu0 %vm229_vm1, %v6619_v27  ;;  %v5549_v27 = vpop.permute.xlu1 %5548 }
 0x157   : > { %6230 = vmatpush3.msk.msra.mxu1 %vm229_vm1, %v6701_v42  ;;  %6231 = vmatprep.mubr.msk.f32.mxu1 %vm6461_vm0, %v6460_v8 }
 0x158   : > { %5970 = vmatmul.mubr.msk.f32.vlgmr.msra.gmra.mrb[6].mxu0 %vm225_vm2, %v6548_v15  ;;  %6234 = vmatprep.subr.mxu1 %v6460_v8  ;;  %v6465_v15 = vmov 0  }
 0x159   : > { %5974 = vmatpush1.msk.msra.mxu0 %vm229_vm1, %v6611_v25  ;;  %4600 = vmatprep.mubr.f32.mxu0 %v6460_v8  ;;  %v5551_v25 = vpop.permute.xlu0 %5550 }
 0x15a   : > { %5978 = vmatprep.subr.msk.mxu0 %vm229_vm1, %v6900_v13  ;;  %6431 = vset.pattern.permute.xlu0 %v6465_v15  ;;  %v5547_v39 = vpop.permute.xlu1 %5546 }
 0x15b   : > { %v5552_v40 = vsel %vm1539_vm5, %v5547_v39, %v5549_v27 }
 0x15e   : > { %6232 = vmatmul.mubr.msk.f32.vlgmr.msra.gmra.mrb[6].mxu1 %vm225_vm2, %v6581_v21 }
 0x15f   : > { %6235 = vmatpush3.msk.msra.mxu1 %vm229_vm1, %v6890_v9  ;;  %6236 = vmatprep.mubr.msk.f32.mxu1 %vm6461_vm0, %v6460_v8 }
 0x160   : > { %5975 = vmatmul.mubr.msk.f32.vlgmr.msra.gmra.mrb[6].mxu0 %vm225_vm2, %v6581_v21  ;;  %6239 = vmatprep.subr.mxu1 %v6460_v8  ;;  %v5707_v21 = vld [vmem:[%s7269_s2] sm:$0xff] }
 0x161   : > { %5979 = vmatpush1.msk.msra.mxu0 %vm229_vm1, %v6911_v16  ;;  %4741 = vmatprep.mubr.f32.mxu0 %v6460_v8 }
 0x162   : > { %5983 = vmatprep.subr.msk.mxu0 %vm229_vm1, %v6770_v57  ;;  %5710 = vperm.xlu0 %6431, %v5707_v21  }
 0x166   : > { %6237 = vmatmul.mubr.msk.f32.vlgmr.msra.gmra.mrb[6].mxu1 %vm225_vm2, %v6657_v34 }
 0x167   : > { %6240 = vmatpush3.msk.msra.mxu1 %vm229_vm1, %v6762_v55  ;;  %6241 = vmatprep.mubr.msk.f32.mxu1 %vm6461_vm0, %v6460_v8 }
 0x168   : > { %5980 = vmatmul.mubr.msk.f32.vlgmr.msra.gmra.mrb[6].mxu0 %vm225_vm2, %v6657_v34  ;;  %6244 = vmatprep.subr.mxu1 %v6460_v8  ;;  %v5553_v34 = vsel %vm1539_vm5, %v5549_v27, %v5551_v25 }
 0x169   : > { %5984 = vmatpush1.msk.msra.mxu0 %vm229_vm1, %v6790_v61  ;;  %4885 = vmatprep.mubr.f32.mxu0 %v6460_v8 }
 0x16a   : > { %5988 = vmatprep.subr.msk.mxu0 %vm229_vm1, %v6798_v62 }
 0x16e   : > { %6242 = vmatmul.mubr.msk.f32.vlgmr.msra.gmra.mrb[6].mxu1 %vm225_vm2, %v6695_v41 }
 0x16f   : > { %6245 = vmatpush3.msk.msra.mxu1 %vm229_vm1, %v6785_v59  ;;  %6246 = vmatprep.mubr.msk.f32.mxu1 %vm6461_vm0, %v6460_v8 }
 0x170   : > { %5985 = vmatmul.mubr.msk.f32.vlgmr.msra.gmra.mrb[6].mxu0 %vm225_vm2, %v6695_v41  ;;  %6249 = vmatprep.subr.mxu1 %v6460_v8 }
 0x171   : > { %5989 = vmatpush1.msk.msra.mxu0 %vm229_vm1, %v6814_v1  ;;  %5029 = vmatprep.mubr.f32.mxu0 %v6460_v8 }
 0x172   : > { %5993 = vmatprep.subr.msk.mxu0 %vm229_vm1, %v6951_v19 }
 0x176   : > { %6247 = vmatmul.mubr.msk.f32.vlgmr.msra.gmra.mrb[6].mxu1 %vm225_vm2, %v6729_v48 }
 0x177   : > { %6250 = vmatpush3.msk.msra.mxu1 %vm229_vm1, %v6941_v17  ;;  %6251 = vmatprep.mubr.msk.f32.mxu1 %vm6461_vm0, %v6460_v8 }
 0x178   : > { %5990 = vmatmul.mubr.msk.f32.vlgmr.msra.gmra.mrb[6].mxu0 %vm225_vm2, %v6729_v48  ;;  %6254 = vmatprep.subr.mxu1 %v6460_v8 }
 0x179   : > { %5994 = vmatpush1.msk.msra.mxu0 %vm229_vm1, %v6964_v22  ;;  %5173 = vmatprep.mubr.f32.mxu0 %v6460_v8 }
 0x17a   : > { %5998 = vmatprep.subr.msk.mxu0 %vm229_vm1, %v7072_v31 }
 0x17e   : > { %6252 = vmatmul.mubr.msk.f32.vlgmr.msra.gmra.mrb[6].mxu1 %vm225_vm2, %v6755_v53 }
 0x17f   : > { %6255 = vmatpush3.msk.msra.mxu1 %vm229_vm1, %v7065_v29  ;;  %6256 = vmatprep.mubr.msk.f32.mxu1 %vm6461_vm0, %v6460_v8 }
 0x180   : > { %5995 = vmatmul.mubr.msk.f32.vlgmr.msra.gmra.mrb[6].mxu0 %vm225_vm2, %v6755_v53  ;;  %6259 = vmatprep.subr.mxu1 %v6460_v8 }
 0x181   : > { %5999 = vmatpush1.msk.msra.mxu0 %vm229_vm1, %v7086_v35  ;;  %5317 = vmatprep.mubr.f32.mxu0 %v6460_v8 }
 0x182   : > { %6003 = vmatprep.subr.msk.mxu0 %vm229_vm1, %v7094_v36 }
 0x186   : > { %6257 = vmatmul.mubr.msk.f32.vlgmr.msra.gmra.mrb[6].mxu1 %vm225_vm2, %v6783_v58 }
 0x187   : > { %6260 = vmatpush3.msk.msra.mxu1 %vm229_vm1, %v7081_v32  ;;  %6261 = vmatprep.mubr.msk.f32.mxu1 %vm6461_vm0, %v6460_v8 }
 0x188   : > { %6000 = vmatmul.mubr.msk.f32.vlgmr.msra.gmra.mrb[6].mxu0 %vm225_vm2, %v6783_v58  ;;  %6264 = vmatprep.subr.mxu1 %v6460_v8 }
 0x189   : > { %6004 = vmatpush1.msk.msra.mxu0 %vm229_vm1, %v7105_v38  ;;  %5461 = vmatprep.mubr.f32.mxu0 %v6460_v8 }
 0x18a   : > { %6010 = vmatprep.subr.msk.mxu0 %vm229_vm1, %v5553_v34 }
 0x18e   : > { %6262 = vmatmul.mubr.msk.f32.vlgmr.msra.gmra.mrb[6].mxu1 %vm225_vm2, %v6811_v0 }
 0x18f   : > { %6265 = vmatpush3.msk.msra.mxu1 %vm229_vm1, %v5551_v25  ;;  %6266 = vmatprep.mubr.msk.f32.mxu1 %vm6461_vm0, %v6460_v8 }
 0x190   : > { %6005 = vmatmul.mubr.msk.f32.vlgmr.msra.gmra.mrb[6].mxu0 %vm225_vm2, %v6811_v0 }
 0x191   : > { %6011 = vmatpush1.msk.msra.mxu0 %vm229_vm1, %v5552_v40  ;;  %5624 = vmatprep.mubr.f32.mxu0 %v6460_v8 }
 0x196   : > { %6267 = vmatmul.mubr.msk.f32.vlgmr.msra.gmra.mrb[6].mxu1 %vm225_vm2, %v6833_v2 }
 0x198   : > { %6012 = vmatmul.mubr.msk.f32.vlgmr.msra.gmra.mrb[6].mxu0 %vm225_vm2, %v6833_v2 }
 0x19d   : > { %v1688_v41 = vpop.f32.mrb[0].mxu1 }
 0x19e   : > { %v6133_v42 = vpop.f32.mrb[1].mxu1 }
 0x19f   : > { %v1617_v43 = vpop.f32.mrb[0].mxu0 }
 0x1a0   : > { %v1619_v44 = vpop.f32.mrb[1].mxu0 }
 0x1e1   : > { %v3035_v45 = vpop.f32.mrb[2].mxu1  ;;  %v5711_v59 = vpop.permute.xlu0 %5710 }
 0x1e2   : > { %v3044_v46 = vmax.f32 %v1688_v41, %v3035_v45  ;;  %v6178_v47 = vpop.f32.mrb[3].mxu1 }
 0x1e3   : > { %v2964_v48 = vpop.f32.mrb[2].mxu0 }
 0x1e4   : > { %v3042_v49 = vmax.f32 %v1617_v43, %v2964_v48  ;;  %v2966_v50 = vpop.f32.mrb[3].mxu0 }
 0x1e5   : > { %v3043_v51 = vmax.f32 %v1619_v44, %v2966_v50 }
 0x225   : > { %v4385_v8 = vpop.f32.mrb[4].mxu1 }
 0x226   : > { %v4394_v52 = vmax.f32 %v3044_v46, %v4385_v8  ;;  %v6223_v53 = vpop.f32.mrb[5].mxu1 }
 0x227   : > { %v4314_v54 = vpop.f32.mrb[4].mxu0 }
 0x228   : > { %v4392_v55 = vmax.f32 %v3042_v49, %v4314_v54  ;;  %v4316_v56 = vpop.f32.mrb[5].mxu0 }
 0x229   : > { %v4393_v57 = vmax.f32 %v3043_v51, %v4316_v56 }
 0x269   : > { %v5697_v58 = vpop.f32.mrb[6].mxu1 }
 0x26a   : > { %v5706_v60 = vmax.f32 %v4394_v52, %v5697_v58  ;;  %v6268_v61 = vpop.f32.mrb[7].mxu1 }
 0x26b   : > { %v5626_v62 = vpop.f32.mrb[6].mxu0 }
 0x26c   : > { %v5715_v63 = vadd.f32 %v5711_v59, %v5706_v60  ;;  %v5704_v0 = vmax.f32 %v4392_v55, %v5626_v62  ;;  %v5628_v1 = vpop.f32.mrb[7].mxu0 }
 0x26d   : > { %v5705_v2 = vmax.f32 %v4393_v57, %v5628_v1 }
 0x26e   : > { %v5718_v3 = vmax.f32 %v5715_v63, 0.0  ;;  %v5713_v4 = vadd.f32 %v5711_v59, %v5704_v0 }
 0x26f   : > { %v5714_v5 = vadd.f32 %v5711_v59, %v5705_v2 }
 0x270   : > { %5722 = vst.msk [vmem:[%s213_s7 + $0x10] sm:$0xff] %vm5721_vm6, %v5718_v3  ;;  %v5716_v6 = vmax.f32 %v5713_v4, 0.0 }
 0x271   : > { %v5717_v7 = vmax.f32 %v5714_v5, 0.0 }
 0x272   : > { %5719 = vst [vmem:[%s213_s7] sm:$0xff] %v5716_v6 }
 0x273   : > { %5720 = vst [vmem:[%s213_s7 + $0x8] sm:$0xff] %v5717_v7 }
 0x274 PF: > { %p10_p9 = scmp.ge.s32.totalorder %s6503_s16, 4   ;;  %s7271_s12 = smov %s6454_s13 }
 0x275   : > { %s7272_s13 = smov %s6512_s19  ;;  %s7273_s14 = smov %s6503_s16 }
 0x276   :  { %12 = sbr.rel (!%p10_p9) target bundleno = 2 (0x2), region = 110 }

// kernel: image_regression_forward.6
= control target key start
LH: loop header
LB: loop body
LE: loop exit
PB: predicated region body
PF: predicated region fallthrough
CT: control target
= control target key end

     0   :  { %s3721_s12 = smov 0   ;;  %s3723_s13 = smov 0   ;;  %s4079_s0 = inlined_call_operand.vmem [shape: f32[4,2,8,90], index: 0, kind: input, shape index: {}]   ;;  %s4080_s1 = inlined_call_operand.vmem [shape: f32[3,3,16,8], index: 1, kind: input, shape index: {}]   ;;  %s4081_s2 = inlined_call_operand.vmem [shape: f32[16,1], index: 2, kind: input, shape index: {}]   ;;  %s4082_s3 = inlined_call_operand.vmem [shape: f32[2,16,72], index: 3, kind: output, shape index: {}]  }
   0x1   :  { %s3725_s14 = smov 0  }
   0x2 LB: > { %s3187_s15 = sadd.s32 4294967295, %s3695_s14   ;;  %s3738_s16 = sadd.s32 1, %s3695_s14   ;;  %s3695_s14 = sphi %s3725_s14, %s4085_s14   ;;  %s3691_s13 = sphi %s3723_s13, %s4084_s13   ;;  %s3687_s12 = sphi %s3721_s12, %s4083_s12  }
   0x3   : > { %s17_s17 = ssub.s32 %s3695_s14, %s3738_s16  ;;  %s20_s18 = sadd.s32 1, %s3691_s13 }
   0x4   : > { %p18_p0 = scmp.eq.s32.totalorder %s17_s17, 0  ;;  %p27_p1 = scmp.ne.s32.totalorder %s3691_s13, %s3687_s12 }
   0x5   : > { %p28_p2 = scmp.eq.s32.totalorder %s3695_s14, 0  ;;  %p3190_p4 = scmp.ge.s32.totalorder %s3695_s14, 2 }
   0x6   : > { %s3747_s19 = scalar_select %p18_p0, %s3691_s13, %s20_s18  }
   0x7   : > { %p29_p3 = por %p28_p2, %p27_p1  ;;  %127 = sbr.rel (%p3190_p4) target bundleno = 21 (0x15), region = 24 }
   0xe   : > { %130 = sbr.rel (!%p29_p3) target bundleno = 21 (0x15), region = 28  ;;  %s132_s20 = sand.u32 (%p29_p3), 1, %s3691_s13  }
   0xf   : > { %s3192_s21 = sshll.u32 (%p29_p3), %s3695_s14, 3  ;;  %s3191_s22 = sshll.u32 (%p29_p3), %s132_s20, 5 }
  0x10   : > { %s136_s25 = scalar_lea.vmem (%p29_p3), %s4079_s0, %s3192_s21  ;;  %s134_s26 = scalar_lea.vmem (%p29_p3), [#allocation2], %s3191_s22 }
  0x11   : > { %v170_v0 = vld [vmem:[%s136_s25] sm:$0xff] (%p29_p3)  ;;  %v172_v1 = vld [vmem:[%s136_s25 + $0x10] sm:$0xff] (%p29_p3) }
  0x12   : > { %v174_v2 = vld [vmem:[%s136_s25 + $0x20] sm:$0xff] (%p29_p3)  ;;  %171 = vst [vmem:[%s134_s26] sm:$0xff] (%p29_p3), %v170_v0  ;;  %173 = vst [vmem:[%s134_s26 + $0x8] sm:$0xff] (%p29_p3), %v172_v1  ;;  %v176_v3 = vld [vmem:[%s136_s25 + $0x30] sm:$0xff] (%p29_p3) }
  0x13   : > { %175 = vst [vmem:[%s134_s26 + $0x10] sm:$0xff] (%p29_p3), %v174_v2  ;;  %177 = vst [vmem:[%s134_s26 + $0x18] sm:$0xff] (%p29_p3), %v176_v3 }
  0x15 PF: > { %p3193_p5 = scmp.ge.s32.totalorder %s3695_s14, 1  ;;  %p182_p6 = scmp.lt.s32.totalorder %s3695_s14, 3 }
  0x17   : > { %p183_p7 = pnand %p3193_p5, %p182_p6 }
  0x18   : > { %s189_s27 = sand.u32 (!%p183_p7), 1, %s3687_s12   ;;  %v3761_v4 = vld [vmem:[%s4080_s1 + $0x10] sm:$0xff] (!%p183_p7)  ;;  %vm225_vm0 = vcmask (!%p183_p7), 64512   ;;  %v3770_v7 = vld [vmem:[%s4080_s1 + $0x18] sm:$0xff] (!%p183_p7)  ;;  %s3697_s7 = smov (!%p183_p7), 127   ;;  %v3777_v9 = vld [vmem:[%s4080_s1] sm:$0xff] (!%p183_p7) }
  0x19   : > { %186 = sbr.rel (%p183_p7) target bundleno = 497 (0x1f1), region = 66  ;;  %s3194_s30 = sshll.u32 (!%p183_p7), %s189_s27, 5  ;;  %3401 = vmatprep.mubr.msk.f32.mxu0 (!%p183_p7), %vm225_vm0, %v3761_v4  ;;  %3446 = vmatprep.mubr.msk.f32.mxu1 (!%p183_p7), %vm225_vm0, %v3761_v4  ;;  %v3790_v11 = vld [vmem:[%s4080_s1 + $0x8] sm:$0xff] (!%p183_p7)  ;;  %v3795_v12 = vld [vmem:[%s4080_s1 + $0x20] sm:$0xff] (!%p183_p7)  ;;  %v3817_v15 = vld [vmem:[%s4080_s1 + $0x30] sm:$0xff] (!%p183_p7)  ;;  %v3700_v20 = vmov (!%p183_p7), 0  }
  0x1a   : > { %s191_s4 = scalar_lea.vmem (!%p183_p7), [#allocation2], %s3194_s30  ;;  %s3698_s12 = smov (!%p183_p7), 119   ;;  %v3808_v14 = vld [vmem:[%s4080_s1 + $0x28] sm:$0xff] (!%p183_p7)  ;;  %v3107_v18 = vld [vmem:[%s4081_s2] sm:$0xff] (!%p183_p7)  ;;  %v3835_v19 = vld [vmem:[%s4080_s1 + $0x38] sm:$0xff] (!%p183_p7)  ;;  %3672 = vset.pattern.permute.xlu1 (!%p183_p7), %v3700_v20  ;;  %3671 = vset.pattern.permute.xlu0 (!%p183_p7), %v3700_v20  ;;  %vm3123_vm1 = vcmask (!%p183_p7), 588800  }
  0x1b   : > { %v217_v5 = vld [vmem:[%s191_s4] sm:$0xff] (!%p183_p7)  ;;  %v3197_v6 = vld [vmem:[%s191_s4 + $0x8] sm:$0xff] (!%p183_p7)  ;;  %v3772_v8 = vld [vmem:[%s191_s4 + $0x10] sm:$0xff] (!%p183_p7)  ;;  %s3699_s20 = smov (!%p183_p7), 118   ;;  %p212_p8 = scmp.lt.s32.totalorder (!%p183_p7), %s3187_s15, 1 }
  0x1c   : > { %392 = vrot.lane.b32.xlu0 (!%p183_p7), %v217_v5, %s3697_s7  ;;  %3399 = vmatprep.subr.mxu0 (!%p183_p7), %v3197_v6  ;;  %v3780_v10 = vld [vmem:[%s191_s4 + $0x18] sm:$0xff] (!%p183_p7)  ;;  %v3108_v17 = vld [vmem:[%s4081_s2 + $0x8] sm:$0xff] (!%p183_p7)  ;;  %v3840_v21 = vld [vmem:[%s4080_s1 + $0x40] sm:$0xff] (!%p183_p7) }
  0x1d   : > { %658 = vrot.lane.b32.xlu1 (!%p183_p7), %v3772_v8, %s3697_s7  ;;  %3400 = vmatpush3.msra.mxu0 (!%p183_p7), %v3197_v6  ;;  %v3858_v23 = vld [vmem:[%s4080_s1 + $0x48] sm:$0xff] (!%p183_p7)  ;;  %v3863_v24 = vld [vmem:[%s4080_s1 + $0x50] sm:$0xff] (!%p183_p7)  ;;  %v3884_v27 = vld [vmem:[%s4080_s1 + $0x58] sm:$0xff] (!%p183_p7) }
  0x1e   : > { %3402 = vmatmul.mubr.msk.f32.vlgmr.msra.gmra.mrb[0].mxu0 (!%p183_p7), %vm225_vm0, %v3770_v7  ;;  %3404 = vmatprep.subr.mxu0 (!%p183_p7), %v217_v5  ;;  %v3889_v28 = vld [vmem:[%s4080_s1 + $0x60] sm:$0xff] (!%p183_p7)  ;;  %v3908_v30 = vld [vmem:[%s4080_s1 + $0x68] sm:$0xff] (!%p183_p7)  ;;  %v3913_v31 = vld [vmem:[%s4080_s1 + $0x70] sm:$0xff] (!%p183_p7) }
  0x1f   : > { %3405 = vmatpush3.msra.mxu0 (!%p183_p7), %v217_v5  ;;  %3406 = vmatprep.mubr.msk.f32.mxu0 (!%p183_p7), %vm225_vm0, %v3777_v9  ;;  %v3932_v33 = vld [vmem:[%s4080_s1 + $0x78] sm:$0xff] (!%p183_p7)  ;;  %v3937_v34 = vld [vmem:[%s4080_s1 + $0x80] sm:$0xff] (!%p183_p7)  ;;  %v3954_v35 = vld [vmem:[%s4080_s1 + $0x88] sm:$0xff] (!%p183_p7) }
  0x20   : > { %1162 = vrot.lane.b32.xlu0 %v3197_v6, %s3697_s7  ;;  %s4087_s15 = smov (!%p212_p8, %s3187_s15), 1 }
  0x21   : > { %1397 = vrot.lane.b32.xlu1 %v3780_v10, %s3697_s7  ;;  %s3290_s29 = sshll.u32 %s4087_s15, 4 }
  0x22   : > { %s216_s5 = scalar_lea.vmem %s4082_s3, %s3290_s29 }
  0x24   : > { %747 = vrot.lane.b32.xlu0 %v217_v5, %s3698_s12 }
  0x25   : > { %837 = vrot.lane.b32.xlu1 %v3197_v6, %s3698_s12 }
  0x26   : > { %3407 = vmatmul.mubr.msk.f32.vlgmr.msra.gmra.mrb[0].mxu0 %vm225_vm0, %v3790_v11 }
  0x27   : > { %3411 = vmatprep.mubr.msk.f32.mxu0 %vm225_vm0, %v3795_v12 }
  0x28   : > { %926 = vrot.lane.b32.xlu0 %v217_v5, %s3699_s20 }
  0x29   : > { %1631 = vrot.lane.b32.xlu1 %v3197_v6, %s3699_s20 }
  0x2c   : > { %2171 = vrot.lane.b32.xlu0 %v3772_v8, %s3698_s12 }
  0x2d   : > { %2251 = vrot.lane.b32.xlu1 %v3780_v10, %s3698_s12 }
  0x30   : > { %2331 = vrot.lane.b32.xlu0 %v3772_v8, %s3699_s20 }
  0x31   : > { %3025 = vrot.lane.b32.xlu1 %v3780_v10, %s3699_s20 }
  0x34   : > { %3111 = vperm.xlu0 %3671, %v3107_v18  }
  0x35   : > { %3116 = vperm.xlu1 %3672, %v3108_v17  }
  0x8e   : > { %v393_v13 = vpop.permute.xlu0 %392 }
  0x8f   : > { %3409 = vmatprep.subr.mxu0 %v393_v13  ;;  %3444 = vmatprep.subr.mxu1 %v393_v13  ;;  %v3846_v22 = vpop.permute.xlu1 %658 }
  0x90   : > { %3410 = vmatpush3.msra.mxu0 %v393_v13  ;;  %3445 = vmatpush3.msra.mxu1 %v393_v13 }
  0x91   : > { %3412 = vmatmul.mubr.msk.f32.vlgmr.msra.gmra.mrb[0].mxu0 %vm225_vm0, %v3808_v14  ;;  %3447 = vmatmul.mubr.msk.f32.vlgmr.msra.gmra.mrb[0].mxu1 %vm225_vm0, %v3770_v7 }
  0x92   : > { %3449 = vmatprep.subr.mxu1 %v3197_v6  ;;  %v1163_v16 = vpop.permute.xlu0 %1162  ;;  %3414 = vmatprep.subr.mxu0 %v3772_v8 }
  0x93   : > { %3450 = vmatpush3.msra.mxu1 %v3197_v6  ;;  %3415 = vmatpush3.msra.mxu0 %v3772_v8  ;;  %v3877_v26 = vpop.permute.xlu1 %1397 }
  0x94   : > { %3416 = vmatprep.mubr.msk.f32.mxu0 %vm225_vm0, %v3817_v15  ;;  %3451 = vmatprep.mubr.msk.f32.mxu1 %vm225_vm0, %v3777_v9 }
  0x95   : > { %3454 = vmatprep.subr.mxu1 %v1163_v16  ;;  %3419 = vmatprep.subr.mxu0 %v3780_v10 }
  0x96   : > { %v3869_v25 = vpop.permute.xlu0 %747 }
  0x97   : > { %v3895_v29 = vpop.permute.xlu1 %837 }
  0x99   : > { %3417 = vmatmul.mubr.msk.f32.vlgmr.msra.gmra.mrb[0].mxu0 %vm225_vm0, %v3835_v19  ;;  %3452 = vmatmul.mubr.msk.f32.vlgmr.msra.gmra.mrb[0].mxu1 %vm225_vm0, %v3790_v11 }
  0x9a   : > { %3455 = vmatpush3.msra.mxu1 %v1163_v16  ;;  %3420 = vmatpush3.msra.mxu0 %v3780_v10  ;;  %v3919_v32 = vpop.permute.xlu0 %926 }
  0x9b   : > { %3421 = vmatprep.mubr.msk.f32.mxu0 %vm225_vm0, %v3840_v21  ;;  %3456 = vmatprep.mubr.msk.f32.mxu1 %vm225_vm0, %v3795_v12  ;;  %v1632_v36 = vpop.permute.xlu1 %1631 }
  0x9c   : > { %3459 = vmatprep.subr.mxu1 %v3780_v10  ;;  %3424 = vmatprep.subr.mxu0 %v3846_v22 }
  0x9e   : > { %v2172_v37 = vpop.permute.xlu0 %2171 }
  0x9f   : > { %v2252_v38 = vpop.permute.xlu1 %2251 }
  0xa1   : > { %3422 = vmatmul.mubr.msk.f32.vlgmr.msra.gmra.mrb[0].mxu0 %vm225_vm0, %v3858_v23  ;;  %3457 = vmatmul.mubr.msk.f32.vlgmr.msra.gmra.mrb[0].mxu1 %vm225_vm0, %v3808_v14 }
  0xa2   : > { %3460 = vmatpush3.msra.mxu1 %v3780_v10  ;;  %3425 = vmatpush3.msra.mxu0 %v3846_v22  ;;  %v2332_v39 = vpop.permute.xlu0 %2331 }
  0xa3   : > { %3426 = vmatprep.mubr.msk.f32.mxu0 %vm225_vm0, %v3863_v24  ;;  %3461 = vmatprep.mubr.msk.f32.mxu1 %vm225_vm0, %v3817_v15  ;;  %v3026_v40 = vpop.permute.xlu1 %3025 }
  0xa4   : > { %3464 = vmatprep.subr.mxu1 %v3846_v22  ;;  %3429 = vmatprep.subr.mxu0 %v3869_v25 }
  0xa9   : > { %3427 = vmatmul.mubr.msk.f32.vlgmr.msra.gmra.mrb[0].mxu0 %vm225_vm0, %v3884_v27  ;;  %3462 = vmatmul.mubr.msk.f32.vlgmr.msra.gmra.mrb[0].mxu1 %vm225_vm0, %v3835_v19 }
  0xaa   : > { %3465 = vmatpush3.msra.mxu1 %v3846_v22  ;;  %3430 = vmatpush3.msra.mxu0 %v3869_v25 }
  0xab   : > { %3431 = vmatprep.mubr.msk.f32.mxu0 %vm225_vm0, %v3889_v28  ;;  %3466 = vmatprep.mubr.msk.f32.mxu1 %vm225_vm0, %v3840_v21 }
  0xac   : > { %3469 = vmatprep.subr.mxu1 %v3877_v26  ;;  %3434 = vmatprep.subr.mxu0 %v3895_v29 }
  0xb1   : > { %3432 = vmatmul.mubr.msk.f32.vlgmr.msra.gmra.mrb[0].mxu0 %vm225_vm0, %v3908_v30  ;;  %3467 = vmatmul.mubr.msk.f32.vlgmr.msra.gmra.mrb[0].mxu1 %vm225_vm0, %v3858_v23 }
  0xb2   : > { %3470 = vmatpush3.msra.mxu1 %v3877_v26  ;;  %3435 = vmatpush3.msra.mxu0 %v3895_v29 }
  0xb3   : > { %3436 = vmatprep.mubr.msk.f32.mxu0 %vm225_vm0, %v3913_v31  ;;  %3471 = vmatprep.mubr.msk.f32.mxu1 %vm225_vm0, %v3863_v24  ;;  %v3112_v55 = vpop.permute.xlu0 %3111 }
  0xb4   : > { %3474 = vmatprep.subr.mxu1 %v3895_v29  ;;  %3439 = vmatprep.subr.mxu0 %v3919_v32  ;;  %v3117_v52 = vpop.permute.xlu1 %3116 }
  0xb9   : > { %3437 = vmatmul.mubr.msk.f32.vlgmr.msra.gmra.mrb[0].mxu0 %vm225_vm0, %v3932_v33  ;;  %3472 = vmatmul.mubr.msk.f32.vlgmr.msra.gmra.mrb[0].mxu1 %vm225_vm0, %v3884_v27 }
  0xba   : > { %3475 = vmatpush3.msra.mxu1 %v3895_v29  ;;  %3440 = vmatpush3.msra.mxu0 %v3919_v32 }
  0xbb   : > { %3441 = vmatprep.mubr.msk.f32.mxu0 %vm225_vm0, %v3937_v34  ;;  %3476 = vmatprep.mubr.msk.f32.mxu1 %vm225_vm0, %v3889_v28 }
  0xbc   : > { %3479 = vmatprep.subr.mxu1 %v3919_v32  ;;  %3489 = vmatprep.subr.mxu0 %v3780_v10 }
  0xc1   : > { %3442 = vmatmul.mubr.msk.f32.vlgmr.msra.gmra.mrb[0].mxu0 %vm225_vm0, %v3954_v35  ;;  %3477 = vmatmul.mubr.msk.f32.vlgmr.msra.gmra.mrb[0].mxu1 %vm225_vm0, %v3908_v30 }
  0xc2   : > { %3480 = vmatpush3.msra.mxu1 %v3919_v32  ;;  %3490 = vmatpush3.msra.mxu0 %v3780_v10 }
  0xc3   : > { %3491 = vmatprep.mubr.msk.f32.mxu0 %vm225_vm0, %v3761_v4  ;;  %3494 = vmatprep.subr.mxu0 %v3772_v8 }
  0xc4   : > { %3481 = vmatprep.mubr.msk.f32.mxu1 %vm225_vm0, %v3913_v31  ;;  %3484 = vmatprep.subr.mxu1 %v1632_v36 }
  0xc5   : > { %3492 = vmatmul.mubr.msk.f32.vlgmr.msra.gmra.mrb[2].mxu0 %vm225_vm0, %v3770_v7 }
  0xc6   : > { %3495 = vmatpush3.msra.mxu0 %v3772_v8  ;;  %3496 = vmatprep.mubr.msk.f32.mxu0 %vm225_vm0, %v3777_v9 }
  0xc7   : > { %3499 = vmatprep.subr.mxu0 %v3846_v22 }
  0xc9   : > { %3482 = vmatmul.mubr.msk.f32.vlgmr.msra.gmra.mrb[0].mxu1 %vm225_vm0, %v3932_v33 }
  0xca   : > { %3485 = vmatpush3.msra.mxu1 %v1632_v36  ;;  %3486 = vmatprep.mubr.msk.f32.mxu1 %vm225_vm0, %v3937_v34 }
  0xcb   : > { %3534 = vmatprep.subr.mxu1 %v3846_v22 }
  0xcd   : > { %3497 = vmatmul.mubr.msk.f32.vlgmr.msra.gmra.mrb[2].mxu0 %vm225_vm0, %v3790_v11 }
  0xce   : > { %3500 = vmatpush3.msra.mxu0 %v3846_v22  ;;  %3501 = vmatprep.mubr.msk.f32.mxu0 %vm225_vm0, %v3795_v12 }
  0xcf   : > { %3504 = vmatprep.subr.mxu0 %v3869_v25 }
  0xd1   : > { %3487 = vmatmul.mubr.msk.f32.vlgmr.msra.gmra.mrb[0].mxu1 %vm225_vm0, %v3954_v35 }
  0xd2   : > { %3535 = vmatpush3.msra.mxu1 %v3846_v22  ;;  %3536 = vmatprep.mubr.msk.f32.mxu1 %vm225_vm0, %v3761_v4 }
  0xd3   : > { %3539 = vmatprep.subr.mxu1 %v3780_v10 }
  0xd5   : > { %3502 = vmatmul.mubr.msk.f32.vlgmr.msra.gmra.mrb[2].mxu0 %vm225_vm0, %v3808_v14  ;;  %3537 = vmatmul.mubr.msk.f32.vlgmr.msra.gmra.mrb[2].mxu1 %vm225_vm0, %v3770_v7 }
  0xd6   : > { %3505 = vmatpush3.msra.mxu0 %v3869_v25  ;;  %3540 = vmatpush3.msra.mxu1 %v3780_v10 }
  0xd7   : > { %3509 = vmatprep.subr.mxu0 %v3895_v29  ;;  %3544 = vmatprep.subr.mxu1 %v3877_v26 }
  0xd8   : > { %3506 = vmatprep.mubr.msk.f32.mxu0 %vm225_vm0, %v3817_v15  ;;  %3541 = vmatprep.mubr.msk.f32.mxu1 %vm225_vm0, %v3777_v9 }
  0xdd   : > { %3507 = vmatmul.mubr.msk.f32.vlgmr.msra.gmra.mrb[2].mxu0 %vm225_vm0, %v3835_v19  ;;  %3542 = vmatmul.mubr.msk.f32.vlgmr.msra.gmra.mrb[2].mxu1 %vm225_vm0, %v3790_v11 }
  0xde   : > { %3510 = vmatpush3.msra.mxu0 %v3895_v29  ;;  %3545 = vmatpush3.msra.mxu1 %v3877_v26 }
  0xdf   : > { %3514 = vmatprep.subr.mxu0 %v3919_v32  ;;  %3549 = vmatprep.subr.mxu1 %v3895_v29 }
  0xe0   : > { %3511 = vmatprep.mubr.msk.f32.mxu0 %vm225_vm0, %v3840_v21  ;;  %3546 = vmatprep.mubr.msk.f32.mxu1 %vm225_vm0, %v3795_v12 }
  0xe5   : > { %3512 = vmatmul.mubr.msk.f32.vlgmr.msra.gmra.mrb[2].mxu0 %vm225_vm0, %v3858_v23  ;;  %3547 = vmatmul.mubr.msk.f32.vlgmr.msra.gmra.mrb[2].mxu1 %vm225_vm0, %v3808_v14 }
  0xe6   : > { %3515 = vmatpush3.msra.mxu0 %v3919_v32  ;;  %3550 = vmatpush3.msra.mxu1 %v3895_v29 }
  0xe7   : > { %3554 = vmatprep.subr.mxu1 %v3919_v32  ;;  %3516 = vmatprep.mubr.msk.f32.mxu0 %vm225_vm0, %v3863_v24 }
  0xe8   : > { %3551 = vmatprep.mubr.msk.f32.mxu1 %vm225_vm0, %v3817_v15  ;;  %3519 = vmatprep.subr.mxu0 %v2172_v37 }
  0xed   : > { %3517 = vmatmul.mubr.msk.f32.vlgmr.msra.gmra.mrb[2].mxu0 %vm225_vm0, %v3884_v27  ;;  %3552 = vmatmul.mubr.msk.f32.vlgmr.msra.gmra.mrb[2].mxu1 %vm225_vm0, %v3835_v19 }
  0xee   : > { %3555 = vmatpush3.msra.mxu1 %v3919_v32  ;;  %3520 = vmatpush3.msra.mxu0 %v2172_v37 }
  0xef   : > { %3559 = vmatprep.subr.mxu1 %v1632_v36  ;;  %3521 = vmatprep.mubr.msk.f32.mxu0 %vm225_vm0, %v3889_v28 }
  0xf0   : > { %3556 = vmatprep.mubr.msk.f32.mxu1 %vm225_vm0, %v3840_v21  ;;  %3524 = vmatprep.subr.mxu0 %v2252_v38 }
  0xf5   : > { %3522 = vmatmul.mubr.msk.f32.vlgmr.msra.gmra.mrb[2].mxu0 %vm225_vm0, %v3908_v30  ;;  %3557 = vmatmul.mubr.msk.f32.vlgmr.msra.gmra.mrb[2].mxu1 %vm225_vm0, %v3858_v23 }
  0xf6   : > { %3560 = vmatpush3.msra.mxu1 %v1632_v36  ;;  %3525 = vmatpush3.msra.mxu0 %v2252_v38 }
  0xf7   : > { %3526 = vmatprep.mubr.msk.f32.mxu0 %vm225_vm0, %v3913_v31  ;;  %3561 = vmatprep.mubr.msk.f32.mxu1 %vm225_vm0, %v3863_v24 }
  0xf8   : > { %3564 = vmatprep.subr.mxu1 %v2252_v38  ;;  %3529 = vmatprep.subr.mxu0 %v2332_v39 }
  0xfd   : > { %3527 = vmatmul.mubr.msk.f32.vlgmr.msra.gmra.mrb[2].mxu0 %vm225_vm0, %v3932_v33  ;;  %3562 = vmatmul.mubr.msk.f32.vlgmr.msra.gmra.mrb[2].mxu1 %vm225_vm0, %v3884_v27 }
  0xfe   : > { %3565 = vmatpush3.msra.mxu1 %v2252_v38  ;;  %3530 = vmatpush3.msra.mxu0 %v2332_v39 }
  0xff   : > { %3531 = vmatprep.mubr.msk.f32.mxu0 %vm225_vm0, %v3937_v34  ;;  %3566 = vmatprep.mubr.msk.f32.mxu1 %vm225_vm0, %v3889_v28 }
 0x100   : > { %3569 = vmatprep.subr.mxu1 %v2332_v39 }
 0x105   : > { %3532 = vmatmul.mubr.msk.f32.vlgmr.msra.gmra.mrb[2].mxu0 %vm225_vm0, %v3954_v35  ;;  %3567 = vmatmul.mubr.msk.f32.vlgmr.msra.gmra.mrb[2].mxu1 %vm225_vm0, %v3908_v30 }
 0x106   : > { %3570 = vmatpush3.msra.mxu1 %v2332_v39  ;;  %3571 = vmatprep.mubr.msk.f32.mxu1 %vm225_vm0, %v3913_v31 }
 0x107   : > { %3574 = vmatprep.subr.mxu1 %v3026_v40 }
 0x10d   : > { %3572 = vmatmul.mubr.msk.f32.vlgmr.msra.gmra.mrb[2].mxu1 %vm225_vm0, %v3932_v33 }
 0x10e   : > { %3575 = vmatpush3.msra.mxu1 %v3026_v40  ;;  %3576 = vmatprep.mubr.msk.f32.mxu1 %vm225_vm0, %v3937_v34 }
 0x115   : > { %3577 = vmatmul.mubr.msk.f32.vlgmr.msra.gmra.mrb[2].mxu1 %vm225_vm0, %v3954_v35 }
 0x194   : > { %v3443_v41 = vpop.f32.mrb[0].mxu0 }
 0x195   : > { %v1001_v42 = vpop.f32.mrb[1].mxu0 }
 0x1a4   : > { %v3488_v43 = vpop.f32.mrb[0].mxu1 }
 0x1a5   : > { %v1712_v44 = vmax.f32 %v3443_v41, %v3488_v43  ;;  %v1700_v45 = vpop.f32.mrb[1].mxu1 }
 0x1a6   : > { %v1711_v46 = vmax.f32 %v1001_v42, %v1700_v45 }
 0x1d8   : > { %v3533_v47 = vpop.f32.mrb[2].mxu0 }
 0x1d9   : > { %v2412_v48 = vmax.f32 %v1712_v44, %v3533_v47  ;;  %v2400_v49 = vpop.f32.mrb[3].mxu0 }
 0x1da   : > { %v2411_v50 = vmax.f32 %v1711_v46, %v2400_v49 }
 0x1e8   : > { %v3578_v51 = vpop.f32.mrb[2].mxu1 }
 0x1e9   : > { %v3106_v53 = vmax.f32 %v2412_v48, %v3578_v51  ;;  %v3094_v54 = vpop.f32.mrb[3].mxu1 }
 0x1ea   : > { %v3105_v56 = vmax.f32 %v2411_v50, %v3094_v54 }
 0x1eb   : > { %v3120_v57 = vadd.f32 %v3117_v52, %v3106_v53 }
 0x1ec   : > { %v3119_v58 = vadd.f32 %v3112_v55, %v3105_v56 }
 0x1ed   : > { %v3122_v59 = vmax.f32 %v3120_v57, 0.0 }
 0x1ee   : > { %v3121_v60 = vmax.f32 %v3119_v58, 0.0 }
 0x1ef   : > { %3125 = vst.msk [vmem:[%s216_s5 + $0x8] sm:$0xff] %vm3123_vm1, %v3122_v59 }
 0x1f0   : > { %3124 = vst.msk [vmem:[%s216_s5] sm:$0xff] %vm3123_vm1, %v3121_v60 }
 0x1f1 PF: > { %p10_p9 = scmp.ge.s32.totalorder %s3738_s16, 4   ;;  %s4083_s12 = smov %s3691_s13 }
 0x1f2   : > { %s4084_s13 = smov %s3747_s19  ;;  %s4085_s14 = smov %s3738_s16 }
 0x1f3   :  { %12 = sbr.rel (!%p10_p9) target bundleno = 2 (0x2), region = 116 }

// kernel: image_regression_forward.7
= control target key start
LH: loop header
LB: loop body
LE: loop exit
PB: predicated region body
PF: predicated region fallthrough
CT: control target
= control target key end

     0   :  { %v913_v47 = vmov 1983009808   ;;  %v164_v49 = vlaneseq  ;;  %s1376_s0 = inlined_call_operand.vmem [shape: f32[2,1024], index: 0, kind: input, shape index: {}]   ;;  %s1377_s1 = inlined_call_operand.vmem [shape: f32[1024,16], index: 1, kind: input, shape index: {}]   ;;  %s1378_s2 = inlined_call_operand.vmem [shape: f32[1,16], index: 2, kind: input, shape index: {}]   ;;  %s1379_s3 = inlined_call_operand.vmem [shape: f32[16,6], index: 3, kind: input, shape index: {}]   ;;  %s1380_s4 = inlined_call_operand.vmem [shape: f32[1,6], index: 4, kind: input, shape index: {}]   ;;  %s1381_s5 = inlined_call_operand.hbm [shape: f32[2,6], index: 5, kind: output, shape index: {}]  }
   0x1   :  { %v39_v0 = vld [vmem:[%s1377_s1 + $0x80] sm:$0xff]  ;;  %v40_v1 = vld [vmem:[%s1377_s1 + $0x88] sm:$0xff]  ;;  %v41_v11 = vld [vmem:[%s1377_s1 + $0x90] sm:$0xff]  ;;  %v162_v48 = vunpack.c.l.s4 %v913_v47 }
   0x2   :  { %v23_v2 = vld [vmem:[%s1377_s1] sm:$0xff]  ;;  %v747_v3 = vpack.c.bf16 %v40_v1, %v39_v0  ;;  %v24_v4 = vld [vmem:[%s1377_s1 + $0x8] sm:$0xff]  ;;  %v42_v13 = vld [vmem:[%s1377_s1 + $0x98] sm:$0xff]  ;;  %v165_v0 = vshrl.u32 %v164_v49, 7 }
   0x3   :  { %v71_v5 = vld [vmem:[%s1377_s1 + $0x180] sm:$0xff]  ;;  %v72_v6 = vld [vmem:[%s1377_s1 + $0x188] sm:$0xff]  ;;  %v749_v7 = vpack.c.bf16 %v24_v4, %v23_v2  ;;  %v25_v14 = vld [vmem:[%s1377_s1 + $0x10] sm:$0xff]  ;;  %v751_v16 = vpack.c.bf16 %v42_v13, %v41_v11  ;;  %v163_v63 = vunpack.c.0.s8 %v162_v48 }
   0x4   :  { %v779_v8 = vpack.c.bf16 %v72_v6, %v71_v5  ;;  %v55_v9 = vld [vmem:[%s1377_s1 + $0x100] sm:$0xff]  ;;  %v56_v10 = vld [vmem:[%s1377_s1 + $0x108] sm:$0xff]  ;;  %748 = vmatprep.subr.bf16.mxu0 %v747_v3  ;;  %v26_v15 = vld [vmem:[%s1377_s1 + $0x18] sm:$0xff] }
   0x5   :  { %v781_v12 = vpack.c.bf16 %v56_v10, %v55_v9  ;;  %750 = vmatpush3.bf16.msra.mxu0 %v749_v7  ;;  %v753_v17 = vpack.c.bf16 %v26_v15, %v25_v14  ;;  %v73_v18 = vld [vmem:[%s1377_s1 + $0x190] sm:$0xff]  ;;  %v74_v19 = vld [vmem:[%s1377_s1 + $0x198] sm:$0xff]  ;;  %v43_v23 = vld [vmem:[%s1377_s1 + $0xa0] sm:$0xff]  ;;  %v1098_v13 = vsub.s32 %v163_v63, %v165_v0 }
   0x6   :  { %780 = vmatprep.subr.bf16.mxu1 %v779_v8  ;;  %v57_v20 = vld [vmem:[%s1377_s1 + $0x110] sm:$0xff]  ;;  %v783_v21 = vpack.c.bf16 %v74_v19, %v73_v18  ;;  %v58_v22 = vld [vmem:[%s1377_s1 + $0x118] sm:$0xff]  ;;  %v44_v24 = vld [vmem:[%s1377_s1 + $0xa8] sm:$0xff]  ;;  %752 = vmatprep.subr.bf16.mxu0 %v751_v16 }
   0x7   :  { %782 = vmatpush3.bf16.msra.mxu1 %v781_v12  ;;  %v785_v25 = vpack.c.bf16 %v58_v22, %v57_v20  ;;  %v755_v26 = vpack.c.bf16 %v44_v24, %v43_v23  ;;  %v27_v27 = vld [vmem:[%s1377_s1 + $0x20] sm:$0xff]  ;;  %v28_v28 = vld [vmem:[%s1377_s1 + $0x28] sm:$0xff]  ;;  %v45_v35 = vld [vmem:[%s1377_s1 + $0xb0] sm:$0xff] }
   0x8   :  { %v75_v29 = vld [vmem:[%s1377_s1 + $0x1a0] sm:$0xff]  ;;  %784 = vmatprep.subr.bf16.mxu1 %v783_v21  ;;  %v76_v30 = vld [vmem:[%s1377_s1 + $0x1a8] sm:$0xff]  ;;  %v757_v33 = vpack.c.bf16 %v28_v28, %v27_v27  ;;  %v46_v36 = vld [vmem:[%s1377_s1 + $0xb8] sm:$0xff] }
   0x9   :  { %v59_v31 = vld [vmem:[%s1377_s1 + $0x120] sm:$0xff]  ;;  %v60_v32 = vld [vmem:[%s1377_s1 + $0x128] sm:$0xff]  ;;  %754 = vmatpush3.bf16.msra.mxu0 %v753_v17  ;;  %v787_v34 = vpack.c.bf16 %v76_v30, %v75_v29  ;;  %v29_v37 = vld [vmem:[%s1377_s1 + $0x30] sm:$0xff]  ;;  %v759_v39 = vpack.c.bf16 %v46_v36, %v45_v35 }
   0xa   :  { %756 = vmatprep.subr.bf16.mxu0 %v755_v26  ;;  %v789_v38 = vpack.c.bf16 %v60_v32, %v59_v31  ;;  %v30_v40 = vld [vmem:[%s1377_s1 + $0x38] sm:$0xff]  ;;  %v77_v41 = vld [vmem:[%s1377_s1 + $0x1b0] sm:$0xff]  ;;  %v47_v46 = vld [vmem:[%s1377_s1 + $0xc0] sm:$0xff] }
   0xb   :  { %786 = vmatpush3.bf16.msra.mxu1 %v785_v25  ;;  %v78_v42 = vld [vmem:[%s1377_s1 + $0x1b8] sm:$0xff]  ;;  %v61_v44 = vld [vmem:[%s1377_s1 + $0x130] sm:$0xff]  ;;  %v48_v50 = vld [vmem:[%s1377_s1 + $0xc8] sm:$0xff]  ;;  %v761_v51 = vpack.c.bf16 %v30_v40, %v29_v37 }
   0xc   :  { %788 = vmatprep.subr.bf16.mxu1 %v787_v34  ;;  %v791_v43 = vpack.c.bf16 %v78_v42, %v77_v41  ;;  %v62_v45 = vld [vmem:[%s1377_s1 + $0x138] sm:$0xff]  ;;  %v79_v52 = vld [vmem:[%s1377_s1 + $0x1c0] sm:$0xff]  ;;  %v80_v53 = vld [vmem:[%s1377_s1 + $0x1c8] sm:$0xff]  ;;  %v763_v55 = vpack.c.bf16 %v48_v50, %v47_v46 }
   0xd   :  { %758 = vmatpush3.bf16.msra.mxu0 %v757_v33  ;;  %v793_v54 = vpack.c.bf16 %v62_v45, %v61_v44  ;;  %v31_v56 = vld [vmem:[%s1377_s1 + $0x40] sm:$0xff]  ;;  %v32_v57 = vld [vmem:[%s1377_s1 + $0x48] sm:$0xff]  ;;  %v795_v59 = vpack.c.bf16 %v80_v53, %v79_v52  ;;  %v49_v61 = vld [vmem:[%s1377_s1 + $0xd0] sm:$0xff] }
   0xe   :  { %760 = vmatprep.subr.bf16.mxu0 %v759_v39  ;;  %v63_v58 = vld [vmem:[%s1377_s1 + $0x140] sm:$0xff]  ;;  %v64_v60 = vld [vmem:[%s1377_s1 + $0x148] sm:$0xff]  ;;  %v50_v62 = vld [vmem:[%s1377_s1 + $0xd8] sm:$0xff]  ;;  %v765_v3 = vpack.c.bf16 %v32_v57, %v31_v56 }
   0xf   :  { %790 = vmatpush3.bf16.msra.mxu1 %v789_v38  ;;  %v81_v1 = vld [vmem:[%s1377_s1 + $0x1d0] sm:$0xff]  ;;  %v82_v2 = vld [vmem:[%s1377_s1 + $0x1d8] sm:$0xff]  ;;  %v797_v4 = vpack.c.bf16 %v64_v60, %v63_v58  ;;  %v767_v5 = vpack.c.bf16 %v50_v62, %v49_v61  ;;  %v51_v11 = vld [vmem:[%s1377_s1 + $0xe0] sm:$0xff] }
  0x10   :  { %792 = vmatprep.subr.bf16.mxu1 %v791_v43  ;;  %v33_v6 = vld [vmem:[%s1377_s1 + $0x50] sm:$0xff]  ;;  %v34_v7 = vld [vmem:[%s1377_s1 + $0x58] sm:$0xff]  ;;  %v799_v9 = vpack.c.bf16 %v82_v2, %v81_v1  ;;  %v52_v12 = vld [vmem:[%s1377_s1 + $0xe8] sm:$0xff] }
  0x11   :  { %762 = vmatpush3.bf16.msra.mxu0 %v761_v51  ;;  %v65_v8 = vld [vmem:[%s1377_s1 + $0x150] sm:$0xff]  ;;  %v66_v10 = vld [vmem:[%s1377_s1 + $0x158] sm:$0xff]  ;;  %v83_v14 = vld [vmem:[%s1377_s1 + $0x1e0] sm:$0xff]  ;;  %v769_v16 = vpack.c.bf16 %v34_v7, %v33_v6  ;;  %v771_v19 = vpack.c.bf16 %v52_v12, %v51_v11 }
  0x12   :  { %764 = vmatprep.subr.bf16.mxu0 %v763_v55  ;;  %v84_v15 = vld [vmem:[%s1377_s1 + $0x1e8] sm:$0xff]  ;;  %v35_v17 = vld [vmem:[%s1377_s1 + $0x60] sm:$0xff]  ;;  %v801_v18 = vpack.c.bf16 %v66_v10, %v65_v8  ;;  %v53_v25 = vld [vmem:[%s1377_s1 + $0xf0] sm:$0xff] }
  0x13   :  { %794 = vmatpush3.bf16.msra.mxu1 %v793_v54  ;;  %v36_v20 = vld [vmem:[%s1377_s1 + $0x68] sm:$0xff]  ;;  %v67_v21 = vld [vmem:[%s1377_s1 + $0x160] sm:$0xff]  ;;  %v803_v23 = vpack.c.bf16 %v84_v15, %v83_v14  ;;  %v54_v26 = vld [vmem:[%s1377_s1 + $0xf8] sm:$0xff] }
  0x14   :  { %796 = vmatprep.subr.bf16.mxu1 %v795_v59  ;;  %v21_v22 = vld [vmem:[%s1376_s0] sm:$0xff]  ;;  %v68_v24 = vld [vmem:[%s1377_s1 + $0x168] sm:$0xff]  ;;  %v85_v29 = vld [vmem:[%s1377_s1 + $0x1f0] sm:$0xff]  ;;  %v773_v31 = vpack.c.bf16 %v36_v20, %v35_v17  ;;  %v775_v35 = vpack.c.bf16 %v54_v26, %v53_v25 }
  0x15   :  { %766 = vmatpush3.bf16.msra.mxu0 %v765_v3  ;;  %v167_v27 = vrot.slane %v21_v22, %v1098_v13  ;;  %v160_v28 = vcombine.high %v21_v22, %v21_v22  ;;  %v86_v30 = vld [vmem:[%s1377_s1 + $0x1f8] sm:$0xff]  ;;  %v805_v34 = vpack.c.bf16 %v68_v24, %v67_v21  ;;  %v37_v36 = vld [vmem:[%s1377_s1 + $0x70] sm:$0xff]  ;;  %v103_v41 = vld [vmem:[%s1377_s1 + $0x280] sm:$0xff] }
  0x16   :  { %768 = vmatprep.subr.bf16.mxu0 %v767_v5  ;;  %v38_v37 = vld [vmem:[%s1377_s1 + $0x78] sm:$0xff]  ;;  %v69_v38 = vld [vmem:[%s1377_s1 + $0x170] sm:$0xff]  ;;  %v807_v39 = vpack.c.bf16 %v86_v30, %v85_v29  ;;  %v104_v42 = vld [vmem:[%s1377_s1 + $0x288] sm:$0xff] }
  0x17   :  { %798 = vmatpush3.bf16.msra.mxu1 %v797_v4  ;;  %v175_v32 = vcombine.high %v167_v27, %v167_v27  ;;  %v174_v33 = vrot.slane %v160_v28, %v1098_v13  ;;  %v70_v40 = vld [vmem:[%s1377_s1 + $0x178] sm:$0xff]  ;;  %v135_v44 = vld [vmem:[%s1377_s1 + $0x380] sm:$0xff]  ;;  %v136_v45 = vld [vmem:[%s1377_s1 + $0x388] sm:$0xff]  ;;  %v777_v46 = vpack.c.bf16 %v38_v37, %v37_v36  ;;  %v811_v48 = vpack.c.bf16 %v104_v42, %v103_v41 }
  0x18   :  { %800 = vmatprep.subr.bf16.mxu1 %v799_v9  ;;  %v809_v47 = vpack.c.bf16 %v70_v40, %v69_v38  ;;  %v87_v49 = vld [vmem:[%s1377_s1 + $0x200] sm:$0xff]  ;;  %v88_v50 = vld [vmem:[%s1377_s1 + $0x208] sm:$0xff]  ;;  %v843_v52 = vpack.c.bf16 %v136_v45, %v135_v44  ;;  %v105_v54 = vld [vmem:[%s1377_s1 + $0x290] sm:$0xff] }
  0x19   :  { %770 = vmatpush3.bf16.msra.mxu0 %v769_v16  ;;  %266 = vmatprep.mubr.f32.mxu0 %v175_v32  ;;  %v176_v43 = vcombine.high %v174_v33, %v174_v33  ;;  %v119_v51 = vld [vmem:[%s1377_s1 + $0x300] sm:$0xff]  ;;  %v120_v53 = vld [vmem:[%s1377_s1 + $0x308] sm:$0xff]  ;;  %v106_v55 = vld [vmem:[%s1377_s1 + $0x298] sm:$0xff]  ;;  %v813_v58 = vpack.c.bf16 %v88_v50, %v87_v49 }
  0x1a   :  { %772 = vmatprep.subr.bf16.mxu0 %v771_v19  ;;  %v137_v56 = vld [vmem:[%s1377_s1 + $0x390] sm:$0xff]  ;;  %v138_v57 = vld [vmem:[%s1377_s1 + $0x398] sm:$0xff]  ;;  %v845_v59 = vpack.c.bf16 %v120_v53, %v119_v51  ;;  %v815_v60 = vpack.c.bf16 %v106_v55, %v105_v54  ;;  %v107_v2 = vld [vmem:[%s1377_s1 + $0x2a0] sm:$0xff] }
  0x1b   :  { %802 = vmatpush3.bf16.msra.mxu1 %v801_v18  ;;  %336 = vmatprep.mubr.f32.mxu1 %v176_v43  ;;  %v89_v61 = vld [vmem:[%s1377_s1 + $0x210] sm:$0xff]  ;;  %v90_v62 = vld [vmem:[%s1377_s1 + $0x218] sm:$0xff]  ;;  %v847_v0 = vpack.c.bf16 %v138_v57, %v137_v56  ;;  %v108_v3 = vld [vmem:[%s1377_s1 + $0x2a8] sm:$0xff] }
  0x1c   :  { %804 = vmatprep.subr.bf16.mxu1 %v803_v23  ;;  %v121_v63 = vld [vmem:[%s1377_s1 + $0x310] sm:$0xff]  ;;  %v122_v1 = vld [vmem:[%s1377_s1 + $0x318] sm:$0xff]  ;;  %v139_v4 = vld [vmem:[%s1377_s1 + $0x3a0] sm:$0xff]  ;;  %v817_v6 = vpack.c.bf16 %v90_v62, %v89_v61  ;;  %v819_v8 = vpack.c.bf16 %v108_v3, %v107_v2 }
  0x1d   :  { %774 = vmatpush3.bf16.msra.mxu0 %v773_v31  ;;  %v140_v5 = vld [vmem:[%s1377_s1 + $0x3a8] sm:$0xff]  ;;  %v849_v7 = vpack.c.bf16 %v122_v1, %v121_v63  ;;  %v91_v9 = vld [vmem:[%s1377_s1 + $0x220] sm:$0xff]  ;;  %v109_v15 = vld [vmem:[%s1377_s1 + $0x2b0] sm:$0xff] }
  0x1e   :  { %776 = vmatprep.subr.bf16.mxu0 %v775_v35  ;;  %v92_v10 = vld [vmem:[%s1377_s1 + $0x228] sm:$0xff]  ;;  %v123_v11 = vld [vmem:[%s1377_s1 + $0x320] sm:$0xff]  ;;  %v851_v12 = vpack.c.bf16 %v140_v5, %v139_v4  ;;  %v110_v16 = vld [vmem:[%s1377_s1 + $0x2b8] sm:$0xff] }
  0x1f   :  { %806 = vmatpush3.bf16.msra.mxu1 %v805_v34  ;;  %v124_v14 = vld [vmem:[%s1377_s1 + $0x328] sm:$0xff]  ;;  %v141_v17 = vld [vmem:[%s1377_s1 + $0x3b0] sm:$0xff]  ;;  %v142_v18 = vld [vmem:[%s1377_s1 + $0x3b8] sm:$0xff]  ;;  %v821_v19 = vpack.c.bf16 %v92_v10, %v91_v9  ;;  %v823_v22 = vpack.c.bf16 %v110_v16, %v109_v15 }
  0x20   :  { %808 = vmatprep.subr.bf16.mxu1 %v807_v39  ;;  %v93_v20 = vld [vmem:[%s1377_s1 + $0x230] sm:$0xff]  ;;  %v853_v21 = vpack.c.bf16 %v124_v14, %v123_v11  ;;  %v94_v23 = vld [vmem:[%s1377_s1 + $0x238] sm:$0xff]  ;;  %v855_v26 = vpack.c.bf16 %v142_v18, %v141_v17  ;;  %v112_v28 = vld [vmem:[%s1377_s1 + $0x2c8] sm:$0xff] }
  0x21   :  { %778 = vmatpush3.bf16.msra.mxu0 %v777_v46  ;;  %v125_v24 = vld [vmem:[%s1377_s1 + $0x330] sm:$0xff]  ;;  %v126_v25 = vld [vmem:[%s1377_s1 + $0x338] sm:$0xff]  ;;  %v143_v29 = vld [vmem:[%s1377_s1 + $0x3c0] sm:$0xff] }
  0x22   :  { %812 = vmatprep.subr.bf16.mxu0 %v811_v48  ;;  %v144_v30 = vld [vmem:[%s1377_s1 + $0x3c8] sm:$0xff] }
  0x23   :  { %810 = vmatpush3.bf16.msra.mxu1 %v809_v47  ;;  %v22_v31 = vld [vmem:[%s1376_s0 + $0x8] sm:$0xff] }
  0x24   :  { %844 = vmatprep.subr.bf16.mxu1 %v843_v52  ;;  %267 = vmatmul.mubr.f32.vlgmr.msra.gmra.mrb[0].mxu0 %v167_v27  ;;  %v111_v27 = vld [vmem:[%s1377_s1 + $0x2c0] sm:$0xff] }
  0x25   :  { %814 = vmatpush3.bf16.msra.mxu0 %v813_v58 }
  0x26   :  { %337 = vmatmul.mubr.f32.vlgmr.msra.gmra.mrb[0].mxu1 %v174_v33  ;;  %816 = vmatprep.subr.bf16.mxu0 %v815_v60 }
  0x27   :  { %846 = vmatpush3.bf16.msra.mxu1 %v845_v59 }
  0x28   :  { %848 = vmatprep.subr.bf16.mxu1 %v847_v0 }
  0x29   :  { %818 = vmatpush3.bf16.msra.mxu0 %v817_v6 }
  0x2a   :  { %820 = vmatprep.subr.bf16.mxu0 %v819_v8 }
  0x2b   :  { %850 = vmatpush3.bf16.msra.mxu1 %v849_v7 }
  0x2c   :  { %852 = vmatprep.subr.bf16.mxu1 %v851_v12 }
  0x2d   :  { %10 = vsyncpa [#allocation3], 0  ;;  %822 = vmatpush3.bf16.msra.mxu0 %v821_v19  ;;  %v825_v32 = vpack.c.bf16 %v94_v23, %v93_v20  ;;  %v1259_v33 = vrot.slane %v22_v31, %v1098_v13  ;;  %v177_v34 = vcombine.high %v22_v31, %v22_v31  ;;  %v857_v35 = vpack.c.bf16 %v126_v25, %v125_v24  ;;  %v95_v37 = vld [vmem:[%s1377_s1 + $0x240] sm:$0xff]  ;;  %v96_v38 = vld [vmem:[%s1377_s1 + $0x248] sm:$0xff]  ;;  %s917_s30 = smov [#allocation2]  }
  0x2e   :  { %824 = vmatprep.subr.bf16.mxu0 %v823_v22  ;;  %v827_v36 = vpack.c.bf16 %v112_v28, %v111_v27  ;;  %v127_v39 = vld [vmem:[%s1377_s1 + $0x340] sm:$0xff]  ;;  %v859_v40 = vpack.c.bf16 %v144_v30, %v143_v29  ;;  %v128_v41 = vld [vmem:[%s1377_s1 + $0x348] sm:$0xff]  ;;  %v113_v42 = vld [vmem:[%s1377_s1 + $0x2d0] sm:$0xff]  ;;  %v829_v48 = vpack.c.bf16 %v96_v38, %v95_v37  ;;  %v914_v22 = vmov 0.0|0.0  }
  0x2f   :  { %854 = vmatpush3.bf16.msra.mxu1 %v853_v21  ;;  %v114_v43 = vld [vmem:[%s1377_s1 + $0x2d8] sm:$0xff]  ;;  %v192_v44 = vcombine.high %v1259_v33, %v1259_v33  ;;  %v191_v45 = vrot.slane %v177_v34, %v1098_v13  ;;  %v145_v46 = vld [vmem:[%s1377_s1 + $0x3d0] sm:$0xff]  ;;  %v861_v50 = vpack.c.bf16 %v128_v41, %v127_v39  ;;  %v115_v56 = vld [vmem:[%s1377_s1 + $0x2e0] sm:$0xff]  ;;  %vm915_vm0 = vmmov 0  }
  0x30   :  { %856 = vmatprep.subr.bf16.mxu1 %v855_v26  ;;  %v146_v47 = vld [vmem:[%s1377_s1 + $0x3d8] sm:$0xff]  ;;  %v831_v51 = vpack.c.bf16 %v114_v43, %v113_v42  ;;  %v97_v13 = vld [vmem:[%s1377_s1 + $0x250] sm:$0xff]  ;;  %v116_v57 = vld [vmem:[%s1377_s1 + $0x2e8] sm:$0xff]  ;;  %v916_v23 = vmov 0.0   ;;  %vm492_vm1 = vcmask 130048   ;;  %vm566_vm2 = vcmask 41984  }
  0x31   :  { %826 = vmatpush3.bf16.msra.mxu0 %v825_v32  ;;  %406 = vmatprep.mubr.f32.mxu0 %v192_v44  ;;  %v193_v49 = vcombine.high %v191_v45, %v191_v45  ;;  %v98_v52 = vld [vmem:[%s1377_s1 + $0x258] sm:$0xff]  ;;  %v129_v53 = vld [vmem:[%s1377_s1 + $0x350] sm:$0xff]  ;;  %v863_v54 = vpack.c.bf16 %v146_v47, %v145_v46  ;;  %v147_v58 = vld [vmem:[%s1377_s1 + $0x3e0] sm:$0xff]  ;;  %v835_v62 = vpack.c.bf16 %v116_v57, %v115_v56 }
  0x32   :  { %828 = vmatprep.subr.bf16.mxu0 %v827_v36  ;;  %v130_v55 = vld [vmem:[%s1377_s1 + $0x358] sm:$0xff]  ;;  %v148_v59 = vld [vmem:[%s1377_s1 + $0x3e8] sm:$0xff]  ;;  %v833_v60 = vpack.c.bf16 %v98_v52, %v97_v13  ;;  %v99_v63 = vld [vmem:[%s1377_s1 + $0x260] sm:$0xff] }
  0x33   :  { %858 = vmatpush3.bf16.msra.mxu1 %v857_v35  ;;  %476 = vmatprep.mubr.f32.mxu1 %v193_v49  ;;  %v865_v61 = vpack.c.bf16 %v130_v55, %v129_v53  ;;  %v100_v0 = vld [vmem:[%s1377_s1 + $0x268] sm:$0xff]  ;;  %v131_v1 = vld [vmem:[%s1377_s1 + $0x360] sm:$0xff]  ;;  %v867_v2 = vpack.c.bf16 %v148_v59, %v147_v58  ;;  %v117_v4 = vld [vmem:[%s1377_s1 + $0x2f0] sm:$0xff] }
  0x34   :  { %860 = vmatprep.subr.bf16.mxu1 %v859_v40  ;;  %v132_v3 = vld [vmem:[%s1377_s1 + $0x368] sm:$0xff]  ;;  %v118_v5 = vld [vmem:[%s1377_s1 + $0x2f8] sm:$0xff]  ;;  %v149_v6 = vld [vmem:[%s1377_s1 + $0x3f0] sm:$0xff]  ;;  %v837_v8 = vpack.c.bf16 %v100_v0, %v99_v63 }
  0x35   :  { %830 = vmatpush3.bf16.msra.mxu0 %v829_v48  ;;  %v150_v7 = vld [vmem:[%s1377_s1 + $0x3f8] sm:$0xff]  ;;  %v869_v9 = vpack.c.bf16 %v132_v3, %v131_v1  ;;  %v839_v10 = vpack.c.bf16 %v118_v5, %v117_v4  ;;  %v101_v11 = vld [vmem:[%s1377_s1 + $0x270] sm:$0xff]  ;;  %v483_v19 = vld [vmem:[%s1379_s3] sm:$0xff] }
  0x36   :  { %832 = vmatprep.subr.bf16.mxu0 %v831_v51  ;;  %v102_v12 = vld [vmem:[%s1377_s1 + $0x278] sm:$0xff]  ;;  %v871_v14 = vpack.c.bf16 %v150_v7, %v149_v6  ;;  %v133_v15 = vld [vmem:[%s1377_s1 + $0x370] sm:$0xff]  ;;  %v484_v20 = vld [vmem:[%s1379_s3 + $0x8] sm:$0xff] }
  0x37   :  { %862 = vmatpush3.bf16.msra.mxu1 %v861_v50  ;;  %v134_v16 = vld [vmem:[%s1377_s1 + $0x378] sm:$0xff]  ;;  %v841_v17 = vpack.c.bf16 %v102_v12, %v101_v11  ;;  %v876_v21 = vpack.c.bf16 %v484_v20, %v483_v19  ;;  %v594_v25 = vld [vmem:[%s1378_s2] ss:$0 sm:$0xff] }
  0x38   :  { %864 = vmatprep.subr.bf16.mxu1 %v863_v54  ;;  %v873_v18 = vpack.c.bf16 %v134_v16, %v133_v15  ;;  %v595_v42 = vld [vmem:[%s1380_s4] ss:$0 sm:$0xff]  ;;  %s586_s4 = sshll.u32 %s917_s30, 4  ;;  %s587_s4 = int_to_ptr.vmem [resolvable:$true] %s586_s4 }
  0x39   :  { %834 = vmatpush3.bf16.msra.mxu0 %v833_v60  ;;  %s889_s6 = scalar_lea.vmem %s587_s4, 32  ;;  %p894_p1 = scmp.lt.s32.totalorder %s587_s4, %s587_s4 }
  0x3a   :  { %836 = vmatprep.subr.bf16.mxu0 %v835_v62  ;;  %p890_p0 = scmp.ne.s32.totalorder %s587_s4, %s889_s6  ;;  %p895_p2 = scmp.lt.s32.totalorder %s889_s6, %s889_s6 }
  0x3b   :  { %866 = vmatpush3.bf16.msra.mxu1 %v865_v61 }
  0x3c   :  { %868 = vmatprep.subr.bf16.mxu1 %v867_v2  ;;  %p896_p3 = por %p895_p2, %p894_p1 }
  0x3d   :  { %838 = vmatpush3.bf16.msra.mxu0 %v837_v8 }
  0x3e   :  { %840 = vmatprep.subr.bf16.mxu0 %v839_v10  ;;  %p897_p4 = pnand %p896_p3, %p890_p0 }
  0x3f   :  { %870 = vmatpush3.bf16.msra.mxu1 %v869_v9 }
  0x40   :  { %872 = vmatprep.subr.bf16.mxu1 %v871_v14 }
  0x41   :  { %842 = vmatpush3.bf16.msra.mxu0 %v841_v17 }
  0x42   :  { %875 = vmatprep.subr.bf16.mxu0 %v914_v22 }
  0x43   :  { %874 = vmatpush3.bf16.msra.mxu1 %v873_v18 }
  0x44   :  { %407 = vmatmul.mubr.f32.vlgmr.msra.gmra.mrb[2].mxu0 %v1259_v33 }
  0x45   :  { %877 = vmatpush3.bf16.msra.mxu0 %v876_v21  ;;  %744 = vmatprep.mubr.msk.f32.mxu0 %vm915_vm0, %v916_v23 }
  0x46   :  { %477 = vmatmul.mubr.f32.vlgmr.msra.gmra.mrb[2].mxu1 %v191_v45 }
  0xf7   :  { %v629_v24 = vpop.f32.mrb[0].mxu0 }
  0xf8   :  { %v630_v26 = vpop.f32.mrb[1].mxu0 }
  0xf9   :  { %v664_v27 = vpop.f32.mrb[0].mxu1  ;;  %v631_v28 = vadd.f32 %v630_v26, %v629_v24 }
  0xfa   :  { %v665_v29 = vpop.f32.mrb[1].mxu1 }
  0xfb   :  { %v666_v30 = vadd.f32 %v665_v29, %v664_v27  ;;  %v269_v31 = vadd.f32 %v631_v28, %v594_v25 }
  0xfd   :  { %v339_v32 = vadd.f32 %v666_v30, %v269_v31 }
 0x117   :  { %v699_v33 = vpop.f32.mrb[2].mxu0 }
 0x118   :  { %v700_v34 = vpop.f32.mrb[3].mxu0 }
 0x119   :  { %v734_v35 = vpop.f32.mrb[2].mxu1  ;;  %v701_v36 = vadd.f32 %v700_v34, %v699_v33 }
 0x11a   :  { %v735_v37 = vpop.f32.mrb[3].mxu1 }
 0x11b   :  { %v736_v38 = vadd.f32 %v735_v37, %v734_v35  ;;  %v409_v39 = vadd.f32 %v701_v36, %v339_v32 }
 0x11d   :  { %v479_v40 = vadd.f32 %v736_v38, %v409_v39 }
 0x11f   :  { %v482_v41 = vmax.f32 %v479_v40, 0.0 }
 0x121   :  { %745 = vmatmul.mubr.msk.f32.vlgmr.msra.gmra.mrb[4].mxu0 %vm492_vm1, %v482_v41 }
 0x1f4   :  { %v562_v43 = vpop.f32.mrb[4].mxu0 }
 0x1f5   :  { %v563_v44 = vadd.f32 %v595_v42, %v562_v43  ;;  %v746_v45 = vpop.f32.mrb[5].mxu0 }
 0x1f7   :  { %v567_v46 = vsel %vm566_vm2, %v563_v44, -inf }
 0x1f8   :  { %568 = vmax.xlane.f32.xlu0 %v567_v46 }
 0x285   :  { %v569_v47 = vpop.xlane.xlu0 %568 }
 0x286   :  { %v570_v48 = vsub.f32 %v563_v44, %v569_v47 }
 0x288   :  { %v571_v49 = vmul.f32 1.442695, %v570_v48 }
 0x28a   :  { %885 = vpow2.f32 %v571_v49 }
 0x294   :  { %v886_v50 = vpop.eup %885 }
 0x295   :  { %v573_v51 = vsel %vm566_vm2, %v886_v50, 0.0 }
 0x296   :  { %574 = vadd.xlane.f32.xlu0 %v573_v51 }
 0x323   :  { %v575_v13 = vpop.xlane.xlu0 %574 }
 0x324   :  { %887 = vlog2.f32 %v575_v13 }
 0x32e   :  { %v888_v52 = vpop.eup %887 }
 0x32f   :  { %v577_v53 = vmul.f32 0.6931472, %v888_v52 }
 0x331   :  { %v578_v54 = vsub.f32 %v570_v48, %v577_v53 }
 0x333   :  { %579 = vst.msk [vmem:[#allocation2] sm:$0x3] %vm566_vm2, %v578_v54 }
 0x334   :  { %900 = shalt.err (!%p897_p4)
}
 0x335   :  { %s901_s9 = scalar_lea.hbm %s1381_s5, 32 }
 0x336   :  { %p902_p5 = scmp.ne.s32.totalorder %s1381_s5, %s901_s9  ;;  %p905_p6 = scmp.lt.u32.totalorder %s901_s9, %s1381_s5 }
 0x338   :  { %p907_p7 = pnand %p905_p6, %p902_p5 }
 0x33a   :  { %910 = shalt.err (!%p907_p7)
}
 0x33b   :  { %589 = dma.vmem_to_hbm [thread:$0]  %s587_s4, 32, %s1381_s5, [#allocation3]  }
 0x33c   :  { %911 = dma.done.wait [#allocation3], 32  }
 0x33d   :  { %912 = vsyncadd [#allocation3], 4294967264 }
 0x33e   :  { %593 = vsyncpa [#allocation3], 1 }

</bundles_post_ra>
